<compile_context>
chip_gen: v7x
topology: tpu7x:2x2x1
jax: 0.10.0
libtpu: 0.0.40
codegen_flags: <defaults>
</compile_context>

<pallas_src>
import functools

import jax
import jax.numpy as jnp
from jax.experimental import pallas as pl
from jax.experimental.pallas import tpu as pltpu

_LANE = 128     # all channel dims padded to a multiple of this (lane width)
_WPAD = 8       # left halo width along W (8 -> f32 sublane-aligned interior)


def _round_up(n, m):
    return ((n + m - 1) // m) * m


def _fused_regression_kernel(x_ref, w_ref, b_ref, o_ref, act_ref, col_ref, *,
                             H, W, cpad, n_layers):
    """Runs the whole conv stack for one batch element entirely in VMEM.

    x_ref  : (1, H, W, cpad)           f32   input (channels zero-padded)
    w_ref  : (L, 9*cpad, cpad)         bf16  weights, row = tap*cpad + cin
    b_ref  : (L, 1, cpad)              f32   biases (zero-padded)
    o_ref  : (1, H*W, cpad)            f32   head-layer output (lane-dense)
    act_ref: (H+2, W+2*_WPAD, cpad)    f32   halo-padded activation scratch
    col_ref: (H*W, 9*cpad)             bf16  im2col scratch
    """
    HW = H * W

    # Zero the halo buffer once; only the interior is rewritten per layer, so
    # the zero SAME-padding border (and unused padded channels) persist.
    act_ref[...] = jnp.zeros_like(act_ref)
    act_ref[1:H + 1, _WPAD:_WPAD + W, :] = x_ref[0]

    for l in range(n_layers):
        # im2col: 9 shifted windows -> (HW, 9*cpad) bf16.  The H shift (dy) is
        # along the untiled leading dim (cheap); the W shift (dx) is a
        # sublane-offset read of the halo buffer.
        for tap in range(9):
            dy, dx = tap // 3, tap % 3
            c0 = _WPAD - 1 + dx
            win = act_ref[dy:dy + H, c0:c0 + W, :]          # (H, W, cpad) f32
            col_ref[:, tap * cpad:(tap + 1) * cpad] = (
                win.reshape(HW, cpad).astype(col_ref.dtype))

        # One lane-dense MXU matmul per layer, f32 accumulation.
        y = jnp.dot(col_ref[...], w_ref[l],
                    preferred_element_type=jnp.float32)      # (HW, cpad) f32
        y = y + b_ref[l]                                     # bias in f32
        if l < n_layers - 1:
            y = jnp.maximum(y, 0.0)                          # ReLU in f32
            # Write back into the sublane-aligned interior of the halo buffer.
            act_ref[1:H + 1, _WPAD:_WPAD + W, :] = y.reshape(H, W, cpad)
        else:
            o_ref[0] = y.astype(o_ref.dtype)                 # head: no ReLU


def _fused_convnet(x_nhwc_pad, w_all, b_all):
    """x: (B,H,W,cpad) f32, w: (L,9*cpad,cpad) bf16, b: (L,1,cpad) f32
       -> (B, H*W, cpad) f32 (channel-padded, lane-dense)."""
    B, H, W, cpad = x_nhwc_pad.shape
    L = w_all.shape[0]
    HW = H * W
    kernel = functools.partial(_fused_regression_kernel,
                               H=H, W=W, cpad=cpad, n_layers=L)
    flops = 2 * B * HW * (9 * cpad) * cpad * L
    bytes_accessed = (x_nhwc_pad.size * 4 + w_all.size * 2 + b_all.size * 4
                      + B * HW * cpad * 4)
    return pl.pallas_call(
        kernel,
        out_shape=jax.ShapeDtypeStruct((B, HW, cpad), jnp.float32),
        grid_spec=pltpu.PrefetchScalarGridSpec(
            num_scalar_prefetch=0,
            grid=(B,),
            in_specs=[
                pl.BlockSpec((1, H, W, cpad), lambda b: (b, 0, 0, 0)),
                pl.BlockSpec((L, 9 * cpad, cpad), lambda b: (0, 0, 0)),
                pl.BlockSpec((L, 1, cpad), lambda b: (0, 0, 0)),
            ],
            out_specs=pl.BlockSpec((1, HW, cpad), lambda b: (b, 0, 0)),
            scratch_shapes=[
                pltpu.VMEM((H + 2, W + 2 * _WPAD, cpad), jnp.float32),
                pltpu.VMEM((HW, 9 * cpad), jnp.bfloat16),
            ],
        ),
        compiler_params=pltpu.CompilerParams(
            dimension_semantics=("parallel",)),
        cost_estimate=pl.CostEstimate(flops=flops, transcendentals=0,
                                      bytes_accessed=bytes_accessed),
    )(x_nhwc_pad, w_all, b_all)


def _pack_params(params, cpad):
    """Pack per-layer (9,Cin,Cout) f32 weights into a stacked, zero-padded,
    lane-dense (L, 9*cpad, cpad) bf16 tensor (row index = tap*cpad + cin) and
    biases into (L, 1, cpad) f32."""
    w_list, b_list = [], []
    for w_taps, b in params:
        cin, cout = w_taps.shape[1], w_taps.shape[2]
        wp = jnp.zeros((9, cpad, cpad), jnp.float32)
        wp = wp.at[:, :cin, :cout].set(w_taps)
        w_list.append(wp.reshape(9 * cpad, cpad))
        b_list.append(jnp.zeros((cpad,), jnp.float32).at[:cout].set(b))
    w_all = jnp.stack(w_list).astype(jnp.bfloat16)
    b_all = jnp.stack(b_list)[:, None, :]
    return w_all, b_all


def init_params(key, feature_num, anchor_num, feature_size):
    """Deterministic synthetic init. Weights stored tap-major (9, Cin, Cout)."""
    dims = [(feature_num, feature_size),
            (feature_size, feature_size),
            (feature_size, feature_size),
            (feature_size, feature_size),
            (feature_size, anchor_num * 4)]
    params = []
    for (cin, cout) in dims:
        key, kw, kb = jax.random.split(key, 3)
        fan_in = cin * 9
        scale = 1.0 / jnp.sqrt(fan_in)
        w = jax.random.uniform(kw, (9, cin, cout), jnp.float32,
                               minval=-scale, maxval=scale)
        b = jax.random.uniform(kb, (cout,), jnp.float32,
                               minval=-scale, maxval=scale)
        params.append((w, b))
    return params


@jax.jit
def regression_net_forward(x_nchw, params):
    """Mirrors RegressionNet.forward. x_nchw: (B, feature_num, H, W).
    Returns (B, H*W*anchor_num, 4) in f32."""
    B, cin, H, W = x_nchw.shape
    cout_last = params[-1][0].shape[2]
    cpad = _round_up(max([cin] + [w.shape[2] for w, _ in params]), _LANE)

    x = jnp.transpose(x_nchw, (0, 2, 3, 1))                     # NCHW -> NHWC
    x = jnp.pad(x, ((0, 0), (0, 0), (0, 0), (0, cpad - cin)))   # lane-dense C
    w_all, b_all = _pack_params(params, cpad)

    out = _fused_convnet(x, w_all, b_all)          # (B, H*W, cpad)
    out = out[:, :, :cout_last]                    # drop channel padding
    # PyTorch: permute(0,2,3,1).view(B, -1, 4); we are already NHWC-flattened.
    return out.reshape(B, H * W * (cout_last // 4), 4)


def _reference_forward(x_nchw, params):
    """Pure-JAX reference (lax conv, NCHW) at matching precision: bf16 matmul
    inputs, f32 accumulation / bias / ReLU."""
    x = x_nchw
    n = len(params)
    for i, (w_taps, b) in enumerate(params):
        cin, cout = w_taps.shape[1], w_taps.shape[2]
        w = jnp.transpose(w_taps.reshape(3, 3, cin, cout), (3, 2, 0, 1))
        x = jax.lax.conv_general_dilated(
            x.astype(jnp.bfloat16), w.astype(jnp.bfloat16),
            window_strides=(1, 1), padding="SAME",
            dimension_numbers=("NCHW", "OIHW", "NCHW"),
            preferred_element_type=jnp.float32)
        x = x + b.reshape(1, -1, 1, 1)
        if i != n - 1:
            x = jnp.maximum(x, 0.0)
    x = jnp.transpose(x, (0, 2, 3, 1))
    return x.reshape(x.shape[0], -1, 4)


if __name__ == "__main__":
    B, FEATURE_NUM, H, W = 2, 4, 16, 16
    ANCHOR_NUM, FEATURE_SIZE = 9, 32   # small feature_size for a quick run

    key = jax.random.PRNGKey(0)
    key, kx = jax.random.split(key)
    x = jax.random.normal(kx, (B, FEATURE_NUM, H, W), dtype=jnp.float32)

    params = init_params(key, FEATURE_NUM, ANCHOR_NUM, FEATURE_SIZE)

    out = regression_net_forward(x, params)
    out = jax.block_until_ready(out)

    assert out.shape == (B, H * W * ANCHOR_NUM, 4), out.shape

    ref = jax.block_until_ready(_reference_forward(x, params))
    max_err = float(jnp.max(jnp.abs(out - ref)))
    assert jnp.allclose(out, ref, atol=1e-2, rtol=1e-2), max_err

    print("KERNEL_OK")
</pallas_src>

<mosaic_0001>
module attributes {stable_mosaic.version = 11 : i64} {
  func.func @_fused_regression_kernel(%arg0: i32, %arg1: memref<1x16x16x128xf32, #tpu.memory_space<vmem>>, %arg2: memref<5x1152x128xbf16, #tpu.memory_space<vmem>>, %arg3: memref<5x1x128xf32, #tpu.memory_space<vmem>>, %arg4: memref<1x256x128xf32, #tpu.memory_space<vmem>>, %arg5: memref<18x32x128xf32, #tpu.memory_space<vmem>>, %arg6: memref<256x1152xbf16, #tpu.memory_space<vmem>>) attributes {dimension_semantics = [#tpu.dimension_semantics<parallel>], iteration_bounds = array<i64: 2>, scalar_prefetch = 0 : i64, scratch_operands = 2 : i64, tpu.core_type = #tpu.core_type<tc>, window_params = [{transform_indices = @transform_0, window_bounds = array<i64: 1, 16, 16, 128>}, {pipeline_mode = #tpu.pipeline_mode<synchronous>, transform_indices = @transform_1, window_bounds = array<i64: 5, 1152, 128>}, {pipeline_mode = #tpu.pipeline_mode<synchronous>, transform_indices = @transform_2, window_bounds = array<i64: 5, 1, 128>}, {transform_indices = @transform_3, window_bounds = array<i64: 1, 256, 128>}]} {
    %cst = arith.constant 0.000000e+00 : f32
    %0 = vector.broadcast %cst : f32 to vector<18x32x128xf32>
    %c0 = arith.constant 0 : index
    %c0_0 = arith.constant 0 : index
    %c0_1 = arith.constant 0 : index
    %1 = vector.load %arg5[%c0, %c0_0, %c0_1] : memref<18x32x128xf32, #tpu.memory_space<vmem>>, vector<18x32x128xf32>
    tpu.vector_store %arg5[%c0, %c0_0, %c0_1], %0 {strides = array<i32>} : memref<18x32x128xf32, #tpu.memory_space<vmem>>, vector<18x32x128xf32>,
    %c0_2 = arith.constant 0 : index
    %c0_3 = arith.constant 0 : index
    %c0_4 = arith.constant 0 : index
    %c0_5 = arith.constant 0 : index
    %2 = vector.load %arg1[%c0_2, %c0_3, %c0_4, %c0_5] : memref<1x16x16x128xf32, #tpu.memory_space<vmem>>, vector<1x16x16x128xf32>
    %3 = vector.shape_cast %2 : vector<1x16x16x128xf32> to vector<16x16x128xf32>
    %c1 = arith.constant 1 : index
    %c8 = arith.constant 8 : index
    %c0_6 = arith.constant 0 : index
    %4 = vector.load %arg5[%c1, %c8, %c0_6] : memref<18x32x128xf32, #tpu.memory_space<vmem>>, vector<16x16x128xf32>
    tpu.vector_store %arg5[%c1, %c8, %c0_6], %3 {strides = array<i32>} : memref<18x32x128xf32, #tpu.memory_space<vmem>>, vector<16x16x128xf32>,
    %c0_7 = arith.constant 0 : index
    %c7 = arith.constant 7 : index
    %c0_8 = arith.constant 0 : index
    %5 = vector.load %arg5[%c0_7, %c7, %c0_8] : memref<18x32x128xf32, #tpu.memory_space<vmem>>, vector<16x16x128xf32>
    %6 = vector.shape_cast %5 : vector<16x16x128xf32> to vector<256x128xf32>
    %7 = arith.truncf %6 : vector<256x128xf32> to vector<256x128xbf16>
    %c0_9 = arith.constant 0 : index
    %c0_10 = arith.constant 0 : index
    %8 = vector.load %arg6[%c0_9, %c0_10] : memref<256x1152xbf16, #tpu.memory_space<vmem>>, vector<256x128xbf16>
    tpu.vector_store %arg6[%c0_9, %c0_10], %7 {strides = array<i32>} : memref<256x1152xbf16, #tpu.memory_space<vmem>>, vector<256x128xbf16>,
    %c0_11 = arith.constant 0 : index
    %c8_12 = arith.constant 8 : index
    %c0_13 = arith.constant 0 : index
    %9 = vector.load %arg5[%c0_11, %c8_12, %c0_13] : memref<18x32x128xf32, #tpu.memory_space<vmem>>, vector<16x16x128xf32>
    %10 = vector.shape_cast %9 : vector<16x16x128xf32> to vector<256x128xf32>
    %11 = arith.truncf %10 : vector<256x128xf32> to vector<256x128xbf16>
    %c0_14 = arith.constant 0 : index
    %c128 = arith.constant 128 : index
    %12 = vector.load %arg6[%c0_14, %c128] : memref<256x1152xbf16, #tpu.memory_space<vmem>>, vector<256x128xbf16>
    tpu.vector_store %arg6[%c0_14, %c128], %11 {strides = array<i32>} : memref<256x1152xbf16, #tpu.memory_space<vmem>>, vector<256x128xbf16>,
    %c0_15 = arith.constant 0 : index
    %c9 = arith.constant 9 : index
    %c0_16 = arith.constant 0 : index
    %13 = vector.load %arg5[%c0_15, %c9, %c0_16] : memref<18x32x128xf32, #tpu.memory_space<vmem>>, vector<16x16x128xf32>
    %14 = vector.shape_cast %13 : vector<16x16x128xf32> to vector<256x128xf32>
    %15 = arith.truncf %14 : vector<256x128xf32> to vector<256x128xbf16>
    %c0_17 = arith.constant 0 : index
    %c256 = arith.constant 256 : index
    %16 = vector.load %arg6[%c0_17, %c256] : memref<256x1152xbf16, #tpu.memory_space<vmem>>, vector<256x128xbf16>
    tpu.vector_store %arg6[%c0_17, %c256], %15 {strides = array<i32>} : memref<256x1152xbf16, #tpu.memory_space<vmem>>, vector<256x128xbf16>,
    %c1_18 = arith.constant 1 : index
    %c7_19 = arith.constant 7 : index
    %c0_20 = arith.constant 0 : index
    %17 = vector.load %arg5[%c1_18, %c7_19, %c0_20] : memref<18x32x128xf32, #tpu.memory_space<vmem>>, vector<16x16x128xf32>
    %18 = vector.shape_cast %17 : vector<16x16x128xf32> to vector<256x128xf32>
    %19 = arith.truncf %18 : vector<256x128xf32> to vector<256x128xbf16>
    %c0_21 = arith.constant 0 : index
    %c384 = arith.constant 384 : index
    %20 = vector.load %arg6[%c0_21, %c384] : memref<256x1152xbf16, #tpu.memory_space<vmem>>, vector<256x128xbf16>
    tpu.vector_store %arg6[%c0_21, %c384], %19 {strides = array<i32>} : memref<256x1152xbf16, #tpu.memory_space<vmem>>, vector<256x128xbf16>,
    %c1_22 = arith.constant 1 : index
    %c8_23 = arith.constant 8 : index
    %c0_24 = arith.constant 0 : index
    %21 = vector.load %arg5[%c1_22, %c8_23, %c0_24] : memref<18x32x128xf32, #tpu.memory_space<vmem>>, vector<16x16x128xf32>
    %22 = vector.shape_cast %21 : vector<16x16x128xf32> to vector<256x128xf32>
    %23 = arith.truncf %22 : vector<256x128xf32> to vector<256x128xbf16>
    %c0_25 = arith.constant 0 : index
    %c512 = arith.constant 512 : index
    %24 = vector.load %arg6[%c0_25, %c512] : memref<256x1152xbf16, #tpu.memory_space<vmem>>, vector<256x128xbf16>
    tpu.vector_store %arg6[%c0_25, %c512], %23 {strides = array<i32>} : memref<256x1152xbf16, #tpu.memory_space<vmem>>, vector<256x128xbf16>,
    %c1_26 = arith.constant 1 : index
    %c9_27 = arith.constant 9 : index
    %c0_28 = arith.constant 0 : index
    %25 = vector.load %arg5[%c1_26, %c9_27, %c0_28] : memref<18x32x128xf32, #tpu.memory_space<vmem>>, vector<16x16x128xf32>
    %26 = vector.shape_cast %25 : vector<16x16x128xf32> to vector<256x128xf32>
    %27 = arith.truncf %26 : vector<256x128xf32> to vector<256x128xbf16>
    %c0_29 = arith.constant 0 : index
    %c640 = arith.constant 640 : index
    %28 = vector.load %arg6[%c0_29, %c640] : memref<256x1152xbf16, #tpu.memory_space<vmem>>, vector<256x128xbf16>
    tpu.vector_store %arg6[%c0_29, %c640], %27 {strides = array<i32>} : memref<256x1152xbf16, #tpu.memory_space<vmem>>, vector<256x128xbf16>,
    %c2 = arith.constant 2 : index
    %c7_30 = arith.constant 7 : index
    %c0_31 = arith.constant 0 : index
    %29 = vector.load %arg5[%c2, %c7_30, %c0_31] : memref<18x32x128xf32, #tpu.memory_space<vmem>>, vector<16x16x128xf32>
    %30 = vector.shape_cast %29 : vector<16x16x128xf32> to vector<256x128xf32>
    %31 = arith.truncf %30 : vector<256x128xf32> to vector<256x128xbf16>
    %c0_32 = arith.constant 0 : index
    %c768 = arith.constant 768 : index
    %32 = vector.load %arg6[%c0_32, %c768] : memref<256x1152xbf16, #tpu.memory_space<vmem>>, vector<256x128xbf16>
    tpu.vector_store %arg6[%c0_32, %c768], %31 {strides = array<i32>} : memref<256x1152xbf16, #tpu.memory_space<vmem>>, vector<256x128xbf16>,
    %c2_33 = arith.constant 2 : index
    %c8_34 = arith.constant 8 : index
    %c0_35 = arith.constant 0 : index
    %33 = vector.load %arg5[%c2_33, %c8_34, %c0_35] : memref<18x32x128xf32, #tpu.memory_space<vmem>>, vector<16x16x128xf32>
    %34 = vector.shape_cast %33 : vector<16x16x128xf32> to vector<256x128xf32>
    %35 = arith.truncf %34 : vector<256x128xf32> to vector<256x128xbf16>
    %c0_36 = arith.constant 0 : index
    %c896 = arith.constant 896 : index
    %36 = vector.load %arg6[%c0_36, %c896] : memref<256x1152xbf16, #tpu.memory_space<vmem>>, vector<256x128xbf16>
    tpu.vector_store %arg6[%c0_36, %c896], %35 {strides = array<i32>} : memref<256x1152xbf16, #tpu.memory_space<vmem>>, vector<256x128xbf16>,
    %c2_37 = arith.constant 2 : index
    %c9_38 = arith.constant 9 : index
    %c0_39 = arith.constant 0 : index
    %37 = vector.load %arg5[%c2_37, %c9_38, %c0_39] : memref<18x32x128xf32, #tpu.memory_space<vmem>>, vector<16x16x128xf32>
    %38 = vector.shape_cast %37 : vector<16x16x128xf32> to vector<256x128xf32>
    %39 = arith.truncf %38 : vector<256x128xf32> to vector<256x128xbf16>
    %c0_40 = arith.constant 0 : index
    %c1024 = arith.constant 1024 : index
    %40 = vector.load %arg6[%c0_40, %c1024] : memref<256x1152xbf16, #tpu.memory_space<vmem>>, vector<256x128xbf16>
    tpu.vector_store %arg6[%c0_40, %c1024], %39 {strides = array<i32>} : memref<256x1152xbf16, #tpu.memory_space<vmem>>, vector<256x128xbf16>,
    %c0_41 = arith.constant 0 : index
    %c0_42 = arith.constant 0 : index
    %41 = vector.load %arg6[%c0_41, %c0_42] : memref<256x1152xbf16, #tpu.memory_space<vmem>>, vector<256x1152xbf16>
    %c0_43 = arith.constant 0 : index
    %c0_44 = arith.constant 0 : index
    %c0_45 = arith.constant 0 : index
    %42 = vector.load %arg2[%c0_43, %c0_44, %c0_45] : memref<5x1152x128xbf16, #tpu.memory_space<vmem>>, vector<1x1152x128xbf16>
    %43 = vector.shape_cast %42 : vector<1x1152x128xbf16> to vector<1152x128xbf16>
    %cst_46 = arith.constant dense<0.000000e+00> : vector<256x128xf32>
    %44 = tpu.matmul %41, %43, %cst_46 {dimension_numbers = #tpu.dot_dimension_numbers<[1], [0], [0], [1], [0, 0, 1, 1], [], []>} : vector<256x1152xbf16>, vector<1152x128xbf16>, vector<256x128xf32> -> vector<256x128xf32>
    %c0_47 = arith.constant 0 : index
    %c0_48 = arith.constant 0 : index
    %c0_49 = arith.constant 0 : index
    %45 = vector.load %arg3[%c0_47, %c0_48, %c0_49] : memref<5x1x128xf32, #tpu.memory_space<vmem>>, vector<1x1x128xf32>
    %46 = vector.shape_cast %45 : vector<1x1x128xf32> to vector<1x128xf32>
    %47 = vector.broadcast %46 : vector<1x128xf32> to vector<256x128xf32>
    %48 = arith.addf %44, %47 : vector<256x128xf32>
    %cst_50 = arith.constant 0.000000e+00 : f32
    %49 = vector.broadcast %cst_50 : f32 to vector<256x128xf32>
    %50 = arith.maximumf %48, %49 : vector<256x128xf32>
    %51 = vector.shape_cast %50 : vector<256x128xf32> to vector<16x16x128xf32>
    %c1_51 = arith.constant 1 : index
    %c8_52 = arith.constant 8 : index
    %c0_53 = arith.constant 0 : index
    %52 = vector.load %arg5[%c1_51, %c8_52, %c0_53] : memref<18x32x128xf32, #tpu.memory_space<vmem>>, vector<16x16x128xf32>
    tpu.vector_store %arg5[%c1_51, %c8_52, %c0_53], %51 {strides = array<i32>} : memref<18x32x128xf32, #tpu.memory_space<vmem>>, vector<16x16x128xf32>,
    %c0_54 = arith.constant 0 : index
    %c7_55 = arith.constant 7 : index
    %c0_56 = arith.constant 0 : index
    %53 = vector.load %arg5[%c0_54, %c7_55, %c0_56] : memref<18x32x128xf32, #tpu.memory_space<vmem>>, vector<16x16x128xf32>
    %54 = vector.shape_cast %53 : vector<16x16x128xf32> to vector<256x128xf32>
    %55 = arith.truncf %54 : vector<256x128xf32> to vector<256x128xbf16>
    %c0_57 = arith.constant 0 : index
    %c0_58 = arith.constant 0 : index
    %56 = vector.load %arg6[%c0_57, %c0_58] : memref<256x1152xbf16, #tpu.memory_space<vmem>>, vector<256x128xbf16>
    tpu.vector_store %arg6[%c0_57, %c0_58], %55 {strides = array<i32>} : memref<256x1152xbf16, #tpu.memory_space<vmem>>, vector<256x128xbf16>,
    %c0_59 = arith.constant 0 : index
    %c8_60 = arith.constant 8 : index
    %c0_61 = arith.constant 0 : index
    %57 = vector.load %arg5[%c0_59, %c8_60, %c0_61] : memref<18x32x128xf32, #tpu.memory_space<vmem>>, vector<16x16x128xf32>
    %58 = vector.shape_cast %57 : vector<16x16x128xf32> to vector<256x128xf32>
    %59 = arith.truncf %58 : vector<256x128xf32> to vector<256x128xbf16>
    %c0_62 = arith.constant 0 : index
    %c128_63 = arith.constant 128 : index
    %60 = vector.load %arg6[%c0_62, %c128_63] : memref<256x1152xbf16, #tpu.memory_space<vmem>>, vector<256x128xbf16>
    tpu.vector_store %arg6[%c0_62, %c128_63], %59 {strides = array<i32>} : memref<256x1152xbf16, #tpu.memory_space<vmem>>, vector<256x128xbf16>,
    %c0_64 = arith.constant 0 : index
    %c9_65 = arith.constant 9 : index
    %c0_66 = arith.constant 0 : index
    %61 = vector.load %arg5[%c0_64, %c9_65, %c0_66] : memref<18x32x128xf32, #tpu.memory_space<vmem>>, vector<16x16x128xf32>
    %62 = vector.shape_cast %61 : vector<16x16x128xf32> to vector<256x128xf32>
    %63 = arith.truncf %62 : vector<256x128xf32> to vector<256x128xbf16>
    %c0_67 = arith.constant 0 : index
    %c256_68 = arith.constant 256 : index
    %64 = vector.load %arg6[%c0_67, %c256_68] : memref<256x1152xbf16, #tpu.memory_space<vmem>>, vector<256x128xbf16>
    tpu.vector_store %arg6[%c0_67, %c256_68], %63 {strides = array<i32>} : memref<256x1152xbf16, #tpu.memory_space<vmem>>, vector<256x128xbf16>,
    %c1_69 = arith.constant 1 : index
    %c7_70 = arith.constant 7 : index
    %c0_71 = arith.constant 0 : index
    %65 = vector.load %arg5[%c1_69, %c7_70, %c0_71] : memref<18x32x128xf32, #tpu.memory_space<vmem>>, vector<16x16x128xf32>
    %66 = vector.shape_cast %65 : vector<16x16x128xf32> to vector<256x128xf32>
    %67 = arith.truncf %66 : vector<256x128xf32> to vector<256x128xbf16>
    %c0_72 = arith.constant 0 : index
    %c384_73 = arith.constant 384 : index
    %68 = vector.load %arg6[%c0_72, %c384_73] : memref<256x1152xbf16, #tpu.memory_space<vmem>>, vector<256x128xbf16>
    tpu.vector_store %arg6[%c0_72, %c384_73], %67 {strides = array<i32>} : memref<256x1152xbf16, #tpu.memory_space<vmem>>, vector<256x128xbf16>,
    %c1_74 = arith.constant 1 : index
    %c8_75 = arith.constant 8 : index
    %c0_76 = arith.constant 0 : index
    %69 = vector.load %arg5[%c1_74, %c8_75, %c0_76] : memref<18x32x128xf32, #tpu.memory_space<vmem>>, vector<16x16x128xf32>
    %70 = vector.shape_cast %69 : vector<16x16x128xf32> to vector<256x128xf32>
    %71 = arith.truncf %70 : vector<256x128xf32> to vector<256x128xbf16>
    %c0_77 = arith.constant 0 : index
    %c512_78 = arith.constant 512 : index
    %72 = vector.load %arg6[%c0_77, %c512_78] : memref<256x1152xbf16, #tpu.memory_space<vmem>>, vector<256x128xbf16>
    tpu.vector_store %arg6[%c0_77, %c512_78], %71 {strides = array<i32>} : memref<256x1152xbf16, #tpu.memory_space<vmem>>, vector<256x128xbf16>,
    %c1_79 = arith.constant 1 : index
    %c9_80 = arith.constant 9 : index
    %c0_81 = arith.constant 0 : index
    %73 = vector.load %arg5[%c1_79, %c9_80, %c0_81] : memref<18x32x128xf32, #tpu.memory_space<vmem>>, vector<16x16x128xf32>
    %74 = vector.shape_cast %73 : vector<16x16x128xf32> to vector<256x128xf32>
    %75 = arith.truncf %74 : vector<256x128xf32> to vector<256x128xbf16>
    %c0_82 = arith.constant 0 : index
    %c640_83 = arith.constant 640 : index
    %76 = vector.load %arg6[%c0_82, %c640_83] : memref<256x1152xbf16, #tpu.memory_space<vmem>>, vector<256x128xbf16>
    tpu.vector_store %arg6[%c0_82, %c640_83], %75 {strides = array<i32>} : memref<256x1152xbf16, #tpu.memory_space<vmem>>, vector<256x128xbf16>,
    %c2_84 = arith.constant 2 : index
    %c7_85 = arith.constant 7 : index
    %c0_86 = arith.constant 0 : index
    %77 = vector.load %arg5[%c2_84, %c7_85, %c0_86] : memref<18x32x128xf32, #tpu.memory_space<vmem>>, vector<16x16x128xf32>
    %78 = vector.shape_cast %77 : vector<16x16x128xf32> to vector<256x128xf32>
    %79 = arith.truncf %78 : vector<256x128xf32> to vector<256x128xbf16>
    %c0_87 = arith.constant 0 : index
    %c768_88 = arith.constant 768 : index
    %80 = vector.load %arg6[%c0_87, %c768_88] : memref<256x1152xbf16, #tpu.memory_space<vmem>>, vector<256x128xbf16>
    tpu.vector_store %arg6[%c0_87, %c768_88], %79 {strides = array<i32>} : memref<256x1152xbf16, #tpu.memory_space<vmem>>, vector<256x128xbf16>,
    %c2_89 = arith.constant 2 : index
    %c8_90 = arith.constant 8 : index
    %c0_91 = arith.constant 0 : index
    %81 = vector.load %arg5[%c2_89, %c8_90, %c0_91] : memref<18x32x128xf32, #tpu.memory_space<vmem>>, vector<16x16x128xf32>
    %82 = vector.shape_cast %81 : vector<16x16x128xf32> to vector<256x128xf32>
    %83 = arith.truncf %82 : vector<256x128xf32> to vector<256x128xbf16>
    %c0_92 = arith.constant 0 : index
    %c896_93 = arith.constant 896 : index
    %84 = vector.load %arg6[%c0_92, %c896_93] : memref<256x1152xbf16, #tpu.memory_space<vmem>>, vector<256x128xbf16>
    tpu.vector_store %arg6[%c0_92, %c896_93], %83 {strides = array<i32>} : memref<256x1152xbf16, #tpu.memory_space<vmem>>, vector<256x128xbf16>,
    %c2_94 = arith.constant 2 : index
    %c9_95 = arith.constant 9 : index
    %c0_96 = arith.constant 0 : index
    %85 = vector.load %arg5[%c2_94, %c9_95, %c0_96] : memref<18x32x128xf32, #tpu.memory_space<vmem>>, vector<16x16x128xf32>
    %86 = vector.shape_cast %85 : vector<16x16x128xf32> to vector<256x128xf32>
    %87 = arith.truncf %86 : vector<256x128xf32> to vector<256x128xbf16>
    %c0_97 = arith.constant 0 : index
    %c1024_98 = arith.constant 1024 : index
    %88 = vector.load %arg6[%c0_97, %c1024_98] : memref<256x1152xbf16, #tpu.memory_space<vmem>>, vector<256x128xbf16>
    tpu.vector_store %arg6[%c0_97, %c1024_98], %87 {strides = array<i32>} : memref<256x1152xbf16, #tpu.memory_space<vmem>>, vector<256x128xbf16>,
    %c0_99 = arith.constant 0 : index
    %c0_100 = arith.constant 0 : index
    %89 = vector.load %arg6[%c0_99, %c0_100] : memref<256x1152xbf16, #tpu.memory_space<vmem>>, vector<256x1152xbf16>
    %c1_101 = arith.constant 1 : index
    %c0_102 = arith.constant 0 : index
    %c0_103 = arith.constant 0 : index
    %90 = vector.load %arg2[%c1_101, %c0_102, %c0_103] : memref<5x1152x128xbf16, #tpu.memory_space<vmem>>, vector<1x1152x128xbf16>
    %91 = vector.shape_cast %90 : vector<1x1152x128xbf16> to vector<1152x128xbf16>
    %cst_104 = arith.constant dense<0.000000e+00> : vector<256x128xf32>
    %92 = tpu.matmul %89, %91, %cst_104 {dimension_numbers = #tpu.dot_dimension_numbers<[1], [0], [0], [1], [0, 0, 1, 1], [], []>} : vector<256x1152xbf16>, vector<1152x128xbf16>, vector<256x128xf32> -> vector<256x128xf32>
    %c1_105 = arith.constant 1 : index
    %c0_106 = arith.constant 0 : index
    %c0_107 = arith.constant 0 : index
    %93 = vector.load %arg3[%c1_105, %c0_106, %c0_107] : memref<5x1x128xf32, #tpu.memory_space<vmem>>, vector<1x1x128xf32>
    %94 = vector.shape_cast %93 : vector<1x1x128xf32> to vector<1x128xf32>
    %95 = vector.broadcast %94 : vector<1x128xf32> to vector<256x128xf32>
    %96 = arith.addf %92, %95 : vector<256x128xf32>
    %cst_108 = arith.constant 0.000000e+00 : f32
    %97 = vector.broadcast %cst_108 : f32 to vector<256x128xf32>
    %98 = arith.maximumf %96, %97 : vector<256x128xf32>
    %99 = vector.shape_cast %98 : vector<256x128xf32> to vector<16x16x128xf32>
    %c1_109 = arith.constant 1 : index
    %c8_110 = arith.constant 8 : index
    %c0_111 = arith.constant 0 : index
    %100 = vector.load %arg5[%c1_109, %c8_110, %c0_111] : memref<18x32x128xf32, #tpu.memory_space<vmem>>, vector<16x16x128xf32>
    tpu.vector_store %arg5[%c1_109, %c8_110, %c0_111], %99 {strides = array<i32>} : memref<18x32x128xf32, #tpu.memory_space<vmem>>, vector<16x16x128xf32>,
    %c0_112 = arith.constant 0 : index
    %c7_113 = arith.constant 7 : index
    %c0_114 = arith.constant 0 : index
    %101 = vector.load %arg5[%c0_112, %c7_113, %c0_114] : memref<18x32x128xf32, #tpu.memory_space<vmem>>, vector<16x16x128xf32>
    %102 = vector.shape_cast %101 : vector<16x16x128xf32> to vector<256x128xf32>
    %103 = arith.truncf %102 : vector<256x128xf32> to vector<256x128xbf16>
    %c0_115 = arith.constant 0 : index
    %c0_116 = arith.constant 0 : index
    %104 = vector.load %arg6[%c0_115, %c0_116] : memref<256x1152xbf16, #tpu.memory_space<vmem>>, vector<256x128xbf16>
    tpu.vector_store %arg6[%c0_115, %c0_116], %103 {strides = array<i32>} : memref<256x1152xbf16, #tpu.memory_space<vmem>>, vector<256x128xbf16>,
    %c0_117 = arith.constant 0 : index
    %c8_118 = arith.constant 8 : index
    %c0_119 = arith.constant 0 : index
    %105 = vector.load %arg5[%c0_117, %c8_118, %c0_119] : memref<18x32x128xf32, #tpu.memory_space<vmem>>, vector<16x16x128xf32>
    %106 = vector.shape_cast %105 : vector<16x16x128xf32> to vector<256x128xf32>
    %107 = arith.truncf %106 : vector<256x128xf32> to vector<256x128xbf16>
    %c0_120 = arith.constant 0 : index
    %c128_121 = arith.constant 128 : index
    %108 = vector.load %arg6[%c0_120, %c128_121] : memref<256x1152xbf16, #tpu.memory_space<vmem>>, vector<256x128xbf16>
    tpu.vector_store %arg6[%c0_120, %c128_121], %107 {strides = array<i32>} : memref<256x1152xbf16, #tpu.memory_space<vmem>>, vector<256x128xbf16>,
    %c0_122 = arith.constant 0 : index
    %c9_123 = arith.constant 9 : index
    %c0_124 = arith.constant 0 : index
    %109 = vector.load %arg5[%c0_122, %c9_123, %c0_124] : memref<18x32x128xf32, #tpu.memory_space<vmem>>, vector<16x16x128xf32>
    %110 = vector.shape_cast %109 : vector<16x16x128xf32> to vector<256x128xf32>
    %111 = arith.truncf %110 : vector<256x128xf32> to vector<256x128xbf16>
    %c0_125 = arith.constant 0 : index
    %c256_126 = arith.constant 256 : index
    %112 = vector.load %arg6[%c0_125, %c256_126] : memref<256x1152xbf16, #tpu.memory_space<vmem>>, vector<256x128xbf16>
    tpu.vector_store %arg6[%c0_125, %c256_126], %111 {strides = array<i32>} : memref<256x1152xbf16, #tpu.memory_space<vmem>>, vector<256x128xbf16>,
    %c1_127 = arith.constant 1 : index
    %c7_128 = arith.constant 7 : index
    %c0_129 = arith.constant 0 : index
    %113 = vector.load %arg5[%c1_127, %c7_128, %c0_129] : memref<18x32x128xf32, #tpu.memory_space<vmem>>, vector<16x16x128xf32>
    %114 = vector.shape_cast %113 : vector<16x16x128xf32> to vector<256x128xf32>
    %115 = arith.truncf %114 : vector<256x128xf32> to vector<256x128xbf16>
    %c0_130 = arith.constant 0 : index
    %c384_131 = arith.constant 384 : index
    %116 = vector.load %arg6[%c0_130, %c384_131] : memref<256x1152xbf16, #tpu.memory_space<vmem>>, vector<256x128xbf16>
    tpu.vector_store %arg6[%c0_130, %c384_131], %115 {strides = array<i32>} : memref<256x1152xbf16, #tpu.memory_space<vmem>>, vector<256x128xbf16>,
    %c1_132 = arith.constant 1 : index
    %c8_133 = arith.constant 8 : index
    %c0_134 = arith.constant 0 : index
    %117 = vector.load %arg5[%c1_132, %c8_133, %c0_134] : memref<18x32x128xf32, #tpu.memory_space<vmem>>, vector<16x16x128xf32>
    %118 = vector.shape_cast %117 : vector<16x16x128xf32> to vector<256x128xf32>
    %119 = arith.truncf %118 : vector<256x128xf32> to vector<256x128xbf16>
    %c0_135 = arith.constant 0 : index
    %c512_136 = arith.constant 512 : index
    %120 = vector.load %arg6[%c0_135, %c512_136] : memref<256x1152xbf16, #tpu.memory_space<vmem>>, vector<256x128xbf16>
    tpu.vector_store %arg6[%c0_135, %c512_136], %119 {strides = array<i32>} : memref<256x1152xbf16, #tpu.memory_space<vmem>>, vector<256x128xbf16>,
    %c1_137 = arith.constant 1 : index
    %c9_138 = arith.constant 9 : index
    %c0_139 = arith.constant 0 : index
    %121 = vector.load %arg5[%c1_137, %c9_138, %c0_139] : memref<18x32x128xf32, #tpu.memory_space<vmem>>, vector<16x16x128xf32>
    %122 = vector.shape_cast %121 : vector<16x16x128xf32> to vector<256x128xf32>
    %123 = arith.truncf %122 : vector<256x128xf32> to vector<256x128xbf16>
    %c0_140 = arith.constant 0 : index
    %c640_141 = arith.constant 640 : index
    %124 = vector.load %arg6[%c0_140, %c640_141] : memref<256x1152xbf16, #tpu.memory_space<vmem>>, vector<256x128xbf16>
    tpu.vector_store %arg6[%c0_140, %c640_141], %123 {strides = array<i32>} : memref<256x1152xbf16, #tpu.memory_space<vmem>>, vector<256x128xbf16>,
    %c2_142 = arith.constant 2 : index
    %c7_143 = arith.constant 7 : index
    %c0_144 = arith.constant 0 : index
    %125 = vector.load %arg5[%c2_142, %c7_143, %c0_144] : memref<18x32x128xf32, #tpu.memory_space<vmem>>, vector<16x16x128xf32>
    %126 = vector.shape_cast %125 : vector<16x16x128xf32> to vector<256x128xf32>
    %127 = arith.truncf %126 : vector<256x128xf32> to vector<256x128xbf16>
    %c0_145 = arith.constant 0 : index
    %c768_146 = arith.constant 768 : index
    %128 = vector.load %arg6[%c0_145, %c768_146] : memref<256x1152xbf16, #tpu.memory_space<vmem>>, vector<256x128xbf16>
    tpu.vector_store %arg6[%c0_145, %c768_146], %127 {strides = array<i32>} : memref<256x1152xbf16, #tpu.memory_space<vmem>>, vector<256x128xbf16>,
    %c2_147 = arith.constant 2 : index
    %c8_148 = arith.constant 8 : index
    %c0_149 = arith.constant 0 : index
    %129 = vector.load %arg5[%c2_147, %c8_148, %c0_149] : memref<18x32x128xf32, #tpu.memory_space<vmem>>, vector<16x16x128xf32>
    %130 = vector.shape_cast %129 : vector<16x16x128xf32> to vector<256x128xf32>
    %131 = arith.truncf %130 : vector<256x128xf32> to vector<256x128xbf16>
    %c0_150 = arith.constant 0 : index
    %c896_151 = arith.constant 896 : index
    %132 = vector.load %arg6[%c0_150, %c896_151] : memref<256x1152xbf16, #tpu.memory_space<vmem>>, vector<256x128xbf16>
    tpu.vector_store %arg6[%c0_150, %c896_151], %131 {strides = array<i32>} : memref<256x1152xbf16, #tpu.memory_space<vmem>>, vector<256x128xbf16>,
    %c2_152 = arith.constant 2 : index
    %c9_153 = arith.constant 9 : index
    %c0_154 = arith.constant 0 : index
    %133 = vector.load %arg5[%c2_152, %c9_153, %c0_154] : memref<18x32x128xf32, #tpu.memory_space<vmem>>, vector<16x16x128xf32>
    %134 = vector.shape_cast %133 : vector<16x16x128xf32> to vector<256x128xf32>
    %135 = arith.truncf %134 : vector<256x128xf32> to vector<256x128xbf16>
    %c0_155 = arith.constant 0 : index
    %c1024_156 = arith.constant 1024 : index
    %136 = vector.load %arg6[%c0_155, %c1024_156] : memref<256x1152xbf16, #tpu.memory_space<vmem>>, vector<256x128xbf16>
    tpu.vector_store %arg6[%c0_155, %c1024_156], %135 {strides = array<i32>} : memref<256x1152xbf16, #tpu.memory_space<vmem>>, vector<256x128xbf16>,
    %c0_157 = arith.constant 0 : index
    %c0_158 = arith.constant 0 : index
    %137 = vector.load %arg6[%c0_157, %c0_158] : memref<256x1152xbf16, #tpu.memory_space<vmem>>, vector<256x1152xbf16>
    %c2_159 = arith.constant 2 : index
    %c0_160 = arith.constant 0 : index
    %c0_161 = arith.constant 0 : index
    %138 = vector.load %arg2[%c2_159, %c0_160, %c0_161] : memref<5x1152x128xbf16, #tpu.memory_space<vmem>>, vector<1x1152x128xbf16>
    %139 = vector.shape_cast %138 : vector<1x1152x128xbf16> to vector<1152x128xbf16>
    %cst_162 = arith.constant dense<0.000000e+00> : vector<256x128xf32>
    %140 = tpu.matmul %137, %139, %cst_162 {dimension_numbers = #tpu.dot_dimension_numbers<[1], [0], [0], [1], [0, 0, 1, 1], [], []>} : vector<256x1152xbf16>, vector<1152x128xbf16>, vector<256x128xf32> -> vector<256x128xf32>
    %c2_163 = arith.constant 2 : index
    %c0_164 = arith.constant 0 : index
    %c0_165 = arith.constant 0 : index
    %141 = vector.load %arg3[%c2_163, %c0_164, %c0_165] : memref<5x1x128xf32, #tpu.memory_space<vmem>>, vector<1x1x128xf32>
    %142 = vector.shape_cast %141 : vector<1x1x128xf32> to vector<1x128xf32>
    %143 = vector.broadcast %142 : vector<1x128xf32> to vector<256x128xf32>
    %144 = arith.addf %140, %143 : vector<256x128xf32>
    %cst_166 = arith.constant 0.000000e+00 : f32
    %145 = vector.broadcast %cst_166 : f32 to vector<256x128xf32>
    %146 = arith.maximumf %144, %145 : vector<256x128xf32>
    %147 = vector.shape_cast %146 : vector<256x128xf32> to vector<16x16x128xf32>
    %c1_167 = arith.constant 1 : index
    %c8_168 = arith.constant 8 : index
    %c0_169 = arith.constant 0 : index
    %148 = vector.load %arg5[%c1_167, %c8_168, %c0_169] : memref<18x32x128xf32, #tpu.memory_space<vmem>>, vector<16x16x128xf32>
    tpu.vector_store %arg5[%c1_167, %c8_168, %c0_169], %147 {strides = array<i32>} : memref<18x32x128xf32, #tpu.memory_space<vmem>>, vector<16x16x128xf32>,
    %c0_170 = arith.constant 0 : index
    %c7_171 = arith.constant 7 : index
    %c0_172 = arith.constant 0 : index
    %149 = vector.load %arg5[%c0_170, %c7_171, %c0_172] : memref<18x32x128xf32, #tpu.memory_space<vmem>>, vector<16x16x128xf32>
    %150 = vector.shape_cast %149 : vector<16x16x128xf32> to vector<256x128xf32>
    %151 = arith.truncf %150 : vector<256x128xf32> to vector<256x128xbf16>
    %c0_173 = arith.constant 0 : index
    %c0_174 = arith.constant 0 : index
    %152 = vector.load %arg6[%c0_173, %c0_174] : memref<256x1152xbf16, #tpu.memory_space<vmem>>, vector<256x128xbf16>
    tpu.vector_store %arg6[%c0_173, %c0_174], %151 {strides = array<i32>} : memref<256x1152xbf16, #tpu.memory_space<vmem>>, vector<256x128xbf16>,
    %c0_175 = arith.constant 0 : index
    %c8_176 = arith.constant 8 : index
    %c0_177 = arith.constant 0 : index
    %153 = vector.load %arg5[%c0_175, %c8_176, %c0_177] : memref<18x32x128xf32, #tpu.memory_space<vmem>>, vector<16x16x128xf32>
    %154 = vector.shape_cast %153 : vector<16x16x128xf32> to vector<256x128xf32>
    %155 = arith.truncf %154 : vector<256x128xf32> to vector<256x128xbf16>
    %c0_178 = arith.constant 0 : index
    %c128_179 = arith.constant 128 : index
    %156 = vector.load %arg6[%c0_178, %c128_179] : memref<256x1152xbf16, #tpu.memory_space<vmem>>, vector<256x128xbf16>
    tpu.vector_store %arg6[%c0_178, %c128_179], %155 {strides = array<i32>} : memref<256x1152xbf16, #tpu.memory_space<vmem>>, vector<256x128xbf16>,
    %c0_180 = arith.constant 0 : index
    %c9_181 = arith.constant 9 : index
    %c0_182 = arith.constant 0 : index
    %157 = vector.load %arg5[%c0_180, %c9_181, %c0_182] : memref<18x32x128xf32, #tpu.memory_space<vmem>>, vector<16x16x128xf32>
    %158 = vector.shape_cast %157 : vector<16x16x128xf32> to vector<256x128xf32>
    %159 = arith.truncf %158 : vector<256x128xf32> to vector<256x128xbf16>
    %c0_183 = arith.constant 0 : index
    %c256_184 = arith.constant 256 : index
    %160 = vector.load %arg6[%c0_183, %c256_184] : memref<256x1152xbf16, #tpu.memory_space<vmem>>, vector<256x128xbf16>
    tpu.vector_store %arg6[%c0_183, %c256_184], %159 {strides = array<i32>} : memref<256x1152xbf16, #tpu.memory_space<vmem>>, vector<256x128xbf16>,
    %c1_185 = arith.constant 1 : index
    %c7_186 = arith.constant 7 : index
    %c0_187 = arith.constant 0 : index
    %161 = vector.load %arg5[%c1_185, %c7_186, %c0_187] : memref<18x32x128xf32, #tpu.memory_space<vmem>>, vector<16x16x128xf32>
    %162 = vector.shape_cast %161 : vector<16x16x128xf32> to vector<256x128xf32>
    %163 = arith.truncf %162 : vector<256x128xf32> to vector<256x128xbf16>
    %c0_188 = arith.constant 0 : index
    %c384_189 = arith.constant 384 : index
    %164 = vector.load %arg6[%c0_188, %c384_189] : memref<256x1152xbf16, #tpu.memory_space<vmem>>, vector<256x128xbf16>
    tpu.vector_store %arg6[%c0_188, %c384_189], %163 {strides = array<i32>} : memref<256x1152xbf16, #tpu.memory_space<vmem>>, vector<256x128xbf16>,
    %c1_190 = arith.constant 1 : index
    %c8_191 = arith.constant 8 : index
    %c0_192 = arith.constant 0 : index
    %165 = vector.load %arg5[%c1_190, %c8_191, %c0_192] : memref<18x32x128xf32, #tpu.memory_space<vmem>>, vector<16x16x128xf32>
    %166 = vector.shape_cast %165 : vector<16x16x128xf32> to vector<256x128xf32>
    %167 = arith.truncf %166 : vector<256x128xf32> to vector<256x128xbf16>
    %c0_193 = arith.constant 0 : index
    %c512_194 = arith.constant 512 : index
    %168 = vector.load %arg6[%c0_193, %c512_194] : memref<256x1152xbf16, #tpu.memory_space<vmem>>, vector<256x128xbf16>
    tpu.vector_store %arg6[%c0_193, %c512_194], %167 {strides = array<i32>} : memref<256x1152xbf16, #tpu.memory_space<vmem>>, vector<256x128xbf16>,
    %c1_195 = arith.constant 1 : index
    %c9_196 = arith.constant 9 : index
    %c0_197 = arith.constant 0 : index
    %169 = vector.load %arg5[%c1_195, %c9_196, %c0_197] : memref<18x32x128xf32, #tpu.memory_space<vmem>>, vector<16x16x128xf32>
    %170 = vector.shape_cast %169 : vector<16x16x128xf32> to vector<256x128xf32>
    %171 = arith.truncf %170 : vector<256x128xf32> to vector<256x128xbf16>
    %c0_198 = arith.constant 0 : index
    %c640_199 = arith.constant 640 : index
    %172 = vector.load %arg6[%c0_198, %c640_199] : memref<256x1152xbf16, #tpu.memory_space<vmem>>, vector<256x128xbf16>
    tpu.vector_store %arg6[%c0_198, %c640_199], %171 {strides = array<i32>} : memref<256x1152xbf16, #tpu.memory_space<vmem>>, vector<256x128xbf16>,
    %c2_200 = arith.constant 2 : index
    %c7_201 = arith.constant 7 : index
    %c0_202 = arith.constant 0 : index
    %173 = vector.load %arg5[%c2_200, %c7_201, %c0_202] : memref<18x32x128xf32, #tpu.memory_space<vmem>>, vector<16x16x128xf32>
    %174 = vector.shape_cast %173 : vector<16x16x128xf32> to vector<256x128xf32>
    %175 = arith.truncf %174 : vector<256x128xf32> to vector<256x128xbf16>
    %c0_203 = arith.constant 0 : index
    %c768_204 = arith.constant 768 : index
    %176 = vector.load %arg6[%c0_203, %c768_204] : memref<256x1152xbf16, #tpu.memory_space<vmem>>, vector<256x128xbf16>
    tpu.vector_store %arg6[%c0_203, %c768_204], %175 {strides = array<i32>} : memref<256x1152xbf16, #tpu.memory_space<vmem>>, vector<256x128xbf16>,
    %c2_205 = arith.constant 2 : index
    %c8_206 = arith.constant 8 : index
    %c0_207 = arith.constant 0 : index
    %177 = vector.load %arg5[%c2_205, %c8_206, %c0_207] : memref<18x32x128xf32, #tpu.memory_space<vmem>>, vector<16x16x128xf32>
    %178 = vector.shape_cast %177 : vector<16x16x128xf32> to vector<256x128xf32>
    %179 = arith.truncf %178 : vector<256x128xf32> to vector<256x128xbf16>
    %c0_208 = arith.constant 0 : index
    %c896_209 = arith.constant 896 : index
    %180 = vector.load %arg6[%c0_208, %c896_209] : memref<256x1152xbf16, #tpu.memory_space<vmem>>, vector<256x128xbf16>
    tpu.vector_store %arg6[%c0_208, %c896_209], %179 {strides = array<i32>} : memref<256x1152xbf16, #tpu.memory_space<vmem>>, vector<256x128xbf16>,
    %c2_210 = arith.constant 2 : index
    %c9_211 = arith.constant 9 : index
    %c0_212 = arith.constant 0 : index
    %181 = vector.load %arg5[%c2_210, %c9_211, %c0_212] : memref<18x32x128xf32, #tpu.memory_space<vmem>>, vector<16x16x128xf32>
    %182 = vector.shape_cast %181 : vector<16x16x128xf32> to vector<256x128xf32>
    %183 = arith.truncf %182 : vector<256x128xf32> to vector<256x128xbf16>
    %c0_213 = arith.constant 0 : index
    %c1024_214 = arith.constant 1024 : index
    %184 = vector.load %arg6[%c0_213, %c1024_214] : memref<256x1152xbf16, #tpu.memory_space<vmem>>, vector<256x128xbf16>
    tpu.vector_store %arg6[%c0_213, %c1024_214], %183 {strides = array<i32>} : memref<256x1152xbf16, #tpu.memory_space<vmem>>, vector<256x128xbf16>,
    %c0_215 = arith.constant 0 : index
    %c0_216 = arith.constant 0 : index
    %185 = vector.load %arg6[%c0_215, %c0_216] : memref<256x1152xbf16, #tpu.memory_space<vmem>>, vector<256x1152xbf16>
    %c3 = arith.constant 3 : index
    %c0_217 = arith.constant 0 : index
    %c0_218 = arith.constant 0 : index
    %186 = vector.load %arg2[%c3, %c0_217, %c0_218] : memref<5x1152x128xbf16, #tpu.memory_space<vmem>>, vector<1x1152x128xbf16>
    %187 = vector.shape_cast %186 : vector<1x1152x128xbf16> to vector<1152x128xbf16>
    %cst_219 = arith.constant dense<0.000000e+00> : vector<256x128xf32>
    %188 = tpu.matmul %185, %187, %cst_219 {dimension_numbers = #tpu.dot_dimension_numbers<[1], [0], [0], [1], [0, 0, 1, 1], [], []>} : vector<256x1152xbf16>, vector<1152x128xbf16>, vector<256x128xf32> -> vector<256x128xf32>
    %c3_220 = arith.constant 3 : index
    %c0_221 = arith.constant 0 : index
    %c0_222 = arith.constant 0 : index
    %189 = vector.load %arg3[%c3_220, %c0_221, %c0_222] : memref<5x1x128xf32, #tpu.memory_space<vmem>>, vector<1x1x128xf32>
    %190 = vector.shape_cast %189 : vector<1x1x128xf32> to vector<1x128xf32>
    %191 = vector.broadcast %190 : vector<1x128xf32> to vector<256x128xf32>
    %192 = arith.addf %188, %191 : vector<256x128xf32>
    %cst_223 = arith.constant 0.000000e+00 : f32
    %193 = vector.broadcast %cst_223 : f32 to vector<256x128xf32>
    %194 = arith.maximumf %192, %193 : vector<256x128xf32>
    %195 = vector.shape_cast %194 : vector<256x128xf32> to vector<16x16x128xf32>
    %c1_224 = arith.constant 1 : index
    %c8_225 = arith.constant 8 : index
    %c0_226 = arith.constant 0 : index
    %196 = vector.load %arg5[%c1_224, %c8_225, %c0_226] : memref<18x32x128xf32, #tpu.memory_space<vmem>>, vector<16x16x128xf32>
    tpu.vector_store %arg5[%c1_224, %c8_225, %c0_226], %195 {strides = array<i32>} : memref<18x32x128xf32, #tpu.memory_space<vmem>>, vector<16x16x128xf32>,
    %c0_227 = arith.constant 0 : index
    %c7_228 = arith.constant 7 : index
    %c0_229 = arith.constant 0 : index
    %197 = vector.load %arg5[%c0_227, %c7_228, %c0_229] : memref<18x32x128xf32, #tpu.memory_space<vmem>>, vector<16x16x128xf32>
    %198 = vector.shape_cast %197 : vector<16x16x128xf32> to vector<256x128xf32>
    %199 = arith.truncf %198 : vector<256x128xf32> to vector<256x128xbf16>
    %c0_230 = arith.constant 0 : index
    %c0_231 = arith.constant 0 : index
    %200 = vector.load %arg6[%c0_230, %c0_231] : memref<256x1152xbf16, #tpu.memory_space<vmem>>, vector<256x128xbf16>
    tpu.vector_store %arg6[%c0_230, %c0_231], %199 {strides = array<i32>} : memref<256x1152xbf16, #tpu.memory_space<vmem>>, vector<256x128xbf16>,
    %c0_232 = arith.constant 0 : index
    %c8_233 = arith.constant 8 : index
    %c0_234 = arith.constant 0 : index
    %201 = vector.load %arg5[%c0_232, %c8_233, %c0_234] : memref<18x32x128xf32, #tpu.memory_space<vmem>>, vector<16x16x128xf32>
    %202 = vector.shape_cast %201 : vector<16x16x128xf32> to vector<256x128xf32>
    %203 = arith.truncf %202 : vector<256x128xf32> to vector<256x128xbf16>
    %c0_235 = arith.constant 0 : index
    %c128_236 = arith.constant 128 : index
    %204 = vector.load %arg6[%c0_235, %c128_236] : memref<256x1152xbf16, #tpu.memory_space<vmem>>, vector<256x128xbf16>
    tpu.vector_store %arg6[%c0_235, %c128_236], %203 {strides = array<i32>} : memref<256x1152xbf16, #tpu.memory_space<vmem>>, vector<256x128xbf16>,
    %c0_237 = arith.constant 0 : index
    %c9_238 = arith.constant 9 : index
    %c0_239 = arith.constant 0 : index
    %205 = vector.load %arg5[%c0_237, %c9_238, %c0_239] : memref<18x32x128xf32, #tpu.memory_space<vmem>>, vector<16x16x128xf32>
    %206 = vector.shape_cast %205 : vector<16x16x128xf32> to vector<256x128xf32>
    %207 = arith.truncf %206 : vector<256x128xf32> to vector<256x128xbf16>
    %c0_240 = arith.constant 0 : index
    %c256_241 = arith.constant 256 : index
    %208 = vector.load %arg6[%c0_240, %c256_241] : memref<256x1152xbf16, #tpu.memory_space<vmem>>, vector<256x128xbf16>
    tpu.vector_store %arg6[%c0_240, %c256_241], %207 {strides = array<i32>} : memref<256x1152xbf16, #tpu.memory_space<vmem>>, vector<256x128xbf16>,
    %c1_242 = arith.constant 1 : index
    %c7_243 = arith.constant 7 : index
    %c0_244 = arith.constant 0 : index
    %209 = vector.load %arg5[%c1_242, %c7_243, %c0_244] : memref<18x32x128xf32, #tpu.memory_space<vmem>>, vector<16x16x128xf32>
    %210 = vector.shape_cast %209 : vector<16x16x128xf32> to vector<256x128xf32>
    %211 = arith.truncf %210 : vector<256x128xf32> to vector<256x128xbf16>
    %c0_245 = arith.constant 0 : index
    %c384_246 = arith.constant 384 : index
    %212 = vector.load %arg6[%c0_245, %c384_246] : memref<256x1152xbf16, #tpu.memory_space<vmem>>, vector<256x128xbf16>
    tpu.vector_store %arg6[%c0_245, %c384_246], %211 {strides = array<i32>} : memref<256x1152xbf16, #tpu.memory_space<vmem>>, vector<256x128xbf16>,
    %c1_247 = arith.constant 1 : index
    %c8_248 = arith.constant 8 : index
    %c0_249 = arith.constant 0 : index
    %213 = vector.load %arg5[%c1_247, %c8_248, %c0_249] : memref<18x32x128xf32, #tpu.memory_space<vmem>>, vector<16x16x128xf32>
    %214 = vector.shape_cast %213 : vector<16x16x128xf32> to vector<256x128xf32>
    %215 = arith.truncf %214 : vector<256x128xf32> to vector<256x128xbf16>
    %c0_250 = arith.constant 0 : index
    %c512_251 = arith.constant 512 : index
    %216 = vector.load %arg6[%c0_250, %c512_251] : memref<256x1152xbf16, #tpu.memory_space<vmem>>, vector<256x128xbf16>
    tpu.vector_store %arg6[%c0_250, %c512_251], %215 {strides = array<i32>} : memref<256x1152xbf16, #tpu.memory_space<vmem>>, vector<256x128xbf16>,
    %c1_252 = arith.constant 1 : index
    %c9_253 = arith.constant 9 : index
    %c0_254 = arith.constant 0 : index
    %217 = vector.load %arg5[%c1_252, %c9_253, %c0_254] : memref<18x32x128xf32, #tpu.memory_space<vmem>>, vector<16x16x128xf32>
    %218 = vector.shape_cast %217 : vector<16x16x128xf32> to vector<256x128xf32>
    %219 = arith.truncf %218 : vector<256x128xf32> to vector<256x128xbf16>
    %c0_255 = arith.constant 0 : index
    %c640_256 = arith.constant 640 : index
    %220 = vector.load %arg6[%c0_255, %c640_256] : memref<256x1152xbf16, #tpu.memory_space<vmem>>, vector<256x128xbf16>
    tpu.vector_store %arg6[%c0_255, %c640_256], %219 {strides = array<i32>} : memref<256x1152xbf16, #tpu.memory_space<vmem>>, vector<256x128xbf16>,
    %c2_257 = arith.constant 2 : index
    %c7_258 = arith.constant 7 : index
    %c0_259 = arith.constant 0 : index
    %221 = vector.load %arg5[%c2_257, %c7_258, %c0_259] : memref<18x32x128xf32, #tpu.memory_space<vmem>>, vector<16x16x128xf32>
    %222 = vector.shape_cast %221 : vector<16x16x128xf32> to vector<256x128xf32>
    %223 = arith.truncf %222 : vector<256x128xf32> to vector<256x128xbf16>
    %c0_260 = arith.constant 0 : index
    %c768_261 = arith.constant 768 : index
    %224 = vector.load %arg6[%c0_260, %c768_261] : memref<256x1152xbf16, #tpu.memory_space<vmem>>, vector<256x128xbf16>
    tpu.vector_store %arg6[%c0_260, %c768_261], %223 {strides = array<i32>} : memref<256x1152xbf16, #tpu.memory_space<vmem>>, vector<256x128xbf16>,
    %c2_262 = arith.constant 2 : index
    %c8_263 = arith.constant 8 : index
    %c0_264 = arith.constant 0 : index
    %225 = vector.load %arg5[%c2_262, %c8_263, %c0_264] : memref<18x32x128xf32, #tpu.memory_space<vmem>>, vector<16x16x128xf32>
    %226 = vector.shape_cast %225 : vector<16x16x128xf32> to vector<256x128xf32>
    %227 = arith.truncf %226 : vector<256x128xf32> to vector<256x128xbf16>
    %c0_265 = arith.constant 0 : index
    %c896_266 = arith.constant 896 : index
    %228 = vector.load %arg6[%c0_265, %c896_266] : memref<256x1152xbf16, #tpu.memory_space<vmem>>, vector<256x128xbf16>
    tpu.vector_store %arg6[%c0_265, %c896_266], %227 {strides = array<i32>} : memref<256x1152xbf16, #tpu.memory_space<vmem>>, vector<256x128xbf16>,
    %c2_267 = arith.constant 2 : index
    %c9_268 = arith.constant 9 : index
    %c0_269 = arith.constant 0 : index
    %229 = vector.load %arg5[%c2_267, %c9_268, %c0_269] : memref<18x32x128xf32, #tpu.memory_space<vmem>>, vector<16x16x128xf32>
    %230 = vector.shape_cast %229 : vector<16x16x128xf32> to vector<256x128xf32>
    %231 = arith.truncf %230 : vector<256x128xf32> to vector<256x128xbf16>
    %c0_270 = arith.constant 0 : index
    %c1024_271 = arith.constant 1024 : index
    %232 = vector.load %arg6[%c0_270, %c1024_271] : memref<256x1152xbf16, #tpu.memory_space<vmem>>, vector<256x128xbf16>
    tpu.vector_store %arg6[%c0_270, %c1024_271], %231 {strides = array<i32>} : memref<256x1152xbf16, #tpu.memory_space<vmem>>, vector<256x128xbf16>,
    %c0_272 = arith.constant 0 : index
    %c0_273 = arith.constant 0 : index
    %233 = vector.load %arg6[%c0_272, %c0_273] : memref<256x1152xbf16, #tpu.memory_space<vmem>>, vector<256x1152xbf16>
    %c4 = arith.constant 4 : index
    %c0_274 = arith.constant 0 : index
    %c0_275 = arith.constant 0 : index
    %234 = vector.load %arg2[%c4, %c0_274, %c0_275] : memref<5x1152x128xbf16, #tpu.memory_space<vmem>>, vector<1x1152x128xbf16>
    %235 = vector.shape_cast %234 : vector<1x1152x128xbf16> to vector<1152x128xbf16>
    %cst_276 = arith.constant dense<0.000000e+00> : vector<256x128xf32>
    %236 = tpu.matmul %233, %235, %cst_276 {dimension_numbers = #tpu.dot_dimension_numbers<[1], [0], [0], [1], [0, 0, 1, 1], [], []>} : vector<256x1152xbf16>, vector<1152x128xbf16>, vector<256x128xf32> -> vector<256x128xf32>
    %c4_277 = arith.constant 4 : index
    %c0_278 = arith.constant 0 : index
    %c0_279 = arith.constant 0 : index
    %237 = vector.load %arg3[%c4_277, %c0_278, %c0_279] : memref<5x1x128xf32, #tpu.memory_space<vmem>>, vector<1x1x128xf32>
    %238 = vector.shape_cast %237 : vector<1x1x128xf32> to vector<1x128xf32>
    %239 = vector.broadcast %238 : vector<1x128xf32> to vector<256x128xf32>
    %240 = arith.addf %236, %239 : vector<256x128xf32>
    %c0_280 = arith.constant 0 : index
    %c0_281 = arith.constant 0 : index
    %c0_282 = arith.constant 0 : index
    %241 = vector.load %arg4[%c0_280, %c0_281, %c0_282] : memref<1x256x128xf32, #tpu.memory_space<vmem>>, vector<1x256x128xf32>
    %242 = vector.shape_cast %241 : vector<1x256x128xf32> to vector<256x128xf32>
    %243 = vector.shape_cast %240 : vector<256x128xf32> to vector<1x256x128xf32>
    tpu.vector_store %arg4[%c0_280, %c0_281, %c0_282], %243 {strides = array<i32>} : memref<1x256x128xf32, #tpu.memory_space<vmem>>, vector<1x256x128xf32>,
    return
  }
  func.func @transform_0(%arg0: i32) -> (i32, i32, i32, i32) {
    %c0_i32 = arith.constant 0 : i32
    %c0_i32_0 = arith.constant 0 : i32
    %c0_i32_1 = arith.constant 0 : i32
    %c0_i32_2 = arith.constant 0 : i32
    return %arg0, %c0_i32, %c0_i32_0, %c0_i32_1 : i32, i32, i32, i32
  }
  func.func @transform_1(%arg0: i32) -> (i32, i32, i32) {
    %c0_i32 = arith.constant 0 : i32
    %c0_i32_0 = arith.constant 0 : i32
    %c0_i32_1 = arith.constant 0 : i32
    %c0_i32_2 = arith.constant 0 : i32
    return %c0_i32, %c0_i32_0, %c0_i32_1 : i32, i32, i32
  }
  func.func @transform_2(%arg0: i32) -> (i32, i32, i32) {
    %c0_i32 = arith.constant 0 : i32
    %c0_i32_0 = arith.constant 0 : i32
    %c0_i32_1 = arith.constant 0 : i32
    %c0_i32_2 = arith.constant 0 : i32
    return %c0_i32, %c0_i32_0, %c0_i32_1 : i32, i32, i32
  }
  func.func @transform_3(%arg0: i32) -> (i32, i32, i32) {
    %c0_i32 = arith.constant 0 : i32
    %c0_i32_0 = arith.constant 0 : i32
    %c0_i32_1 = arith.constant 0 : i32
    return %arg0, %c0_i32, %c0_i32_0 : i32, i32, i32
  }
}

</mosaic_0001>

<bundles_post_ra>
// kernel: regression_net_forward.1
= control target key start
LH: loop header
LB: loop body
LE: loop exit
PB: predicated region body
PF: predicated region fallthrough
CT: control target
= control target key end

     0   :  { %s15179_s12 = smov 0   ;;  %s18699_s0 = inlined_call_operand.vmem [shape: f32[2,16,16,128], index: 0, kind: input, shape index: {}]   ;;  %s18700_s1 = inlined_call_operand.vmem [shape: bf16[5,1152,128], index: 1, kind: input, shape index: {}]   ;;  %s18701_s2 = inlined_call_operand.vmem [shape: f32[5,1,128], index: 2, kind: input, shape index: {}]   ;;  %s18702_s3 = inlined_call_operand.vmem [shape: f32[2,256,128], index: 3, kind: output, shape index: {}]  }
   0x1 LB: > { %s11201_s13 = sadd.s32 4294967295, %s15155_s12   ;;  %p11205_p0 = scmp.ge.s32.totalorder %s15155_s12, 1  ;;  %s15155_s12 = sphi %s15179_s12, %s13_s12  }
   0x2   : > { %p137_p1 = scmp.lt.s32.totalorder %s15155_s12, 3 }
   0x4   : > { %p138_p2 = pnand %p11205_p0, %p137_p1 }
   0x5   : > { %v14784_v0 = vld [vmem:[%s18700_s1 + $0x40] sm:$0xff] (!%p138_p2)   ;;  %v15157_v2 = vmov (!%p138_p2), 0.0   ;;  %v14786_v3 = vld [vmem:[%s18700_s1 + $0x48] sm:$0xff] (!%p138_p2)   ;;  %p161_p3 = scmp.lt.s32.totalorder (!%p138_p2), %s11201_s13, 1  ;;  %v14788_v5 = vld [vmem:[%s18700_s1 + $0x50] sm:$0xff] (!%p138_p2)   ;;  %v15158_v6 = vmov (!%p138_p2), 0.0|0.0  }
   0x6   : > { %141 = sbr.rel (%p138_p2) target bundleno = 2444 (0x98c), region = 32  ;;  %v14785_v1 = vld [vmem:[%s18700_s1] sm:$0xff] (!%p138_p2)   ;;  %173 = vst [vmem:[#allocation2 + $0x8] sm:$0xff] (!%p138_p2), %v15157_v2  ;;  %174 = vst [vmem:[#allocation2 + $0x10] sm:$0xff] (!%p138_p2), %v15157_v2  ;;  %12159 = vmatprep.subr.bf16.mxu0 (!%p138_p2), %v14784_v0  ;;  %14759 = vmatprep.subr.bf16.mxu1 (!%p138_p2), %v14784_v0  ;;  %v14787_v4 = vld [vmem:[%s18700_s1 + $0x8] sm:$0xff] (!%p138_p2)  }
   0x7   : > { %172 = vst [vmem:[#allocation2] sm:$0xff] (!%p138_p2), %v15157_v2  ;;  %175 = vst [vmem:[#allocation2 + $0x18] sm:$0xff] (!%p138_p2), %v15157_v2  ;;  %12160 = vmatpush3.bf16.msra.mxu0 (!%p138_p2), %v14785_v1  ;;  %14767 = vmatpush3.bf16.msra.mxu1 (!%p138_p2), %v14785_v1  ;;  %v14789_v7 = vld [vmem:[%s18700_s1 + $0x10] sm:$0xff] (!%p138_p2)   ;;  %v14790_v8 = vld [vmem:[%s18700_s1 + $0x58] sm:$0xff] (!%p138_p2)  }
   0x8   : > { %176 = vst [vmem:[#allocation2 + $0x20] sm:$0xff] (!%p138_p2), %v15157_v2  ;;  %179 = vst [vmem:[#allocation2 + $0x38] sm:$0xff] (!%p138_p2), %v15157_v2  ;;  %12161 = vmatprep.subr.bf16.mxu0 (!%p138_p2), %v14786_v3  ;;  %14760 = vmatprep.subr.bf16.mxu1 (!%p138_p2), %v14786_v3  ;;  %v14791_v9 = vld [vmem:[%s18700_s1 + $0x18] sm:$0xff] (!%p138_p2)   ;;  %v14792_v10 = vld [vmem:[%s18700_s1 + $0x60] sm:$0xff] (!%p138_p2)  }
   0x9   : > { %180 = vst [vmem:[#allocation2 + $0x40] sm:$0xff] (!%p138_p2), %v15157_v2  ;;  %183 = vst [vmem:[#allocation2 + $0x58] sm:$0xff] (!%p138_p2), %v15157_v2  ;;  %1645 = vmatprep.mubr.bf16.mxu0 (!%p138_p2), %v15158_v6  ;;  %v14793_v11 = vld [vmem:[%s18700_s1 + $0x20] sm:$0xff] (!%p138_p2)   ;;  %v14794_v12 = vld [vmem:[%s18700_s1 + $0x68] sm:$0xff] (!%p138_p2)  }
   0xa   : > { %184 = vst [vmem:[#allocation2 + $0x60] sm:$0xff] (!%p138_p2), %v15157_v2  ;;  %187 = vst [vmem:[#allocation2 + $0x78] sm:$0xff] (!%p138_p2), %v15157_v2  ;;  %v14795_v16 = vld [vmem:[%s18700_s1 + $0x28] sm:$0xff] (!%p138_p2)   ;;  %v14796_v17 = vld [vmem:[%s18700_s1 + $0x70] sm:$0xff] (!%p138_p2)  }
   0xb   : > { %188 = vst [vmem:[#allocation2 + $0x80] sm:$0xff] (!%p138_p2), %v15157_v2  ;;  %191 = vst [vmem:[#allocation2 + $0x98] sm:$0xff] (!%p138_p2), %v15157_v2  ;;  %12162 = vmatpush3.bf16.msra.mxu0 (!%p138_p2), %v14787_v4  ;;  %14768 = vmatpush3.bf16.msra.mxu1 (!%p138_p2), %v14787_v4  ;;  %v14797_v18 = vld [vmem:[%s18700_s1 + $0x30] sm:$0xff] (!%p138_p2)   ;;  %v14798_v21 = vld [vmem:[%s18700_s1 + $0x78] sm:$0xff] (!%p138_p2)  }
   0xc   : > { %192 = vst [vmem:[#allocation2 + $0xa0] sm:$0xff] (!%p138_p2), %v15157_v2  ;;  %195 = vst [vmem:[#allocation2 + $0xb8] sm:$0xff] (!%p138_p2), %v15157_v2  ;;  %12163 = vmatprep.subr.bf16.mxu0 (!%p138_p2), %v14788_v5  ;;  %14761 = vmatprep.subr.bf16.mxu1 (!%p138_p2), %v14788_v5  ;;  %v14799_v23 = vld [vmem:[%s18700_s1 + $0x38] sm:$0xff] (!%p138_p2)   ;;  %v14800_v28 = vld [vmem:[%s18700_s1 + $0xc0] sm:$0xff] (!%p138_p2)  }
   0xd   : > { %196 = vst [vmem:[#allocation2 + $0xc0] sm:$0xff] %v15157_v2  ;;  %199 = vst [vmem:[#allocation2 + $0xd8] sm:$0xff] %v15157_v2  ;;  %s18704_s13 = smov (!%p161_p3, %s11201_s13), 1  ;;  %v310_v25 = vld [vmem:[#allocation2 + $0xf] sm:$0xff]  ;;  %v14801_v30 = vld [vmem:[%s18700_s1 + $0x140] sm:$0xff]  }
   0xe   : > { %200 = vst [vmem:[#allocation2 + $0xe0] sm:$0xff] %v15157_v2  ;;  %203 = vst [vmem:[#allocation2 + $0xf8] sm:$0xff] %v15157_v2  ;;  %s12157_s28 = sshll.u32 %s18704_s13, 8  ;;  %v309_v24 = vld [vmem:[#allocation2 + $0x7] sm:$0xff]  ;;  %v14806_v49 = vld [vmem:[%s18700_s1 + $0xd0] sm:$0xff]  }
   0xf   : > { %204 = vst [vmem:[#allocation2 + $0x100] sm:$0xff] %v15157_v2  ;;  %207 = vst [vmem:[#allocation2 + $0x118] sm:$0xff] %v15157_v2  ;;  %12164 = vmatpush3.bf16.msra.mxu0 %v14789_v7  ;;  %14769 = vmatpush3.bf16.msra.mxu1 %v14789_v7  ;;  %s15226_s8 = scalar_lea.vmem %s18699_s0, %s12157_s28  ;;  %v341_v31 = vpack.c.bf16 %v310_v25, %v309_v24  ;;  %v14802_v33 = vld [vmem:[%s18700_s1 + $0x80] sm:$0xff]   ;;  %v14804_v35 = vld [vmem:[%s18700_s1 + $0xc8] sm:$0xff]   ;;  %s18626_s6 = scalar_lea.vmem %s18702_s3, %s12157_s28 }
  0x10   : > { %208 = vst [vmem:[#allocation2 + $0x120] sm:$0xff] %v15157_v2  ;;  %211 = vst [vmem:[#allocation2 + $0x138] sm:$0xff] %v15157_v2  ;;  %12165 = vmatprep.subr.bf16.mxu0 %v14790_v8  ;;  %14762 = vmatprep.subr.bf16.mxu1 %v14790_v8  ;;  %v266_v13 = vld [vmem:[%s15226_s8 + $0xb0] sm:$0xff]  ;;  %v267_v14 = vld [vmem:[%s15226_s8 + $0xb8] sm:$0xff] }
  0x11   : > { %212 = vst [vmem:[#allocation2 + $0x140] sm:$0xff] %v15157_v2  ;;  %215 = vst [vmem:[#allocation2 + $0x158] sm:$0xff] %v15157_v2  ;;  %v417_v15 = vpack.c.bf16 %v267_v14, %v266_v13  ;;  %v244_v19 = vld [vmem:[%s15226_s8] sm:$0xff]  ;;  %v245_v20 = vld [vmem:[%s15226_s8 + $0x8] sm:$0xff] }
  0x12   : > { %216 = vst [vmem:[#allocation2 + $0x160] sm:$0xff] %v15157_v2  ;;  %219 = vst [vmem:[#allocation2 + $0x178] sm:$0xff] %v15157_v2  ;;  %v268_v22 = vld [vmem:[%s15226_s8 + $0xc0] sm:$0xff]  ;;  %v269_v26 = vld [vmem:[%s15226_s8 + $0xc8] sm:$0xff]  ;;  %v15272_v36 = vpack.c.bf16 %v245_v20, %v244_v19 }
  0x13   : > { %220 = vst [vmem:[#allocation2 + $0x180] sm:$0xff] %v15157_v2  ;;  %223 = vst [vmem:[#allocation2 + $0x198] sm:$0xff] %v15157_v2  ;;  %12166 = vmatpush3.bf16.msra.mxu0 %v14791_v9  ;;  %14770 = vmatpush3.bf16.msra.mxu1 %v14791_v9  ;;  %v14803_v34 = vld [vmem:[%s18700_s1 + $0x100] sm:$0xff]   ;;  %v14809_v37 = vld [vmem:[%s18700_s1 + $0x148] sm:$0xff]   ;;  %v418_v41 = vpack.c.bf16 %v269_v26, %v268_v22 }
  0x14   : > { %224 = vst [vmem:[#allocation2 + $0x1a0] sm:$0xff] %v15157_v2  ;;  %227 = vst [vmem:[#allocation2 + $0x1b8] sm:$0xff] %v15157_v2  ;;  %12167 = vmatprep.subr.bf16.mxu0 %v14792_v10  ;;  %14763 = vmatprep.subr.bf16.mxu1 %v14792_v10  ;;  %v246_v38 = vld [vmem:[%s15226_s8 + $0x10] sm:$0xff]  ;;  %v247_v39 = vld [vmem:[%s15226_s8 + $0x18] sm:$0xff] }
  0x15   : > { %228 = vst [vmem:[#allocation2 + $0x1c0] sm:$0xff] %v15157_v2  ;;  %231 = vst [vmem:[#allocation2 + $0x1d8] sm:$0xff] %v15157_v2  ;;  %1741 = vmatprep.mubr.bf16.mxu1 %v417_v15  ;;  %v14805_v40 = vld [vmem:[%s18700_s1 + $0x88] sm:$0xff]   ;;  %v270_v45 = vld [vmem:[%s15226_s8 + $0xd0] sm:$0xff]  ;;  %v15302_v56 = vpack.c.bf16 %v247_v39, %v246_v38 }
  0x16   : > { %232 = vst [vmem:[#allocation2 + $0x1e0] sm:$0xff] %v15157_v2  ;;  %235 = vst [vmem:[#allocation2 + $0x1f8] sm:$0xff] %v15157_v2  ;;  %v14811_v44 = vld [vmem:[%s18700_s1 + $0x108] sm:$0xff]   ;;  %v271_v46 = vld [vmem:[%s15226_s8 + $0xd8] sm:$0xff] }
  0x17   : > { %236 = vst [vmem:[#allocation2 + $0x200] sm:$0xff] %v15157_v2  ;;  %239 = vst [vmem:[#allocation2 + $0x218] sm:$0xff] %v15157_v2  ;;  %12168 = vmatpush3.bf16.msra.mxu0 %v14793_v11  ;;  %14771 = vmatpush3.bf16.msra.mxu1 %v14793_v11  ;;  %v14807_v50 = vld [vmem:[%s18700_s1 + $0x90] sm:$0xff]   ;;  %v248_v53 = vld [vmem:[%s15226_s8 + $0x20] sm:$0xff]  ;;  %v419_v59 = vpack.c.bf16 %v271_v46, %v270_v45 }
  0x18   : > { %240 = vst [vmem:[#allocation2 + $0x220] sm:$0xff] %v15157_v2  ;;  %241 = vst [vmem:[#allocation2 + $0x228] sm:$0xff] %v15157_v2  ;;  %12169 = vmatprep.subr.bf16.mxu0 %v14794_v12  ;;  %14764 = vmatprep.subr.bf16.mxu1 %v14794_v12  ;;  %v249_v54 = vld [vmem:[%s15226_s8 + $0x28] sm:$0xff]  ;;  %v272_v55 = vld [vmem:[%s15226_s8 + $0xe0] sm:$0xff] }
  0x19   : > { %242 = vst [vmem:[#allocation2 + $0x230] sm:$0xff] %v15157_v2  ;;  %243 = vst [vmem:[#allocation2 + $0x238] sm:$0xff] %v15157_v2  ;;  %v273_v57 = vld [vmem:[%s15226_s8 + $0xe8] sm:$0xff]  ;;  %v14808_v58 = vld [vmem:[%s18700_s1 + $0xd8] sm:$0xff]   ;;  %v15330_v7 = vpack.c.bf16 %v249_v54, %v248_v53 }
  0x1a   : > { %299 = vst [vmem:[#allocation2 + $0x188] sm:$0xff] %v266_v13  ;;  %300 = vst [vmem:[#allocation2 + $0x190] sm:$0xff] %v267_v14  ;;  %v14810_v60 = vld [vmem:[%s18700_s1 + $0x98] sm:$0xff]   ;;  %v14812_v0 = vld [vmem:[%s18700_s1 + $0xe0] sm:$0xff]   ;;  %v420_v9 = vpack.c.bf16 %v273_v57, %v272_v55 }
  0x1b   : > { %12170 = vmatpush3.bf16.msra.mxu0 %v14795_v16  ;;  %14772 = vmatpush3.bf16.msra.mxu1 %v14795_v16  ;;  %277 = vst [vmem:[#allocation2 + $0x28] sm:$0xff] %v244_v19  ;;  %278 = vst [vmem:[#allocation2 + $0x30] sm:$0xff] %v245_v20  ;;  %v14817_v1 = vld [vmem:[%s18700_s1 + $0x150] sm:$0xff]   ;;  %v14813_v6 = vld [vmem:[%s18700_s1 + $0xa0] sm:$0xff]  }
  0x1c   : > { %12171 = vmatprep.subr.bf16.mxu0 %v14796_v17  ;;  %14765 = vmatprep.subr.bf16.mxu1 %v14796_v17  ;;  %301 = vst [vmem:[#allocation2 + $0x1a8] sm:$0xff] %v268_v22  ;;  %302 = vst [vmem:[#allocation2 + $0x1b0] sm:$0xff] %v269_v26  ;;  %v14819_v3 = vld [vmem:[%s18700_s1 + $0x110] sm:$0xff]   ;;  %v14814_v8 = vld [vmem:[%s18700_s1 + $0xe8] sm:$0xff]  }
  0x1d   : > { %279 = vst [vmem:[#allocation2 + $0x48] sm:$0xff] %v246_v38  ;;  %280 = vst [vmem:[#allocation2 + $0x50] sm:$0xff] %v247_v39  ;;  %v250_v10 = vld [vmem:[%s15226_s8 + $0x30] sm:$0xff]  ;;  %v251_v11 = vld [vmem:[%s15226_s8 + $0x38] sm:$0xff] }
  0x1e   : > { %303 = vst [vmem:[#allocation2 + $0x1c8] sm:$0xff] %v270_v45  ;;  %304 = vst [vmem:[#allocation2 + $0x1d0] sm:$0xff] %v271_v46  ;;  %v14815_v12 = vld [vmem:[%s18700_s1 + $0xa8] sm:$0xff]   ;;  %v14822_v17 = vld [vmem:[%s18700_s1 + $0x158] sm:$0xff]  }
  0x1f   : > { %12172 = vmatpush3.bf16.msra.mxu0 %v14797_v18  ;;  %14773 = vmatpush3.bf16.msra.mxu1 %v14797_v18  ;;  %281 = vst [vmem:[#allocation2 + $0x68] sm:$0xff] %v248_v53  ;;  %282 = vst [vmem:[#allocation2 + $0x70] sm:$0xff] %v249_v54  ;;  %v14823_v18 = vld [vmem:[%s18700_s1 + $0x118] sm:$0xff]   ;;  %v252_v19 = vld [vmem:[%s15226_s8 + $0x40] sm:$0xff] }
  0x20   : > { %12173 = vmatprep.subr.bf16.mxu0 %v14798_v21  ;;  %14766 = vmatprep.subr.bf16.mxu1 %v14798_v21  ;;  %305 = vst [vmem:[#allocation2 + $0x1e8] sm:$0xff] %v272_v55  ;;  %306 = vst [vmem:[#allocation2 + $0x1f0] sm:$0xff] %v273_v57  ;;  %v253_v20 = vld [vmem:[%s15226_s8 + $0x48] sm:$0xff]  ;;  %v14816_v21 = vld [vmem:[%s18700_s1 + $0xf0] sm:$0xff]  }
  0x21   : > { %v333_v27 = vld [vmem:[#allocation2 + $0x187] sm:$0xff]  ;;  %v334_v29 = vld [vmem:[#allocation2 + $0x18f] sm:$0xff]  ;;  %283 = vst [vmem:[#allocation2 + $0x88] sm:$0xff] %v250_v10  ;;  %284 = vst [vmem:[#allocation2 + $0x90] sm:$0xff] %v251_v11 }
  0x22   : > { %v15261_v32 = vpack.c.bf16 %v334_v29, %v333_v27  ;;  %v311_v42 = vld [vmem:[#allocation2 + $0x27] sm:$0xff]  ;;  %v312_v43 = vld [vmem:[#allocation2 + $0x2f] sm:$0xff]  ;;  %285 = vst [vmem:[#allocation2 + $0xa8] sm:$0xff] %v252_v19  ;;  %286 = vst [vmem:[#allocation2 + $0xb0] sm:$0xff] %v253_v20 }
  0x23   : > { %12174 = vmatpush3.bf16.msra.mxu0 %v14799_v23  ;;  %14774 = vmatpush3.bf16.msra.mxu1 %v14799_v23  ;;  %v335_v47 = vld [vmem:[#allocation2 + $0x1a7] sm:$0xff]  ;;  %v336_v48 = vld [vmem:[#allocation2 + $0x1af] sm:$0xff]  ;;  %v15295_v51 = vpack.c.bf16 %v312_v43, %v311_v42  ;;  %v15358_v23 = vld [vmem:[%s15226_s8 + $0x58] sm:$0xff] }
  0x24   : > { %12271 = vmatprep.subr.bf16.mxu1 %v14800_v28  ;;  %12383 = vmatprep.subr.bf16.mxu0 %v14801_v30  ;;  %v15297_v52 = vpack.c.bf16 %v336_v48, %v335_v47  ;;  %v313_v61 = vld [vmem:[#allocation2 + $0x47] sm:$0xff]  ;;  %v314_v62 = vld [vmem:[#allocation2 + $0x4f] sm:$0xff]  ;;  %288 = vst [vmem:[#allocation2 + $0xd0] sm:$0xff] %v15358_v23  ;;  %v15372_v28 = vpack.c.bf16 %v251_v11, %v250_v10  ;;  %v14820_v29 = vld [vmem:[%s18700_s1 + $0xf8] sm:$0xff]  }
  0x25   : > { %v337_v63 = vld [vmem:[#allocation2 + $0x1c7] sm:$0xff]  ;;  %v338_v2 = vld [vmem:[#allocation2 + $0x1cf] sm:$0xff]  ;;  %v15323_v4 = vpack.c.bf16 %v314_v62, %v313_v61  ;;  %v15405_v43 = vld [vmem:[%s15226_s8 + $0x78] sm:$0xff]  ;;  %v15414_v47 = vpack.c.bf16 %v253_v20, %v252_v19 }
  0x26   : > { %1646 = vmatmul.mubr.bf16.vlgmr.msra.gmra.mrb[0].mxu0 %v341_v31  ;;  %1742 = vmatmul.mubr.bf16.vlgmr.msra.gmra.mrb[0].mxu1 %v15261_v32  ;;  %v15325_v5 = vpack.c.bf16 %v338_v2, %v337_v63  ;;  %v315_v13 = vld [vmem:[#allocation2 + $0x67] sm:$0xff]  ;;  %v316_v14 = vld [vmem:[#allocation2 + $0x6f] sm:$0xff]  ;;  %v14821_v31 = vld [vmem:[%s18700_s1 + $0xb8] sm:$0xff]   ;;  %292 = vst [vmem:[#allocation2 + $0x110] sm:$0xff] %v15405_v43 }
  0x27   : > { %12272 = vmatpush3.bf16.msra.mxu1 %v14802_v33  ;;  %12384 = vmatpush3.bf16.msra.mxu0 %v14803_v34  ;;  %v339_v15 = vld [vmem:[#allocation2 + $0x1e7] sm:$0xff]  ;;  %v340_v16 = vld [vmem:[#allocation2 + $0x1ef] sm:$0xff]  ;;  %v15361_v24 = vpack.c.bf16 %v316_v14, %v315_v13  ;;  %v14831_v62 = vld [vmem:[%s18700_s1 + $0x138] sm:$0xff]  }
  0x28   : > { %12273 = vmatprep.subr.bf16.mxu1 %v14804_v35  ;;  %1653 = vmatprep.mubr.bf16.mxu0 %v15272_v36  ;;  %v15355_v22 = vld [vmem:[%s15226_s8 + $0x50] sm:$0xff]  ;;  %v15363_v25 = vpack.c.bf16 %v340_v16, %v339_v15  ;;  %v14824_v26 = vld [vmem:[%s18700_s1 + $0x160] sm:$0xff]   ;;  %v14826_v38 = vld [vmem:[%s18700_s1 + $0x168] sm:$0xff]  }
  0x29   : > { %1749 = vmatprep.mubr.bf16.mxu1 %v418_v41  ;;  %12385 = vmatprep.subr.bf16.mxu0 %v14809_v37  ;;  %287 = vst [vmem:[#allocation2 + $0xc8] sm:$0xff] %v15355_v22  ;;  %v14818_v27 = vld [vmem:[%s18700_s1 + $0xb0] sm:$0xff]   ;;  %v15378_v30 = vld [vmem:[%s15226_s8 + $0x60] sm:$0xff]  ;;  %v15387_v37 = vld [vmem:[%s15226_s8 + $0x68] sm:$0xff]  ;;  %v15450_v63 = vpack.c.bf16 %v15358_v23, %v15355_v22 }
  0x2a   : > { %v437_v33 = vld [vmem:[#allocation2 + $0x9] sm:$0xff]  ;;  %v438_v34 = vld [vmem:[#allocation2 + $0x11] sm:$0xff]  ;;  %v14825_v35 = vld [vmem:[%s18700_s1 + $0x120] sm:$0xff]   ;;  %289 = vst [vmem:[#allocation2 + $0xe8] sm:$0xff] %v15378_v30  ;;  %v15485_v15 = vpack.c.bf16 %v15387_v37, %v15378_v30 }
  0x2b   : > { %12274 = vmatpush3.bf16.msra.mxu1 %v14805_v40  ;;  %12386 = vmatpush3.bf16.msra.mxu0 %v14811_v44  ;;  %290 = vst [vmem:[#allocation2 + $0xf0] sm:$0xff] %v15387_v37  ;;  %v317_v39 = vld [vmem:[#allocation2 + $0x87] sm:$0xff]  ;;  %v318_v40 = vld [vmem:[#allocation2 + $0x8f] sm:$0xff]  ;;  %v469_v45 = vpack.c.bf16 %v438_v34, %v437_v33  ;;  %v14842_v30 = vld [vmem:[%s18700_s1 + $0x198] sm:$0xff]  }
  0x2c   : > { %12275 = vmatprep.subr.bf16.mxu1 %v14806_v49  ;;  %12387 = vmatprep.subr.bf16.mxu0 %v14817_v1  ;;  %v14827_v41 = vld [vmem:[%s18700_s1 + $0x128] sm:$0xff]   ;;  %v15402_v42 = vld [vmem:[%s15226_s8 + $0x70] sm:$0xff]  ;;  %v15407_v44 = vpack.c.bf16 %v318_v40, %v317_v39  ;;  %v15412_v46 = vld [vmem:[%s15226_s8 + $0x80] sm:$0xff] }
  0x2d   : > { %291 = vst [vmem:[#allocation2 + $0x108] sm:$0xff] %v15402_v42  ;;  %v15417_v48 = vld [vmem:[%s15226_s8 + $0x88] sm:$0xff]  ;;  %293 = vst [vmem:[#allocation2 + $0x128] sm:$0xff] %v15412_v46  ;;  %v14829_v53 = vld [vmem:[%s18700_s1 + $0x130] sm:$0xff]  }
  0x2e   : > { %1654 = vmatmul.mubr.bf16.gmra.mrb[4].mxu0 %v15295_v51  ;;  %1750 = vmatmul.mubr.bf16.gmra.mrb[4].mxu1 %v15297_v52  ;;  %294 = vst [vmem:[#allocation2 + $0x130] sm:$0xff] %v15417_v48  ;;  %v439_v49 = vld [vmem:[#allocation2 + $0x29] sm:$0xff]  ;;  %v14832_v2 = vld [vmem:[%s18700_s1 + $0x1c0] sm:$0xff]   ;;  %v442_v10 = vld [vmem:[#allocation2 + $0x51] sm:$0xff] }
  0x2f   : > { %12276 = vmatpush3.bf16.msra.mxu1 %v14807_v50  ;;  %1661 = vmatprep.mubr.bf16.mxu0 %v15302_v56  ;;  %v440_v50 = vld [vmem:[#allocation2 + $0x31] sm:$0xff]  ;;  %v319_v55 = vld [vmem:[#allocation2 + $0xa7] sm:$0xff] }
  0x30   : > { %12277 = vmatprep.subr.bf16.mxu1 %v14808_v58  ;;  %1757 = vmatprep.mubr.bf16.mxu1 %v419_v59  ;;  %v15429_v54 = vld [vmem:[%s15226_s8 + $0x90] sm:$0xff]  ;;  %v15434_v58 = vld [vmem:[%s15226_s8 + $0x98] sm:$0xff]  ;;  %v15443_v61 = vpack.c.bf16 %v440_v50, %v439_v49  ;;  %v15456_v1 = vld [vmem:[%s15226_s8 + $0xa8] sm:$0xff] }
  0x31   : > { %12388 = vmatpush3.bf16.msra.mxu0 %v14819_v3  ;;  %v320_v57 = vld [vmem:[#allocation2 + $0xaf] sm:$0xff]  ;;  %295 = vst [vmem:[#allocation2 + $0x148] sm:$0xff] %v15429_v54  ;;  %296 = vst [vmem:[#allocation2 + $0x150] sm:$0xff] %v15434_v58  ;;  %v14830_v59 = vld [vmem:[%s18700_s1 + $0x178] sm:$0xff]  }
  0x32   : > { %12389 = vmatprep.subr.bf16.mxu0 %v14822_v17  ;;  %298 = vst [vmem:[#allocation2 + $0x170] sm:$0xff] %v15456_v1  ;;  %v441_v3 = vld [vmem:[#allocation2 + $0x49] sm:$0xff]  ;;  %v15473_v11 = vld [vmem:[%s18700_s1 + $0x200] sm:$0xff]   ;;  %v446_v34 = vld [vmem:[#allocation2 + $0x91] sm:$0xff] }
  0x33   : > { %12278 = vmatpush3.bf16.msra.mxu1 %v14810_v60  ;;  %v15441_v60 = vpack.c.bf16 %v320_v57, %v319_v55  ;;  %v15477_v13 = vpack.c.bf16 %v442_v10, %v441_v3  ;;  %v14835_v14 = vld [vmem:[%s18700_s1 + $0x1c8] sm:$0xff]   ;;  %v14839_v22 = vld [vmem:[%s18700_s1 + $0x190] sm:$0xff]   ;;  %v14850_v57 = vld [vmem:[%s18700_s1 + $0x1f8] sm:$0xff]  }
  0x34   : > { %12279 = vmatprep.subr.bf16.mxu1 %v14812_v0  ;;  %v15453_v0 = vld [vmem:[%s15226_s8 + $0xa0] sm:$0xff]  ;;  %v14836_v16 = vld [vmem:[%s18700_s1 + $0x188] sm:$0xff]   ;;  %v14849_v55 = vld [vmem:[%s18700_s1 + $0x1b0] sm:$0xff]  }
  0x35   : > { %12390 = vmatpush3.bf16.msra.mxu0 %v14823_v18  ;;  %297 = vst [vmem:[#allocation2 + $0x168] sm:$0xff] %v15453_v0  ;;  %v443_v17 = vld [vmem:[#allocation2 + $0x69] sm:$0xff]  ;;  %v444_v18 = vld [vmem:[#allocation2 + $0x71] sm:$0xff] }
  0x36   : > { %1662 = vmatmul.mubr.bf16.gmra.mrb[8].mxu0 %v15323_v4  ;;  %1758 = vmatmul.mubr.bf16.gmra.mrb[8].mxu1 %v15325_v5  ;;  %v323_v19 = vld [vmem:[#allocation2 + $0xe7] sm:$0xff]  ;;  %v324_v20 = vld [vmem:[#allocation2 + $0xef] sm:$0xff]  ;;  %v14851_v3 = vld [vmem:[%s18700_s1 + $0x1b8] sm:$0xff]  }
  0x37   : > { %12280 = vmatpush3.bf16.msra.mxu1 %v14813_v6  ;;  %1669 = vmatprep.mubr.bf16.mxu0 %v15330_v7  ;;  %v14833_v6 = vld [vmem:[%s18700_s1 + $0x180] sm:$0xff]   ;;  %v15500_v23 = vpack.c.bf16 %v324_v20, %v323_v19  ;;  %v445_v33 = vld [vmem:[#allocation2 + $0x89] sm:$0xff] }
  0x38   : > { %12281 = vmatprep.subr.bf16.mxu1 %v14814_v8  ;;  %1765 = vmatprep.mubr.bf16.mxu1 %v420_v9  ;;  %v321_v8 = vld [vmem:[#allocation2 + $0xc7] sm:$0xff]  ;;  %v322_v9 = vld [vmem:[#allocation2 + $0xcf] sm:$0xff] }
  0x39   : > { %12391 = vmatprep.subr.bf16.mxu0 %v14824_v26  ;;  %v15502_v26 = vpack.c.bf16 %v444_v18, %v443_v17  ;;  %v326_v37 = vld [vmem:[#allocation2 + $0x10f] sm:$0xff] }
  0x3a   : > { %12392 = vmatpush3.bf16.msra.mxu0 %v14825_v35  ;;  %v14843_v35 = vld [vmem:[%s18700_s1 + $0x1e0] sm:$0xff]   ;;  %v14846_v39 = vld [vmem:[%s18700_s1 + $0x1e8] sm:$0xff]   ;;  %v452_v18 = vld [vmem:[#allocation2 + $0xf1] sm:$0xff] }
  0x3b   : > { %12282 = vmatpush3.bf16.msra.mxu1 %v14815_v12  ;;  %12393 = vmatprep.subr.bf16.mxu0 %v14826_v38  ;;  %v15475_v12 = vpack.c.bf16 %v322_v9, %v321_v8  ;;  %v14845_v38 = vld [vmem:[%s18700_s1 + $0x1a0] sm:$0xff]   ;;  %v14847_v49 = vld [vmem:[%s18700_s1 + $0x1a8] sm:$0xff]   ;;  %v450_v8 = vld [vmem:[#allocation2 + $0xd1] sm:$0xff] }
  0x3c   : > { %12283 = vmatprep.subr.bf16.mxu1 %v14816_v21  ;;  %v14838_v21 = vld [vmem:[%s18700_s1 + $0x1d0] sm:$0xff]   ;;  %v329_v9 = vld [vmem:[#allocation2 + $0x147] sm:$0xff] }
  0x3d   : > { %v447_v50 = vld [vmem:[#allocation2 + $0xa9] sm:$0xff] }
  0x3e   : > { %1670 = vmatmul.mubr.bf16.gmra.mrb[12].mxu0 %v15361_v24  ;;  %1766 = vmatmul.mubr.bf16.gmra.mrb[12].mxu1 %v15363_v25  ;;  %v330_v10 = vld [vmem:[#allocation2 + $0x14f] sm:$0xff] }
  0x3f   : > { %12284 = vmatpush3.bf16.msra.mxu1 %v14818_v27  ;;  %1677 = vmatprep.mubr.bf16.mxu0 %v15372_v28  ;;  %v15506_v27 = vpack.c.bf16 %v15405_v43, %v15402_v42  ;;  %v274_v42 = vld [vmem:[%s15226_s8 + $0xf0] sm:$0xff]  ;;  %v15534_v43 = vpack.c.bf16 %v15417_v48, %v15412_v46  ;;  %v327_v46 = vld [vmem:[#allocation2 + $0x127] sm:$0xff] }
  0x40   : > { %12285 = vmatprep.subr.bf16.mxu1 %v14820_v29  ;;  %1806 = vmatprep.mubr.bf16.mxu1 %v15295_v51  ;;  %v14828_v51 = vld [vmem:[%s18700_s1 + $0x170] sm:$0xff]   ;;  %v14841_v29 = vld [vmem:[%s18700_s1 + $0x1d8] sm:$0xff]   ;;  %307 = vst [vmem:[#allocation2 + $0x208] sm:$0xff] %v274_v42 }
  0x41   : > { %12394 = vmatpush3.bf16.msra.mxu0 %v14827_v41  ;;  %v15529_v41 = vpack.c.bf16 %v446_v34, %v445_v33  ;;  %v328_v48 = vld [vmem:[#allocation2 + $0x12f] sm:$0xff] }
  0x42   : > { %12395 = vmatprep.subr.bf16.mxu0 %v14828_v51  ;;  %v448_v51 = vld [vmem:[#allocation2 + $0xb1] sm:$0xff]  ;;  %v451_v17 = vld [vmem:[#allocation2 + $0xe9] sm:$0xff] }
  0x43   : > { %12286 = vmatpush3.bf16.msra.mxu1 %v14821_v31  ;;  %v325_v31 = vld [vmem:[#allocation2 + $0x107] sm:$0xff]  ;;  %v332_v19 = vld [vmem:[#allocation2 + $0x16f] sm:$0xff] }
  0x44   : > { %12495 = vmatprep.subr.bf16.mxu1 %v14832_v2  ;;  %v15527_v40 = vpack.c.bf16 %v326_v37, %v325_v31  ;;  %v15559_v2 = vpack.c.bf16 %v15434_v58, %v15429_v54  ;;  %v15568_v54 = vpack.c.bf16 %v330_v10, %v329_v9  ;;  %v455_v31 = vld [vmem:[#allocation2 + $0x129] sm:$0xff]  ;;  %v456_v33 = vld [vmem:[#allocation2 + $0x131] sm:$0xff] }
  0x45   : > { %12396 = vmatpush3.bf16.msra.mxu0 %v14829_v53  ;;  %v14848_v53 = vld [vmem:[%s18700_s1 + $0x1f0] sm:$0xff]  }
  0x46   : > { %1678 = vmatmul.mubr.bf16.gmra.mrb[16].mxu0 %v15407_v44  ;;  %1807 = vmatmul.mubr.bf16.vlgmr.msra.gmra.mrb[16].mxu1 %v469_v45  ;;  %v275_v45 = vld [vmem:[%s15226_s8 + $0xf8] sm:$0xff]  ;;  %v14840_v34 = vld [vmem:[%s18700_s1 + $0x210] sm:$0xff]  }
  0x47   : > { %1685 = vmatprep.mubr.bf16.mxu0 %v15414_v47  ;;  %1814 = vmatprep.mubr.bf16.mxu1 %v15323_v4  ;;  %308 = vst [vmem:[#allocation2 + $0x210] sm:$0xff] %v275_v45  ;;  %v458_v37 = vld [vmem:[#allocation2 + $0x151] sm:$0xff] }
  0x48   : > { %12397 = vmatprep.subr.bf16.mxu0 %v14830_v59  ;;  %12496 = vmatpush3.bf16.msra.mxu1 %v14833_v6  ;;  %v15553_v59 = vpack.c.bf16 %v328_v48, %v327_v46  ;;  %v449_v6 = vld [vmem:[#allocation2 + $0xc9] sm:$0xff]  ;;  %v464_v48 = vld [vmem:[#allocation2 + $0x1b1] sm:$0xff] }
  0x49   : > { %12398 = vmatpush3.bf16.msra.mxu0 %v14831_v62  ;;  %12497 = vmatprep.subr.bf16.mxu1 %v14835_v14  ;;  %v15555_v62 = vpack.c.bf16 %v448_v51, %v447_v50  ;;  %v15570_v58 = vpack.c.bf16 %v450_v8, %v449_v6  ;;  %v15574_v14 = vpack.c.bf16 %v15456_v1, %v15453_v0  ;;  %v453_v0 = vld [vmem:[#allocation2 + $0x109] sm:$0xff]  ;;  %v454_v1 = vld [vmem:[#allocation2 + $0x111] sm:$0xff] }
  0x4a   : > { %14519 = vmatprep.subr.bf16.mxu0 %v15473_v11  ;;  %v14855_v50 = vld [vmem:[%s18700_s1 + $0x238] sm:$0xff]   ;;  %v461_v51 = vld [vmem:[#allocation2 + $0x189] sm:$0xff] }
  0x4b   : > { %v463_v46 = vld [vmem:[#allocation2 + $0x1a9] sm:$0xff]  ;;  %v468_v10 = vld [vmem:[#allocation2 + $0x1f1] sm:$0xff] }
  0x4c   : > { %12498 = vmatpush3.bf16.msra.mxu1 %v14836_v16  ;;  %v331_v16 = vld [vmem:[#allocation2 + $0x167] sm:$0xff] }
  0x4d   : > { %12499 = vmatprep.subr.bf16.mxu1 %v14838_v21  ;;  %v15580_v20 = vpack.c.bf16 %v332_v19, %v331_v16  ;;  %v15582_v21 = vpack.c.bf16 %v452_v18, %v451_v17  ;;  %v588_v17 = vld [vmem:[#allocation2 + $0x190] sm:$0xff]  ;;  %v593_v18 = vld [vmem:[#allocation2 + $0x1e8] sm:$0xff] }
  0x4e   : > { %1686 = vmatmul.mubr.bf16.gmra.mrb[20].mxu0 %v15441_v60  ;;  %1815 = vmatmul.mubr.bf16.gmra.mrb[20].mxu1 %v15443_v61  ;;  %v532_v6 = vld [vmem:[#allocation2 + $0x20f] sm:$0xff] }
  0x4f   : > { %1693 = vmatprep.mubr.bf16.mxu0 %v15450_v63  ;;  %1822 = vmatprep.mubr.bf16.mxu1 %v15361_v24  ;;  %v594_v19 = vld [vmem:[#allocation2 + $0x1f0] sm:$0xff] }
  0x50   : > { %12500 = vmatpush3.bf16.msra.mxu1 %v14839_v22  ;;  %v15584_v22 = vpack.c.bf16 %v275_v45, %v274_v42  ;;  %v460_v42 = vld [vmem:[#allocation2 + $0x171] sm:$0xff] }
  0x51   : > { %12501 = vmatprep.subr.bf16.mxu1 %v14841_v29  ;;  %v15590_v29 = vpack.c.bf16 %v454_v1, %v453_v0  ;;  %v14854_v45 = vld [vmem:[%s18700_s1 + $0x230] sm:$0xff]   ;;  %v15698_v0 = vpack.c.bf16 %v594_v19, %v593_v18 }
  0x54   : > { %12502 = vmatpush3.bf16.msra.mxu1 %v14842_v30  ;;  %v14837_v30 = vld [vmem:[%s18700_s1 + $0x208] sm:$0xff]  }
  0x55   : > { %12503 = vmatprep.subr.bf16.mxu1 %v14843_v35  ;;  %v14844_v35 = vld [vmem:[%s18700_s1 + $0x218] sm:$0xff]  }
  0x56   : > { %1694 = vmatmul.mubr.bf16.gmra.mrb[24].mxu0 %v15475_v12  ;;  %1823 = vmatmul.mubr.bf16.gmra.mrb[24].mxu1 %v15477_v13 }
  0x57   : > { %1701 = vmatprep.mubr.bf16.mxu0 %v15485_v15  ;;  %1830 = vmatprep.mubr.bf16.mxu1 %v15407_v44 }
  0x58   : > { %12504 = vmatpush3.bf16.msra.mxu1 %v14845_v38  ;;  %v14853_v38 = vld [vmem:[%s18700_s1 + $0x228] sm:$0xff]  }
  0x59   : > { %12505 = vmatprep.subr.bf16.mxu1 %v14846_v39  ;;  %v459_v39 = vld [vmem:[#allocation2 + $0x169] sm:$0xff] }
  0x5c   : > { %12506 = vmatpush3.bf16.msra.mxu1 %v14847_v49  ;;  %v15627_v49 = vpack.c.bf16 %v460_v42, %v459_v39 }
  0x5d   : > { %12507 = vmatprep.subr.bf16.mxu1 %v14848_v53  ;;  %v462_v53 = vld [vmem:[#allocation2 + $0x191] sm:$0xff] }
  0x5e   : > { %1702 = vmatmul.mubr.bf16.gmra.mrb[28].mxu0 %v15500_v23  ;;  %1831 = vmatmul.mubr.bf16.gmra.mrb[28].mxu1 %v15502_v26 }
  0x5f   : > { %1709 = vmatprep.mubr.bf16.mxu0 %v15506_v27  ;;  %1838 = vmatprep.mubr.bf16.mxu1 %v15441_v60 }
  0x60   : > { %12508 = vmatpush3.bf16.msra.mxu1 %v14849_v55  ;;  %v15642_v55 = vpack.c.bf16 %v464_v48, %v463_v46 }
  0x61   : > { %12509 = vmatprep.subr.bf16.mxu1 %v14850_v57  ;;  %v466_v57 = vld [vmem:[#allocation2 + $0x1d1] sm:$0xff] }
  0x64   : > { %12510 = vmatpush3.bf16.msra.mxu1 %v14851_v3  ;;  %v531_v3 = vld [vmem:[#allocation2 + $0x207] sm:$0xff] }
  0x65   : > { %v15650_v9 = vpack.c.bf16 %v532_v6, %v531_v3 }
  0x66   : > { %1710 = vmatmul.mubr.bf16.gmra.mrb[32].mxu0 %v15527_v40  ;;  %1839 = vmatmul.mubr.bf16.gmra.mrb[32].mxu1 %v15529_v41 }
  0x67   : > { %1717 = vmatprep.mubr.bf16.mxu0 %v15534_v43  ;;  %1846 = vmatprep.mubr.bf16.mxu1 %v15475_v12 }
  0x6e   : > { %1718 = vmatmul.mubr.bf16.gmra.mrb[36].mxu0 %v15553_v59  ;;  %1847 = vmatmul.mubr.bf16.gmra.mrb[36].mxu1 %v15555_v62 }
  0x6f   : > { %1725 = vmatprep.mubr.bf16.mxu0 %v15559_v2  ;;  %1854 = vmatprep.mubr.bf16.mxu1 %v15500_v23 }
  0x76   : > { %1726 = vmatmul.mubr.bf16.gmra.mrb[40].mxu0 %v15568_v54  ;;  %1855 = vmatmul.mubr.bf16.gmra.mrb[40].mxu1 %v15570_v58 }
  0x77   : > { %1733 = vmatprep.mubr.bf16.mxu0 %v15574_v14  ;;  %1862 = vmatprep.mubr.bf16.mxu1 %v15527_v40 }
  0x7e   : > { %1734 = vmatmul.mubr.bf16.gmra.mrb[44].mxu0 %v15580_v20  ;;  %1863 = vmatmul.mubr.bf16.gmra.mrb[44].mxu1 %v15582_v21 }
  0x7f   : > { %1870 = vmatprep.mubr.bf16.mxu1 %v15553_v59  ;;  %1967 = vmatprep.mubr.bf16.mxu0 %v15443_v61  ;;  %v15603_v61 = vpack.c.bf16 %v456_v33, %v455_v31  ;;  %v823_v31 = vld [vmem:[#allocation2 + $0x51] sm:$0xff] }
  0x86   : > { %1871 = vmatmul.mubr.bf16.gmra.mrb[48].mxu1 %v15590_v29  ;;  %1968 = vmatmul.mubr.bf16.vlgmr.msra.gmra.mrb[48].mxu0 %v15272_v36  ;;  %v457_v36 = vld [vmem:[#allocation2 + $0x149] sm:$0xff] }
  0x87   : > { %14520 = vmatpush3.bf16.msra.mxu0 %v15473_v11  ;;  %1878 = vmatprep.mubr.bf16.mxu1 %v15568_v54  ;;  %v14852_v11 = vld [vmem:[%s18700_s1 + $0x220] sm:$0xff]  }
  0x88   : > { %1975 = vmatprep.mubr.bf16.mxu0 %v15477_v13  ;;  %14521 = vmatprep.subr.bf16.mxu0 %v14837_v30  ;;  %v15615_v13 = vpack.c.bf16 %v458_v37, %v457_v36 }
  0x8b   : > { %14522 = vmatpush3.bf16.msra.mxu0 %v14837_v30  ;;  %v822_v30 = vld [vmem:[#allocation2 + $0x49] sm:$0xff] }
  0x8c   : > { %14523 = vmatprep.subr.bf16.mxu0 %v14840_v34 }
  0x8e   : > { %1879 = vmatmul.mubr.bf16.gmra.mrb[52].mxu1 %v15603_v61  ;;  %1976 = vmatmul.mubr.bf16.gmra.mrb[52].mxu0 %v15302_v56 }
  0x8f   : > { %1886 = vmatprep.mubr.bf16.mxu1 %v15580_v20  ;;  %1983 = vmatprep.mubr.bf16.mxu0 %v15502_v26 }
  0x90   : > { %14524 = vmatpush3.bf16.msra.mxu0 %v14840_v34 }
  0x91   : > { %14525 = vmatprep.subr.bf16.mxu0 %v14844_v35 }
  0x94   : > { %14526 = vmatpush3.bf16.msra.mxu0 %v14844_v35 }
  0x95   : > { %14527 = vmatprep.subr.bf16.mxu0 %v14852_v11 }
  0x96   : > { %1887 = vmatmul.mubr.bf16.gmra.mrb[56].mxu1 %v15615_v13  ;;  %1984 = vmatmul.mubr.bf16.gmra.mrb[56].mxu0 %v15330_v7 }
  0x97   : > { %1894 = vmatprep.mubr.bf16.mxu1 %v15261_v32  ;;  %1991 = vmatprep.mubr.bf16.mxu0 %v15529_v41  ;;  %v15636_v32 = vpack.c.bf16 %v462_v53, %v461_v51 }
  0x98   : > { %14528 = vmatpush3.bf16.msra.mxu0 %v14852_v11  ;;  %v854_v11 = vpack.c.bf16 %v823_v31, %v822_v30 }
  0x99   : > { %14529 = vmatprep.subr.bf16.mxu0 %v14853_v38 }
  0x9c   : > { %14530 = vmatpush3.bf16.msra.mxu0 %v14853_v38 }
  0x9d   : > { %14531 = vmatprep.subr.bf16.mxu0 %v14854_v45 }
  0x9e   : > { %1895 = vmatmul.mubr.bf16.gmra.mrb[60].mxu1 %v15627_v49  ;;  %1992 = vmatmul.mubr.bf16.gmra.mrb[60].mxu0 %v15372_v28 }
  0x9f   : > { %1902 = vmatprep.mubr.bf16.mxu1 %v15297_v52  ;;  %1999 = vmatprep.mubr.bf16.mxu0 %v15555_v62  ;;  %v465_v52 = vld [vmem:[#allocation2 + $0x1c9] sm:$0xff] }
  0xa0   : > { %14532 = vmatpush3.bf16.msra.mxu0 %v14854_v45  ;;  %v15648_v8 = vpack.c.bf16 %v466_v57, %v465_v52 }
  0xa1   : > { %14533 = vmatprep.subr.bf16.mxu0 %v14855_v50 }
  0xa4   : > { %14534 = vmatpush3.bf16.msra.mxu0 %v14855_v50 }
  0xa6   : > { %1903 = vmatmul.mubr.bf16.gmra.mrb[64].mxu1 %v15636_v32  ;;  %2000 = vmatmul.mubr.bf16.gmra.mrb[64].mxu0 %v15414_v47 }
  0xa7   : > { %1910 = vmatprep.mubr.bf16.mxu1 %v15325_v5  ;;  %2007 = vmatprep.mubr.bf16.mxu0 %v15570_v58  ;;  %v467_v5 = vld [vmem:[#allocation2 + $0x1e9] sm:$0xff] }
  0xa8   : > { %v15656_v16 = vpack.c.bf16 %v468_v10, %v467_v5 }
  0xae   : > { %1911 = vmatmul.mubr.bf16.gmra.mrb[68].mxu1 %v15642_v55  ;;  %2008 = vmatmul.mubr.bf16.gmra.mrb[68].mxu0 %v15450_v63 }
  0xaf   : > { %1918 = vmatprep.mubr.bf16.mxu1 %v15363_v25  ;;  %2015 = vmatprep.mubr.bf16.mxu0 %v15582_v21  ;;  %v587_v25 = vld [vmem:[#allocation2 + $0x188] sm:$0xff] }
  0xb6   : > { %1919 = vmatmul.mubr.bf16.gmra.mrb[72].mxu1 %v15648_v8  ;;  %2016 = vmatmul.mubr.bf16.gmra.mrb[72].mxu0 %v15485_v15 }
  0xb7   : > { %1926 = vmatprep.mubr.bf16.mxu1 %v15650_v9  ;;  %2023 = vmatprep.mubr.bf16.mxu0 %v15590_v29 }
  0xbe   : > { %1927 = vmatmul.mubr.bf16.gmra.mrb[76].mxu1 %v15656_v16  ;;  %2024 = vmatmul.mubr.bf16.gmra.mrb[76].mxu0 %v15506_v27 }
  0xbf   : > { %2031 = vmatprep.mubr.bf16.mxu0 %v15603_v61  ;;  %2128 = vmatprep.mubr.bf16.mxu1 %v15302_v56  ;;  %v15674_v56 = vpack.c.bf16 %v588_v17, %v587_v25 }
  0xc6   : > { %2032 = vmatmul.mubr.bf16.gmra.mrb[80].mxu0 %v15534_v43  ;;  %2129 = vmatmul.mubr.bf16.vlgmr.msra.gmra.mrb[80].mxu1 %v15323_v4  ;;  %v589_v4 = vld [vmem:[#allocation2 + $0x1a8] sm:$0xff] }
  0xc7   : > { %2039 = vmatprep.mubr.bf16.mxu0 %v15615_v13  ;;  %2136 = vmatprep.mubr.bf16.mxu1 %v15330_v7  ;;  %v590_v7 = vld [vmem:[#allocation2 + $0x1b0] sm:$0xff] }
  0xce   : > { %2040 = vmatmul.mubr.bf16.gmra.mrb[84].mxu0 %v15559_v2  ;;  %2137 = vmatmul.mubr.bf16.gmra.mrb[84].mxu1 %v15361_v24  ;;  %v15680_v24 = vpack.c.bf16 %v590_v7, %v589_v4 }
  0xcf   : > { %2047 = vmatprep.mubr.bf16.mxu0 %v15627_v49  ;;  %2144 = vmatprep.mubr.bf16.mxu1 %v15372_v28  ;;  %v591_v28 = vld [vmem:[#allocation2 + $0x1c8] sm:$0xff] }
  0xd6   : > { %2048 = vmatmul.mubr.bf16.gmra.mrb[88].mxu0 %v15574_v14  ;;  %2145 = vmatmul.mubr.bf16.gmra.mrb[88].mxu1 %v15407_v44  ;;  %v592_v44 = vld [vmem:[#allocation2 + $0x1d0] sm:$0xff] }
  0xd7   : > { %2055 = vmatprep.mubr.bf16.mxu0 %v15636_v32  ;;  %2152 = vmatprep.mubr.bf16.mxu1 %v15414_v47  ;;  %v14856_v47 = vld [vmem:[%s18700_s1 + $0x280] sm:$0xff]  }
  0xd8   : > { %12631 = vmatprep.subr.bf16.mxu1 %v14856_v47 }
  0xde   : > { %2056 = vmatmul.mubr.bf16.gmra.mrb[92].mxu0 %v15674_v56  ;;  %2153 = vmatmul.mubr.bf16.gmra.mrb[92].mxu1 %v15441_v60  ;;  %v14857_v60 = vld [vmem:[%s18700_s1 + $0x240] sm:$0xff]  }
  0xdf   : > { %2063 = vmatprep.mubr.bf16.mxu0 %v15642_v55  ;;  %2160 = vmatprep.mubr.bf16.mxu1 %v15450_v63  ;;  %v15692_v63 = vpack.c.bf16 %v592_v44, %v591_v28 }
  0xe0   : > { %12632 = vmatpush3.bf16.msra.mxu1 %v14857_v60 }
  0xe6   : > { %2064 = vmatmul.mubr.bf16.gmra.mrb[96].mxu0 %v15680_v24  ;;  %2161 = vmatmul.mubr.bf16.gmra.mrb[96].mxu1 %v15475_v12  ;;  %v659_v12 = vld [vmem:[#allocation2 + $0x209] sm:$0xff] }
  0xe7   : > { %2071 = vmatprep.mubr.bf16.mxu0 %v15648_v8  ;;  %2168 = vmatprep.mubr.bf16.mxu1 %v15485_v15  ;;  %v660_v15 = vld [vmem:[#allocation2 + $0x211] sm:$0xff] }
  0xe8   : > { %v15700_v1 = vpack.c.bf16 %v660_v15, %v659_v12  ;;  %v714_v12 = vld [vmem:[#allocation2 + $0x187] sm:$0xff]  ;;  %v715_v15 = vld [vmem:[#allocation2 + $0x18f] sm:$0xff] }
  0xee   : > { %2072 = vmatmul.mubr.bf16.gmra.mrb[100].mxu0 %v15692_v63  ;;  %2169 = vmatmul.mubr.bf16.gmra.mrb[100].mxu1 %v15500_v23  ;;  %v14858_v23 = vld [vmem:[%s18700_s1 + $0x288] sm:$0xff]  }
  0xef   : > { %2079 = vmatprep.mubr.bf16.mxu0 %v15656_v16  ;;  %2176 = vmatprep.mubr.bf16.mxu1 %v15506_v27  ;;  %v14859_v27 = vld [vmem:[%s18700_s1 + $0x248] sm:$0xff]  }
  0xf0   : > { %12633 = vmatprep.subr.bf16.mxu1 %v14858_v23 }
  0xf1   : > { %12634 = vmatpush3.bf16.msra.mxu1 %v14859_v27 }
  0xf6   : > { %2080 = vmatmul.mubr.bf16.gmra.mrb[104].mxu0 %v15698_v0  ;;  %2177 = vmatmul.mubr.bf16.gmra.mrb[104].mxu1 %v15527_v40 }
  0xf7   : > { %2087 = vmatprep.mubr.bf16.mxu0 %v15700_v1  ;;  %2184 = vmatprep.mubr.bf16.mxu1 %v15534_v43 }
  0xf9   : > { %v12175_v33 = vpop.f32.mrb[0].mxu0  ;;  %v12247_v34 = vpop.f32.mrb[0].mxu1 }
  0xfa   : > { %v12176_v35 = vpop.f32.mrb[1].mxu0  ;;  %v12248_v36 = vpop.f32.mrb[1].mxu1 }
  0xfb   : > { %v15712_v40 = vadd.f32 %v12176_v35, %v12175_v33  ;;  %v12178_v37 = vpop.f32.mrb[2].mxu0  ;;  %v15714_v38 = vadd.f32 %v12248_v36, %v12247_v34  ;;  %v12250_v43 = vpop.f32.mrb[2].mxu1  ;;  %v736_v33 = vpack.c.bf16 %v715_v15, %v714_v12 }
  0xfc   : > { %v12179_v39 = vpop.f32.mrb[3].mxu0  ;;  %v12251_v42 = vpop.f32.mrb[3].mxu1 }
  0xfd   : > { %v15716_v45 = vadd.f32 %v12179_v39, %v12178_v37  ;;  %v15718_v50 = vadd.f32 %v12251_v42, %v12250_v43  ;;  %v717_v39 = vld [vmem:[#allocation2 + $0x1af] sm:$0xff]  ;;  %v14862_v42 = vld [vmem:[%s18700_s1 + $0x298] sm:$0xff]  }
  0xfe   : > { %2088 = vmatmul.mubr.bf16.gmra.mrb[108].mxu0 %v15584_v22  ;;  %2185 = vmatmul.mubr.bf16.gmra.mrb[108].mxu1 %v15553_v59  ;;  %v14860_v59 = vld [vmem:[%s18700_s1 + $0x290] sm:$0xff]  }
  0xff   : > { %2192 = vmatprep.mubr.bf16.mxu1 %v15559_v2  ;;  %14535 = vmatprep.mubr.bf16.mxu0 %v854_v11  ;;  %v14861_v2 = vld [vmem:[%s18700_s1 + $0x250] sm:$0xff]  }
 0x100   : > { %12635 = vmatprep.subr.bf16.mxu1 %v14860_v59 }
 0x101   : > { %v12181_v51 = vpop.f32.mrb[4].mxu0  ;;  %v12253_v53 = vpop.f32.mrb[4].mxu1  ;;  %12636 = vmatpush3.bf16.msra.mxu1 %v14861_v2 }
 0x102   : > { %v12182_v46 = vpop.f32.mrb[5].mxu0  ;;  %v12254_v48 = vpop.f32.mrb[5].mxu1  ;;  %12637 = vmatprep.subr.bf16.mxu1 %v14862_v42 }
 0x103   : > { %v15723_v52 = vadd.f32 %v12182_v46, %v12181_v51  ;;  %v12184_v57 = vpop.f32.mrb[6].mxu0  ;;  %v15725_v3 = vadd.f32 %v12254_v48, %v12253_v53  ;;  %v12256_v6 = vpop.f32.mrb[6].mxu1  ;;  %v14863_v51 = vld [vmem:[%s18700_s1 + $0x258] sm:$0xff]  }
 0x104   : > { %v12185_v5 = vpop.f32.mrb[7].mxu0  ;;  %v12257_v10 = vpop.f32.mrb[7].mxu1 }
 0x105   : > { %v15727_v25 = vadd.f32 %v12185_v5, %v12184_v57  ;;  %v15729_v17 = vadd.f32 %v12257_v10, %v12256_v6  ;;  %12638 = vmatpush3.bf16.msra.mxu1 %v14863_v51 }
 0x106   : > { %2193 = vmatmul.mubr.bf16.gmra.mrb[112].mxu1 %v15568_v54  ;;  %14536 = vmatmul.mubr.bf16.vlgmr.msra.gmra.mrb[112].mxu0 %v15502_v26 }
 0x107   : > { %2200 = vmatprep.mubr.bf16.mxu1 %v15574_v14  ;;  %14539 = vmatprep.mubr.bf16.mxu0 %v15529_v41 }
 0x109   : > { %v12187_v4 = vpop.f32.mrb[8].mxu0  ;;  %v12259_v7 = vpop.f32.mrb[8].mxu1 }
 0x10a   : > { %v12188_v28 = vpop.f32.mrb[9].mxu0  ;;  %v12260_v44 = vpop.f32.mrb[9].mxu1 }
 0x10b   : > { %v15741_v54 = vadd.f32 %v12188_v28, %v12187_v4  ;;  %v12190_v26 = vpop.f32.mrb[10].mxu0  ;;  %v15743_v14 = vadd.f32 %v12260_v44, %v12259_v7  ;;  %v12262_v41 = vpop.f32.mrb[10].mxu1 }
 0x10c   : > { %v12191_v47 = vpop.f32.mrb[11].mxu0  ;;  %v12263_v60 = vpop.f32.mrb[11].mxu1 }
 0x10d   : > { %v15745_v18 = vadd.f32 %v12191_v47, %v12190_v26  ;;  %v15747_v19 = vadd.f32 %v12263_v60, %v12262_v41  ;;  %v718_v26 = vld [vmem:[#allocation2 + $0x1c7] sm:$0xff]  ;;  %v719_v41 = vld [vmem:[#allocation2 + $0x1cf] sm:$0xff] }
 0x10e   : > { %2201 = vmatmul.mubr.bf16.gmra.mrb[116].mxu1 %v15580_v20  ;;  %14540 = vmatmul.mubr.bf16.gmra.mrb[116].mxu0 %v15555_v62  ;;  %v738_v15 = vpack.c.bf16 %v719_v41, %v718_v26 }
 0x10f   : > { %2208 = vmatprep.mubr.bf16.mxu1 %v15674_v56  ;;  %14543 = vmatprep.mubr.bf16.mxu0 %v15570_v58  ;;  %v716_v56 = vld [vmem:[#allocation2 + $0x1a7] sm:$0xff]  ;;  %v15764_v58 = vld [vmem:[%s18701_s2] ss:$0 sm:$0xff] }
 0x110   : > { %v737_v6 = vpack.c.bf16 %v717_v39, %v716_v56  ;;  %v1651_v4 = vadd.f32 %v15716_v45, %v15764_v58  ;;  %v721_v56 = vld [vmem:[#allocation2 + $0x1ef] sm:$0xff]  ;;  %v14865_v39 = vld [vmem:[%s18700_s1 + $0x260] sm:$0xff]  }
 0x111   : > { %v12193_v30 = vpop.f32.mrb[12].mxu0  ;;  %v12265_v31 = vpop.f32.mrb[12].mxu1 }
 0x112   : > { %v12194_v23 = vpop.f32.mrb[13].mxu0  ;;  %v12266_v27 = vpop.f32.mrb[13].mxu1 }
 0x113   : > { %v15753_v34 = vadd.f32 %v12194_v23, %v12193_v30  ;;  %v12196_v35 = vpop.f32.mrb[14].mxu0  ;;  %v15755_v36 = vadd.f32 %v12266_v27, %v12265_v31  ;;  %v12268_v37 = vpop.f32.mrb[14].mxu1  ;;  %v1656_v30 = vadd.f32 %v15723_v52, %v15764_v58 }
 0x114   : > { %v12197_v11 = vpop.f32.mrb[15].mxu0  ;;  %v12269_v43 = vpop.f32.mrb[15].mxu1 }
 0x115   : > { %v15757_v20 = vadd.f32 %v12197_v11, %v12196_v35  ;;  %v15759_v62 = vadd.f32 %v12269_v43, %v12268_v37  ;;  %v720_v43 = vld [vmem:[#allocation2 + $0x1e7] sm:$0xff] }
 0x116   : > { %2209 = vmatmul.mubr.bf16.gmra.mrb[120].mxu1 %v736_v33  ;;  %14544 = vmatmul.mubr.bf16.gmra.mrb[120].mxu0 %v15582_v21  ;;  %v1648_v21 = vadd.f32 %v15712_v40, %v15764_v58 }
 0x117   : > { %2216 = vmatprep.mubr.bf16.mxu1 %v15680_v24  ;;  %14547 = vmatprep.mubr.bf16.mxu0 %v15590_v29 }
 0x119   : > { %v12199_v53 = vpop.f32.mrb[16].mxu0  ;;  %v12287_v46 = vpop.f32.mrb[16].mxu1 }
 0x11a   : > { %v12200_v48 = vpop.f32.mrb[17].mxu0  ;;  %v12288_v57 = vpop.f32.mrb[17].mxu1 }
 0x11b   : > { %v15777_v24 = vadd.f32 %v12200_v48, %v12199_v53  ;;  %v12289_v29 = vadd.f32 %v12288_v57, %v12287_v46  ;;  %v12202_v5 = vpop.f32.mrb[18].mxu0  ;;  %v12290_v10 = vpop.f32.mrb[18].mxu1 }
 0x11c   : > { %v12203_v59 = vpop.f32.mrb[19].mxu0  ;;  %v12291_v2 = vpop.f32.mrb[19].mxu1 }
 0x11d   : > { %v15781_v7 = vadd.f32 %v12289_v29, %v1648_v21  ;;  %v15783_v28 = vadd.f32 %v12203_v59, %v12202_v5  ;;  %v12292_v44 = vadd.f32 %v12291_v2, %v12290_v10  ;;  %v1667_v5 = vadd.f32 %v15745_v18, %v15764_v58 }
 0x11e   : > { %2217 = vmatmul.mubr.bf16.gmra.mrb[124].mxu1 %v737_v6  ;;  %14548 = vmatmul.mubr.bf16.gmra.mrb[124].mxu0 %v15603_v61  ;;  %v1672_v18 = vadd.f32 %v15753_v34, %v15764_v58  ;;  %v852_v34 = vld [vmem:[#allocation2 + $0x229] sm:$0xff] }
 0x11f   : > { %v15786_v40 = vadd.f32 %v12292_v44, %v1651_v4  ;;  %2224 = vmatprep.mubr.bf16.mxu1 %v15692_v63  ;;  %14551 = vmatprep.mubr.bf16.mxu0 %v15615_v13  ;;  %v1659_v63 = vadd.f32 %v15727_v25, %v15764_v58  ;;  %v14864_v25 = vld [vmem:[%s18700_s1 + $0x2a0] sm:$0xff]  }
 0x120   : > { %12639 = vmatprep.subr.bf16.mxu1 %v14864_v25 }
 0x121   : > { %v12205_v47 = vpop.f32.mrb[20].mxu0  ;;  %v12293_v60 = vpop.f32.mrb[20].mxu1  ;;  %12640 = vmatpush3.bf16.msra.mxu1 %v14865_v39 }
 0x122   : > { %v12206_v12 = vpop.f32.mrb[21].mxu0  ;;  %v12294_v45 = vpop.f32.mrb[21].mxu1 }
 0x123   : > { %v15792_v31 = vadd.f32 %v12206_v12, %v12205_v47  ;;  %v12295_v23 = vadd.f32 %v12294_v45, %v12293_v60  ;;  %v12208_v27 = vpop.f32.mrb[22].mxu0  ;;  %v12296_v33 = vpop.f32.mrb[22].mxu1 }
 0x124   : > { %v12209_v61 = vpop.f32.mrb[23].mxu0  ;;  %v12297_v35 = vpop.f32.mrb[23].mxu1 }
 0x125   : > { %v15796_v37 = vadd.f32 %v12295_v23, %v1656_v30  ;;  %v15798_v13 = vadd.f32 %v12209_v61, %v12208_v27  ;;  %v12298_v11 = vadd.f32 %v12297_v35, %v12296_v33  ;;  %v724_v61 = vld [vmem:[#allocation2 + $0x227] sm:$0xff]  ;;  %v725_v35 = vld [vmem:[#allocation2 + $0x22f] sm:$0xff] }
 0x126   : > { %2225 = vmatmul.mubr.bf16.gmra.mrb[128].mxu1 %v738_v15  ;;  %14552 = vmatmul.mubr.bf16.gmra.mrb[128].mxu0 %v15627_v49  ;;  %v739_v49 = vpack.c.bf16 %v721_v56, %v720_v43  ;;  %v15144_v15 = vld [vmem:[#allocation2 + $0x8] sm:$0xff] }
 0x127   : > { %v15801_v52 = vadd.f32 %v12298_v11, %v1659_v63  ;;  %2232 = vmatprep.mubr.bf16.mxu1 %v15698_v0  ;;  %14555 = vmatprep.mubr.bf16.mxu0 %v15636_v32  ;;  %v1664_v0 = vadd.f32 %v15741_v54, %v15764_v58  ;;  %v853_v63 = vld [vmem:[#allocation2 + $0x231] sm:$0xff]  ;;  %v14867_v43 = vld [vmem:[%s18700_s1 + $0x268] sm:$0xff]  }
 0x129   : > { %v12211_v42 = vpop.f32.mrb[24].mxu0  ;;  %v12299_v51 = vpop.f32.mrb[24].mxu1 }
 0x12a   : > { %v12212_v53 = vpop.f32.mrb[25].mxu0  ;;  %v12300_v46 = vpop.f32.mrb[25].mxu1 }
 0x12b   : > { %v15813_v48 = vadd.f32 %v12212_v53, %v12211_v42  ;;  %v12301_v32 = vadd.f32 %v12300_v46, %v12299_v51  ;;  %v12214_v57 = vpop.f32.mrb[26].mxu0  ;;  %v12302_v6 = vpop.f32.mrb[26].mxu1  ;;  %v741_v42 = vpack.c.bf16 %v725_v35, %v724_v61  ;;  %v1680_v51 = vadd.f32 %v15777_v24, %v15764_v58 }
 0x12c   : > { %v12215_v21 = vpop.f32.mrb[27].mxu0  ;;  %v12303_v29 = vpop.f32.mrb[27].mxu1 }
 0x12d   : > { %v15817_v10 = vadd.f32 %v12301_v32, %v1664_v0  ;;  %v15819_v59 = vadd.f32 %v12215_v21, %v12214_v57  ;;  %v12304_v2 = vadd.f32 %v12303_v29, %v12302_v6  ;;  %v1683_v57 = vadd.f32 %v15783_v28, %v15764_v58 }
 0x12e   : > { %2233 = vmatmul.mubr.bf16.gmra.mrb[132].mxu1 %v739_v49  ;;  %14556 = vmatmul.mubr.bf16.gmra.mrb[132].mxu0 %v15642_v55  ;;  %v805_v55 = vpack.c.bf16 %v15144_v15, %v15144_v15  ;;  %v1691_v15 = vadd.f32 %v15798_v13, %v15764_v58 }
 0x12f   : > { %v15822_v4 = vadd.f32 %v12304_v2, %v1667_v5  ;;  %2240 = vmatprep.mubr.bf16.mxu1 %v15584_v22  ;;  %14559 = vmatprep.mubr.bf16.mxu0 %v15648_v8  ;;  %v1675_v22 = vadd.f32 %v15757_v20, %v15764_v58  ;;  %v14866_v20 = vld [vmem:[%s18700_s1 + $0x2a8] sm:$0xff]  }
 0x130   : > { %12641 = vmatprep.subr.bf16.mxu1 %v14866_v20  ;;  %v1696_v20 = vadd.f32 %v15813_v48, %v15764_v58 }
 0x131   : > { %v12217_v54 = vpop.f32.mrb[28].mxu0  ;;  %v12305_v44 = vpop.f32.mrb[28].mxu1  ;;  %12642 = vmatpush3.bf16.msra.mxu1 %v14867_v43 }
 0x132   : > { %v12218_v26 = vpop.f32.mrb[29].mxu0  ;;  %v12306_v41 = vpop.f32.mrb[29].mxu1 }
 0x133   : > { %v15828_v47 = vadd.f32 %v12218_v26, %v12217_v54  ;;  %v12307_v60 = vadd.f32 %v12306_v41, %v12305_v44  ;;  %v12220_v12 = vpop.f32.mrb[30].mxu0  ;;  %v12308_v45 = vpop.f32.mrb[30].mxu1  ;;  %v1688_v26 = vadd.f32 %v15792_v31, %v15764_v58  ;;  %v14868_v31 = vld [vmem:[%s18700_s1 + $0x2b0] sm:$0xff]  }
 0x134   : > { %v12221_v30 = vpop.f32.mrb[31].mxu0  ;;  %v12309_v23 = vpop.f32.mrb[31].mxu1  ;;  %12643 = vmatprep.subr.bf16.mxu1 %v14868_v31 }
 0x135   : > { %v15832_v8 = vadd.f32 %v12307_v60, %v1672_v18  ;;  %v15834_v27 = vadd.f32 %v12221_v30, %v12220_v12  ;;  %v12310_v33 = vadd.f32 %v12309_v23, %v12308_v45 }
 0x136   : > { %2241 = vmatmul.mubr.bf16.gmra.mrb[136].mxu1 %v15650_v9  ;;  %14560 = vmatmul.mubr.bf16.gmra.mrb[136].mxu0 %v15656_v16  ;;  %v869_v16 = vpack.c.bf16 %v853_v63, %v852_v34  ;;  %v14870_v63 = vld [vmem:[%s18700_s1 + $0x300] sm:$0xff]  }
 0x137   : > { %v15838_v11 = vadd.f32 %v12310_v33, %v1675_v22  ;;  %2248 = vmatprep.mubr.bf16.mxu1 %v805_v55  ;;  %14563 = vmatprep.mubr.bf16.mxu0 %v15700_v1  ;;  %v14869_v33 = vld [vmem:[%s18700_s1 + $0x270] sm:$0xff]  }
 0x138   : > { %12644 = vmatpush3.bf16.msra.mxu1 %v14869_v33  ;;  %12743 = vmatprep.subr.bf16.mxu0 %v14870_v63  ;;  %v14878_v33 = vld [vmem:[%s18700_s1 + $0x318] sm:$0xff]  }
 0x139   : > { %v12223_v56 = vpop.f32.mrb[32].mxu0  ;;  %v12311_v25 = vpop.f32.mrb[32].mxu1 }
 0x13a   : > { %v12224_v39 = vpop.f32.mrb[33].mxu0  ;;  %v12312_v9 = vpop.f32.mrb[33].mxu1 }
 0x13b   : > { %v15849_v1 = vadd.f32 %v12224_v39, %v12223_v56  ;;  %v12313_v53 = vadd.f32 %v12312_v9, %v12311_v25  ;;  %v12226_v46 = vpop.f32.mrb[34].mxu0  ;;  %v12314_v49 = vpop.f32.mrb[34].mxu1  ;;  %v14871_v9 = vld [vmem:[%s18700_s1 + $0x2c0] sm:$0xff]  }
 0x13c   : > { %v12227_v0 = vpop.f32.mrb[35].mxu0  ;;  %v12315_v32 = vpop.f32.mrb[35].mxu1  ;;  %12744 = vmatpush3.bf16.msra.mxu0 %v14871_v9 }
 0x13d   : > { %v15853_v6 = vadd.f32 %v12313_v53, %v1680_v51  ;;  %v15855_v21 = vadd.f32 %v12227_v0, %v12226_v46  ;;  %v12316_v29 = vadd.f32 %v12315_v32, %v12314_v49  ;;  %v1699_v51 = vadd.f32 %v15819_v59, %v15764_v58  ;;  %v14872_v49 = vld [vmem:[%s18700_s1 + $0x308] sm:$0xff]  }
 0x13e   : > { %2249 = vmatmul.mubr.bf16.gmra.mrb[140].mxu1 %v741_v42  ;;  %14564 = vmatmul.mubr.bf16.gmra.mrb[140].mxu0 %v869_v16  ;;  %v14873_v32 = vld [vmem:[%s18700_s1 + $0x2c8] sm:$0xff]  }
 0x13f   : > { %v15857_v5 = vadd.f32 %v12316_v29, %v1683_v57  ;;  %3819 = vmatprep.mubr.bf16.mxu1 %v805_v55  ;;  %12745 = vmatprep.subr.bf16.mxu0 %v14872_v49  ;;  %v1715_v49 = vadd.f32 %v15855_v21, %v15764_v58 }
 0x140   : > { %12746 = vmatpush3.bf16.msra.mxu0 %v14873_v32 }
 0x141   : > { %v12229_v24 = vpop.f32.mrb[36].mxu0  ;;  %v12317_v2 = vpop.f32.mrb[36].mxu1 }
 0x142   : > { %v12230_v54 = vpop.f32.mrb[37].mxu0  ;;  %v12318_v44 = vpop.f32.mrb[37].mxu1 }
 0x143   : > { %v15861_v41 = vadd.f32 %v12230_v54, %v12229_v24  ;;  %v12319_v28 = vadd.f32 %v12318_v44, %v12317_v2  ;;  %v12232_v18 = vpop.f32.mrb[38].mxu0  ;;  %v12320_v60 = vpop.f32.mrb[38].mxu1  ;;  %v14875_v2 = vld [vmem:[%s18700_s1 + $0x310] sm:$0xff]   ;;  %v1704_v54 = vadd.f32 %v15828_v47, %v15764_v58 }
 0x144   : > { %v12233_v12 = vpop.f32.mrb[39].mxu0  ;;  %v12321_v45 = vpop.f32.mrb[39].mxu1  ;;  %12747 = vmatprep.subr.bf16.mxu0 %v14875_v2  ;;  %v2482_v2 = vld [vmem:[#allocation2 + $0x7] sm:$0xff] }
 0x145   : > { %v15865_v30 = vadd.f32 %v12319_v28, %v1688_v26  ;;  %v15867_v55 = vadd.f32 %v12233_v12, %v12232_v18  ;;  %v12322_v23 = vadd.f32 %v12321_v45, %v12320_v60  ;;  %v14877_v60 = vld [vmem:[%s18700_s1 + $0x2d0] sm:$0xff]  }
 0x146   : > { %12748 = vmatpush3.bf16.msra.mxu0 %v14877_v60 }
 0x147   : > { %v15869_v22 = vadd.f32 %v12322_v23, %v1691_v15  ;;  %v1707_v15 = vadd.f32 %v15834_v27, %v15764_v58  ;;  %v14876_v27 = vld [vmem:[%s18700_s1 + $0x278] sm:$0xff]   ;;  %12749 = vmatprep.subr.bf16.mxu0 %v14878_v33  ;;  %v1720_v33 = vadd.f32 %v15861_v41, %v15764_v58 }
 0x149   : > { %v12235_v61 = vpop.f32.mrb[40].mxu0  ;;  %v12323_v35 = vpop.f32.mrb[40].mxu1 }
 0x14a   : > { %v12236_v34 = vpop.f32.mrb[41].mxu0  ;;  %v12324_v13 = vpop.f32.mrb[41].mxu1 }
 0x14b   : > { %v15882_v43 = vadd.f32 %v12236_v34, %v12235_v61  ;;  %v12325_v56 = vadd.f32 %v12324_v13, %v12323_v35  ;;  %v12238_v25 = vpop.f32.mrb[42].mxu0  ;;  %v12326_v39 = vpop.f32.mrb[42].mxu1  ;;  %v14874_v35 = vld [vmem:[%s18700_s1 + $0x2b8] sm:$0xff]  }
 0x14c   : > { %v12239_v42 = vpop.f32.mrb[43].mxu0  ;;  %v12327_v16 = vpop.f32.mrb[43].mxu1  ;;  %v14879_v34 = vld [vmem:[%s18700_s1 + $0x2d8] sm:$0xff]   ;;  %12645 = vmatprep.subr.bf16.mxu1 %v14874_v35 }
 0x14d   : > { %v15889_v53 = vadd.f32 %v12325_v56, %v1696_v20  ;;  %v15891_v46 = vadd.f32 %v12239_v42, %v12238_v25  ;;  %v12328_v48 = vadd.f32 %v12327_v16, %v12326_v39  ;;  %12750 = vmatpush3.bf16.msra.mxu0 %v14879_v34  ;;  %12646 = vmatpush3.bf16.msra.mxu1 %v14876_v27  ;;  %v14880_v25 = vld [vmem:[%s18700_s1 + $0x320] sm:$0xff]  }
 0x14e   : > { %v1712_v39 = vadd.f32 %v15849_v1, %v15764_v58  ;;  %12751 = vmatprep.subr.bf16.mxu0 %v14880_v25 }
 0x14f   : > { %v15896_v0 = vadd.f32 %v12328_v48, %v1699_v51  ;;  %v14881_v48 = vld [vmem:[%s18700_s1 + $0x2e0] sm:$0xff]  }
 0x151   : > { %v12241_v57 = vpop.f32.mrb[44].mxu0  ;;  %v12329_v29 = vpop.f32.mrb[44].mxu1  ;;  %12752 = vmatpush3.bf16.msra.mxu0 %v14881_v48 }
 0x152   : > { %v12242_v59 = vpop.f32.mrb[45].mxu0  ;;  %v12330_v24 = vpop.f32.mrb[45].mxu1 }
 0x153   : > { %v15906_v44 = vadd.f32 %v12242_v59, %v12241_v57  ;;  %v12331_v26 = vadd.f32 %v12330_v24, %v12329_v29  ;;  %v12244_v28 = vpop.f32.mrb[46].mxu0  ;;  %v12332_v18 = vpop.f32.mrb[46].mxu1 }
 0x154   : > { %v12245_v12 = vpop.f32.mrb[47].mxu0  ;;  %v12333_v45 = vpop.f32.mrb[47].mxu1 }
 0x155   : > { %v15913_v23 = vadd.f32 %v12331_v26, %v1704_v54  ;;  %v15915_v31 = vadd.f32 %v12245_v12, %v12244_v28  ;;  %v12334_v47 = vadd.f32 %v12333_v45, %v12332_v18  ;;  %v2483_v54 = vld [vmem:[#allocation2 + $0xf] sm:$0xff] }
 0x156   : > { %v14882_v26 = vld [vmem:[%s18700_s1 + $0x328] sm:$0xff]   ;;  %v2514_v28 = vpack.c.bf16 %v2483_v54, %v2482_v2 }
 0x157   : > { %v15920_v61 = vadd.f32 %v12334_v47, %v1707_v15  ;;  %12753 = vmatprep.subr.bf16.mxu0 %v14882_v26  ;;  %v14884_v47 = vld [vmem:[%s18700_s1 + $0x330] sm:$0xff]  }
 0x158   : > { %3820 = vmatmul.mubr.bf16.vlgmr.msra.gmra.mrb[144].mxu1 %v2514_v28  ;;  %v1731_v28 = vadd.f32 %v15891_v46, %v15764_v58  ;;  %v1736_v46 = vadd.f32 %v15906_v44, %v15764_v58 }
 0x159   : > { %v12335_v13 = vpop.f32.mrb[48].mxu1  ;;  %v12399_v63 = vpop.f32.mrb[48].mxu0 }
 0x15a   : > { %v12336_v20 = vpop.f32.mrb[49].mxu1  ;;  %v12400_v56 = vpop.f32.mrb[49].mxu0 }
 0x15b   : > { %v12337_v9 = vadd.f32 %v12336_v20, %v12335_v13  ;;  %v12401_v42 = vadd.f32 %v12400_v56, %v12399_v63  ;;  %v12338_v16 = vpop.f32.mrb[50].mxu1  ;;  %v12402_v51 = vpop.f32.mrb[50].mxu0  ;;  %v14886_v13 = vld [vmem:[%s18700_s1 + $0x2f0] sm:$0xff]   ;;  %v1723_v63 = vadd.f32 %v15867_v55, %v15764_v58  ;;  %v14889_v55 = vld [vmem:[%s18700_s1 + $0x2f8] sm:$0xff]  }
 0x15c   : > { %v12339_v32 = vpop.f32.mrb[51].mxu1  ;;  %v12403_v57 = vpop.f32.mrb[51].mxu0 }
 0x15d   : > { %v15941_v29 = vadd.f32 %v12337_v9, %v1712_v39  ;;  %v15944_v59 = vadd.f32 %v12401_v42, %v15781_v7  ;;  %v12340_v1 = vadd.f32 %v12339_v32, %v12338_v16  ;;  %v12404_v24 = vadd.f32 %v12403_v57, %v12402_v51  ;;  %v14883_v7 = vld [vmem:[%s18700_s1 + $0x2e8] sm:$0xff]   ;;  %v14888_v42 = vld [vmem:[%s18700_s1 + $0x338] sm:$0xff]   ;;  %v14887_v32 = vld [vmem:[%s18700_s1 + $0x340] sm:$0xff]  }
 0x15e   : > { %12754 = vmatpush3.bf16.msra.mxu0 %v14883_v7 }
 0x15f   : > { %v15949_v18 = vadd.f32 %v12340_v1, %v1715_v49  ;;  %v15952_v21 = vadd.f32 %v12404_v24, %v15786_v40  ;;  %12755 = vmatprep.subr.bf16.mxu0 %v14884_v47  ;;  %v14885_v49 = vld [vmem:[%s18700_s1 + $0x380] sm:$0xff]  }
 0x160   : > { %12855 = vmatprep.subr.bf16.mxu1 %v14885_v49 }
 0x161   : > { %v12341_v60 = vpop.f32.mrb[52].mxu1  ;;  %v12405_v12 = vpop.f32.mrb[52].mxu0  ;;  %12856 = vmatpush3.bf16.msra.mxu1 %v14887_v32 }
 0x162   : > { %v12342_v45 = vpop.f32.mrb[53].mxu1  ;;  %v12406_v15 = vpop.f32.mrb[53].mxu0  ;;  %12756 = vmatpush3.bf16.msra.mxu0 %v14886_v13 }
 0x163   : > { %v12343_v40 = vadd.f32 %v12342_v45, %v12341_v60  ;;  %v12407_v35 = vadd.f32 %v12406_v15, %v12405_v12  ;;  %v12344_v27 = vpop.f32.mrb[54].mxu1  ;;  %v12408_v34 = vpop.f32.mrb[54].mxu0  ;;  %12757 = vmatprep.subr.bf16.mxu0 %v14888_v42 }
 0x164   : > { %v12345_v20 = vpop.f32.mrb[55].mxu1  ;;  %v12409_v56 = vpop.f32.mrb[55].mxu0 }
 0x165   : > { %v15967_v25 = vadd.f32 %v12343_v40, %v1720_v33  ;;  %v15970_v39 = vadd.f32 %v12407_v35, %v15796_v37  ;;  %v12346_v41 = vadd.f32 %v12345_v20, %v12344_v27  ;;  %v12410_v9 = vadd.f32 %v12409_v56, %v12408_v34 }
 0x166   : > { %12758 = vmatpush3.bf16.msra.mxu0 %v14889_v55 }
 0x167   : > { %v15975_v16 = vadd.f32 %v12346_v41, %v1723_v63  ;;  %v15978_v51 = vadd.f32 %v12410_v9, %v15801_v52  ;;  %v1728_v52 = vadd.f32 %v15882_v43, %v15764_v58 }
 0x169   : > { %v12347_v48 = vpop.f32.mrb[56].mxu1  ;;  %v12411_v37 = vpop.f32.mrb[56].mxu0 }
 0x16a   : > { %v12348_v57 = vpop.f32.mrb[57].mxu1  ;;  %v12412_v1 = vpop.f32.mrb[57].mxu0 }
 0x16b   : > { %v12349_v24 = vadd.f32 %v12348_v57, %v12347_v48  ;;  %v12413_v2 = vadd.f32 %v12412_v1, %v12411_v37  ;;  %v12350_v54 = vpop.f32.mrb[58].mxu1  ;;  %v12414_v26 = vpop.f32.mrb[58].mxu0  ;;  %v14891_v57 = vld [vmem:[%s18700_s1 + $0x348] sm:$0xff]  }
 0x16c   : > { %v12351_v7 = vpop.f32.mrb[59].mxu1  ;;  %v12415_v60 = vpop.f32.mrb[59].mxu0 }
 0x16d   : > { %v15993_v12 = vadd.f32 %v12349_v24, %v1728_v52  ;;  %v15996_v45 = vadd.f32 %v12413_v2, %v15817_v10  ;;  %v12352_v15 = vadd.f32 %v12351_v7, %v12350_v54  ;;  %v12416_v47 = vadd.f32 %v12415_v60, %v12414_v26 }
 0x16e   : > { %v1739_v10 = vadd.f32 %v15915_v31, %v15764_v58  ;;  %v14890_v31 = vld [vmem:[%s18700_s1 + $0x388] sm:$0xff]   ;;  %v1744_v52 = vadd.f32 %v15714_v38, %v15764_v58  ;;  %v1747_v26 = vadd.f32 %v15718_v50, %v15764_v58  ;;  %v1752_v50 = vadd.f32 %v15725_v3, %v15764_v58 }
 0x16f   : > { %v15998_v33 = vadd.f32 %v12352_v15, %v1731_v28  ;;  %v16001_v43 = vadd.f32 %v12416_v47, %v15822_v4  ;;  %12857 = vmatprep.subr.bf16.mxu1 %v14890_v31 }
 0x170   : > { %12858 = vmatpush3.bf16.msra.mxu1 %v14891_v57 }
 0x171   : > { %v12353_v40 = vpop.f32.mrb[60].mxu1  ;;  %v12417_v35 = vpop.f32.mrb[60].mxu0 }
 0x172   : > { %v12354_v27 = vpop.f32.mrb[61].mxu1  ;;  %v12418_v34 = vpop.f32.mrb[61].mxu0 }
 0x173   : > { %v12355_v13 = vadd.f32 %v12354_v27, %v12353_v40  ;;  %v12419_v63 = vadd.f32 %v12418_v34, %v12417_v35  ;;  %v12356_v20 = vpop.f32.mrb[62].mxu1  ;;  %v12420_v56 = vpop.f32.mrb[62].mxu0 }
 0x174   : > { %v12357_v41 = vpop.f32.mrb[63].mxu1  ;;  %v12421_v9 = vpop.f32.mrb[63].mxu0 }
 0x175   : > { %v16007_v42 = vadd.f32 %v12355_v13, %v1736_v46  ;;  %v16010_v4 = vadd.f32 %v12419_v63, %v15832_v8  ;;  %v12358_v55 = vadd.f32 %v12357_v41, %v12356_v20  ;;  %v12422_v48 = vadd.f32 %v12421_v9, %v12420_v56 }
 0x177   : > { %v16012_v37 = vadd.f32 %v12358_v55, %v1739_v10  ;;  %v16015_v44 = vadd.f32 %v12422_v48, %v15838_v11 }
 0x179   : > { %v12359_v49 = vpop.f32.mrb[64].mxu1  ;;  %v12423_v32 = vpop.f32.mrb[64].mxu0 }
 0x17a   : > { %v12360_v1 = vpop.f32.mrb[65].mxu1  ;;  %v12424_v8 = vpop.f32.mrb[65].mxu0 }
 0x17b   : > { %v12361_v24 = vadd.f32 %v12360_v1, %v12359_v49  ;;  %v12425_v2 = vadd.f32 %v12424_v8, %v12423_v32  ;;  %v12362_v54 = vpop.f32.mrb[66].mxu1  ;;  %v12426_v11 = vpop.f32.mrb[66].mxu0  ;;  %v14893_v1 = vld [vmem:[%s18700_s1 + $0x350] sm:$0xff]  }
 0x17c   : > { %v12363_v28 = vpop.f32.mrb[67].mxu1  ;;  %v12427_v7 = vpop.f32.mrb[67].mxu0 }
 0x17d   : > { %v16027_v60 = vadd.f32 %v12361_v24, %v1744_v52  ;;  %v16030_v15 = vadd.f32 %v12425_v2, %v15853_v6  ;;  %v12364_v47 = vadd.f32 %v12363_v28, %v12362_v54  ;;  %v12428_v40 = vadd.f32 %v12427_v7, %v12426_v11 }
 0x17e   : > { %v1755_v6 = vadd.f32 %v15729_v17, %v15764_v58  ;;  %v14892_v17 = vld [vmem:[%s18700_s1 + $0x390] sm:$0xff]   ;;  %v1760_v52 = vadd.f32 %v15743_v14, %v15764_v58  ;;  %v1763_v11 = vadd.f32 %v15747_v19, %v15764_v58  ;;  %v1768_v19 = vadd.f32 %v15755_v36, %v15764_v58 }
 0x17f   : > { %v16032_v35 = vadd.f32 %v12364_v47, %v1747_v26  ;;  %v16035_v38 = vadd.f32 %v12428_v40, %v15857_v5  ;;  %12859 = vmatprep.subr.bf16.mxu1 %v14892_v17 }
 0x180   : > { %12860 = vmatpush3.bf16.msra.mxu1 %v14893_v1 }
 0x181   : > { %v12365_v27 = vpop.f32.mrb[68].mxu1  ;;  %v12429_v34 = vpop.f32.mrb[68].mxu0 }
 0x182   : > { %v12366_v46 = vpop.f32.mrb[69].mxu1  ;;  %v12430_v13 = vpop.f32.mrb[69].mxu0 }
 0x183   : > { %v12367_v63 = vadd.f32 %v12366_v46, %v12365_v27  ;;  %v12431_v20 = vadd.f32 %v12430_v13, %v12429_v34  ;;  %v12368_v56 = vpop.f32.mrb[70].mxu1  ;;  %v12432_v10 = vpop.f32.mrb[70].mxu0 }
 0x184   : > { %v12369_v41 = vpop.f32.mrb[71].mxu1  ;;  %v12433_v9 = vpop.f32.mrb[71].mxu0 }
 0x185   : > { %v16041_v55 = vadd.f32 %v12367_v63, %v1752_v50  ;;  %v16044_v5 = vadd.f32 %v12431_v20, %v15865_v30  ;;  %v12370_v48 = vadd.f32 %v12369_v41, %v12368_v56  ;;  %v12434_v49 = vadd.f32 %v12433_v9, %v12432_v10 }
 0x187   : > { %v16046_v32 = vadd.f32 %v12370_v48, %v1755_v6  ;;  %v16049_v3 = vadd.f32 %v12434_v49, %v15869_v22 }
 0x189   : > { %v12371_v31 = vpop.f32.mrb[72].mxu1  ;;  %v12435_v57 = vpop.f32.mrb[72].mxu0 }
 0x18a   : > { %v12372_v8 = vpop.f32.mrb[73].mxu1  ;;  %v12436_v30 = vpop.f32.mrb[73].mxu0 }
 0x18b   : > { %v12373_v24 = vadd.f32 %v12372_v8, %v12371_v31  ;;  %v12437_v2 = vadd.f32 %v12436_v30, %v12435_v57  ;;  %v12374_v54 = vpop.f32.mrb[74].mxu1  ;;  %v12438_v22 = vpop.f32.mrb[74].mxu0 }
 0x18c   : > { %v12375_v26 = vpop.f32.mrb[75].mxu1  ;;  %v12439_v28 = vpop.f32.mrb[75].mxu0 }
 0x18d   : > { %v16061_v7 = vadd.f32 %v12373_v24, %v1760_v52  ;;  %v16064_v47 = vadd.f32 %v12437_v2, %v15889_v53  ;;  %v12376_v40 = vadd.f32 %v12375_v26, %v12374_v54  ;;  %v12440_v27 = vadd.f32 %v12439_v28, %v12438_v22  ;;  %v14895_v28 = vld [vmem:[%s18700_s1 + $0x358] sm:$0xff]  }
 0x18e   : > { %v1771_v53 = vadd.f32 %v15759_v62, %v15764_v58 }
 0x18f   : > { %v16066_v34 = vadd.f32 %v12376_v40, %v1763_v11  ;;  %v16069_v14 = vadd.f32 %v12440_v27, %v15896_v0 }
 0x191   : > { %v12377_v46 = vpop.f32.mrb[76].mxu1  ;;  %v12441_v13 = vpop.f32.mrb[76].mxu0 }
 0x192   : > { %v12378_v50 = vpop.f32.mrb[77].mxu1  ;;  %v12442_v63 = vpop.f32.mrb[77].mxu0 }
 0x193   : > { %v12379_v20 = vadd.f32 %v12378_v50, %v12377_v46  ;;  %v12443_v56 = vadd.f32 %v12442_v63, %v12441_v13  ;;  %v12380_v10 = vpop.f32.mrb[78].mxu1  ;;  %v12444_v6 = vpop.f32.mrb[78].mxu0 }
 0x194   : > { %v12381_v41 = vpop.f32.mrb[79].mxu1  ;;  %v12445_v9 = vpop.f32.mrb[79].mxu0 }
 0x195   : > { %v16075_v48 = vadd.f32 %v12379_v20, %v1768_v19  ;;  %v16078_v0 = vadd.f32 %v12443_v56, %v15913_v23  ;;  %v12382_v49 = vadd.f32 %v12381_v41, %v12380_v10  ;;  %v12446_v31 = vadd.f32 %v12445_v9, %v12444_v6  ;;  %v14897_v9 = vld [vmem:[%s18700_s1 + $0x360] sm:$0xff]  }
 0x197   : > { %v16080_v57 = vadd.f32 %v12382_v49, %v1771_v53  ;;  %v16083_v36 = vadd.f32 %v12446_v31, %v15920_v61  ;;  %v14894_v61 = vld [vmem:[%s18700_s1 + $0x398] sm:$0xff]  }
 0x198   : > { %12861 = vmatprep.subr.bf16.mxu1 %v14894_v61 }
 0x199   : > { %v12447_v17 = vpop.f32.mrb[80].mxu0  ;;  %v12511_v1 = vpop.f32.mrb[80].mxu1  ;;  %12862 = vmatpush3.bf16.msra.mxu1 %v14895_v28 }
 0x19a   : > { %v12448_v8 = vpop.f32.mrb[81].mxu0  ;;  %v12512_v30 = vpop.f32.mrb[81].mxu1 }
 0x19b   : > { %v12449_v52 = vadd.f32 %v12448_v8, %v12447_v17  ;;  %v12513_v62 = vadd.f32 %v12512_v30, %v12511_v1  ;;  %v12450_v58 = vpop.f32.mrb[82].mxu0  ;;  %v12514_v24 = vpop.f32.mrb[82].mxu1 }
 0x19c   : > { %v12451_v2 = vpop.f32.mrb[83].mxu0  ;;  %v12515_v54 = vpop.f32.mrb[83].mxu1 }
 0x19d   : > { %v16086_v23 = vadd.f32 %v12449_v52, %v15941_v29  ;;  %v12452_v22 = vadd.f32 %v12451_v2, %v12450_v58  ;;  %v12516_v11 = vadd.f32 %v12515_v54, %v12514_v24  ;;  %v16089_v26 = vadd.f32 %v12513_v62, %v15944_v59 }
 0x19f   : > { %v16098_v40 = vadd.f32 %v12452_v22, %v15949_v18  ;;  %v16101_v27 = vadd.f32 %v12516_v11, %v15952_v21  ;;  %v14896_v18 = vld [vmem:[%s18700_s1 + $0x3a0] sm:$0xff]  }
 0x1a0   : > { %12863 = vmatprep.subr.bf16.mxu1 %v14896_v18 }
 0x1a1   : > { %v12453_v29 = vpop.f32.mrb[84].mxu0  ;;  %v12517_v46 = vpop.f32.mrb[84].mxu1  ;;  %12864 = vmatpush3.bf16.msra.mxu1 %v14897_v9 }
 0x1a2   : > { %v12454_v59 = vpop.f32.mrb[85].mxu0  ;;  %v12518_v13 = vpop.f32.mrb[85].mxu1 }
 0x1a3   : > { %v12455_v50 = vadd.f32 %v12454_v59, %v12453_v29  ;;  %v12519_v63 = vadd.f32 %v12518_v13, %v12517_v46  ;;  %v12456_v19 = vpop.f32.mrb[86].mxu0  ;;  %v12520_v20 = vpop.f32.mrb[86].mxu1 }
 0x1a4   : > { %v12457_v56 = vpop.f32.mrb[87].mxu0  ;;  %v12521_v10 = vpop.f32.mrb[87].mxu1 }
 0x1a5   : > { %v16107_v6 = vadd.f32 %v12455_v50, %v15967_v25  ;;  %v12458_v21 = vadd.f32 %v12457_v56, %v12456_v19  ;;  %v12522_v53 = vadd.f32 %v12521_v10, %v12520_v20  ;;  %v16110_v41 = vadd.f32 %v12519_v63, %v15970_v39  ;;  %v14899_v10 = vld [vmem:[%s18700_s1 + $0x368] sm:$0xff]  }
 0x1a7   : > { %v16116_v49 = vadd.f32 %v12458_v21, %v15975_v16  ;;  %v16119_v31 = vadd.f32 %v12522_v53, %v15978_v51 }
 0x1a9   : > { %v12459_v17 = vpop.f32.mrb[88].mxu0  ;;  %v12523_v25 = vpop.f32.mrb[88].mxu1 }
 0x1aa   : > { %v12460_v1 = vpop.f32.mrb[89].mxu0  ;;  %v12524_v8 = vpop.f32.mrb[89].mxu1 }
 0x1ab   : > { %v12461_v30 = vadd.f32 %v12460_v1, %v12459_v17  ;;  %v12525_v52 = vadd.f32 %v12524_v8, %v12523_v25  ;;  %v12462_v39 = vpop.f32.mrb[90].mxu0  ;;  %v12526_v62 = vpop.f32.mrb[90].mxu1 }
 0x1ac   : > { %v12463_v58 = vpop.f32.mrb[91].mxu0  ;;  %v12527_v24 = vpop.f32.mrb[91].mxu1 }
 0x1ad   : > { %v16122_v2 = vadd.f32 %v12461_v30, %v15993_v12  ;;  %v12464_v54 = vadd.f32 %v12463_v58, %v12462_v39  ;;  %v12528_v16 = vadd.f32 %v12527_v24, %v12526_v62  ;;  %v16125_v22 = vadd.f32 %v12525_v52, %v15996_v45  ;;  %v14898_v45 = vld [vmem:[%s18700_s1 + $0x3a8] sm:$0xff]  }
 0x1ae   : > { %12865 = vmatprep.subr.bf16.mxu1 %v14898_v45 }
 0x1af   : > { %v16128_v51 = vadd.f32 %v12464_v54, %v15998_v33  ;;  %v16131_v11 = vadd.f32 %v12528_v16, %v16001_v43  ;;  %12866 = vmatpush3.bf16.msra.mxu1 %v14899_v10 }
 0x1b1   : > { %v12465_v61 = vpop.f32.mrb[92].mxu0  ;;  %v12529_v28 = vpop.f32.mrb[92].mxu1 }
 0x1b2   : > { %v12466_v29 = vpop.f32.mrb[93].mxu0  ;;  %v12530_v46 = vpop.f32.mrb[93].mxu1 }
 0x1b3   : > { %v12467_v59 = vadd.f32 %v12466_v29, %v12465_v61  ;;  %v12531_v13 = vadd.f32 %v12530_v46, %v12529_v28  ;;  %v12468_v50 = vpop.f32.mrb[94].mxu0  ;;  %v12532_v12 = vpop.f32.mrb[94].mxu1 }
 0x1b4   : > { %v12469_v63 = vpop.f32.mrb[95].mxu0  ;;  %v12533_v19 = vpop.f32.mrb[95].mxu1 }
 0x1b5   : > { %v16137_v33 = vadd.f32 %v12467_v59, %v16007_v42  ;;  %v12470_v20 = vadd.f32 %v12469_v63, %v12468_v50  ;;  %v12534_v43 = vadd.f32 %v12533_v19, %v12532_v12  ;;  %v16140_v56 = vadd.f32 %v12531_v13, %v16010_v4  ;;  %v14901_v19 = vld [vmem:[%s18700_s1 + $0x370] sm:$0xff]  }
 0x1b7   : > { %v16146_v18 = vadd.f32 %v12470_v20, %v16012_v37  ;;  %v16149_v21 = vadd.f32 %v12534_v43, %v16015_v44 }
 0x1b9   : > { %v12471_v53 = vpop.f32.mrb[96].mxu0  ;;  %v12535_v42 = vpop.f32.mrb[96].mxu1 }
 0x1ba   : > { %v12472_v9 = vpop.f32.mrb[97].mxu0  ;;  %v12536_v17 = vpop.f32.mrb[97].mxu1 }
 0x1bb   : > { %v12473_v25 = vadd.f32 %v12472_v9, %v12471_v53  ;;  %v12537_v1 = vadd.f32 %v12536_v17, %v12535_v42  ;;  %v12474_v4 = vpop.f32.mrb[98].mxu0  ;;  %v12538_v8 = vpop.f32.mrb[98].mxu1 }
 0x1bc   : > { %v12475_v30 = vpop.f32.mrb[99].mxu0  ;;  %v12539_v52 = vpop.f32.mrb[99].mxu1 }
 0x1bd   : > { %v16152_v39 = vadd.f32 %v12473_v25, %v16027_v60  ;;  %v12476_v62 = vadd.f32 %v12475_v30, %v12474_v4  ;;  %v12540_v37 = vadd.f32 %v12539_v52, %v12538_v8  ;;  %v16155_v58 = vadd.f32 %v12537_v1, %v16030_v15  ;;  %v14900_v15 = vld [vmem:[%s18700_s1 + $0x3b0] sm:$0xff]  }
 0x1be   : > { %12867 = vmatprep.subr.bf16.mxu1 %v14900_v15  ;;  %v14908_v15 = vld [vmem:[%s18700_s1 + $0x378] sm:$0xff]  }
 0x1bf   : > { %v16158_v44 = vadd.f32 %v12476_v62, %v16032_v35  ;;  %v16161_v24 = vadd.f32 %v12540_v37, %v16035_v38  ;;  %12868 = vmatpush3.bf16.msra.mxu1 %v14901_v19 }
 0x1c1   : > { %v12477_v54 = vpop.f32.mrb[100].mxu0  ;;  %v12541_v16 = vpop.f32.mrb[100].mxu1 }
 0x1c2   : > { %v12478_v61 = vpop.f32.mrb[101].mxu0  ;;  %v12542_v28 = vpop.f32.mrb[101].mxu1 }
 0x1c3   : > { %v12479_v29 = vadd.f32 %v12478_v61, %v12477_v54  ;;  %v12543_v46 = vadd.f32 %v12542_v28, %v12541_v16  ;;  %v12480_v59 = vpop.f32.mrb[102].mxu0  ;;  %v12544_v60 = vpop.f32.mrb[102].mxu1 }
 0x1c4   : > { %v12481_v13 = vpop.f32.mrb[103].mxu0  ;;  %v12545_v50 = vpop.f32.mrb[103].mxu1 }
 0x1c5   : > { %v16167_v35 = vadd.f32 %v12479_v29, %v16041_v55  ;;  %v12482_v12 = vadd.f32 %v12481_v13, %v12480_v59  ;;  %v12546_v38 = vadd.f32 %v12545_v50, %v12544_v60  ;;  %v16170_v63 = vadd.f32 %v12543_v46, %v16044_v5  ;;  %v14902_v5 = vld [vmem:[%s18700_s1 + $0x400] sm:$0xff]  }
 0x1c6   : > { %12967 = vmatprep.subr.bf16.mxu0 %v14902_v5 }
 0x1c7   : > { %v16176_v45 = vadd.f32 %v12482_v12, %v16046_v32  ;;  %v16179_v20 = vadd.f32 %v12546_v38, %v16049_v3 }
 0x1c9   : > { %v12483_v43 = vpop.f32.mrb[104].mxu0  ;;  %v12547_v55 = vpop.f32.mrb[104].mxu1 }
 0x1ca   : > { %v12484_v10 = vpop.f32.mrb[105].mxu0  ;;  %v12548_v53 = vpop.f32.mrb[105].mxu1 }
 0x1cb   : > { %v12485_v42 = vadd.f32 %v12484_v10, %v12483_v43  ;;  %v12549_v9 = vadd.f32 %v12548_v53, %v12547_v55  ;;  %v12486_v17 = vpop.f32.mrb[106].mxu0  ;;  %v12550_v25 = vpop.f32.mrb[106].mxu1 }
 0x1cc   : > { %v12487_v1 = vpop.f32.mrb[107].mxu0  ;;  %v12551_v4 = vpop.f32.mrb[107].mxu1 }
 0x1cd   : > { %v16185_v32 = vadd.f32 %v12485_v42, %v16061_v7  ;;  %v12488_v3 = vadd.f32 %v12487_v1, %v12486_v17  ;;  %v12552_v8 = vadd.f32 %v12551_v4, %v12550_v25  ;;  %v16188_v30 = vadd.f32 %v12549_v9, %v16064_v47  ;;  %v14906_v47 = vld [vmem:[%s18700_s1 + $0x3b8] sm:$0xff]  }
 0x1ce   : > { %12869 = vmatprep.subr.bf16.mxu1 %v14906_v47 }
 0x1cf   : > { %v16191_v52 = vadd.f32 %v12488_v3, %v16066_v34  ;;  %v16194_v62 = vadd.f32 %v12552_v8, %v16069_v14  ;;  %12870 = vmatpush3.bf16.msra.mxu1 %v14908_v15 }
 0x1d1   : > { %v12489_v37 = vpop.f32.mrb[108].mxu0  ;;  %v12553_v54 = vpop.f32.mrb[108].mxu1 }
 0x1d2   : > { %v12490_v16 = vpop.f32.mrb[109].mxu0  ;;  %v12554_v61 = vpop.f32.mrb[109].mxu1 }
 0x1d3   : > { %v12491_v28 = vadd.f32 %v12490_v16, %v12489_v37  ;;  %v12555_v29 = vadd.f32 %v12554_v61, %v12553_v54  ;;  %v12492_v46 = vpop.f32.mrb[110].mxu0  ;;  %v12556_v7 = vpop.f32.mrb[110].mxu1 }
 0x1d4   : > { %v12493_v59 = vpop.f32.mrb[111].mxu0  ;;  %v12557_v60 = vpop.f32.mrb[111].mxu1 }
 0x1d5   : > { %v16200_v34 = vadd.f32 %v12491_v28, %v16075_v48  ;;  %v12494_v13 = vadd.f32 %v12493_v59, %v12492_v46  ;;  %v12558_v14 = vadd.f32 %v12557_v60, %v12556_v7  ;;  %v16203_v50 = vadd.f32 %v12555_v29, %v16078_v0 }
 0x1d7   : > { %v16209_v12 = vadd.f32 %v12494_v13, %v16080_v57  ;;  %v16212_v38 = vadd.f32 %v12558_v14, %v16083_v36  ;;  %v16230_v13 = vld [vmem:[%s18700_s1 + $0x440] sm:$0xff]  }
 0x1d8   : > { %14567 = vmatprep.subr.bf16.mxu1 %v16230_v13 }
 0x1d9   : > { %v12559_v19 = vpop.f32.mrb[112].mxu1  ;;  %v14537_v48 = vpop.f32.mrb[112].mxu0 }
 0x1da   : > { %v2300_v43 = vadd.f32 %v14537_v48, %v16110_v41  ;;  %v12560_v55 = vpop.f32.mrb[113].mxu1  ;;  %v2291_v10 = vpop.f32.mrb[113].mxu0  ;;  %v2611_v48 = vld [vmem:[#allocation2 + $0x11] sm:$0xff] }
 0x1db   : > { %v12561_v0 = vadd.f32 %v12560_v55, %v12559_v19  ;;  %v2292_v53 = vadd.f32 %v2291_v10, %v16089_v26  ;;  %v12562_v5 = vpop.f32.mrb[114].mxu1  ;;  %v14538_v42 = vpop.f32.mrb[114].mxu0  ;;  %v2610_v19 = vld [vmem:[#allocation2 + $0x9] sm:$0xff] }
 0x1dc   : > { %v2420_v9 = vmax.f32 %v2300_v43, 0.0  ;;  %v2303_v17 = vadd.f32 %v14538_v42, %v16119_v31  ;;  %v12563_v57 = vpop.f32.mrb[115].mxu1  ;;  %v2294_v25 = vpop.f32.mrb[115].mxu0 }
 0x1dd   : > { %v2418_v1 = vmax.f32 %v2292_v53, 0.0  ;;  %v12564_v36 = vadd.f32 %v12563_v57, %v12562_v5  ;;  %v2295_v4 = vadd.f32 %v2294_v25, %v16101_v27  ;;  %v16219_v3 = vadd.f32 %v12561_v0, %v16086_v23  ;;  %v14903_v57 = vld [vmem:[%s18700_s1 + $0x3c0] sm:$0xff]  }
 0x1de   : > { %2452 = vst [vmem:[#allocation2 + $0x48] sm:$0xff] %v2420_v9  ;;  %v2421_v41 = vmax.f32 %v2303_v17, 0.0  ;;  %v2642_v53 = vpack.c.bf16 %v2611_v48, %v2610_v19  ;;  %v14909_v19 = vld [vmem:[%s18700_s1 + $0x3d0] sm:$0xff]  }
 0x1df   : > { %2450 = vst [vmem:[#allocation2 + $0x28] sm:$0xff] %v2418_v1  ;;  %v2419_v8 = vmax.f32 %v2295_v4, 0.0  ;;  %v16222_v26 = vadd.f32 %v12564_v36, %v16098_v40  ;;  %v14904_v4 = vld [vmem:[%s18700_s1 + $0x408] sm:$0xff]  }
 0x1e0   : > { %2453 = vst [vmem:[#allocation2 + $0x50] sm:$0xff] %v2421_v41  ;;  %v2580_v37 = vpack.c.bf16 %v2421_v41, %v2420_v9 }
 0x1e1   : > { %2451 = vst [vmem:[#allocation2 + $0x30] sm:$0xff] %v2419_v8  ;;  %v12565_v31 = vpop.f32.mrb[116].mxu1  ;;  %v14541_v54 = vpop.f32.mrb[116].mxu0  ;;  %v2579_v16 = vpack.c.bf16 %v2419_v8, %v2418_v1 }
 0x1e2   : > { %v2316_v61 = vadd.f32 %v14541_v54, %v16140_v56  ;;  %v12566_v28 = vpop.f32.mrb[117].mxu1  ;;  %v2307_v27 = vpop.f32.mrb[117].mxu0 }
 0x1e3   : > { %v12567_v29 = vadd.f32 %v12566_v28, %v12565_v31  ;;  %v2308_v23 = vadd.f32 %v2307_v27, %v16125_v22  ;;  %v12568_v46 = vpop.f32.mrb[118].mxu1  ;;  %v14542_v7 = vpop.f32.mrb[118].mxu0  ;;  %3827 = vmatprep.mubr.bf16.mxu1 %v2579_v16 }
 0x1e4   : > { %v2424_v59 = vmax.f32 %v2316_v61, 0.0  ;;  %v2319_v40 = vadd.f32 %v14542_v7, %v16149_v21  ;;  %v12569_v60 = vpop.f32.mrb[119].mxu1  ;;  %v2310_v47 = vpop.f32.mrb[119].mxu0  ;;  %v14905_v7 = vld [vmem:[%s18700_s1 + $0x3c8] sm:$0xff]  }
 0x1e5   : > { %v2422_v14 = vmax.f32 %v2308_v23, 0.0  ;;  %v12570_v56 = vadd.f32 %v12569_v60, %v12568_v46  ;;  %v2311_v15 = vadd.f32 %v2310_v47, %v16131_v11  ;;  %v16234_v22 = vadd.f32 %v12567_v29, %v16107_v6  ;;  %v2676_v36 = vld [vmem:[#allocation2 + $0x47] sm:$0xff] }
 0x1e6   : > { %2456 = vst [vmem:[#allocation2 + $0x88] sm:$0xff] %v2424_v59  ;;  %v2425_v43 = vmax.f32 %v2319_v40, 0.0  ;;  %v2674_v10 = vld [vmem:[#allocation2 + $0x27] sm:$0xff] }
 0x1e7   : > { %2454 = vst [vmem:[#allocation2 + $0x68] sm:$0xff] %v2422_v14  ;;  %v2423_v21 = vmax.f32 %v2311_v15, 0.0  ;;  %v16238_v55 = vadd.f32 %v12570_v56, %v16116_v49  ;;  %v2677_v5 = vld [vmem:[#allocation2 + $0x4f] sm:$0xff] }
 0x1e8   : > { %2457 = vst [vmem:[#allocation2 + $0x90] sm:$0xff] %v2425_v43  ;;  %v2675_v0 = vld [vmem:[#allocation2 + $0x2f] sm:$0xff]  ;;  %v16240_v11 = vpack.c.bf16 %v2425_v43, %v2424_v59  ;;  %v16250_v16 = vpack.c.bf16 %v2677_v5, %v2676_v36 }
 0x1e9   : > { %2455 = vst [vmem:[#allocation2 + $0x70] sm:$0xff] %v2423_v21  ;;  %v12571_v42 = vpop.f32.mrb[120].mxu1  ;;  %v14545_v6 = vpop.f32.mrb[120].mxu0  ;;  %v2706_v9 = vpack.c.bf16 %v2675_v0, %v2674_v10  ;;  %v2581_v17 = vpack.c.bf16 %v2423_v21, %v2422_v14  ;;  %v2613_v40 = vld [vmem:[#allocation2 + $0x31] sm:$0xff] }
 0x1ea   : > { %v2332_v25 = vadd.f32 %v14545_v6, %v16170_v63  ;;  %v12572_v49 = vpop.f32.mrb[121].mxu1  ;;  %v2323_v1 = vpop.f32.mrb[121].mxu0  ;;  %v14910_v0 = vld [vmem:[%s18700_s1 + $0x418] sm:$0xff]  }
 0x1eb   : > { %v12573_v41 = vadd.f32 %v12572_v49, %v12571_v42  ;;  %v2324_v8 = vadd.f32 %v2323_v1, %v16155_v58  ;;  %v12574_v31 = vpop.f32.mrb[122].mxu1  ;;  %v14546_v54 = vpop.f32.mrb[122].mxu0  ;;  %3980 = vmatprep.mubr.bf16.mxu0 %v2706_v9  ;;  %3828 = vmatmul.mubr.bf16.gmra.mrb[148].mxu1 %v2706_v9 }
 0x1ec   : > { %v2428_v61 = vmax.f32 %v2332_v25, 0.0  ;;  %v2335_v28 = vadd.f32 %v14546_v54, %v16179_v20  ;;  %v12575_v63 = vpop.f32.mrb[123].mxu1  ;;  %v2326_v27 = vpop.f32.mrb[123].mxu0  ;;  %3981 = vmatmul.mubr.bf16.vlgmr.msra.gmra.mrb[144].mxu0 %v2642_v53  ;;  %3835 = vmatprep.mubr.bf16.mxu1 %v2580_v37  ;;  %v14907_v37 = vld [vmem:[%s18700_s1 + $0x410] sm:$0xff]  }
 0x1ed   : > { %v2426_v29 = vmax.f32 %v2324_v8, 0.0  ;;  %v12576_v23 = vadd.f32 %v12575_v63, %v12574_v31  ;;  %v2327_v46 = vadd.f32 %v2326_v27, %v16161_v24  ;;  %3988 = vmatprep.mubr.bf16.mxu0 %v16250_v16  ;;  %v16256_v58 = vadd.f32 %v12573_v41, %v16122_v2  ;;  %12968 = vmatpush3.bf16.msra.mxu0 %v14903_v57  ;;  %v2612_v24 = vld [vmem:[#allocation2 + $0x29] sm:$0xff]  ;;  %v14911_v41 = vld [vmem:[%s18700_s1 + $0x3d8] sm:$0xff]  }
 0x1ee   : > { %2460 = vst [vmem:[#allocation2 + $0xc8] sm:$0xff] %v2428_v61  ;;  %v2429_v20 = vmax.f32 %v2335_v28, 0.0  ;;  %12969 = vmatprep.subr.bf16.mxu0 %v14904_v4  ;;  %v2678_v10 = vld [vmem:[#allocation2 + $0x67] sm:$0xff]  ;;  %v2615_v31 = vld [vmem:[#allocation2 + $0x51] sm:$0xff] }
 0x1ef   : > { %2458 = vst [vmem:[#allocation2 + $0xa8] sm:$0xff] %v2426_v29  ;;  %v2427_v59 = vmax.f32 %v2327_v46, 0.0  ;;  %v16265_v60 = vadd.f32 %v12576_v23, %v16128_v51  ;;  %v16275_v51 = vpack.c.bf16 %v2613_v40, %v2612_v24 }
 0x1f0   : > { %2461 = vst [vmem:[#allocation2 + $0xd0] sm:$0xff] %v2429_v20  ;;  %v2679_v2 = vld [vmem:[#allocation2 + $0x6f] sm:$0xff]  ;;  %v16267_v47 = vpack.c.bf16 %v2429_v20, %v2428_v61  ;;  %v2680_v20 = vld [vmem:[#allocation2 + $0x87] sm:$0xff] }
 0x1f1   : > { %2459 = vst [vmem:[#allocation2 + $0xb0] sm:$0xff] %v2427_v59  ;;  %v12577_v14 = vpop.f32.mrb[124].mxu1  ;;  %v14549_v56 = vpop.f32.mrb[124].mxu0  ;;  %v16269_v15 = vpack.c.bf16 %v2427_v59, %v2426_v29  ;;  %12970 = vmatpush3.bf16.msra.mxu0 %v14905_v7  ;;  %v16282_v9 = vpack.c.bf16 %v2679_v2, %v2678_v10  ;;  %v14913_v29 = vld [vmem:[%s18700_s1 + $0x3e0] sm:$0xff]  }
 0x1f2   : > { %v2348_v48 = vadd.f32 %v14549_v56, %v16203_v50  ;;  %v12578_v43 = vpop.f32.mrb[125].mxu1  ;;  %v2339_v21 = vpop.f32.mrb[125].mxu0  ;;  %12971 = vmatprep.subr.bf16.mxu0 %v14907_v37  ;;  %v14914_v37 = vld [vmem:[%s18700_s1 + $0x428] sm:$0xff]  }
 0x1f3   : > { %v12579_v53 = vadd.f32 %v12578_v43, %v12577_v14  ;;  %v2340_v5 = vadd.f32 %v2339_v21, %v16188_v30  ;;  %v12580_v42 = vpop.f32.mrb[126].mxu1  ;;  %v14550_v6 = vpop.f32.mrb[126].mxu0  ;;  %3836 = vmatmul.mubr.bf16.gmra.mrb[152].mxu1 %v16250_v16 }
 0x1f4   : > { %v2432_v50 = vmax.f32 %v2348_v48, 0.0  ;;  %v2351_v57 = vadd.f32 %v14550_v6, %v16212_v38  ;;  %v12581_v25 = vpop.f32.mrb[127].mxu1  ;;  %v2342_v49 = vpop.f32.mrb[127].mxu0  ;;  %3989 = vmatmul.mubr.bf16.gmra.mrb[148].mxu0 %v16275_v51  ;;  %3843 = vmatprep.mubr.bf16.mxu1 %v2581_v17  ;;  %v14912_v17 = vld [vmem:[%s18700_s1 + $0x420] sm:$0xff]  }
 0x1f5   : > { %v2430_v1 = vmax.f32 %v2340_v5, 0.0  ;;  %v12582_v36 = vadd.f32 %v12581_v25, %v12580_v42  ;;  %v2343_v4 = vadd.f32 %v2342_v49, %v16194_v62  ;;  %3996 = vmatprep.mubr.bf16.mxu0 %v16282_v9  ;;  %v16289_v30 = vadd.f32 %v12579_v53, %v16137_v33  ;;  %12972 = vmatpush3.bf16.msra.mxu0 %v14909_v19  ;;  %v2614_v62 = vld [vmem:[#allocation2 + $0x49] sm:$0xff]  ;;  %v2617_v5 = vld [vmem:[#allocation2 + $0x71] sm:$0xff] }
 0x1f6   : > { %2464 = vst [vmem:[#allocation2 + $0x108] sm:$0xff] %v2432_v50  ;;  %v2433_v38 = vmax.f32 %v2351_v57, 0.0  ;;  %12973 = vmatprep.subr.bf16.mxu0 %v14910_v0  ;;  %v2681_v33 = vld [vmem:[#allocation2 + $0x8f] sm:$0xff] }
 0x1f7   : > { %2462 = vst [vmem:[#allocation2 + $0xe8] sm:$0xff] %v2430_v1  ;;  %v2431_v8 = vmax.f32 %v2343_v4, 0.0  ;;  %v16298_v54 = vadd.f32 %v12582_v36, %v16146_v18  ;;  %v16308_v18 = vpack.c.bf16 %v2615_v31, %v2614_v62  ;;  %v16315_v14 = vpack.c.bf16 %v2681_v33, %v2680_v20  ;;  %v14918_v49 = vld [vmem:[%s18700_s1 + $0x3f0] sm:$0xff]   ;;  %v14920_v20 = vld [vmem:[%s18700_s1 + $0x3f8] sm:$0xff]  }
 0x1f8   : > { %2465 = vst [vmem:[#allocation2 + $0x110] sm:$0xff] %v2433_v38  ;;  %v16300_v61 = vpack.c.bf16 %v2433_v38, %v2432_v50  ;;  %v14919_v38 = vld [vmem:[%s18700_s1 + $0x438] sm:$0xff]  }
 0x1f9   : > { %2463 = vst [vmem:[#allocation2 + $0xf0] sm:$0xff] %v2431_v8  ;;  %v12583_v28 = vpop.f32.mrb[128].mxu1  ;;  %v14553_v63 = vpop.f32.mrb[128].mxu0  ;;  %v16302_v27 = vpack.c.bf16 %v2431_v8, %v2430_v1  ;;  %12974 = vmatpush3.bf16.msra.mxu0 %v14911_v41  ;;  %v2682_v41 = vld [vmem:[#allocation2 + $0xa7] sm:$0xff] }
 0x1fa   : > { %v2364_v23 = vadd.f32 %v14553_v63, %v16234_v22  ;;  %v12584_v46 = vpop.f32.mrb[129].mxu1  ;;  %v2355_v7 = vpop.f32.mrb[129].mxu0  ;;  %12975 = vmatprep.subr.bf16.mxu0 %v14912_v17 }
 0x1fb   : > { %v12585_v59 = vadd.f32 %v12584_v46, %v12583_v28  ;;  %v2356_v24 = vadd.f32 %v2355_v7, %v16219_v3  ;;  %v12586_v40 = vpop.f32.mrb[130].mxu1  ;;  %v14554_v2 = vpop.f32.mrb[130].mxu0  ;;  %3844 = vmatmul.mubr.bf16.gmra.mrb[156].mxu1 %v16282_v9 }
 0x1fc   : > { %v2436_v22 = vmax.f32 %v2364_v23, 0.0  ;;  %v2367_v56 = vadd.f32 %v14554_v2, %v16238_v55  ;;  %v12587_v19 = vpop.f32.mrb[131].mxu1  ;;  %v2358_v48 = vpop.f32.mrb[131].mxu0  ;;  %3997 = vmatmul.mubr.bf16.gmra.mrb[152].mxu0 %v16308_v18  ;;  %3851 = vmatprep.mubr.bf16.mxu1 %v16240_v11  ;;  %v14915_v55 = vld [vmem:[%s18700_s1 + $0x3e8] sm:$0xff]   ;;  %v14916_v11 = vld [vmem:[%s18700_s1 + $0x430] sm:$0xff]  }
 0x1fd   : > { %v2434_v43 = vmax.f32 %v2356_v24, 0.0  ;;  %v12588_v21 = vadd.f32 %v12587_v19, %v12586_v40  ;;  %v2359_v10 = vadd.f32 %v2358_v48, %v16222_v26  ;;  %4004 = vmatprep.mubr.bf16.mxu0 %v16315_v14  ;;  %v16323_v3 = vadd.f32 %v12585_v59, %v16152_v39  ;;  %12976 = vmatpush3.bf16.msra.mxu0 %v14913_v29  ;;  %v2616_v26 = vld [vmem:[#allocation2 + $0x69] sm:$0xff]  ;;  %v2619_v24 = vld [vmem:[#allocation2 + $0x91] sm:$0xff] }
 0x1fe   : > { %2468 = vst [vmem:[#allocation2 + $0x148] sm:$0xff] %v2436_v22  ;;  %v2437_v0 = vmax.f32 %v2367_v56, 0.0  ;;  %12977 = vmatprep.subr.bf16.mxu0 %v14914_v37  ;;  %v2683_v39 = vld [vmem:[#allocation2 + $0xaf] sm:$0xff] }
 0x1ff   : > { %2466 = vst [vmem:[#allocation2 + $0x128] sm:$0xff] %v2434_v43  ;;  %v2435_v53 = vmax.f32 %v2359_v10, 0.0  ;;  %v16332_v42 = vadd.f32 %v12588_v21, %v16158_v44  ;;  %v16342_v44 = vpack.c.bf16 %v2617_v5, %v2616_v26  ;;  %v16349_v33 = vpack.c.bf16 %v2683_v39, %v2682_v41  ;;  %v2618_v59 = vld [vmem:[#allocation2 + $0x89] sm:$0xff] }
 0x200   : > { %2469 = vst [vmem:[#allocation2 + $0x150] sm:$0xff] %v2437_v0  ;;  %v16334_v6 = vpack.c.bf16 %v2437_v0, %v2436_v22  ;;  %v2684_v21 = vld [vmem:[#allocation2 + $0xc7] sm:$0xff] }
 0x201   : > { %2467 = vst [vmem:[#allocation2 + $0x130] sm:$0xff] %v2435_v53  ;;  %v12589_v50 = vpop.f32.mrb[132].mxu1  ;;  %v14557_v57 = vpop.f32.mrb[132].mxu0  ;;  %v16336_v25 = vpack.c.bf16 %v2435_v53, %v2434_v43  ;;  %12978 = vmatpush3.bf16.msra.mxu0 %v14915_v55  ;;  %v16365_v43 = vpack.c.bf16 %v2619_v24, %v2618_v59  ;;  %v2620_v41 = vld [vmem:[#allocation2 + $0xa9] sm:$0xff] }
 0x202   : > { %v2380_v1 = vadd.f32 %v14557_v57, %v16289_v30  ;;  %v12590_v36 = vpop.f32.mrb[133].mxu1  ;;  %v2371_v4 = vpop.f32.mrb[133].mxu0  ;;  %12979 = vmatprep.subr.bf16.mxu0 %v14916_v11 }
 0x203   : > { %v12591_v17 = vadd.f32 %v12590_v36, %v12589_v50  ;;  %v2372_v8 = vadd.f32 %v2371_v4, %v16256_v58  ;;  %v12592_v62 = vpop.f32.mrb[134].mxu1  ;;  %v14558_v31 = vpop.f32.mrb[134].mxu0  ;;  %3852 = vmatmul.mubr.bf16.gmra.mrb[160].mxu1 %v16315_v14 }
 0x204   : > { %v2440_v30 = vmax.f32 %v2380_v1, 0.0  ;;  %v2383_v28 = vadd.f32 %v14558_v31, %v16298_v54  ;;  %v12593_v63 = vpop.f32.mrb[135].mxu1  ;;  %v2374_v29 = vpop.f32.mrb[135].mxu0  ;;  %4005 = vmatmul.mubr.bf16.gmra.mrb[156].mxu0 %v16342_v44  ;;  %3859 = vmatprep.mubr.bf16.mxu1 %v16269_v15 }
 0x205   : > { %v2438_v23 = vmax.f32 %v2372_v8, 0.0  ;;  %v12594_v46 = vadd.f32 %v12593_v63, %v12592_v62  ;;  %v2375_v7 = vadd.f32 %v2374_v29, %v16265_v60  ;;  %4012 = vmatprep.mubr.bf16.mxu0 %v16349_v33  ;;  %v2235_v58 = vadd.f32 %v12591_v17, %v16167_v35  ;;  %12980 = vmatpush3.bf16.msra.mxu0 %v14918_v49  ;;  %v2685_v60 = vld [vmem:[#allocation2 + $0xcf] sm:$0xff] }
 0x206   : > { %2472 = vst [vmem:[#allocation2 + $0x188] sm:$0xff] %v2440_v30  ;;  %v2441_v54 = vmax.f32 %v2383_v28, 0.0  ;;  %12981 = vmatprep.subr.bf16.mxu0 %v14919_v38  ;;  %v16369_v11 = vpack.c.bf16 %v2685_v60, %v2684_v21  ;;  %v2621_v38 = vld [vmem:[#allocation2 + $0xb1] sm:$0xff]  ;;  %v2686_v28 = vld [vmem:[#allocation2 + $0xe7] sm:$0xff] }
 0x207   : > { %2470 = vst [vmem:[#allocation2 + $0x168] sm:$0xff] %v2438_v23  ;;  %v2439_v37 = vmax.f32 %v2375_v7, 0.0  ;;  %v2238_v15 = vadd.f32 %v12594_v46, %v16176_v45  ;;  %v2687_v17 = vld [vmem:[#allocation2 + $0xef] sm:$0xff] }
 0x208   : > { %2473 = vst [vmem:[#allocation2 + $0x190] sm:$0xff] %v2441_v54  ;;  %v16361_v40 = vpack.c.bf16 %v2441_v54, %v2440_v30  ;;  %v16384_v46 = vpack.c.bf16 %v2687_v17, %v2686_v28 }
 0x209   : > { %2471 = vst [vmem:[#allocation2 + $0x170] sm:$0xff] %v2439_v37  ;;  %v12595_v35 = vpop.f32.mrb[136].mxu1  ;;  %v14561_v2 = vpop.f32.mrb[136].mxu0  ;;  %v16363_v22 = vpack.c.bf16 %v2439_v37, %v2438_v23  ;;  %12982 = vmatpush3.bf16.msra.mxu0 %v14920_v20 }
 0x20a   : > { %v2396_v56 = vadd.f32 %v14561_v2, %v2235_v58  ;;  %v12596_v19 = vpop.f32.mrb[137].mxu1  ;;  %v2387_v48 = vpop.f32.mrb[137].mxu0  ;;  %v2623_v2 = vld [vmem:[#allocation2 + $0xd1] sm:$0xff] }
 0x20b   : > { %v12597_v10 = vadd.f32 %v12596_v19, %v12595_v35  ;;  %v2388_v45 = vadd.f32 %v2387_v48, %v16323_v3  ;;  %v12598_v55 = vpop.f32.mrb[138].mxu1  ;;  %v14562_v0 = vpop.f32.mrb[138].mxu0  ;;  %3860 = vmatmul.mubr.bf16.gmra.mrb[164].mxu1 %v16349_v33  ;;  %v2622_v35 = vld [vmem:[#allocation2 + $0xc9] sm:$0xff] }
 0x20c   : > { %v2444_v53 = vmax.f32 %v2396_v56, 0.0  ;;  %v2399_v26 = vadd.f32 %v14562_v0, %v2238_v15  ;;  %v12599_v5 = vpop.f32.mrb[139].mxu1  ;;  %v2390_v39 = vpop.f32.mrb[139].mxu0  ;;  %4013 = vmatmul.mubr.bf16.gmra.mrb[160].mxu0 %v16365_v43  ;;  %3867 = vmatprep.mubr.bf16.mxu1 %v16267_v47  ;;  %v2689_v56 = vld [vmem:[#allocation2 + $0x10f] sm:$0xff]  ;;  %v16391_v21 = vpack.c.bf16 %v2623_v2, %v2622_v35 }
 0x20d   : > { %v2442_v50 = vmax.f32 %v2388_v45, 0.0  ;;  %v12600_v57 = vadd.f32 %v12599_v5, %v12598_v55  ;;  %v2391_v49 = vadd.f32 %v2390_v39, %v16332_v42  ;;  %4020 = vmatprep.mubr.bf16.mxu0 %v16369_v11  ;;  %v2243_v3 = vadd.f32 %v12597_v10, %v16185_v32  ;;  %v2625_v55 = vld [vmem:[#allocation2 + $0xf1] sm:$0xff] }
 0x20e   : > { %2476 = vst [vmem:[#allocation2 + $0x1c8] sm:$0xff] %v2444_v53  ;;  %v2445_v1 = vmax.f32 %v2399_v26, 0.0  ;;  %v16381_v32 = vpack.c.bf16 %v2621_v38, %v2620_v41  ;;  %v2691_v0 = vld [vmem:[#allocation2 + $0x12f] sm:$0xff]  ;;  %v2690_v26 = vld [vmem:[#allocation2 + $0x127] sm:$0xff] }
 0x20f   : > { %2474 = vst [vmem:[#allocation2 + $0x1a8] sm:$0xff] %v2442_v50  ;;  %v2443_v36 = vmax.f32 %v2391_v49, 0.0  ;;  %v2246_v4 = vadd.f32 %v12600_v57, %v16191_v52  ;;  %v16404_v5 = vpack.c.bf16 %v2691_v0, %v2690_v26  ;;  %v2627_v39 = vld [vmem:[#allocation2 + $0x111] sm:$0xff]  ;;  %v2692_v49 = vld [vmem:[#allocation2 + $0x147] sm:$0xff] }
 0x210   : > { %2477 = vst [vmem:[#allocation2 + $0x1d0] sm:$0xff] %v2445_v1  ;;  %v16377_v8 = vpack.c.bf16 %v2445_v1, %v2444_v53  ;;  %v2628_v1 = vld [vmem:[#allocation2 + $0x129] sm:$0xff] }
 0x211   : > { %2475 = vst [vmem:[#allocation2 + $0x1b0] sm:$0xff] %v2443_v36  ;;  %v12601_v47 = vpop.f32.mrb[140].mxu1  ;;  %v14565_v62 = vpop.f32.mrb[140].mxu0  ;;  %v16379_v42 = vpack.c.bf16 %v2443_v36, %v2442_v50  ;;  %v2693_v50 = vld [vmem:[#allocation2 + $0x14f] sm:$0xff]  ;;  %v2694_v41 = vld [vmem:[#allocation2 + $0x167] sm:$0xff] }
 0x212   : > { %v12602_v31 = vpop.f32.mrb[141].mxu1  ;;  %v2403_v30 = vpop.f32.mrb[141].mxu0  ;;  %v2695_v36 = vld [vmem:[#allocation2 + $0x16f] sm:$0xff] }
 0x213   : > { %v12603_v63 = vadd.f32 %v12602_v31, %v12601_v47  ;;  %v2404_v29 = vadd.f32 %v2403_v30, %v2243_v3  ;;  %v12604_v23 = vpop.f32.mrb[142].mxu1  ;;  %v14566_v52 = vpop.f32.mrb[142].mxu0  ;;  %3868 = vmatmul.mubr.bf16.gmra.mrb[168].mxu1 %v16369_v11  ;;  %v16412_v3 = vpack.c.bf16 %v2693_v50, %v2692_v49  ;;  %v16420_v38 = vpack.c.bf16 %v2695_v36, %v2694_v41  ;;  %v2630_v31 = vld [vmem:[#allocation2 + $0x149] sm:$0xff]  ;;  %v2631_v30 = vld [vmem:[#allocation2 + $0x151] sm:$0xff] }
 0x214   : > { %v12605_v7 = vpop.f32.mrb[143].mxu1  ;;  %v2406_v58 = vpop.f32.mrb[143].mxu0  ;;  %4021 = vmatmul.mubr.bf16.gmra.mrb[164].mxu0 %v16381_v32  ;;  %3875 = vmatprep.mubr.bf16.mxu1 %v16302_v27  ;;  %v2688_v27 = vld [vmem:[#allocation2 + $0x107] sm:$0xff] }
 0x215   : > { %v2251_v20 = vadd.f32 %v12603_v63, %v16200_v34  ;;  %v2446_v54 = vmax.f32 %v2404_v29, 0.0  ;;  %v12606_v37 = vadd.f32 %v12605_v7, %v12604_v23  ;;  %v2407_v15 = vadd.f32 %v2406_v58, %v2246_v4  ;;  %4028 = vmatprep.mubr.bf16.mxu0 %v16384_v46  ;;  %v2697_v63 = vld [vmem:[#allocation2 + $0x18f] sm:$0xff]  ;;  %v2700_v35 = vld [vmem:[#allocation2 + $0x1c7] sm:$0xff] }
 0x216   : > { %v16396_v45 = vpack.c.bf16 %v2689_v56, %v2688_v27  ;;  %v16429_v23 = vpack.c.bf16 %v2631_v30, %v2630_v31  ;;  %v2633_v58 = vld [vmem:[#allocation2 + $0x171] sm:$0xff]  ;;  %v2738_v49 = vld [vmem:[#allocation2 + $0x28] sm:$0xff] }
 0x217   : > { %v2412_v59 = vadd.f32 %v14565_v62, %v2251_v20  ;;  %2478 = vst [vmem:[#allocation2 + $0x1e8] sm:$0xff] %v2446_v54  ;;  %v2254_v24 = vadd.f32 %v12606_v37, %v16209_v12  ;;  %v2447_v60 = vmax.f32 %v2407_v15, 0.0  ;;  %v2624_v12 = vld [vmem:[#allocation2 + $0xe9] sm:$0xff]  ;;  %v14923_v30 = vld [vmem:[%s18700_s1 + $0x458] sm:$0xff]  }
 0x218   : > { %v16401_v53 = vpack.c.bf16 %v2625_v55, %v2624_v12  ;;  %v2699_v20 = vld [vmem:[#allocation2 + $0x1af] sm:$0xff]  ;;  %v2698_v37 = vld [vmem:[#allocation2 + $0x1a7] sm:$0xff] }
 0x219   : > { %v2448_v19 = vmax.f32 %v2412_v59, 0.0  ;;  %v2415_v48 = vadd.f32 %v14566_v52, %v2254_v24  ;;  %2479 = vst [vmem:[#allocation2 + $0x1f0] sm:$0xff] %v2447_v60  ;;  %v16393_v34 = vpack.c.bf16 %v2447_v60, %v2446_v54  ;;  %v2696_v52 = vld [vmem:[#allocation2 + $0x187] sm:$0xff]  ;;  %v16440_v15 = vpack.c.bf16 %v2699_v20, %v2698_v37  ;;  %v2701_v24 = vld [vmem:[#allocation2 + $0x1cf] sm:$0xff]  ;;  %v14927_v20 = vld [vmem:[%s18700_s1 + $0x478] sm:$0xff]  }
 0x21a   : > { %v16432_v7 = vpack.c.bf16 %v2697_v63, %v2696_v52  ;;  %v2634_v59 = vld [vmem:[#allocation2 + $0x189] sm:$0xff]  ;;  %v16448_v2 = vpack.c.bf16 %v2701_v24, %v2700_v35 }
 0x21b   : > { %2480 = vst [vmem:[#allocation2 + $0x208] sm:$0xff] %v2448_v19  ;;  %v2449_v10 = vmax.f32 %v2415_v48, 0.0  ;;  %3876 = vmatmul.mubr.bf16.gmra.mrb[172].mxu1 %v16384_v46  ;;  %v2636_v56 = vld [vmem:[#allocation2 + $0x1a9] sm:$0xff] }
 0x21c   : > { %4029 = vmatmul.mubr.bf16.gmra.mrb[168].mxu0 %v16391_v21  ;;  %3883 = vmatprep.mubr.bf16.mxu1 %v16300_v61  ;;  %v2626_v61 = vld [vmem:[#allocation2 + $0x109] sm:$0xff] }
 0x21d   : > { %2481 = vst [vmem:[#allocation2 + $0x210] sm:$0xff] %v2449_v10  ;;  %4036 = vmatprep.mubr.bf16.mxu0 %v16396_v45  ;;  %v16409_v57 = vpack.c.bf16 %v2627_v39, %v2626_v61  ;;  %v2638_v12 = vld [vmem:[#allocation2 + $0x1c9] sm:$0xff] }
 0x21e   : > { %v2702_v27 = vld [vmem:[#allocation2 + $0x1e7] sm:$0xff]  ;;  %v2739_v39 = vld [vmem:[#allocation2 + $0x30] sm:$0xff] }
 0x21f   : > { %v2930_v41 = vld [vmem:[#allocation2 + $0x48] sm:$0xff] }
 0x220   : > { %v2703_v19 = vld [vmem:[#allocation2 + $0x1ef] sm:$0xff] }
 0x221   : > { %v16456_v10 = vpack.c.bf16 %v2703_v19, %v2702_v27  ;;  %v2641_v50 = vld [vmem:[#allocation2 + $0x1f1] sm:$0xff]  ;;  %v2932_v31 = vld [vmem:[#allocation2 + $0x68] sm:$0xff] }
 0x222   : > { %v2704_v26 = vld [vmem:[#allocation2 + $0x207] sm:$0xff] }
 0x223   : > { %3884 = vmatmul.mubr.bf16.gmra.mrb[176].mxu1 %v16396_v45  ;;  %v2934_v63 = vld [vmem:[#allocation2 + $0x88] sm:$0xff] }
 0x224   : > { %4037 = vmatmul.mubr.bf16.gmra.mrb[172].mxu0 %v16401_v53  ;;  %3891 = vmatprep.mubr.bf16.mxu1 %v16336_v25  ;;  %v2629_v25 = vld [vmem:[#allocation2 + $0x131] sm:$0xff]  ;;  %v14925_v52 = vld [vmem:[%s18700_s1 + $0x468] sm:$0xff]  }
 0x225   : > { %4044 = vmatprep.mubr.bf16.mxu0 %v16404_v5  ;;  %v16417_v4 = vpack.c.bf16 %v2629_v25, %v2628_v1  ;;  %v2705_v55 = vld [vmem:[#allocation2 + $0x20f] sm:$0xff]  ;;  %v2770_v25 = vpack.c.bf16 %v2739_v39, %v2738_v49 }
 0x226   : > { %v16464_v61 = vpack.c.bf16 %v2705_v55, %v2704_v26  ;;  %v2931_v1 = vld [vmem:[#allocation2 + $0x50] sm:$0xff]  ;;  %v2940_v24 = vld [vmem:[#allocation2 + $0xe8] sm:$0xff] }
 0x22b   : > { %3892 = vmatmul.mubr.bf16.gmra.mrb[180].mxu1 %v16404_v5  ;;  %v12647_v17 = vpop.f32.mrb[144].mxu1 }
 0x22c   : > { %4045 = vmatmul.mubr.bf16.gmra.mrb[176].mxu0 %v16409_v57  ;;  %3899 = vmatprep.mubr.bf16.mxu1 %v16334_v6  ;;  %v12648_v6 = vpop.f32.mrb[145].mxu1 }
 0x22d   : > { %4052 = vmatprep.mubr.bf16.mxu0 %v16412_v3  ;;  %v16425_v47 = vadd.f32 %v12648_v6, %v12647_v17  ;;  %v12650_v62 = vpop.f32.mrb[146].mxu1  ;;  %v14921_v17 = vld [vmem:[%s18700_s1 + $0x448] sm:$0xff]   ;;  %v2962_v6 = vpack.c.bf16 %v2931_v1, %v2930_v41 }
 0x22e   : > { %v12651_v28 = vpop.f32.mrb[147].mxu1  ;;  %v2954_v41 = vld [vmem:[#allocation2 + $0x1c8] sm:$0xff] }
 0x22f   : > { %v16427_v29 = vadd.f32 %v12651_v28, %v12650_v62  ;;  %v2933_v62 = vld [vmem:[#allocation2 + $0x70] sm:$0xff] }
 0x230   : > { %v2963_v28 = vpack.c.bf16 %v2933_v62, %v2932_v31  ;;  %v14929_v31 = vld [vmem:[%s18700_s1 + $0x480] sm:$0xff]  }
 0x233   : > { %3900 = vmatmul.mubr.bf16.gmra.mrb[184].mxu1 %v16412_v3 }
 0x234   : > { %4053 = vmatmul.mubr.bf16.gmra.mrb[180].mxu0 %v16417_v4  ;;  %3907 = vmatprep.mubr.bf16.mxu1 %v16363_v22  ;;  %v2632_v22 = vld [vmem:[#allocation2 + $0x169] sm:$0xff] }
 0x235   : > { %4060 = vmatprep.mubr.bf16.mxu0 %v16420_v38  ;;  %v16437_v54 = vpack.c.bf16 %v2633_v58, %v2632_v22  ;;  %v2936_v58 = vld [vmem:[#allocation2 + $0xa8] sm:$0xff] }
 0x23b   : > { %3908 = vmatmul.mubr.bf16.gmra.mrb[188].mxu1 %v16420_v38 }
 0x23c   : > { %4061 = vmatmul.mubr.bf16.gmra.mrb[184].mxu0 %v16429_v23  ;;  %3915 = vmatprep.mubr.bf16.mxu1 %v16361_v40  ;;  %v2635_v40 = vld [vmem:[#allocation2 + $0x191] sm:$0xff] }
 0x23d   : > { %4068 = vmatprep.mubr.bf16.mxu0 %v16432_v7  ;;  %v16445_v60 = vpack.c.bf16 %v2635_v40, %v2634_v59  ;;  %v2941_v40 = vld [vmem:[#allocation2 + $0xf0] sm:$0xff] }
 0x23e   : > { %v2967_v35 = vpack.c.bf16 %v2941_v40, %v2940_v24 }
 0x243   : > { %3916 = vmatmul.mubr.bf16.gmra.mrb[192].mxu1 %v16432_v7 }
 0x244   : > { %4069 = vmatmul.mubr.bf16.gmra.mrb[188].mxu0 %v16437_v54  ;;  %3923 = vmatprep.mubr.bf16.mxu1 %v16379_v42  ;;  %v2637_v42 = vld [vmem:[#allocation2 + $0x1b1] sm:$0xff] }
 0x245   : > { %4076 = vmatprep.mubr.bf16.mxu0 %v16440_v15  ;;  %v16453_v48 = vpack.c.bf16 %v2637_v42, %v2636_v56 }
 0x24b   : > { %3924 = vmatmul.mubr.bf16.gmra.mrb[196].mxu1 %v16440_v15 }
 0x24c   : > { %4077 = vmatmul.mubr.bf16.gmra.mrb[192].mxu0 %v16445_v60  ;;  %3931 = vmatprep.mubr.bf16.mxu1 %v16377_v8  ;;  %v2639_v8 = vld [vmem:[#allocation2 + $0x1d1] sm:$0xff] }
 0x24d   : > { %4084 = vmatprep.mubr.bf16.mxu0 %v16448_v2  ;;  %v16461_v0 = vpack.c.bf16 %v2639_v8, %v2638_v12 }
 0x253   : > { %3932 = vmatmul.mubr.bf16.gmra.mrb[200].mxu1 %v16448_v2 }
 0x254   : > { %4085 = vmatmul.mubr.bf16.gmra.mrb[196].mxu0 %v16453_v48  ;;  %3939 = vmatprep.mubr.bf16.mxu1 %v16393_v34  ;;  %v2640_v34 = vld [vmem:[#allocation2 + $0x1e9] sm:$0xff] }
 0x255   : > { %4092 = vmatprep.mubr.bf16.mxu0 %v16456_v10  ;;  %v16469_v36 = vpack.c.bf16 %v2641_v50, %v2640_v34  ;;  %v2955_v34 = vld [vmem:[#allocation2 + $0x1d0] sm:$0xff] }
 0x256   : > { %v2974_v62 = vpack.c.bf16 %v2955_v34, %v2954_v41  ;;  %v2994_v34 = vld [vmem:[#allocation2 + $0x49] sm:$0xff] }
 0x25b   : > { %3940 = vmatmul.mubr.bf16.gmra.mrb[204].mxu1 %v16456_v10 }
 0x25c   : > { %4093 = vmatmul.mubr.bf16.gmra.mrb[200].mxu0 %v16461_v0  ;;  %4141 = vmatprep.mubr.bf16.mxu1 %v16275_v51  ;;  %v14922_v51 = vld [vmem:[%s18700_s1 + $0x450] sm:$0xff]  }
 0x25d   : > { %4100 = vmatprep.mubr.bf16.mxu0 %v16464_v61 }
 0x263   : > { %4142 = vmatmul.mubr.bf16.vlgmr.msra.gmra.mrb[208].mxu1 %v2770_v25 }
 0x264   : > { %4101 = vmatmul.mubr.bf16.gmra.mrb[204].mxu0 %v16469_v36  ;;  %4149 = vmatprep.mubr.bf16.mxu1 %v16308_v18  ;;  %v2935_v18 = vld [vmem:[#allocation2 + $0x90] sm:$0xff] }
 0x265   : > { %4302 = vmatprep.mubr.bf16.mxu0 %v2962_v6  ;;  %14568 = vmatpush3.bf16.msra.mxu1 %v16230_v13  ;;  %v14924_v13 = vld [vmem:[%s18700_s1 + $0x460] sm:$0xff]   ;;  %v2964_v22 = vpack.c.bf16 %v2935_v18, %v2934_v63 }
 0x266   : > { %14569 = vmatprep.subr.bf16.mxu1 %v14921_v17 }
 0x269   : > { %14570 = vmatpush3.bf16.msra.mxu1 %v14921_v17 }
 0x26a   : > { %14571 = vmatprep.subr.bf16.mxu1 %v14922_v51 }
 0x26b   : > { %4150 = vmatmul.mubr.bf16.gmra.mrb[212].mxu1 %v2962_v6 }
 0x26c   : > { %4303 = vmatmul.mubr.bf16.vlgmr.msra.gmra.mrb[208].mxu0 %v16250_v16  ;;  %4157 = vmatprep.mubr.bf16.mxu1 %v16342_v44  ;;  %v14926_v16 = vld [vmem:[%s18700_s1 + $0x470] sm:$0xff]  }
 0x26d   : > { %4310 = vmatprep.mubr.bf16.mxu0 %v2963_v28  ;;  %14572 = vmatpush3.bf16.msra.mxu1 %v14922_v51  ;;  %v2937_v44 = vld [vmem:[#allocation2 + $0xb0] sm:$0xff] }
 0x26e   : > { %14573 = vmatprep.subr.bf16.mxu1 %v14923_v30  ;;  %v2965_v37 = vpack.c.bf16 %v2937_v44, %v2936_v58 }
 0x271   : > { %14574 = vmatpush3.bf16.msra.mxu1 %v14923_v30 }
 0x272   : > { %14575 = vmatprep.subr.bf16.mxu1 %v14924_v13 }
 0x273   : > { %4158 = vmatmul.mubr.bf16.gmra.mrb[216].mxu1 %v2963_v28 }
 0x274   : > { %4311 = vmatmul.mubr.bf16.gmra.mrb[212].mxu0 %v16282_v9  ;;  %4165 = vmatprep.mubr.bf16.mxu1 %v16365_v43  ;;  %v2939_v9 = vld [vmem:[#allocation2 + $0xd0] sm:$0xff]  ;;  %v2938_v43 = vld [vmem:[#allocation2 + $0xc8] sm:$0xff] }
 0x275   : > { %4318 = vmatprep.mubr.bf16.mxu0 %v2964_v22  ;;  %14576 = vmatpush3.bf16.msra.mxu1 %v14924_v13  ;;  %v2966_v59 = vpack.c.bf16 %v2939_v9, %v2938_v43 }
 0x276   : > { %14577 = vmatprep.subr.bf16.mxu1 %v14925_v52 }
 0x279   : > { %14578 = vmatpush3.bf16.msra.mxu1 %v14925_v52 }
 0x27a   : > { %14579 = vmatprep.subr.bf16.mxu1 %v14926_v16 }
 0x27b   : > { %4166 = vmatmul.mubr.bf16.gmra.mrb[220].mxu1 %v2964_v22 }
 0x27c   : > { %4319 = vmatmul.mubr.bf16.gmra.mrb[216].mxu0 %v16315_v14  ;;  %4173 = vmatprep.mubr.bf16.mxu1 %v16381_v32  ;;  %v2943_v14 = vld [vmem:[#allocation2 + $0x110] sm:$0xff]  ;;  %v2942_v32 = vld [vmem:[#allocation2 + $0x108] sm:$0xff] }
 0x27d   : > { %4326 = vmatprep.mubr.bf16.mxu0 %v2965_v37  ;;  %14580 = vmatpush3.bf16.msra.mxu1 %v14926_v16  ;;  %v2968_v56 = vpack.c.bf16 %v2943_v14, %v2942_v32 }
 0x27e   : > { %14581 = vmatprep.subr.bf16.mxu1 %v14927_v20 }
 0x281   : > { %14582 = vmatpush3.bf16.msra.mxu1 %v14927_v20 }
 0x283   : > { %4174 = vmatmul.mubr.bf16.gmra.mrb[224].mxu1 %v2965_v37  ;;  %v2956_v37 = vld [vmem:[#allocation2 + $0x1e8] sm:$0xff] }
 0x284   : > { %4327 = vmatmul.mubr.bf16.gmra.mrb[220].mxu0 %v16349_v33  ;;  %4181 = vmatprep.mubr.bf16.mxu1 %v16391_v21  ;;  %v2945_v33 = vld [vmem:[#allocation2 + $0x130] sm:$0xff]  ;;  %v2944_v21 = vld [vmem:[#allocation2 + $0x128] sm:$0xff] }
 0x285   : > { %4334 = vmatprep.mubr.bf16.mxu0 %v2966_v59  ;;  %v2969_v42 = vpack.c.bf16 %v2945_v33, %v2944_v21  ;;  %v2833_v33 = vld [vmem:[#allocation2 + $0x211] sm:$0xff] }
 0x28b   : > { %4182 = vmatmul.mubr.bf16.gmra.mrb[228].mxu1 %v2966_v59 }
 0x28c   : > { %4335 = vmatmul.mubr.bf16.gmra.mrb[224].mxu0 %v16369_v11  ;;  %4189 = vmatprep.mubr.bf16.mxu1 %v16401_v53  ;;  %v2947_v11 = vld [vmem:[#allocation2 + $0x150] sm:$0xff]  ;;  %v2946_v53 = vld [vmem:[#allocation2 + $0x148] sm:$0xff] }
 0x28d   : > { %4342 = vmatprep.mubr.bf16.mxu0 %v2967_v35  ;;  %v2970_v19 = vpack.c.bf16 %v2947_v11, %v2946_v53  ;;  %v2959_v53 = vld [vmem:[#allocation2 + $0x210] sm:$0xff] }
 0x293   : > { %4190 = vmatmul.mubr.bf16.gmra.mrb[232].mxu1 %v2967_v35 }
 0x294   : > { %4343 = vmatmul.mubr.bf16.gmra.mrb[228].mxu0 %v16384_v46  ;;  %4197 = vmatprep.mubr.bf16.mxu1 %v16409_v57  ;;  %v2949_v46 = vld [vmem:[#allocation2 + $0x170] sm:$0xff]  ;;  %v2948_v57 = vld [vmem:[#allocation2 + $0x168] sm:$0xff] }
 0x295   : > { %4350 = vmatprep.mubr.bf16.mxu0 %v2968_v56  ;;  %v2971_v27 = vpack.c.bf16 %v2949_v46, %v2948_v57 }
 0x29b   : > { %4198 = vmatmul.mubr.bf16.gmra.mrb[236].mxu1 %v2968_v56  ;;  %v2832_v56 = vld [vmem:[#allocation2 + $0x209] sm:$0xff] }
 0x29c   : > { %4351 = vmatmul.mubr.bf16.gmra.mrb[232].mxu0 %v16396_v45  ;;  %4205 = vmatprep.mubr.bf16.mxu1 %v16417_v4  ;;  %v2951_v45 = vld [vmem:[#allocation2 + $0x190] sm:$0xff]  ;;  %v2950_v4 = vld [vmem:[#allocation2 + $0x188] sm:$0xff] }
 0x29d   : > { %4358 = vmatprep.mubr.bf16.mxu0 %v2969_v42  ;;  %v2972_v12 = vpack.c.bf16 %v2951_v45, %v2950_v4  ;;  %v2958_v4 = vld [vmem:[#allocation2 + $0x208] sm:$0xff] }
 0x2a3   : > { %4206 = vmatmul.mubr.bf16.gmra.mrb[240].mxu1 %v2969_v42 }
 0x2a4   : > { %4359 = vmatmul.mubr.bf16.gmra.mrb[236].mxu0 %v16404_v5  ;;  %4213 = vmatprep.mubr.bf16.mxu1 %v16429_v23  ;;  %v2953_v5 = vld [vmem:[#allocation2 + $0x1b0] sm:$0xff]  ;;  %v2952_v23 = vld [vmem:[#allocation2 + $0x1a8] sm:$0xff] }
 0x2a5   : > { %4366 = vmatprep.mubr.bf16.mxu0 %v2970_v19  ;;  %v2973_v8 = vpack.c.bf16 %v2953_v5, %v2952_v23 }
 0x2ab   : > { %4214 = vmatmul.mubr.bf16.gmra.mrb[244].mxu1 %v2970_v19 }
 0x2ac   : > { %4367 = vmatmul.mubr.bf16.gmra.mrb[240].mxu0 %v16412_v3  ;;  %4221 = vmatprep.mubr.bf16.mxu1 %v16437_v54  ;;  %v16520_v3 = vld [vmem:[%s18701_s2 + $0x1] ss:$0 sm:$0xff] }
 0x2ad   : > { %4374 = vmatprep.mubr.bf16.mxu0 %v2971_v27  ;;  %v3822_v50 = vadd.f32 %v16425_v47, %v16520_v3  ;;  %v3825_v17 = vadd.f32 %v16427_v29, %v16520_v3  ;;  %v14928_v47 = vld [vmem:[%s18700_s1 + $0x4c0] sm:$0xff]  }
 0x2ae   : > { %13103 = vmatprep.subr.bf16.mxu0 %v14928_v47 }
 0x2af   : > { %13104 = vmatpush3.bf16.msra.mxu0 %v14929_v31 }
 0x2b3   : > { %4222 = vmatmul.mubr.bf16.gmra.mrb[248].mxu1 %v2971_v27 }
 0x2b4   : > { %4375 = vmatmul.mubr.bf16.gmra.mrb[244].mxu0 %v16420_v38  ;;  %4229 = vmatprep.mubr.bf16.mxu1 %v16445_v60 }
 0x2b5   : > { %4382 = vmatprep.mubr.bf16.mxu0 %v2972_v12 }
 0x2bb   : > { %4230 = vmatmul.mubr.bf16.gmra.mrb[252].mxu1 %v2972_v12 }
 0x2bc   : > { %4383 = vmatmul.mubr.bf16.gmra.mrb[248].mxu0 %v16432_v7  ;;  %4237 = vmatprep.mubr.bf16.mxu1 %v16453_v48 }
 0x2bd   : > { %4390 = vmatprep.mubr.bf16.mxu0 %v2973_v8 }
 0x2be   : > { %v12653_v54 = vpop.f32.mrb[148].mxu1 }
 0x2bf   : > { %v12759_v55 = vpop.f32.mrb[144].mxu0  ;;  %v12654_v38 = vpop.f32.mrb[149].mxu1 }
 0x2c0   : > { %v12655_v26 = vadd.f32 %v12654_v38, %v12653_v54  ;;  %v12760_v60 = vpop.f32.mrb[145].mxu0  ;;  %v12656_v39 = vpop.f32.mrb[150].mxu1  ;;  %v14930_v54 = vld [vmem:[%s18700_s1 + $0x4c8] sm:$0xff]  }
 0x2c1   : > { %v12761_v49 = vadd.f32 %v12760_v60, %v12759_v55  ;;  %v12762_v7 = vpop.f32.mrb[146].mxu0  ;;  %v12657_v1 = vpop.f32.mrb[151].mxu1  ;;  %v14931_v55 = vld [vmem:[%s18700_s1 + $0x488] sm:$0xff]   ;;  %13105 = vmatprep.subr.bf16.mxu0 %v14930_v54  ;;  %v3003_v54 = vld [vmem:[#allocation2 + $0xd1] sm:$0xff] }
 0x2c2   : > { %v12658_v48 = vadd.f32 %v12657_v1, %v12656_v39  ;;  %v12763_v25 = vpop.f32.mrb[147].mxu0  ;;  %v3830_v52 = vadd.f32 %v12655_v26, %v16520_v3  ;;  %13106 = vmatpush3.bf16.msra.mxu0 %v14931_v55 }
 0x2c3   : > { %v16526_v6 = vadd.f32 %v12761_v49, %v3822_v50  ;;  %v12764_v51 = vadd.f32 %v12763_v25, %v12762_v7  ;;  %4238 = vmatmul.mubr.bf16.gmra.mrb[0].mxu1 %v2973_v8  ;;  %v2976_v8 = vpack.c.bf16 %v2959_v53, %v2958_v4  ;;  %v2995_v50 = vld [vmem:[#allocation2 + $0x51] sm:$0xff] }
 0x2c4   : > { %4391 = vmatmul.mubr.bf16.gmra.mrb[252].mxu0 %v16440_v15  ;;  %4245 = vmatprep.mubr.bf16.mxu1 %v16461_v0  ;;  %v2957_v0 = vld [vmem:[#allocation2 + $0x1f0] sm:$0xff]  ;;  %v3833_v9 = vadd.f32 %v12658_v48, %v16520_v3  ;;  %v3026_v31 = vpack.c.bf16 %v2995_v50, %v2994_v34 }
 0x2c5   : > { %v16536_v30 = vadd.f32 %v12764_v51, %v3825_v17  ;;  %4398 = vmatprep.mubr.bf16.mxu0 %v2974_v62  ;;  %v2975_v40 = vpack.c.bf16 %v2957_v0, %v2956_v37  ;;  %v15145_v17 = vld [vmem:[#allocation2 + $0x8] sm:$0xff]  ;;  %v3001_v4 = vld [vmem:[#allocation2 + $0xb1] sm:$0xff] }
 0x2c6   : > { %v12659_v29 = vpop.f32.mrb[152].mxu1  ;;  %v16563_v51 = vpack.c.bf16 %v15145_v17, %v15145_v17 }
 0x2c7   : > { %v12765_v28 = vpop.f32.mrb[148].mxu0  ;;  %v12660_v13 = vpop.f32.mrb[153].mxu1 }
 0x2c8   : > { %v12661_v18 = vadd.f32 %v12660_v13, %v12659_v29  ;;  %v12766_v15 = vpop.f32.mrb[149].mxu0  ;;  %v12662_v63 = vpop.f32.mrb[154].mxu1 }
 0x2c9   : > { %v12767_v22 = vadd.f32 %v12766_v15, %v12765_v28  ;;  %v12768_v16 = vpop.f32.mrb[150].mxu0  ;;  %v12663_v44 = vpop.f32.mrb[155].mxu1  ;;  %v2896_v15 = vld [vmem:[#allocation2 + $0x227] sm:$0xff] }
 0x2ca   : > { %v12664_v58 = vadd.f32 %v12663_v44, %v12662_v63  ;;  %v12769_v20 = vpop.f32.mrb[151].mxu0  ;;  %v3838_v19 = vadd.f32 %v12661_v18, %v16520_v3  ;;  %v2897_v63 = vld [vmem:[#allocation2 + $0x22f] sm:$0xff] }
 0x2cb   : > { %v16540_v43 = vadd.f32 %v12767_v22, %v3830_v52  ;;  %v12770_v59 = vadd.f32 %v12769_v20, %v12768_v16  ;;  %4246 = vmatmul.mubr.bf16.gmra.mrb[4].mxu1 %v2974_v62  ;;  %v2996_v52 = vld [vmem:[#allocation2 + $0x69] sm:$0xff]  ;;  %v2997_v22 = vld [vmem:[#allocation2 + $0x71] sm:$0xff] }
 0x2cc   : > { %4399 = vmatmul.mubr.bf16.gmra.mrb[0].mxu0 %v16448_v2  ;;  %4253 = vmatprep.mubr.bf16.mxu1 %v16469_v36  ;;  %v16547_v36 = vpack.c.bf16 %v2833_v33, %v2832_v56  ;;  %v3841_v12 = vadd.f32 %v12664_v58, %v16520_v3  ;;  %v2998_v58 = vld [vmem:[#allocation2 + $0x89] sm:$0xff]  ;;  %v2999_v20 = vld [vmem:[#allocation2 + $0x91] sm:$0xff]  ;;  %v3027_v56 = vpack.c.bf16 %v2997_v22, %v2996_v52 }
 0x2cd   : > { %v16544_v24 = vadd.f32 %v12770_v59, %v3833_v9  ;;  %4406 = vmatprep.mubr.bf16.mxu0 %v2975_v40 }
 0x2ce   : > { %v12665_v35 = vpop.f32.mrb[156].mxu1 }
 0x2cf   : > { %v12771_v14 = vpop.f32.mrb[152].mxu0  ;;  %v12666_v32 = vpop.f32.mrb[157].mxu1 }
 0x2d0   : > { %v12667_v21 = vadd.f32 %v12666_v32, %v12665_v35  ;;  %v12772_v42 = vpop.f32.mrb[153].mxu0  ;;  %v12668_v11 = vpop.f32.mrb[158].mxu1 }
 0x2d1   : > { %v12773_v46 = vadd.f32 %v12772_v42, %v12771_v14  ;;  %v12774_v57 = vpop.f32.mrb[154].mxu0  ;;  %v12669_v27 = vpop.f32.mrb[159].mxu1  ;;  %v3028_v42 = vpack.c.bf16 %v2999_v20, %v2998_v58 }
 0x2d2   : > { %v12670_v2 = vadd.f32 %v12669_v27, %v12668_v11  ;;  %v12775_v45 = vpop.f32.mrb[155].mxu0  ;;  %v3846_v1 = vadd.f32 %v12667_v21, %v16520_v3 }
 0x2d3   : > { %v16550_v5 = vadd.f32 %v12773_v46, %v3838_v19  ;;  %v12776_v23 = vadd.f32 %v12775_v45, %v12774_v57  ;;  %4254 = vmatmul.mubr.bf16.gmra.mrb[8].mxu1 %v2975_v40  ;;  %v2913_v40 = vpack.c.bf16 %v2897_v63, %v2896_v15  ;;  %v14932_v46 = vld [vmem:[%s18700_s1 + $0x4d0] sm:$0xff]  }
 0x2d4   : > { %4407 = vmatmul.mubr.bf16.gmra.mrb[4].mxu0 %v16456_v10  ;;  %4261 = vmatprep.mubr.bf16.mxu1 %v16547_v36  ;;  %v3849_v29 = vadd.f32 %v12670_v2, %v16520_v3  ;;  %v14933_v57 = vld [vmem:[%s18700_s1 + $0x490] sm:$0xff]  }
 0x2d5   : > { %v16560_v38 = vadd.f32 %v12776_v23, %v3841_v12  ;;  %4414 = vmatprep.mubr.bf16.mxu0 %v2976_v8  ;;  %v3000_v45 = vld [vmem:[#allocation2 + $0xa9] sm:$0xff]  ;;  %13107 = vmatprep.subr.bf16.mxu0 %v14932_v46 }
 0x2d6   : > { %v12671_v26 = vpop.f32.mrb[160].mxu1  ;;  %13108 = vmatpush3.bf16.msra.mxu0 %v14933_v57  ;;  %v3006_v63 = vld [vmem:[#allocation2 + $0x109] sm:$0xff] }
 0x2d7   : > { %v12777_v60 = vpop.f32.mrb[156].mxu0  ;;  %v12672_v39 = vpop.f32.mrb[161].mxu1 }
 0x2d8   : > { %v12673_v10 = vadd.f32 %v12672_v39, %v12671_v26  ;;  %v12778_v49 = vpop.f32.mrb[157].mxu0  ;;  %v12674_v7 = vpop.f32.mrb[162].mxu1 }
 0x2d9   : > { %v12779_v48 = vadd.f32 %v12778_v49, %v12777_v60  ;;  %v12780_v25 = vpop.f32.mrb[158].mxu0  ;;  %v12675_v41 = vpop.f32.mrb[163].mxu1  ;;  %v3029_v49 = vpack.c.bf16 %v3001_v4, %v3000_v45  ;;  %v3011_v45 = vld [vmem:[#allocation2 + $0x151] sm:$0xff] }
 0x2da   : > { %v12676_v62 = vadd.f32 %v12675_v41, %v12674_v7  ;;  %v12781_v47 = vpop.f32.mrb[159].mxu0 }
 0x2db   : > { %v16566_v28 = vadd.f32 %v12779_v48, %v3846_v1  ;;  %v12782_v13 = vadd.f32 %v12781_v47, %v12780_v25  ;;  %4262 = vmatmul.mubr.bf16.gmra.mrb[12].mxu1 %v2976_v8  ;;  %v3002_v8 = vld [vmem:[#allocation2 + $0xc9] sm:$0xff] }
 0x2dc   : > { %4415 = vmatmul.mubr.bf16.gmra.mrb[8].mxu0 %v16464_v61  ;;  %14583 = vmatprep.mubr.bf16.mxu1 %v3026_v31  ;;  %v3854_v61 = vadd.f32 %v12673_v10, %v16520_v3  ;;  %v3857_v11 = vadd.f32 %v12676_v62, %v16520_v3  ;;  %v3030_v48 = vpack.c.bf16 %v3003_v54, %v3002_v8  ;;  %v3004_v31 = vld [vmem:[#allocation2 + $0xe9] sm:$0xff] }
 0x2dd   : > { %v16569_v18 = vadd.f32 %v12782_v13, %v3849_v29  ;;  %4422 = vmatprep.mubr.bf16.mxu0 %v16563_v51  ;;  %v3005_v29 = vld [vmem:[#allocation2 + $0xf1] sm:$0xff] }
 0x2de   : > { %v12677_v0 = vpop.f32.mrb[164].mxu1 }
 0x2df   : > { %v12783_v16 = vpop.f32.mrb[160].mxu0  ;;  %v12678_v44 = vpop.f32.mrb[165].mxu1 }
 0x2e0   : > { %v12679_v37 = vadd.f32 %v12678_v44, %v12677_v0  ;;  %v12784_v9 = vpop.f32.mrb[161].mxu0  ;;  %v12680_v59 = vpop.f32.mrb[166].mxu1  ;;  %v3007_v0 = vld [vmem:[#allocation2 + $0x111] sm:$0xff] }
 0x2e1   : > { %v12785_v35 = vadd.f32 %v12784_v9, %v12783_v16  ;;  %v12786_v14 = vpop.f32.mrb[162].mxu0  ;;  %v12681_v32 = vpop.f32.mrb[167].mxu1  ;;  %v3031_v9 = vpack.c.bf16 %v3005_v29, %v3004_v31  ;;  %v3014_v29 = vld [vmem:[#allocation2 + $0x189] sm:$0xff] }
 0x2e2   : > { %v12682_v33 = vadd.f32 %v12681_v32, %v12680_v59  ;;  %v12787_v21 = vpop.f32.mrb[163].mxu0  ;;  %v3862_v39 = vadd.f32 %v12679_v37, %v16520_v3 }
 0x2e3   : > { %v16574_v53 = vadd.f32 %v12785_v35, %v3854_v61  ;;  %v12788_v19 = vadd.f32 %v12787_v21, %v12786_v14  ;;  %14584 = vmatmul.mubr.bf16.vlgmr.msra.gmra.mrb[16].mxu1 %v3027_v56  ;;  %v3032_v61 = vpack.c.bf16 %v3007_v0, %v3006_v63  ;;  %v14934_v56 = vld [vmem:[%s18700_s1 + $0x4d8] sm:$0xff]  }
 0x2e4   : > { %4423 = vmatmul.mubr.bf16.gmra.mrb[12].mxu0 %v2913_v40  ;;  %14587 = vmatprep.mubr.bf16.mxu1 %v3028_v42  ;;  %v3865_v25 = vadd.f32 %v12682_v33, %v16520_v3  ;;  %v14935_v33 = vld [vmem:[%s18700_s1 + $0x498] sm:$0xff]  }
 0x2e5   : > { %v16582_v27 = vadd.f32 %v12788_v19, %v3857_v11  ;;  %v3008_v11 = vld [vmem:[#allocation2 + $0x129] sm:$0xff]  ;;  %v3009_v19 = vld [vmem:[#allocation2 + $0x131] sm:$0xff]  ;;  %13109 = vmatprep.subr.bf16.mxu0 %v14934_v56  ;;  %5993 = vmatprep.mubr.bf16.mxu0 %v16563_v51 }
 0x2e6   : > { %v12683_v2 = vpop.f32.mrb[168].mxu1  ;;  %13110 = vmatpush3.bf16.msra.mxu0 %v14935_v33  ;;  %v14956_v51 = vld [vmem:[%s18700_s1 + $0x570] sm:$0xff]  }
 0x2e7   : > { %v12789_v12 = vpop.f32.mrb[164].mxu0  ;;  %v12684_v23 = vpop.f32.mrb[169].mxu1 }
 0x2e8   : > { %v12685_v55 = vadd.f32 %v12684_v23, %v12683_v2  ;;  %v12790_v26 = vpop.f32.mrb[165].mxu0  ;;  %v12686_v60 = vpop.f32.mrb[170].mxu1  ;;  %v3010_v2 = vld [vmem:[#allocation2 + $0x149] sm:$0xff] }
 0x2e9   : > { %v12791_v34 = vadd.f32 %v12790_v26, %v12789_v12  ;;  %v12792_v50 = vpop.f32.mrb[166].mxu0  ;;  %v12687_v10 = vpop.f32.mrb[171].mxu1 }
 0x2ea   : > { %v12688_v7 = vadd.f32 %v12687_v10, %v12686_v60  ;;  %v12793_v1 = vpop.f32.mrb[167].mxu0  ;;  %v3870_v44 = vadd.f32 %v12685_v55, %v16520_v3  ;;  %v3033_v60 = vpack.c.bf16 %v3009_v19, %v3008_v11  ;;  %v3017_v11 = vld [vmem:[#allocation2 + $0x1b1] sm:$0xff] }
 0x2eb   : > { %v16586_v41 = vadd.f32 %v12791_v34, %v3862_v39  ;;  %v12794_v17 = vadd.f32 %v12793_v1, %v12792_v50  ;;  %14588 = vmatmul.mubr.bf16.gmra.mrb[20].mxu1 %v3029_v49  ;;  %v3034_v50 = vpack.c.bf16 %v3011_v45, %v3010_v2  ;;  %v3019_v2 = vld [vmem:[#allocation2 + $0x1d1] sm:$0xff] }
 0x2ec   : > { %14591 = vmatprep.mubr.bf16.mxu1 %v3030_v48  ;;  %v3873_v35 = vadd.f32 %v12688_v7, %v16520_v3 }
 0x2ed   : > { %v16588_v62 = vadd.f32 %v12794_v17, %v3865_v25  ;;  %v3012_v25 = vld [vmem:[#allocation2 + $0x169] sm:$0xff]  ;;  %v3013_v17 = vld [vmem:[#allocation2 + $0x171] sm:$0xff] }
 0x2ee   : > { %v12689_v47 = vpop.f32.mrb[172].mxu1 }
 0x2ef   : > { %v12795_v13 = vpop.f32.mrb[168].mxu0  ;;  %v12690_v15 = vpop.f32.mrb[173].mxu1 }
 0x2f0   : > { %v12691_v52 = vadd.f32 %v12690_v15, %v12689_v47  ;;  %v12796_v22 = vpop.f32.mrb[169].mxu0  ;;  %v12692_v16 = vpop.f32.mrb[174].mxu1 }
 0x2f1   : > { %v12797_v58 = vadd.f32 %v12796_v22, %v12795_v13  ;;  %v12798_v20 = vpop.f32.mrb[170].mxu0  ;;  %v12693_v37 = vpop.f32.mrb[175].mxu1  ;;  %v3015_v13 = vld [vmem:[#allocation2 + $0x191] sm:$0xff] }
 0x2f2   : > { %v12694_v59 = vadd.f32 %v12693_v37, %v12692_v16  ;;  %v12799_v40 = vpop.f32.mrb[171].mxu0  ;;  %v3878_v8 = vadd.f32 %v12691_v52, %v16520_v3 }
 0x2f3   : > { %v16592_v14 = vadd.f32 %v12797_v58, %v3870_v44  ;;  %v12800_v32 = vadd.f32 %v12799_v40, %v12798_v20  ;;  %14592 = vmatmul.mubr.bf16.gmra.mrb[24].mxu1 %v3031_v9  ;;  %v3035_v58 = vpack.c.bf16 %v3013_v17, %v3012_v25  ;;  %v3036_v9 = vpack.c.bf16 %v3015_v13, %v3014_v29  ;;  %v3020_v17 = vld [vmem:[#allocation2 + $0x1e9] sm:$0xff] }
 0x2f4   : > { %14595 = vmatprep.mubr.bf16.mxu1 %v3032_v61  ;;  %v3881_v10 = vadd.f32 %v12694_v59, %v16520_v3 }
 0x2f5   : > { %v16600_v21 = vadd.f32 %v12800_v32, %v3873_v35  ;;  %v14936_v35 = vld [vmem:[%s18700_s1 + $0x4e0] sm:$0xff]  }
 0x2f6   : > { %v12695_v42 = vpop.f32.mrb[176].mxu1  ;;  %v14937_v32 = vld [vmem:[%s18700_s1 + $0x4a0] sm:$0xff]   ;;  %13111 = vmatprep.subr.bf16.mxu0 %v14936_v35  ;;  %v3025_v35 = vld [vmem:[#allocation2 + $0x231] sm:$0xff] }
 0x2f7   : > { %v12801_v46 = vpop.f32.mrb[172].mxu0  ;;  %v12696_v57 = vpop.f32.mrb[177].mxu1  ;;  %13112 = vmatpush3.bf16.msra.mxu0 %v14937_v32  ;;  %v14938_v32 = vld [vmem:[%s18700_s1 + $0x4e8] sm:$0xff]  }
 0x2f8   : > { %v12697_v4 = vadd.f32 %v12696_v57, %v12695_v42  ;;  %v12802_v12 = vpop.f32.mrb[173].mxu0  ;;  %v12698_v23 = vpop.f32.mrb[178].mxu1  ;;  %v3016_v42 = vld [vmem:[#allocation2 + $0x1a9] sm:$0xff]  ;;  %13113 = vmatprep.subr.bf16.mxu0 %v14938_v32 }
 0x2f9   : > { %v12803_v54 = vadd.f32 %v12802_v12, %v12801_v46  ;;  %v12804_v55 = vpop.f32.mrb[174].mxu0  ;;  %v12699_v26 = vpop.f32.mrb[179].mxu1  ;;  %v3018_v57 = vld [vmem:[#allocation2 + $0x1c9] sm:$0xff] }
 0x2fa   : > { %v12700_v39 = vadd.f32 %v12699_v26, %v12698_v23  ;;  %v12805_v34 = vpop.f32.mrb[175].mxu0  ;;  %v3886_v52 = vadd.f32 %v12697_v4, %v16520_v3  ;;  %v3037_v26 = vpack.c.bf16 %v3017_v11, %v3016_v42 }
 0x2fb   : > { %v16604_v49 = vadd.f32 %v12803_v54, %v3878_v8  ;;  %v12806_v7 = vadd.f32 %v12805_v34, %v12804_v55  ;;  %14596 = vmatmul.mubr.bf16.gmra.mrb[28].mxu1 %v3033_v60  ;;  %v3038_v34 = vpack.c.bf16 %v3019_v2, %v3018_v57 }
 0x2fc   : > { %14599 = vmatprep.mubr.bf16.mxu1 %v3034_v50  ;;  %v3889_v59 = vadd.f32 %v12700_v39, %v16520_v3 }
 0x2fd   : > { %v16606_v1 = vadd.f32 %v12806_v7, %v3881_v10 }
 0x2fe   : > { %v12701_v48 = vpop.f32.mrb[180].mxu1 }
 0x2ff   : > { %v12807_v47 = vpop.f32.mrb[176].mxu0  ;;  %v12702_v31 = vpop.f32.mrb[181].mxu1 }
 0x300   : > { %v12703_v15 = vadd.f32 %v12702_v31, %v12701_v48  ;;  %v12808_v63 = vpop.f32.mrb[177].mxu0  ;;  %v12704_v0 = vpop.f32.mrb[182].mxu1 }
 0x301   : > { %v12809_v22 = vadd.f32 %v12808_v63, %v12807_v47  ;;  %v12810_v16 = vpop.f32.mrb[178].mxu0  ;;  %v12705_v44 = vpop.f32.mrb[183].mxu1  ;;  %v3021_v47 = vld [vmem:[#allocation2 + $0x1f1] sm:$0xff] }
 0x302   : > { %v12706_v20 = vadd.f32 %v12705_v44, %v12704_v0  ;;  %v12811_v37 = vpop.f32.mrb[179].mxu0  ;;  %v3894_v23 = vadd.f32 %v12703_v15, %v16520_v3  ;;  %v3039_v44 = vpack.c.bf16 %v3021_v47, %v3020_v17 }
 0x303   : > { %v16610_v40 = vadd.f32 %v12809_v22, %v3886_v52  ;;  %v12812_v61 = vadd.f32 %v12811_v37, %v12810_v16  ;;  %14600 = vmatmul.mubr.bf16.gmra.mrb[32].mxu1 %v3035_v58 }
 0x304   : > { %14603 = vmatprep.mubr.bf16.mxu1 %v3036_v9  ;;  %v3897_v50 = vadd.f32 %v12706_v20, %v16520_v3 }
 0x305   : > { %v16618_v56 = vadd.f32 %v12812_v61, %v3889_v59  ;;  %v3024_v61 = vld [vmem:[#allocation2 + $0x229] sm:$0xff] }
 0x306   : > { %v12707_v33 = vpop.f32.mrb[184].mxu1  ;;  %v3041_v57 = vpack.c.bf16 %v3025_v35, %v3024_v61 }
 0x307   : > { %v12813_v19 = vpop.f32.mrb[180].mxu0  ;;  %v12708_v46 = vpop.f32.mrb[185].mxu1 }
 0x308   : > { %v12709_v45 = vadd.f32 %v12708_v46, %v12707_v33  ;;  %v12814_v4 = vpop.f32.mrb[181].mxu0  ;;  %v12710_v12 = vpop.f32.mrb[186].mxu1  ;;  %v14939_v33 = vld [vmem:[%s18700_s1 + $0x4a8] sm:$0xff]  }
 0x309   : > { %v12815_v8 = vadd.f32 %v12814_v4, %v12813_v19  ;;  %v12816_v54 = vpop.f32.mrb[182].mxu0  ;;  %v12711_v55 = vpop.f32.mrb[187].mxu1  ;;  %13114 = vmatpush3.bf16.msra.mxu0 %v14939_v33 }
 0x30a   : > { %v12712_v60 = vadd.f32 %v12711_v55, %v12710_v12  ;;  %v12817_v39 = vpop.f32.mrb[183].mxu0  ;;  %v3902_v0 = vadd.f32 %v12709_v45, %v16520_v3 }
 0x30b   : > { %v16622_v10 = vadd.f32 %v12815_v8, %v3894_v23  ;;  %v12818_v7 = vadd.f32 %v12817_v39, %v12816_v54  ;;  %14604 = vmatmul.mubr.bf16.gmra.mrb[36].mxu1 %v3037_v26 }
 0x30c   : > { %14607 = vmatprep.mubr.bf16.mxu1 %v3038_v34  ;;  %v3905_v37 = vadd.f32 %v12712_v60, %v16520_v3 }
 0x30d   : > { %v16624_v48 = vadd.f32 %v12818_v7, %v3897_v50 }
 0x30e   : > { %v12713_v25 = vpop.f32.mrb[188].mxu1 }
 0x30f   : > { %v12819_v31 = vpop.f32.mrb[184].mxu0  ;;  %v12714_v29 = vpop.f32.mrb[189].mxu1 }
 0x310   : > { %v12715_v13 = vadd.f32 %v12714_v29, %v12713_v25  ;;  %v12820_v15 = vpop.f32.mrb[185].mxu0  ;;  %v12716_v63 = vpop.f32.mrb[190].mxu1 }
 0x311   : > { %v12821_v52 = vadd.f32 %v12820_v15, %v12819_v31  ;;  %v12822_v22 = vpop.f32.mrb[186].mxu0  ;;  %v12717_v16 = vpop.f32.mrb[191].mxu1 }
 0x312   : > { %v12718_v58 = vadd.f32 %v12717_v16, %v12716_v63  ;;  %v12823_v20 = vpop.f32.mrb[187].mxu0  ;;  %v3910_v4 = vadd.f32 %v12715_v13, %v16520_v3 }
 0x313   : > { %v16628_v9 = vadd.f32 %v12821_v52, %v3902_v0  ;;  %v12824_v59 = vadd.f32 %v12823_v20, %v12822_v22  ;;  %14608 = vmatmul.mubr.bf16.gmra.mrb[40].mxu1 %v3039_v44  ;;  %v14941_v20 = vld [vmem:[%s18700_s1 + $0x4b0] sm:$0xff]  }
 0x314   : > { %14611 = vmatprep.mubr.bf16.mxu1 %v16547_v36  ;;  %v3913_v26 = vadd.f32 %v12718_v58, %v16520_v3  ;;  %v14940_v58 = vld [vmem:[%s18700_s1 + $0x4f0] sm:$0xff]  }
 0x315   : > { %v16637_v42 = vadd.f32 %v12824_v59, %v3905_v37  ;;  %13115 = vmatprep.subr.bf16.mxu0 %v14940_v58 }
 0x316   : > { %v12719_v11 = vpop.f32.mrb[192].mxu1  ;;  %13116 = vmatpush3.bf16.msra.mxu0 %v14941_v20 }
 0x317   : > { %v12825_v19 = vpop.f32.mrb[188].mxu0  ;;  %v12720_v46 = vpop.f32.mrb[193].mxu1 }
 0x318   : > { %v12721_v2 = vadd.f32 %v12720_v46, %v12719_v11  ;;  %v12826_v45 = vpop.f32.mrb[189].mxu0  ;;  %v12722_v36 = vpop.f32.mrb[194].mxu1 }
 0x319   : > { %v12827_v12 = vadd.f32 %v12826_v45, %v12825_v19  ;;  %v12828_v23 = vpop.f32.mrb[190].mxu0  ;;  %v12723_v8 = vpop.f32.mrb[195].mxu1 }
 0x31a   : > { %v12724_v54 = vadd.f32 %v12723_v8, %v12722_v36  ;;  %v12829_v55 = vpop.f32.mrb[191].mxu0  ;;  %v3918_v29 = vadd.f32 %v12721_v2, %v16520_v3 }
 0x31b   : > { %v16641_v60 = vadd.f32 %v12827_v12, %v3910_v4  ;;  %v12830_v39 = vadd.f32 %v12829_v55, %v12828_v23  ;;  %14612 = vmatmul.mubr.bf16.gmra.mrb[44].mxu1 %v3041_v57  ;;  %v14942_v4 = vld [vmem:[%s18700_s1 + $0x540] sm:$0xff]   ;;  %v14944_v55 = vld [vmem:[%s18700_s1 + $0x548] sm:$0xff]  }
 0x31c   : > { %v3921_v22 = vadd.f32 %v12724_v54, %v16520_v3  ;;  %v14943_v54 = vld [vmem:[%s18700_s1 + $0x500] sm:$0xff]   ;;  %13215 = vmatprep.subr.bf16.mxu1 %v14942_v4 }
 0x31d   : > { %v16643_v34 = vadd.f32 %v12830_v39, %v3913_v26  ;;  %13216 = vmatpush3.bf16.msra.mxu1 %v14943_v54 }
 0x31e   : > { %v12725_v50 = vpop.f32.mrb[196].mxu1  ;;  %13217 = vmatprep.subr.bf16.mxu1 %v14944_v55 }
 0x31f   : > { %v12831_v7 = vpop.f32.mrb[192].mxu0  ;;  %v12726_v25 = vpop.f32.mrb[197].mxu1 }
 0x320   : > { %v12727_v17 = vadd.f32 %v12726_v25, %v12725_v50  ;;  %v12832_v47 = vpop.f32.mrb[193].mxu0  ;;  %v12728_v31 = vpop.f32.mrb[198].mxu1  ;;  %v14945_v25 = vld [vmem:[%s18700_s1 + $0x508] sm:$0xff]  }
 0x321   : > { %v12833_v13 = vadd.f32 %v12832_v47, %v12831_v7  ;;  %v12834_v15 = vpop.f32.mrb[194].mxu0  ;;  %v12729_v63 = vpop.f32.mrb[199].mxu1  ;;  %13218 = vmatpush3.bf16.msra.mxu1 %v14945_v25 }
 0x322   : > { %v12730_v0 = vadd.f32 %v12729_v63, %v12728_v31  ;;  %v12835_v52 = vpop.f32.mrb[195].mxu0  ;;  %v3926_v19 = vadd.f32 %v12727_v17, %v16520_v3 }
 0x323   : > { %v16647_v16 = vadd.f32 %v12833_v13, %v3918_v29  ;;  %v12836_v44 = vadd.f32 %v12835_v52, %v12834_v15 }
 0x324   : > { %v3929_v12 = vadd.f32 %v12730_v0, %v16520_v3 }
 0x325   : > { %v16655_v37 = vadd.f32 %v12836_v44, %v3921_v22  ;;  %v14947_v22 = vld [vmem:[%s18700_s1 + $0x550] sm:$0xff]  }
 0x326   : > { %v12731_v59 = vpop.f32.mrb[200].mxu1  ;;  %13219 = vmatprep.subr.bf16.mxu1 %v14947_v22 }
 0x327   : > { %v12837_v61 = vpop.f32.mrb[196].mxu0  ;;  %v12732_v35 = vpop.f32.mrb[201].mxu1 }
 0x328   : > { %v12733_v32 = vadd.f32 %v12732_v35, %v12731_v59  ;;  %v12838_v33 = vpop.f32.mrb[197].mxu0  ;;  %v12734_v11 = vpop.f32.mrb[202].mxu1  ;;  %v14949_v59 = vld [vmem:[%s18700_s1 + $0x510] sm:$0xff]   ;;  %v14948_v35 = vld [vmem:[%s18700_s1 + $0x4b8] sm:$0xff]  }
 0x329   : > { %v12839_v46 = vadd.f32 %v12838_v33, %v12837_v61  ;;  %v12840_v57 = vpop.f32.mrb[198].mxu0  ;;  %v12735_v2 = vpop.f32.mrb[203].mxu1  ;;  %v14946_v61 = vld [vmem:[%s18700_s1 + $0x4f8] sm:$0xff]   ;;  %13220 = vmatpush3.bf16.msra.mxu1 %v14949_v59 }
 0x32a   : > { %v12736_v45 = vadd.f32 %v12735_v2, %v12734_v11  ;;  %v12841_v36 = vpop.f32.mrb[199].mxu0  ;;  %v3934_v29 = vadd.f32 %v12733_v32, %v16520_v3  ;;  %v14950_v32 = vld [vmem:[%s18700_s1 + $0x558] sm:$0xff]   ;;  %13117 = vmatprep.subr.bf16.mxu0 %v14946_v61 }
 0x32b   : > { %v16662_v23 = vadd.f32 %v12839_v46, %v3926_v19  ;;  %v12842_v8 = vadd.f32 %v12841_v36, %v12840_v57  ;;  %13221 = vmatprep.subr.bf16.mxu1 %v14950_v32  ;;  %13118 = vmatpush3.bf16.msra.mxu0 %v14948_v35  ;;  %v14951_v57 = vld [vmem:[%s18700_s1 + $0x518] sm:$0xff]  }
 0x32c   : > { %v3937_v44 = vadd.f32 %v12736_v45, %v16520_v3 }
 0x32d   : > { %v16670_v26 = vadd.f32 %v12842_v8, %v3929_v12  ;;  %13222 = vmatpush3.bf16.msra.mxu1 %v14951_v57 }
 0x32e   : > { %v12737_v39 = vpop.f32.mrb[204].mxu1 }
 0x32f   : > { %v12843_v50 = vpop.f32.mrb[200].mxu0  ;;  %v12738_v7 = vpop.f32.mrb[205].mxu1 }
 0x330   : > { %v12739_v17 = vadd.f32 %v12738_v7, %v12737_v39  ;;  %v12844_v47 = vpop.f32.mrb[201].mxu0  ;;  %v12740_v31 = vpop.f32.mrb[206].mxu1  ;;  %v14952_v7 = vld [vmem:[%s18700_s1 + $0x560] sm:$0xff]  }
 0x331   : > { %v12845_v13 = vadd.f32 %v12844_v47, %v12843_v50  ;;  %v12846_v15 = vpop.f32.mrb[202].mxu0  ;;  %v12741_v63 = vpop.f32.mrb[207].mxu1  ;;  %13223 = vmatprep.subr.bf16.mxu1 %v14952_v7 }
 0x332   : > { %v12742_v0 = vadd.f32 %v12741_v63, %v12740_v31  ;;  %v12847_v52 = vpop.f32.mrb[203].mxu0  ;;  %v3942_v4 = vadd.f32 %v12739_v17, %v16520_v3  ;;  %v14953_v17 = vld [vmem:[%s18700_s1 + $0x520] sm:$0xff]  }
 0x333   : > { %v16680_v58 = vadd.f32 %v12845_v13, %v3934_v29  ;;  %v12848_v20 = vadd.f32 %v12847_v52, %v12846_v15  ;;  %13224 = vmatpush3.bf16.msra.mxu1 %v14953_v17  ;;  %v4657_v15 = vld [vmem:[#allocation2 + $0xf] sm:$0xff] }
 0x334   : > { %v3945_v25 = vadd.f32 %v12742_v0, %v16520_v3  ;;  %v14954_v3 = vld [vmem:[%s18700_s1 + $0x568] sm:$0xff]  }
 0x335   : > { %v16694_v33 = vadd.f32 %v12848_v20, %v3937_v44  ;;  %13225 = vmatprep.subr.bf16.mxu1 %v14954_v3 }
 0x336   : > { %v12871_v11 = vpop.f32.mrb[208].mxu1 }
 0x337   : > { %v12849_v19 = vpop.f32.mrb[204].mxu0  ;;  %v12872_v46 = vpop.f32.mrb[209].mxu1 }
 0x338   : > { %v12850_v2 = vpop.f32.mrb[205].mxu0  ;;  %v12873_v45 = vadd.f32 %v12872_v46, %v12871_v11  ;;  %v12874_v36 = vpop.f32.mrb[210].mxu1 }
 0x339   : > { %v12851_v12 = vadd.f32 %v12850_v2, %v12849_v19  ;;  %v12852_v8 = vpop.f32.mrb[206].mxu0  ;;  %v12875_v54 = vpop.f32.mrb[211].mxu1 }
 0x33a   : > { %v4144_v55 = vadd.f32 %v12873_v45, %v16526_v6  ;;  %v12853_v39 = vpop.f32.mrb[207].mxu0  ;;  %v12876_v50 = vadd.f32 %v12875_v54, %v12874_v36  ;;  %v4656_v6 = vld [vmem:[#allocation2 + $0x7] sm:$0xff]  ;;  %v14958_v45 = vld [vmem:[%s18700_s1 + $0x530] sm:$0xff]   ;;  %v14960_v54 = vld [vmem:[%s18700_s1 + $0x578] sm:$0xff]  }
 0x33b   : > { %v16705_v47 = vadd.f32 %v12851_v12, %v3942_v4  ;;  %v12854_v31 = vadd.f32 %v12853_v39, %v12852_v8  ;;  %v4688_v0 = vpack.c.bf16 %v4657_v15, %v4656_v6  ;;  %v14957_v12 = vld [vmem:[%s18700_s1 + $0x5c0] sm:$0xff]  }
 0x33c   : > { %v4147_v29 = vadd.f32 %v12876_v50, %v16536_v30  ;;  %v14955_v30 = vld [vmem:[%s18700_s1 + $0x528] sm:$0xff]   ;;  %v14959_v8 = vld [vmem:[%s18700_s1 + $0x580] sm:$0xff]   ;;  %13327 = vmatprep.subr.bf16.mxu0 %v14957_v12 }
 0x33d   : > { %v16711_v13 = vadd.f32 %v12854_v31, %v3945_v25  ;;  %5994 = vmatmul.mubr.bf16.vlgmr.msra.gmra.mrb[16].mxu0 %v4688_v0  ;;  %13226 = vmatpush3.bf16.msra.mxu1 %v14955_v30  ;;  %v14962_v12 = vld [vmem:[%s18700_s1 + $0x5c8] sm:$0xff]  }
 0x33e   : > { %v12877_v63 = vpop.f32.mrb[212].mxu1  ;;  %13227 = vmatprep.subr.bf16.mxu1 %v14956_v51  ;;  %13328 = vmatpush3.bf16.msra.mxu0 %v14959_v8  ;;  %v14963_v8 = vld [vmem:[%s18700_s1 + $0x588] sm:$0xff]  }
 0x33f   : > { %v12983_v52 = vpop.f32.mrb[208].mxu0  ;;  %v12878_v22 = vpop.f32.mrb[213].mxu1  ;;  %13329 = vmatprep.subr.bf16.mxu0 %v14962_v12 }
 0x340   : > { %v12879_v44 = vadd.f32 %v12878_v22, %v12877_v63  ;;  %v12984_v20 = vpop.f32.mrb[209].mxu0  ;;  %v12880_v59 = vpop.f32.mrb[214].mxu1 }
 0x341   : > { %v12985_v61 = vadd.f32 %v12984_v20, %v12983_v52  ;;  %v12986_v35 = vpop.f32.mrb[210].mxu0  ;;  %v12881_v32 = vpop.f32.mrb[215].mxu1  ;;  %13228 = vmatpush3.bf16.msra.mxu1 %v14958_v45 }
 0x342   : > { %v4152_v11 = vadd.f32 %v12879_v44, %v16540_v43  ;;  %v12882_v19 = vadd.f32 %v12881_v32, %v12880_v59  ;;  %v12987_v46 = vpop.f32.mrb[211].mxu0  ;;  %13229 = vmatprep.subr.bf16.mxu1 %v14960_v54  ;;  %13330 = vmatpush3.bf16.msra.mxu0 %v14963_v8 }
 0x343   : > { %v12988_v57 = vadd.f32 %v12987_v46, %v12986_v35  ;;  %v16724_v2 = vadd.f32 %v12985_v61, %v4144_v55 }
 0x344   : > { %v4155_v36 = vadd.f32 %v12882_v19, %v16544_v24  ;;  %v14961_v24 = vld [vmem:[%s18700_s1 + $0x538] sm:$0xff]  }
 0x345   : > { %v16730_v4 = vadd.f32 %v12988_v57, %v4147_v29  ;;  %13230 = vmatpush3.bf16.msra.mxu1 %v14961_v24 }
 0x346   : > { %v12883_v43 = vpop.f32.mrb[216].mxu1 }
 0x347   : > { %v12989_v55 = vpop.f32.mrb[212].mxu0  ;;  %v12884_v39 = vpop.f32.mrb[217].mxu1 }
 0x348   : > { %v12885_v50 = vadd.f32 %v12884_v39, %v12883_v43  ;;  %v12990_v7 = vpop.f32.mrb[213].mxu0  ;;  %v12886_v25 = vpop.f32.mrb[218].mxu1 }
 0x349   : > { %v12991_v31 = vadd.f32 %v12990_v7, %v12989_v55  ;;  %v12992_v17 = vpop.f32.mrb[214].mxu0  ;;  %v12887_v29 = vpop.f32.mrb[219].mxu1 }
 0x34a   : > { %v4160_v6 = vadd.f32 %v12885_v50, %v16550_v5  ;;  %v12888_v15 = vadd.f32 %v12887_v29, %v12886_v25  ;;  %v12993_v63 = vpop.f32.mrb[215].mxu0 }
 0x34b   : > { %v12994_v3 = vadd.f32 %v12993_v63, %v12992_v17  ;;  %v16745_v0 = vadd.f32 %v12991_v31, %v4152_v11 }
 0x34c   : > { %v4163_v52 = vadd.f32 %v12888_v15, %v16560_v38 }
 0x34d   : > { %v16748_v22 = vadd.f32 %v12994_v3, %v4155_v36 }
 0x34e   : > { %v12889_v30 = vpop.f32.mrb[220].mxu1 }
 0x34f   : > { %v12995_v44 = vpop.f32.mrb[216].mxu0  ;;  %v12890_v20 = vpop.f32.mrb[221].mxu1 }
 0x350   : > { %v12891_v59 = vadd.f32 %v12890_v20, %v12889_v30  ;;  %v12996_v61 = vpop.f32.mrb[217].mxu0  ;;  %v12892_v35 = vpop.f32.mrb[222].mxu1 }
 0x351   : > { %v12997_v32 = vadd.f32 %v12996_v61, %v12995_v44  ;;  %v12998_v19 = vpop.f32.mrb[218].mxu0  ;;  %v12893_v46 = vpop.f32.mrb[223].mxu1 }
 0x352   : > { %v4168_v5 = vadd.f32 %v12891_v59, %v16566_v28  ;;  %v12894_v51 = vadd.f32 %v12893_v46, %v12892_v35  ;;  %v12999_v57 = vpop.f32.mrb[219].mxu0 }
 0x353   : > { %v13000_v45 = vadd.f32 %v12999_v57, %v12998_v19  ;;  %v16751_v11 = vadd.f32 %v12997_v32, %v4160_v6 }
 0x354   : > { %v4171_v38 = vadd.f32 %v12894_v51, %v16569_v18 }
 0x355   : > { %v16754_v36 = vadd.f32 %v13000_v45, %v4163_v52 }
 0x356   : > { %v12895_v43 = vpop.f32.mrb[224].mxu1 }
 0x357   : > { %v13001_v54 = vpop.f32.mrb[220].mxu0  ;;  %v12896_v28 = vpop.f32.mrb[225].mxu1 }
 0x358   : > { %v12897_v55 = vadd.f32 %v12896_v28, %v12895_v43  ;;  %v13002_v39 = vpop.f32.mrb[221].mxu0  ;;  %v12898_v24 = vpop.f32.mrb[226].mxu1  ;;  %v14965_v43 = vld [vmem:[%s18700_s1 + $0x590] sm:$0xff]  }
 0x359   : > { %v13003_v50 = vadd.f32 %v13002_v39, %v13001_v54  ;;  %v13004_v7 = vpop.f32.mrb[222].mxu0  ;;  %v12899_v18 = vpop.f32.mrb[227].mxu1 }
 0x35a   : > { %v4176_v25 = vadd.f32 %v12897_v55, %v16574_v53  ;;  %v12900_v31 = vadd.f32 %v12899_v18, %v12898_v24  ;;  %v13005_v17 = vpop.f32.mrb[223].mxu0 }
 0x35b   : > { %v13006_v29 = vadd.f32 %v13005_v17, %v13004_v7  ;;  %v16763_v6 = vadd.f32 %v13003_v50, %v4168_v5 }
 0x35c   : > { %v4179_v15 = vadd.f32 %v12900_v31, %v16582_v27 }
 0x35d   : > { %v16766_v63 = vadd.f32 %v13006_v29, %v4171_v38  ;;  %v14964_v38 = vld [vmem:[%s18700_s1 + $0x5d0] sm:$0xff]  }
 0x35e   : > { %v12901_v3 = vpop.f32.mrb[228].mxu1  ;;  %13331 = vmatprep.subr.bf16.mxu0 %v14964_v38 }
 0x35f   : > { %v13007_v52 = vpop.f32.mrb[224].mxu0  ;;  %v12902_v30 = vpop.f32.mrb[229].mxu1  ;;  %13332 = vmatpush3.bf16.msra.mxu0 %v14965_v43 }
 0x360   : > { %v12903_v44 = vadd.f32 %v12902_v30, %v12901_v3  ;;  %v13008_v20 = vpop.f32.mrb[225].mxu0  ;;  %v12904_v59 = vpop.f32.mrb[230].mxu1 }
 0x361   : > { %v13009_v61 = vadd.f32 %v13008_v20, %v13007_v52  ;;  %v13010_v35 = vpop.f32.mrb[226].mxu0  ;;  %v12905_v32 = vpop.f32.mrb[231].mxu1 }
 0x362   : > { %v4184_v53 = vadd.f32 %v12903_v44, %v16586_v41  ;;  %v12906_v19 = vadd.f32 %v12905_v32, %v12904_v59  ;;  %v13011_v46 = vpop.f32.mrb[227].mxu0 }
 0x363   : > { %v13012_v51 = vadd.f32 %v13011_v46, %v13010_v35  ;;  %v16769_v5 = vadd.f32 %v13009_v61, %v4176_v25 }
 0x364   : > { %v4187_v27 = vadd.f32 %v12906_v19, %v16588_v62 }
 0x365   : > { %v16772_v57 = vadd.f32 %v13012_v51, %v4179_v15 }
 0x366   : > { %v12907_v45 = vpop.f32.mrb[232].mxu1 }
 0x367   : > { %v13013_v12 = vpop.f32.mrb[228].mxu0  ;;  %v12908_v41 = vpop.f32.mrb[233].mxu1 }
 0x368   : > { %v12909_v8 = vadd.f32 %v12908_v41, %v12907_v45  ;;  %v13014_v54 = vpop.f32.mrb[229].mxu0  ;;  %v12910_v28 = vpop.f32.mrb[234].mxu1  ;;  %v14967_v45 = vld [vmem:[%s18700_s1 + $0x598] sm:$0xff]  }
 0x369   : > { %v13015_v55 = vadd.f32 %v13014_v54, %v13013_v12  ;;  %v13016_v39 = vpop.f32.mrb[230].mxu0  ;;  %v12911_v62 = vpop.f32.mrb[235].mxu1 }
 0x36a   : > { %v4192_v24 = vadd.f32 %v12909_v8, %v16592_v14  ;;  %v12912_v50 = vadd.f32 %v12911_v62, %v12910_v28  ;;  %v13017_v7 = vpop.f32.mrb[231].mxu0 }
 0x36b   : > { %v13018_v18 = vadd.f32 %v13017_v7, %v13016_v39  ;;  %v16781_v25 = vadd.f32 %v13015_v55, %v4184_v53 }
 0x36c   : > { %v4195_v31 = vadd.f32 %v12912_v50, %v16600_v21 }
 0x36d   : > { %v16784_v17 = vadd.f32 %v13018_v18, %v4187_v27  ;;  %v14966_v27 = vld [vmem:[%s18700_s1 + $0x5d8] sm:$0xff]  }
 0x36e   : > { %v12913_v29 = vpop.f32.mrb[236].mxu1  ;;  %13333 = vmatprep.subr.bf16.mxu0 %v14966_v27 }
 0x36f   : > { %v13019_v15 = vpop.f32.mrb[232].mxu0  ;;  %v12914_v3 = vpop.f32.mrb[237].mxu1  ;;  %13334 = vmatpush3.bf16.msra.mxu0 %v14967_v45 }
 0x370   : > { %v12915_v52 = vadd.f32 %v12914_v3, %v12913_v29  ;;  %v13020_v30 = vpop.f32.mrb[233].mxu0  ;;  %v12916_v44 = vpop.f32.mrb[238].mxu1 }
 0x371   : > { %v13021_v20 = vadd.f32 %v13020_v30, %v13019_v15  ;;  %v13022_v59 = vpop.f32.mrb[234].mxu0  ;;  %v12917_v61 = vpop.f32.mrb[239].mxu1 }
 0x372   : > { %v4200_v14 = vadd.f32 %v12915_v52, %v16604_v49  ;;  %v12918_v35 = vadd.f32 %v12917_v61, %v12916_v44  ;;  %v13023_v32 = vpop.f32.mrb[235].mxu0 }
 0x373   : > { %v13024_v19 = vadd.f32 %v13023_v32, %v13022_v59  ;;  %v16787_v53 = vadd.f32 %v13021_v20, %v4192_v24 }
 0x374   : > { %v4203_v21 = vadd.f32 %v12918_v35, %v16606_v1 }
 0x375   : > { %v16790_v46 = vadd.f32 %v13024_v19, %v4195_v31 }
 0x376   : > { %v12919_v51 = vpop.f32.mrb[240].mxu1 }
 0x377   : > { %v13025_v38 = vpop.f32.mrb[236].mxu0  ;;  %v12920_v49 = vpop.f32.mrb[241].mxu1 }
 0x378   : > { %v12921_v43 = vadd.f32 %v12920_v49, %v12919_v51  ;;  %v13026_v12 = vpop.f32.mrb[237].mxu0  ;;  %v12922_v41 = vpop.f32.mrb[242].mxu1 }
 0x379   : > { %v13027_v8 = vadd.f32 %v13026_v12, %v13025_v38  ;;  %v13028_v54 = vpop.f32.mrb[238].mxu0  ;;  %v12923_v1 = vpop.f32.mrb[243].mxu1 }
 0x37a   : > { %v4208_v28 = vadd.f32 %v12921_v43, %v16610_v40  ;;  %v12924_v55 = vadd.f32 %v12923_v1, %v12922_v41  ;;  %v13029_v39 = vpop.f32.mrb[239].mxu0  ;;  %v14968_v40 = vld [vmem:[%s18700_s1 + $0x5e0] sm:$0xff]  }
 0x37b   : > { %v13030_v62 = vadd.f32 %v13029_v39, %v13028_v54  ;;  %v16799_v24 = vadd.f32 %v13027_v8, %v4200_v14  ;;  %13335 = vmatprep.subr.bf16.mxu0 %v14968_v40 }
 0x37c   : > { %v4211_v50 = vadd.f32 %v12924_v55, %v16618_v56  ;;  %v14969_v56 = vld [vmem:[%s18700_s1 + $0x5a0] sm:$0xff]  }
 0x37d   : > { %v16802_v7 = vadd.f32 %v13030_v62, %v4203_v21  ;;  %13336 = vmatpush3.bf16.msra.mxu0 %v14969_v56 }
 0x37e   : > { %v12925_v18 = vpop.f32.mrb[244].mxu1 }
 0x37f   : > { %v13031_v31 = vpop.f32.mrb[240].mxu0  ;;  %v12926_v29 = vpop.f32.mrb[245].mxu1 }
 0x380   : > { %v12927_v15 = vadd.f32 %v12926_v29, %v12925_v18  ;;  %v13032_v3 = vpop.f32.mrb[241].mxu0  ;;  %v12928_v52 = vpop.f32.mrb[246].mxu1 }
 0x381   : > { %v13033_v30 = vadd.f32 %v13032_v3, %v13031_v31  ;;  %v13034_v44 = vpop.f32.mrb[242].mxu0  ;;  %v12929_v20 = vpop.f32.mrb[247].mxu1 }
 0x382   : > { %v4216_v59 = vadd.f32 %v12927_v15, %v16622_v10  ;;  %v12930_v61 = vadd.f32 %v12929_v20, %v12928_v52  ;;  %v13035_v14 = vpop.f32.mrb[243].mxu0 }
 0x383   : > { %v13036_v35 = vadd.f32 %v13035_v14, %v13034_v44  ;;  %v16811_v32 = vadd.f32 %v13033_v30, %v4208_v28 }
 0x384   : > { %v4219_v19 = vadd.f32 %v12930_v61, %v16624_v48 }
 0x385   : > { %v16814_v21 = vadd.f32 %v13036_v35, %v4211_v50 }
 0x386   : > { %v12931_v51 = vpop.f32.mrb[248].mxu1 }
 0x387   : > { %v13037_v27 = vpop.f32.mrb[244].mxu0  ;;  %v12932_v45 = vpop.f32.mrb[249].mxu1 }
 0x388   : > { %v12933_v38 = vadd.f32 %v12932_v45, %v12931_v51  ;;  %v13038_v10 = vpop.f32.mrb[245].mxu0  ;;  %v12934_v49 = vpop.f32.mrb[250].mxu1 }
 0x389   : > { %v13039_v43 = vadd.f32 %v13038_v10, %v13037_v27  ;;  %v13040_v12 = vpop.f32.mrb[246].mxu0  ;;  %v12935_v41 = vpop.f32.mrb[251].mxu1 }
 0x38a   : > { %v4224_v8 = vadd.f32 %v12933_v38, %v16628_v9  ;;  %v12936_v54 = vadd.f32 %v12935_v41, %v12934_v49  ;;  %v13041_v1 = vpop.f32.mrb[247].mxu0  ;;  %v14970_v9 = vld [vmem:[%s18700_s1 + $0x5e8] sm:$0xff]  }
 0x38b   : > { %v13042_v28 = vadd.f32 %v13041_v1, %v13040_v12  ;;  %v16817_v55 = vadd.f32 %v13039_v43, %v4216_v59  ;;  %13337 = vmatprep.subr.bf16.mxu0 %v14970_v9 }
 0x38c   : > { %v4227_v48 = vadd.f32 %v12936_v54, %v16637_v42  ;;  %v14971_v42 = vld [vmem:[%s18700_s1 + $0x5a8] sm:$0xff]  }
 0x38d   : > { %v16820_v39 = vadd.f32 %v13042_v28, %v4219_v19  ;;  %13338 = vmatpush3.bf16.msra.mxu0 %v14971_v42 }
 0x38e   : > { %v12937_v62 = vpop.f32.mrb[252].mxu1 }
 0x38f   : > { %v13043_v50 = vpop.f32.mrb[248].mxu0  ;;  %v12938_v18 = vpop.f32.mrb[253].mxu1 }
 0x390   : > { %v12939_v31 = vadd.f32 %v12938_v18, %v12937_v62  ;;  %v13044_v29 = vpop.f32.mrb[249].mxu0  ;;  %v12940_v15 = vpop.f32.mrb[254].mxu1 }
 0x391   : > { %v13045_v3 = vadd.f32 %v13044_v29, %v13043_v50  ;;  %v13046_v52 = vpop.f32.mrb[250].mxu0  ;;  %v12941_v30 = vpop.f32.mrb[255].mxu1 }
 0x392   : > { %v4232_v44 = vadd.f32 %v12939_v31, %v16641_v60  ;;  %v12942_v20 = vadd.f32 %v12941_v30, %v12940_v15  ;;  %v13047_v40 = vpop.f32.mrb[251].mxu0 }
 0x393   : > { %v13048_v59 = vadd.f32 %v13047_v40, %v13046_v52  ;;  %v16829_v61 = vadd.f32 %v13045_v3, %v4224_v8 }
 0x394   : > { %v4235_v14 = vadd.f32 %v12942_v20, %v16643_v34 }
 0x395   : > { %v16832_v56 = vadd.f32 %v13048_v59, %v4227_v48 }
 0x396   : > { %v12943_v35 = vpop.f32.mrb[0].mxu1 }
 0x397   : > { %v13049_v19 = vpop.f32.mrb[252].mxu0  ;;  %v12944_v51 = vpop.f32.mrb[1].mxu1 }
 0x398   : > { %v12945_v27 = vadd.f32 %v12944_v51, %v12943_v35  ;;  %v13050_v60 = vpop.f32.mrb[253].mxu0  ;;  %v12946_v45 = vpop.f32.mrb[2].mxu1 }
 0x399   : > { %v13051_v38 = vadd.f32 %v13050_v60, %v13049_v19  ;;  %v13052_v10 = vpop.f32.mrb[254].mxu0  ;;  %v12947_v49 = vpop.f32.mrb[3].mxu1 }
 0x39a   : > { %v4240_v43 = vadd.f32 %v12945_v27, %v16647_v16  ;;  %v12948_v12 = vadd.f32 %v12947_v49, %v12946_v45  ;;  %v13053_v41 = vpop.f32.mrb[255].mxu0  ;;  %v14972_v16 = vld [vmem:[%s18700_s1 + $0x5f0] sm:$0xff]  }
 0x39b   : > { %v13054_v8 = vadd.f32 %v13053_v41, %v13052_v10  ;;  %v16835_v54 = vadd.f32 %v13051_v38, %v4232_v44  ;;  %13339 = vmatprep.subr.bf16.mxu0 %v14972_v16  ;;  %v14974_v38 = vld [vmem:[%s18700_s1 + $0x640] sm:$0xff]  }
 0x39c   : > { %v4243_v34 = vadd.f32 %v12948_v12, %v16655_v37  ;;  %v14973_v37 = vld [vmem:[%s18700_s1 + $0x5b0] sm:$0xff]   ;;  %13439 = vmatprep.subr.bf16.mxu1 %v14974_v38 }
 0x39d   : > { %v16838_v1 = vadd.f32 %v13054_v8, %v4235_v14  ;;  %13340 = vmatpush3.bf16.msra.mxu0 %v14973_v37 }
 0x39e   : > { %v12949_v28 = vpop.f32.mrb[4].mxu1 }
 0x39f   : > { %v13055_v48 = vpop.f32.mrb[0].mxu0  ;;  %v12950_v62 = vpop.f32.mrb[5].mxu1 }
 0x3a0   : > { %v12951_v50 = vadd.f32 %v12950_v62, %v12949_v28  ;;  %v13056_v18 = vpop.f32.mrb[1].mxu0  ;;  %v12952_v31 = vpop.f32.mrb[6].mxu1 }
 0x3a1   : > { %v13057_v29 = vadd.f32 %v13056_v18, %v13055_v48  ;;  %v13058_v15 = vpop.f32.mrb[2].mxu0  ;;  %v12953_v3 = vpop.f32.mrb[7].mxu1 }
 0x3a2   : > { %v4248_v52 = vadd.f32 %v12951_v50, %v16662_v23  ;;  %v12954_v30 = vadd.f32 %v12953_v3, %v12952_v31  ;;  %v13059_v9 = vpop.f32.mrb[3].mxu0 }
 0x3a3   : > { %v13060_v44 = vadd.f32 %v13059_v9, %v13058_v15  ;;  %v16847_v20 = vadd.f32 %v13057_v29, %v4240_v43 }
 0x3a4   : > { %v4251_v40 = vadd.f32 %v12954_v30, %v16670_v26 }
 0x3a5   : > { %v16850_v42 = vadd.f32 %v13060_v44, %v4243_v34 }
 0x3a6   : > { %v12955_v59 = vpop.f32.mrb[8].mxu1 }
 0x3a7   : > { %v13061_v14 = vpop.f32.mrb[4].mxu0  ;;  %v12956_v35 = vpop.f32.mrb[9].mxu1 }
 0x3a8   : > { %v12957_v19 = vadd.f32 %v12956_v35, %v12955_v59  ;;  %v13062_v23 = vpop.f32.mrb[5].mxu0  ;;  %v12958_v51 = vpop.f32.mrb[10].mxu1 }
 0x3a9   : > { %v13063_v27 = vadd.f32 %v13062_v23, %v13061_v14  ;;  %v13064_v60 = vpop.f32.mrb[6].mxu0  ;;  %v12959_v45 = vpop.f32.mrb[11].mxu1 }
 0x3aa   : > { %v4256_v10 = vadd.f32 %v12957_v19, %v16680_v58  ;;  %v12960_v49 = vadd.f32 %v12959_v45, %v12958_v51  ;;  %v13065_v26 = vpop.f32.mrb[7].mxu0  ;;  %v14978_v58 = vld [vmem:[%s18700_s1 + $0x5f8] sm:$0xff]  }
 0x3ab   : > { %v13066_v43 = vadd.f32 %v13065_v26, %v13064_v60  ;;  %v16856_v12 = vadd.f32 %v13063_v27, %v4248_v52  ;;  %13341 = vmatprep.subr.bf16.mxu0 %v14978_v58 }
 0x3ac   : > { %v4259_v41 = vadd.f32 %v12960_v49, %v16694_v33  ;;  %v14980_v33 = vld [vmem:[%s18700_s1 + $0x5b8] sm:$0xff]  }
 0x3ad   : > { %v16859_v8 = vadd.f32 %v13066_v43, %v4251_v40  ;;  %13342 = vmatpush3.bf16.msra.mxu0 %v14980_v33 }
 0x3ae   : > { %v12961_v34 = vpop.f32.mrb[12].mxu1 }
 0x3af   : > { %v13067_v28 = vpop.f32.mrb[8].mxu0  ;;  %v12962_v48 = vpop.f32.mrb[13].mxu1 }
 0x3b0   : > { %v12963_v62 = vadd.f32 %v12962_v48, %v12961_v34  ;;  %v13068_v50 = vpop.f32.mrb[9].mxu0  ;;  %v12964_v18 = vpop.f32.mrb[14].mxu1 }
 0x3b1   : > { %v13069_v31 = vadd.f32 %v13068_v50, %v13067_v28  ;;  %v13070_v29 = vpop.f32.mrb[10].mxu0  ;;  %v12965_v15 = vpop.f32.mrb[15].mxu1 }
 0x3b2   : > { %v4264_v3 = vadd.f32 %v12963_v62, %v16705_v47  ;;  %v12966_v16 = vadd.f32 %v12965_v15, %v12964_v18  ;;  %v13071_v52 = vpop.f32.mrb[11].mxu0  ;;  %v16887_v15 = vld [vmem:[%s18700_s1 + $0x680] sm:$0xff]  }
 0x3b3   : > { %v13072_v30 = vadd.f32 %v13071_v52, %v13070_v29  ;;  %v16868_v9 = vadd.f32 %v13069_v31, %v4256_v10  ;;  %v4785_v52 = vld [vmem:[#allocation2 + $0x11] sm:$0xff]  ;;  %14615 = vmatprep.subr.bf16.mxu0 %v16887_v15 }
 0x3b4   : > { %v4267_v37 = vadd.f32 %v12966_v16, %v16711_v13  ;;  %v4784_v16 = vld [vmem:[#allocation2 + $0x9] sm:$0xff] }
 0x3b5   : > { %v16871_v44 = vadd.f32 %v13072_v30, %v4259_v41  ;;  %v4816_v30 = vpack.c.bf16 %v4785_v52, %v4784_v16 }
 0x3b6   : > { %v14585_v40 = vpop.f32.mrb[16].mxu1 }
 0x3b7   : > { %v13073_v59 = vpop.f32.mrb[12].mxu0  ;;  %v4474_v14 = vadd.f32 %v14585_v40, %v16745_v0  ;;  %v4465_v47 = vpop.f32.mrb[17].mxu1 }
 0x3b8   : > { %v13074_v35 = vpop.f32.mrb[13].mxu0  ;;  %v4466_v19 = vadd.f32 %v4465_v47, %v16724_v2  ;;  %v14586_v23 = vpop.f32.mrb[18].mxu1 }
 0x3b9   : > { %v4594_v51 = vmax.f32 %v4474_v14, 0.0  ;;  %v13075_v27 = vadd.f32 %v13074_v35, %v13073_v59  ;;  %v13076_v60 = vpop.f32.mrb[14].mxu0  ;;  %v4477_v45 = vadd.f32 %v14586_v23, %v16748_v22  ;;  %v4468_v38 = vpop.f32.mrb[19].mxu1 }
 0x3ba   : > { %v4592_v10 = vmax.f32 %v4466_v19, 0.0  ;;  %v13077_v13 = vpop.f32.mrb[15].mxu0  ;;  %v4469_v49 = vadd.f32 %v4468_v38, %v16730_v4 }
 0x3bb   : > { %4626 = vst [vmem:[#allocation2 + $0x48] sm:$0xff] %v4594_v51  ;;  %v4595_v26 = vmax.f32 %v4477_v45, 0.0  ;;  %v13078_v43 = vadd.f32 %v13077_v13, %v13076_v60  ;;  %v16877_v41 = vadd.f32 %v13075_v27, %v4264_v3 }
 0x3bc   : > { %4624 = vst [vmem:[#allocation2 + $0x28] sm:$0xff] %v4592_v10  ;;  %v4593_v0 = vmax.f32 %v4469_v49, 0.0 }
 0x3bd   : > { %4627 = vst [vmem:[#allocation2 + $0x50] sm:$0xff] %v4595_v26  ;;  %v4754_v2 = vpack.c.bf16 %v4595_v26, %v4594_v51  ;;  %v16879_v34 = vadd.f32 %v13078_v43, %v4267_v37  ;;  %v14976_v51 = vld [vmem:[%s18700_s1 + $0x648] sm:$0xff]  }
 0x3be   : > { %4625 = vst [vmem:[#allocation2 + $0x30] sm:$0xff] %v4593_v0  ;;  %v14589_v28 = vpop.f32.mrb[20].mxu1  ;;  %v4753_v48 = vpack.c.bf16 %v4593_v0, %v4592_v10 }
 0x3bf   : > { %v4490_v22 = vadd.f32 %v14589_v28, %v16763_v6  ;;  %v4481_v62 = vpop.f32.mrb[21].mxu1 }
 0x3c0   : > { %v4482_v50 = vadd.f32 %v4481_v62, %v16751_v11  ;;  %v14590_v4 = vpop.f32.mrb[22].mxu1  ;;  %6001 = vmatprep.mubr.bf16.mxu0 %v4753_v48  ;;  %v14981_v62 = vld [vmem:[%s18700_s1 + $0x610] sm:$0xff]  }
 0x3c1   : > { %v4598_v18 = vmax.f32 %v4490_v22, 0.0  ;;  %v4493_v31 = vadd.f32 %v14590_v4, %v16766_v63  ;;  %v4484_v29 = vpop.f32.mrb[23].mxu1 }
 0x3c2   : > { %v4596_v58 = vmax.f32 %v4482_v50, 0.0  ;;  %v4485_v3 = vadd.f32 %v4484_v29, %v16754_v36  ;;  %v14975_v36 = vld [vmem:[%s18700_s1 + $0x600] sm:$0xff]   ;;  %v14982_v29 = vld [vmem:[%s18700_s1 + $0x658] sm:$0xff]  }
 0x3c3   : > { %4630 = vst [vmem:[#allocation2 + $0x88] sm:$0xff] %v4598_v18  ;;  %v4599_v6 = vmax.f32 %v4493_v31, 0.0  ;;  %v4848_v33 = vld [vmem:[#allocation2 + $0x27] sm:$0xff] }
 0x3c4   : > { %4628 = vst [vmem:[#allocation2 + $0x68] sm:$0xff] %v4596_v58  ;;  %v4597_v11 = vmax.f32 %v4485_v3, 0.0  ;;  %v4851_v37 = vld [vmem:[#allocation2 + $0x4f] sm:$0xff]  ;;  %v4850_v23 = vld [vmem:[#allocation2 + $0x47] sm:$0xff] }
 0x3c5   : > { %4631 = vst [vmem:[#allocation2 + $0x90] sm:$0xff] %v4599_v6  ;;  %v4849_v63 = vld [vmem:[#allocation2 + $0x2f] sm:$0xff]  ;;  %v16891_v40 = vpack.c.bf16 %v4599_v6, %v4598_v18  ;;  %v16901_v45 = vpack.c.bf16 %v4851_v37, %v4850_v23 }
 0x3c6   : > { %4629 = vst [vmem:[#allocation2 + $0x70] sm:$0xff] %v4597_v11  ;;  %v14593_v59 = vpop.f32.mrb[24].mxu1  ;;  %v4880_v14 = vpack.c.bf16 %v4849_v63, %v4848_v33  ;;  %v4755_v47 = vpack.c.bf16 %v4597_v11, %v4596_v58  ;;  %v4786_v0 = vld [vmem:[#allocation2 + $0x29] sm:$0xff] }
 0x3c7   : > { %v4506_v35 = vadd.f32 %v14593_v59, %v16781_v25  ;;  %v4497_v19 = vpop.f32.mrb[25].mxu1  ;;  %v4788_v37 = vld [vmem:[#allocation2 + $0x49] sm:$0xff]  ;;  %v4789_v59 = vld [vmem:[#allocation2 + $0x51] sm:$0xff] }
 0x3c8   : > { %v4498_v27 = vadd.f32 %v4497_v19, %v16769_v5  ;;  %v14594_v60 = vpop.f32.mrb[26].mxu1  ;;  %6154 = vmatprep.mubr.bf16.mxu1 %v4880_v14  ;;  %6002 = vmatmul.mubr.bf16.gmra.mrb[20].mxu0 %v4880_v14  ;;  %v14977_v5 = vld [vmem:[%s18700_s1 + $0x608] sm:$0xff]  }
 0x3c9   : > { %v4602_v38 = vmax.f32 %v4506_v35, 0.0  ;;  %v4509_v10 = vadd.f32 %v14594_v60, %v16784_v17  ;;  %v4500_v13 = vpop.f32.mrb[27].mxu1  ;;  %6155 = vmatmul.mubr.bf16.vlgmr.msra.gmra.mrb[48].mxu1 %v4816_v30  ;;  %6009 = vmatprep.mubr.bf16.mxu0 %v4754_v2  ;;  %v14979_v17 = vld [vmem:[%s18700_s1 + $0x650] sm:$0xff]   ;;  %v14985_v35 = vld [vmem:[%s18700_s1 + $0x620] sm:$0xff]   ;;  %v14986_v60 = vld [vmem:[%s18700_s1 + $0x668] sm:$0xff]  }
 0x3ca   : > { %v4600_v25 = vmax.f32 %v4498_v27, 0.0  ;;  %v4501_v49 = vadd.f32 %v4500_v13, %v16772_v57  ;;  %6162 = vmatprep.mubr.bf16.mxu1 %v16901_v45  ;;  %13440 = vmatpush3.bf16.msra.mxu1 %v14975_v36  ;;  %v4787_v2 = vld [vmem:[#allocation2 + $0x31] sm:$0xff]  ;;  %v4854_v27 = vld [vmem:[#allocation2 + $0x87] sm:$0xff] }
 0x3cb   : > { %4634 = vst [vmem:[#allocation2 + $0xc8] sm:$0xff] %v4602_v38  ;;  %v4603_v26 = vmax.f32 %v4509_v10, 0.0  ;;  %13441 = vmatprep.subr.bf16.mxu1 %v14976_v51  ;;  %v16920_v18 = vpack.c.bf16 %v4787_v2, %v4786_v0  ;;  %v4852_v31 = vld [vmem:[#allocation2 + $0x67] sm:$0xff]  ;;  %v16947_v51 = vpack.c.bf16 %v4789_v59, %v4788_v37 }
 0x3cc   : > { %4632 = vst [vmem:[#allocation2 + $0xa8] sm:$0xff] %v4600_v25  ;;  %v4601_v43 = vmax.f32 %v4501_v49, 0.0 }
 0x3cd   : > { %4635 = vst [vmem:[#allocation2 + $0xd0] sm:$0xff] %v4603_v26  ;;  %v4853_v57 = vld [vmem:[#allocation2 + $0x6f] sm:$0xff]  ;;  %v16912_v28 = vpack.c.bf16 %v4603_v26, %v4602_v38 }
 0x3ce   : > { %4633 = vst [vmem:[#allocation2 + $0xb0] sm:$0xff] %v4601_v43  ;;  %v14597_v48 = vpop.f32.mrb[28].mxu1  ;;  %v16914_v22 = vpack.c.bf16 %v4601_v43, %v4600_v25  ;;  %13442 = vmatpush3.bf16.msra.mxu1 %v14977_v5  ;;  %v16927_v16 = vpack.c.bf16 %v4853_v57, %v4852_v31  ;;  %v4791_v0 = vld [vmem:[#allocation2 + $0x71] sm:$0xff] }
 0x3cf   : > { %v4522_v50 = vadd.f32 %v14597_v48, %v16799_v24  ;;  %v4513_v4 = vpop.f32.mrb[29].mxu1  ;;  %13443 = vmatprep.subr.bf16.mxu1 %v14979_v17 }
 0x3d0   : > { %v4514_v58 = vadd.f32 %v4513_v4, %v16787_v53  ;;  %v14598_v3 = vpop.f32.mrb[30].mxu1  ;;  %6010 = vmatmul.mubr.bf16.gmra.mrb[24].mxu0 %v16901_v45  ;;  %v14983_v53 = vld [vmem:[%s18700_s1 + $0x618] sm:$0xff]  }
 0x3d1   : > { %v4606_v52 = vmax.f32 %v4522_v50, 0.0  ;;  %v4525_v6 = vadd.f32 %v14598_v3, %v16802_v7  ;;  %v4516_v24 = vpop.f32.mrb[31].mxu1  ;;  %6163 = vmatmul.mubr.bf16.gmra.mrb[52].mxu1 %v16920_v18  ;;  %6017 = vmatprep.mubr.bf16.mxu0 %v4755_v47  ;;  %v14984_v7 = vld [vmem:[%s18700_s1 + $0x660] sm:$0xff]  }
 0x3d2   : > { %v4604_v11 = vmax.f32 %v4514_v58, 0.0  ;;  %v4517_v33 = vadd.f32 %v4516_v24, %v16790_v46  ;;  %6170 = vmatprep.mubr.bf16.mxu1 %v16927_v16  ;;  %13444 = vmatpush3.bf16.msra.mxu1 %v14981_v62  ;;  %v4855_v46 = vld [vmem:[#allocation2 + $0x8f] sm:$0xff]  ;;  %v14991_v58 = vld [vmem:[%s18700_s1 + $0x678] sm:$0xff]  }
 0x3d3   : > { %4638 = vst [vmem:[#allocation2 + $0x108] sm:$0xff] %v4606_v52  ;;  %v4607_v63 = vmax.f32 %v4525_v6, 0.0  ;;  %13445 = vmatprep.subr.bf16.mxu1 %v14982_v29  ;;  %v16954_v13 = vpack.c.bf16 %v4855_v46, %v4854_v27  ;;  %v14990_v62 = vld [vmem:[%s18700_s1 + $0x630] sm:$0xff]   ;;  %v4856_v29 = vld [vmem:[#allocation2 + $0xa7] sm:$0xff] }
 0x3d4   : > { %4636 = vst [vmem:[#allocation2 + $0xe8] sm:$0xff] %v4604_v11  ;;  %v4605_v30 = vmax.f32 %v4517_v33, 0.0  ;;  %v4859_v37 = vld [vmem:[#allocation2 + $0xcf] sm:$0xff] }
 0x3d5   : > { %4639 = vst [vmem:[#allocation2 + $0x110] sm:$0xff] %v4607_v63  ;;  %v16939_v14 = vpack.c.bf16 %v4607_v63, %v4606_v52 }
 0x3d6   : > { %4637 = vst [vmem:[#allocation2 + $0xf0] sm:$0xff] %v4605_v30  ;;  %v14601_v47 = vpop.f32.mrb[32].mxu1  ;;  %v16941_v36 = vpack.c.bf16 %v4605_v30, %v4604_v11  ;;  %13446 = vmatpush3.bf16.msra.mxu1 %v14983_v53  ;;  %v4793_v30 = vld [vmem:[#allocation2 + $0x91] sm:$0xff] }
 0x3d7   : > { %v4538_v19 = vadd.f32 %v14601_v47, %v16817_v55  ;;  %v4529_v23 = vpop.f32.mrb[33].mxu1  ;;  %13447 = vmatprep.subr.bf16.mxu1 %v14984_v7  ;;  %v4792_v7 = vld [vmem:[#allocation2 + $0x89] sm:$0xff] }
 0x3d8   : > { %v4530_v38 = vadd.f32 %v4529_v23, %v16811_v32  ;;  %v14602_v10 = vpop.f32.mrb[34].mxu1  ;;  %6018 = vmatmul.mubr.bf16.gmra.mrb[28].mxu0 %v16927_v16  ;;  %v14987_v32 = vld [vmem:[%s18700_s1 + $0x628] sm:$0xff]  }
 0x3d9   : > { %v4610_v25 = vmax.f32 %v4538_v19, 0.0  ;;  %v4541_v49 = vadd.f32 %v14602_v10, %v16820_v39  ;;  %v4532_v55 = vpop.f32.mrb[35].mxu1  ;;  %6171 = vmatmul.mubr.bf16.gmra.mrb[56].mxu1 %v16947_v51  ;;  %6025 = vmatprep.mubr.bf16.mxu0 %v16891_v40  ;;  %v14988_v39 = vld [vmem:[%s18700_s1 + $0x670] sm:$0xff]   ;;  %v4858_v19 = vld [vmem:[#allocation2 + $0xc7] sm:$0xff] }
 0x3da   : > { %v4608_v5 = vmax.f32 %v4530_v38, 0.0  ;;  %v4533_v26 = vadd.f32 %v4532_v55, %v16814_v21  ;;  %6178 = vmatprep.mubr.bf16.mxu1 %v16954_v13  ;;  %13448 = vmatpush3.bf16.msra.mxu1 %v14985_v35  ;;  %v4790_v40 = vld [vmem:[#allocation2 + $0x69] sm:$0xff]  ;;  %v16997_v35 = vpack.c.bf16 %v4793_v30, %v4792_v7 }
 0x3db   : > { %4642 = vst [vmem:[#allocation2 + $0x148] sm:$0xff] %v4610_v25  ;;  %v4611_v17 = vmax.f32 %v4541_v49, 0.0  ;;  %13449 = vmatprep.subr.bf16.mxu1 %v14986_v60  ;;  %v4857_v21 = vld [vmem:[#allocation2 + $0xaf] sm:$0xff]  ;;  %v16975_v31 = vpack.c.bf16 %v4791_v0, %v4790_v40  ;;  %v17001_v60 = vpack.c.bf16 %v4859_v37, %v4858_v19  ;;  %v4860_v40 = vld [vmem:[#allocation2 + $0xe7] sm:$0xff] }
 0x3dc   : > { %4640 = vst [vmem:[#allocation2 + $0x128] sm:$0xff] %v4608_v5  ;;  %v4609_v43 = vmax.f32 %v4533_v26, 0.0  ;;  %v16982_v6 = vpack.c.bf16 %v4857_v21, %v4856_v29  ;;  %v4795_v26 = vld [vmem:[#allocation2 + $0xb1] sm:$0xff]  ;;  %v4800_v7 = vld [vmem:[#allocation2 + $0x109] sm:$0xff] }
 0x3dd   : > { %4643 = vst [vmem:[#allocation2 + $0x150] sm:$0xff] %v4611_v17  ;;  %v16967_v2 = vpack.c.bf16 %v4611_v17, %v4610_v25 }
 0x3de   : > { %4641 = vst [vmem:[#allocation2 + $0x130] sm:$0xff] %v4609_v43  ;;  %v14605_v57 = vpop.f32.mrb[36].mxu1  ;;  %v16969_v48 = vpack.c.bf16 %v4609_v43, %v4608_v5  ;;  %13450 = vmatpush3.bf16.msra.mxu1 %v14987_v32  ;;  %v4794_v5 = vld [vmem:[#allocation2 + $0xa9] sm:$0xff] }
 0x3df   : > { %v4554_v50 = vadd.f32 %v14605_v57, %v16835_v54  ;;  %v4545_v4 = vpop.f32.mrb[37].mxu1  ;;  %13451 = vmatprep.subr.bf16.mxu1 %v14988_v39  ;;  %v4861_v32 = vld [vmem:[#allocation2 + $0xef] sm:$0xff] }
 0x3e0   : > { %v4546_v3 = vadd.f32 %v4545_v4, %v16829_v61  ;;  %v14606_v52 = vpop.f32.mrb[38].mxu1  ;;  %6026 = vmatmul.mubr.bf16.gmra.mrb[32].mxu0 %v16954_v13  ;;  %v14992_v61 = vld [vmem:[%s18700_s1 + $0x638] sm:$0xff]   ;;  %v17017_v57 = vpack.c.bf16 %v4861_v32, %v4860_v40 }
 0x3e1   : > { %v4614_v24 = vmax.f32 %v4554_v50, 0.0  ;;  %v4557_v11 = vadd.f32 %v14606_v52, %v16838_v1  ;;  %v4548_v54 = vpop.f32.mrb[39].mxu1  ;;  %6179 = vmatmul.mubr.bf16.gmra.mrb[60].mxu1 %v16975_v31  ;;  %6033 = vmatprep.mubr.bf16.mxu0 %v16914_v22  ;;  %v4797_v52 = vld [vmem:[#allocation2 + $0xd1] sm:$0xff] }
 0x3e2   : > { %v4612_v33 = vmax.f32 %v4546_v3, 0.0  ;;  %v4549_v53 = vadd.f32 %v4548_v54, %v16832_v56  ;;  %6186 = vmatprep.mubr.bf16.mxu1 %v16982_v6  ;;  %13452 = vmatpush3.bf16.msra.mxu1 %v14990_v62  ;;  %v4796_v3 = vld [vmem:[#allocation2 + $0xc9] sm:$0xff] }
 0x3e3   : > { %4646 = vst [vmem:[#allocation2 + $0x188] sm:$0xff] %v4614_v24  ;;  %v4615_v63 = vmax.f32 %v4557_v11, 0.0  ;;  %13453 = vmatprep.subr.bf16.mxu1 %v14991_v58  ;;  %v17026_v11 = vpack.c.bf16 %v4797_v52, %v4796_v3  ;;  %v4862_v54 = vld [vmem:[#allocation2 + $0x107] sm:$0xff] }
 0x3e4   : > { %4644 = vst [vmem:[#allocation2 + $0x168] sm:$0xff] %v4612_v33  ;;  %v4613_v1 = vmax.f32 %v4549_v53, 0.0  ;;  %v4867_v30 = vld [vmem:[#allocation2 + $0x14f] sm:$0xff] }
 0x3e5   : > { %4647 = vst [vmem:[#allocation2 + $0x190] sm:$0xff] %v4615_v63  ;;  %v16992_v22 = vpack.c.bf16 %v4615_v63, %v4614_v24  ;;  %v4863_v24 = vld [vmem:[#allocation2 + $0x10f] sm:$0xff]  ;;  %v4864_v63 = vld [vmem:[#allocation2 + $0x127] sm:$0xff] }
 0x3e6   : > { %4645 = vst [vmem:[#allocation2 + $0x170] sm:$0xff] %v4613_v1  ;;  %v14609_v56 = vpop.f32.mrb[40].mxu1  ;;  %v16994_v59 = vpack.c.bf16 %v4613_v1, %v4612_v33  ;;  %13454 = vmatpush3.bf16.msra.mxu1 %v14992_v61  ;;  %v4799_v33 = vld [vmem:[#allocation2 + $0xf1] sm:$0xff] }
 0x3e7   : > { %v4570_v46 = vadd.f32 %v14609_v56, %v16856_v12  ;;  %v4561_v47 = vpop.f32.mrb[41].mxu1  ;;  %v4865_v53 = vld [vmem:[#allocation2 + $0x12f] sm:$0xff]  ;;  %v4866_v56 = vld [vmem:[#allocation2 + $0x147] sm:$0xff] }
 0x3e8   : > { %v4562_v23 = vadd.f32 %v4561_v47, %v16847_v20  ;;  %v14610_v27 = vpop.f32.mrb[42].mxu1  ;;  %6034 = vmatmul.mubr.bf16.gmra.mrb[36].mxu0 %v16982_v6  ;;  %v17037_v1 = vpack.c.bf16 %v4865_v53, %v4864_v63  ;;  %v4802_v47 = vld [vmem:[#allocation2 + $0x129] sm:$0xff] }
 0x3e9   : > { %v4618_v38 = vmax.f32 %v4570_v46, 0.0  ;;  %v4573_v10 = vadd.f32 %v14610_v27, %v16859_v8  ;;  %v4564_v25 = vpop.f32.mrb[43].mxu1  ;;  %6187 = vmatmul.mubr.bf16.gmra.mrb[64].mxu1 %v16997_v35  ;;  %6041 = vmatprep.mubr.bf16.mxu0 %v16912_v28  ;;  %v17045_v46 = vpack.c.bf16 %v4867_v30, %v4866_v56  ;;  %v4912_v56 = vld [vmem:[#allocation2 + $0x28] sm:$0xff] }
 0x3ea   : > { %v4616_v12 = vmax.f32 %v4562_v23, 0.0  ;;  %v4565_v49 = vadd.f32 %v4564_v25, %v16850_v42  ;;  %6194 = vmatprep.mubr.bf16.mxu1 %v17001_v60  ;;  %v17013_v42 = vpack.c.bf16 %v4795_v26, %v4794_v5  ;;  %v4805_v25 = vld [vmem:[#allocation2 + $0x151] sm:$0xff]  ;;  %v4870_v32 = vld [vmem:[#allocation2 + $0x187] sm:$0xff] }
 0x3eb   : > { %4650 = vst [vmem:[#allocation2 + $0x1c8] sm:$0xff] %v4618_v38  ;;  %v4619_v20 = vmax.f32 %v4573_v10, 0.0  ;;  %v4868_v27 = vld [vmem:[#allocation2 + $0x167] sm:$0xff] }
 0x3ec   : > { %4648 = vst [vmem:[#allocation2 + $0x1a8] sm:$0xff] %v4616_v12  ;;  %v4617_v55 = vmax.f32 %v4565_v49, 0.0  ;;  %v4871_v49 = vld [vmem:[#allocation2 + $0x18f] sm:$0xff] }
 0x3ed   : > { %4651 = vst [vmem:[#allocation2 + $0x1d0] sm:$0xff] %v4619_v20  ;;  %v17008_v17 = vpack.c.bf16 %v4619_v20, %v4618_v38  ;;  %v4869_v19 = vld [vmem:[#allocation2 + $0x16f] sm:$0xff] }
 0x3ee   : > { %4649 = vst [vmem:[#allocation2 + $0x1b0] sm:$0xff] %v4617_v55  ;;  %v14613_v8 = vpop.f32.mrb[44].mxu1  ;;  %v17010_v39 = vpack.c.bf16 %v4617_v55, %v4616_v12  ;;  %v17053_v38 = vpack.c.bf16 %v4869_v19, %v4868_v27  ;;  %v5104_v27 = vld [vmem:[#allocation2 + $0x48] sm:$0xff] }
 0x3ef   : > { %v4586_v28 = vadd.f32 %v14613_v8, %v16877_v41  ;;  %v4577_v43 = vpop.f32.mrb[45].mxu1 }
 0x3f0   : > { %v4578_v0 = vadd.f32 %v4577_v43, %v16868_v9  ;;  %v14614_v21 = vpop.f32.mrb[46].mxu1  ;;  %6042 = vmatmul.mubr.bf16.gmra.mrb[40].mxu0 %v17001_v60  ;;  %v4807_v43 = vld [vmem:[#allocation2 + $0x171] sm:$0xff] }
 0x3f1   : > { %v4622_v62 = vmax.f32 %v4586_v28, 0.0  ;;  %v4589_v50 = vadd.f32 %v14614_v21, %v16879_v34  ;;  %v4580_v4 = vpop.f32.mrb[47].mxu1  ;;  %6195 = vmatmul.mubr.bf16.gmra.mrb[68].mxu1 %v17013_v42  ;;  %6049 = vmatprep.mubr.bf16.mxu0 %v16941_v36  ;;  %v17029_v36 = vpack.c.bf16 %v4863_v24, %v4862_v54  ;;  %v17065_v28 = vpack.c.bf16 %v4871_v49, %v4870_v32  ;;  %v14995_v49 = vld [vmem:[%s18700_s1 + $0x698] sm:$0xff]   ;;  %v14997_v32 = vld [vmem:[%s18700_s1 + $0x6a8] sm:$0xff]  }
 0x3f2   : > { %v4620_v41 = vmax.f32 %v4578_v0, 0.0  ;;  %v4581_v29 = vadd.f32 %v4580_v4, %v16871_v44  ;;  %6202 = vmatprep.mubr.bf16.mxu1 %v17017_v57  ;;  %v4798_v44 = vld [vmem:[#allocation2 + $0xe9] sm:$0xff] }
 0x3f3   : > { %4654 = vst [vmem:[#allocation2 + $0x208] sm:$0xff] %v4622_v62  ;;  %v4623_v9 = vmax.f32 %v4589_v50, 0.0  ;;  %v17034_v61 = vpack.c.bf16 %v4799_v33, %v4798_v44  ;;  %v4872_v21 = vld [vmem:[#allocation2 + $0x1a7] sm:$0xff] }
 0x3f4   : > { %4652 = vst [vmem:[#allocation2 + $0x1e8] sm:$0xff] %v4620_v41  ;;  %v4621_v58 = vmax.f32 %v4581_v29, 0.0  ;;  %v4808_v50 = vld [vmem:[#allocation2 + $0x189] sm:$0xff] }
 0x3f5   : > { %4655 = vst [vmem:[#allocation2 + $0x210] sm:$0xff] %v4623_v9  ;;  %v4873_v40 = vld [vmem:[#allocation2 + $0x1af] sm:$0xff]  ;;  %v4874_v29 = vld [vmem:[#allocation2 + $0x1c7] sm:$0xff] }
 0x3f6   : > { %4653 = vst [vmem:[#allocation2 + $0x1f0] sm:$0xff] %v4621_v58  ;;  %v17024_v34 = vpack.c.bf16 %v4621_v58, %v4620_v41  ;;  %v17073_v62 = vpack.c.bf16 %v4873_v40, %v4872_v21  ;;  %v4875_v4 = vld [vmem:[#allocation2 + $0x1cf] sm:$0xff]  ;;  %v14999_v40 = vld [vmem:[%s18700_s1 + $0x6b8] sm:$0xff]  }
 0x3f7   : > { %v17081_v9 = vpack.c.bf16 %v4875_v4, %v4874_v29  ;;  %v4810_v58 = vld [vmem:[#allocation2 + $0x1a9] sm:$0xff] }
 0x3f8   : > { %6050 = vmatmul.mubr.bf16.gmra.mrb[44].mxu0 %v17017_v57  ;;  %v4812_v44 = vld [vmem:[#allocation2 + $0x1c9] sm:$0xff] }
 0x3f9   : > { %6203 = vmatmul.mubr.bf16.gmra.mrb[72].mxu1 %v17026_v11  ;;  %6057 = vmatprep.mubr.bf16.mxu0 %v16939_v14  ;;  %v4801_v14 = vld [vmem:[#allocation2 + $0x111] sm:$0xff]  ;;  %v5114_v4 = vld [vmem:[#allocation2 + $0xe8] sm:$0xff] }
 0x3fa   : > { %6210 = vmatprep.mubr.bf16.mxu1 %v17029_v36  ;;  %v17042_v37 = vpack.c.bf16 %v4801_v14, %v4800_v7  ;;  %v4878_v63 = vld [vmem:[#allocation2 + $0x207] sm:$0xff]  ;;  %v4913_v14 = vld [vmem:[#allocation2 + $0x30] sm:$0xff] }
 0x3fb   : > { %v4876_v24 = vld [vmem:[#allocation2 + $0x1e7] sm:$0xff] }
 0x3fc   : > { %v4879_v33 = vld [vmem:[#allocation2 + $0x20f] sm:$0xff] }
 0x3fd   : > { %v4877_v3 = vld [vmem:[#allocation2 + $0x1ef] sm:$0xff]  ;;  %v17097_v7 = vpack.c.bf16 %v4879_v33, %v4878_v63 }
 0x3fe   : > { %v17089_v54 = vpack.c.bf16 %v4877_v3, %v4876_v24  ;;  %v4815_v30 = vld [vmem:[#allocation2 + $0x1f1] sm:$0xff] }
 0x400   : > { %6058 = vmatmul.mubr.bf16.gmra.mrb[48].mxu0 %v17029_v36 }
 0x401   : > { %6211 = vmatmul.mubr.bf16.gmra.mrb[76].mxu1 %v17034_v61  ;;  %6065 = vmatprep.mubr.bf16.mxu0 %v16969_v48  ;;  %v4803_v48 = vld [vmem:[#allocation2 + $0x131] sm:$0xff] }
 0x402   : > { %6218 = vmatprep.mubr.bf16.mxu1 %v17037_v1  ;;  %v17050_v23 = vpack.c.bf16 %v4803_v48, %v4802_v47  ;;  %v5105_v47 = vld [vmem:[#allocation2 + $0x50] sm:$0xff]  ;;  %v4944_v48 = vpack.c.bf16 %v4913_v14, %v4912_v56 }
 0x408   : > { %6066 = vmatmul.mubr.bf16.gmra.mrb[52].mxu0 %v17037_v1 }
 0x409   : > { %6219 = vmatmul.mubr.bf16.gmra.mrb[80].mxu1 %v17042_v37  ;;  %6073 = vmatprep.mubr.bf16.mxu0 %v16967_v2  ;;  %v4804_v2 = vld [vmem:[#allocation2 + $0x149] sm:$0xff] }
 0x40a   : > { %6226 = vmatprep.mubr.bf16.mxu1 %v17045_v46  ;;  %v17060_v26 = vpack.c.bf16 %v4805_v25, %v4804_v2  ;;  %v5136_v2 = vpack.c.bf16 %v5105_v47, %v5104_v27  ;;  %v5107_v25 = vld [vmem:[#allocation2 + $0x70] sm:$0xff]  ;;  %v5128_v27 = vld [vmem:[#allocation2 + $0x1c8] sm:$0xff] }
 0x410   : > { %6074 = vmatmul.mubr.bf16.gmra.mrb[56].mxu0 %v17045_v46  ;;  %v13119_v10 = vpop.f32.mrb[16].mxu0 }
 0x411   : > { %6227 = vmatmul.mubr.bf16.gmra.mrb[84].mxu1 %v17050_v23  ;;  %6081 = vmatprep.mubr.bf16.mxu0 %v16994_v59  ;;  %v13120_v12 = vpop.f32.mrb[17].mxu0  ;;  %v4806_v59 = vld [vmem:[#allocation2 + $0x169] sm:$0xff] }
 0x412   : > { %6234 = vmatprep.mubr.bf16.mxu1 %v17053_v38  ;;  %v17058_v20 = vadd.f32 %v13120_v12, %v13119_v10  ;;  %v13122_v55 = vpop.f32.mrb[18].mxu0  ;;  %v17070_v0 = vpack.c.bf16 %v4807_v43, %v4806_v59  ;;  %v14993_v10 = vld [vmem:[%s18700_s1 + $0x688] sm:$0xff]  }
 0x413   : > { %v13123_v5 = vpop.f32.mrb[19].mxu0  ;;  %v5106_v12 = vld [vmem:[#allocation2 + $0x68] sm:$0xff] }
 0x414   : > { %v17062_v8 = vadd.f32 %v13123_v5, %v13122_v55  ;;  %v5137_v55 = vpack.c.bf16 %v5107_v25, %v5106_v12  ;;  %v5108_v5 = vld [vmem:[#allocation2 + $0x88] sm:$0xff]  ;;  %v15001_v12 = vld [vmem:[%s18700_s1 + $0x6c0] sm:$0xff]  }
 0x415   : > { %v5110_v43 = vld [vmem:[#allocation2 + $0xa8] sm:$0xff] }
 0x418   : > { %6082 = vmatmul.mubr.bf16.gmra.mrb[60].mxu0 %v17053_v38 }
 0x419   : > { %6235 = vmatmul.mubr.bf16.gmra.mrb[88].mxu1 %v17060_v26  ;;  %6089 = vmatprep.mubr.bf16.mxu0 %v16992_v22  ;;  %v4809_v22 = vld [vmem:[#allocation2 + $0x191] sm:$0xff] }
 0x41a   : > { %6242 = vmatprep.mubr.bf16.mxu1 %v17065_v28  ;;  %v17078_v41 = vpack.c.bf16 %v4809_v22, %v4808_v50  ;;  %v5115_v22 = vld [vmem:[#allocation2 + $0xf0] sm:$0xff] }
 0x41b   : > { %v5141_v29 = vpack.c.bf16 %v5115_v22, %v5114_v4 }
 0x420   : > { %6090 = vmatmul.mubr.bf16.gmra.mrb[64].mxu0 %v17065_v28 }
 0x421   : > { %6243 = vmatmul.mubr.bf16.gmra.mrb[92].mxu1 %v17070_v0  ;;  %6097 = vmatprep.mubr.bf16.mxu0 %v17010_v39  ;;  %v4811_v39 = vld [vmem:[#allocation2 + $0x1b1] sm:$0xff] }
 0x422   : > { %6250 = vmatprep.mubr.bf16.mxu1 %v17073_v62  ;;  %v17086_v52 = vpack.c.bf16 %v4811_v39, %v4810_v58 }
 0x428   : > { %6098 = vmatmul.mubr.bf16.gmra.mrb[68].mxu0 %v17073_v62 }
 0x429   : > { %6251 = vmatmul.mubr.bf16.gmra.mrb[96].mxu1 %v17078_v41  ;;  %6105 = vmatprep.mubr.bf16.mxu0 %v17008_v17  ;;  %v4813_v17 = vld [vmem:[#allocation2 + $0x1d1] sm:$0xff] }
 0x42a   : > { %6258 = vmatprep.mubr.bf16.mxu1 %v17081_v9  ;;  %v17094_v53 = vpack.c.bf16 %v4813_v17, %v4812_v44 }
 0x430   : > { %6106 = vmatmul.mubr.bf16.gmra.mrb[72].mxu0 %v17081_v9 }
 0x431   : > { %6259 = vmatmul.mubr.bf16.gmra.mrb[100].mxu1 %v17086_v52  ;;  %6113 = vmatprep.mubr.bf16.mxu0 %v17024_v34  ;;  %v4814_v34 = vld [vmem:[#allocation2 + $0x1e9] sm:$0xff] }
 0x432   : > { %6266 = vmatprep.mubr.bf16.mxu1 %v17089_v54  ;;  %v17102_v19 = vpack.c.bf16 %v4815_v30, %v4814_v34  ;;  %v5129_v34 = vld [vmem:[#allocation2 + $0x1d0] sm:$0xff] }
 0x433   : > { %v5148_v25 = vpack.c.bf16 %v5129_v34, %v5128_v27  ;;  %v5168_v34 = vld [vmem:[#allocation2 + $0x49] sm:$0xff] }
 0x438   : > { %6114 = vmatmul.mubr.bf16.gmra.mrb[76].mxu0 %v17089_v54 }
 0x439   : > { %6267 = vmatmul.mubr.bf16.gmra.mrb[104].mxu1 %v17094_v53  ;;  %6315 = vmatprep.mubr.bf16.mxu0 %v16920_v18  ;;  %v14994_v18 = vld [vmem:[%s18700_s1 + $0x690] sm:$0xff]  }
 0x43a   : > { %6274 = vmatprep.mubr.bf16.mxu1 %v17097_v7 }
 0x440   : > { %6316 = vmatmul.mubr.bf16.vlgmr.msra.gmra.mrb[80].mxu0 %v4944_v48 }
 0x441   : > { %6275 = vmatmul.mubr.bf16.gmra.mrb[108].mxu1 %v17102_v19  ;;  %6323 = vmatprep.mubr.bf16.mxu0 %v16947_v51  ;;  %v5109_v51 = vld [vmem:[#allocation2 + $0x90] sm:$0xff] }
 0x442   : > { %6476 = vmatprep.mubr.bf16.mxu1 %v5136_v2  ;;  %14616 = vmatpush3.bf16.msra.mxu0 %v16887_v15  ;;  %v14996_v15 = vld [vmem:[%s18700_s1 + $0x6a0] sm:$0xff]   ;;  %v5138_v59 = vpack.c.bf16 %v5109_v51, %v5108_v5 }
 0x443   : > { %14617 = vmatprep.subr.bf16.mxu0 %v14993_v10 }
 0x446   : > { %14618 = vmatpush3.bf16.msra.mxu0 %v14993_v10 }
 0x447   : > { %14619 = vmatprep.subr.bf16.mxu0 %v14994_v18 }
 0x448   : > { %6324 = vmatmul.mubr.bf16.gmra.mrb[84].mxu0 %v5136_v2 }
 0x449   : > { %6477 = vmatmul.mubr.bf16.vlgmr.msra.gmra.mrb[112].mxu1 %v16901_v45  ;;  %6331 = vmatprep.mubr.bf16.mxu0 %v16975_v31  ;;  %v14998_v45 = vld [vmem:[%s18700_s1 + $0x6b0] sm:$0xff]  }
 0x44a   : > { %6484 = vmatprep.mubr.bf16.mxu1 %v5137_v55  ;;  %14620 = vmatpush3.bf16.msra.mxu0 %v14994_v18  ;;  %v5111_v31 = vld [vmem:[#allocation2 + $0xb0] sm:$0xff] }
 0x44b   : > { %14621 = vmatprep.subr.bf16.mxu0 %v14995_v49  ;;  %v5139_v21 = vpack.c.bf16 %v5111_v31, %v5110_v43 }
 0x44e   : > { %14622 = vmatpush3.bf16.msra.mxu0 %v14995_v49 }
 0x44f   : > { %14623 = vmatprep.subr.bf16.mxu0 %v14996_v15 }
 0x450   : > { %6332 = vmatmul.mubr.bf16.gmra.mrb[88].mxu0 %v5137_v55 }
 0x451   : > { %6485 = vmatmul.mubr.bf16.gmra.mrb[116].mxu1 %v16927_v16  ;;  %6339 = vmatprep.mubr.bf16.mxu0 %v16997_v35  ;;  %v5113_v16 = vld [vmem:[#allocation2 + $0xd0] sm:$0xff]  ;;  %v5112_v35 = vld [vmem:[#allocation2 + $0xc8] sm:$0xff] }
 0x452   : > { %6492 = vmatprep.mubr.bf16.mxu1 %v5138_v59  ;;  %14624 = vmatpush3.bf16.msra.mxu0 %v14996_v15  ;;  %v5140_v50 = vpack.c.bf16 %v5113_v16, %v5112_v35 }
 0x453   : > { %14625 = vmatprep.subr.bf16.mxu0 %v14997_v32 }
 0x456   : > { %14626 = vmatpush3.bf16.msra.mxu0 %v14997_v32 }
 0x457   : > { %14627 = vmatprep.subr.bf16.mxu0 %v14998_v45 }
 0x458   : > { %6340 = vmatmul.mubr.bf16.gmra.mrb[92].mxu0 %v5138_v59 }
 0x459   : > { %6493 = vmatmul.mubr.bf16.gmra.mrb[120].mxu1 %v16954_v13  ;;  %6347 = vmatprep.mubr.bf16.mxu0 %v17013_v42  ;;  %v5117_v13 = vld [vmem:[#allocation2 + $0x110] sm:$0xff]  ;;  %v5116_v42 = vld [vmem:[#allocation2 + $0x108] sm:$0xff] }
 0x45a   : > { %6500 = vmatprep.mubr.bf16.mxu1 %v5139_v21  ;;  %14628 = vmatpush3.bf16.msra.mxu0 %v14998_v45  ;;  %v5142_v58 = vpack.c.bf16 %v5117_v13, %v5116_v42 }
 0x45b   : > { %14629 = vmatprep.subr.bf16.mxu0 %v14999_v40 }
 0x45e   : > { %14630 = vmatpush3.bf16.msra.mxu0 %v14999_v40 }
 0x460   : > { %6348 = vmatmul.mubr.bf16.gmra.mrb[96].mxu0 %v5139_v21  ;;  %v5130_v21 = vld [vmem:[#allocation2 + $0x1e8] sm:$0xff] }
 0x461   : > { %6501 = vmatmul.mubr.bf16.gmra.mrb[124].mxu1 %v16982_v6  ;;  %6355 = vmatprep.mubr.bf16.mxu0 %v17026_v11  ;;  %v5119_v6 = vld [vmem:[#allocation2 + $0x130] sm:$0xff]  ;;  %v5118_v11 = vld [vmem:[#allocation2 + $0x128] sm:$0xff] }
 0x462   : > { %6508 = vmatprep.mubr.bf16.mxu1 %v5140_v50  ;;  %v5143_v39 = vpack.c.bf16 %v5119_v6, %v5118_v11  ;;  %v5007_v6 = vld [vmem:[#allocation2 + $0x211] sm:$0xff] }
 0x468   : > { %6356 = vmatmul.mubr.bf16.gmra.mrb[100].mxu0 %v5140_v50 }
 0x469   : > { %6509 = vmatmul.mubr.bf16.gmra.mrb[128].mxu1 %v17001_v60  ;;  %6363 = vmatprep.mubr.bf16.mxu0 %v17034_v61  ;;  %v5121_v60 = vld [vmem:[#allocation2 + $0x150] sm:$0xff]  ;;  %v5120_v61 = vld [vmem:[#allocation2 + $0x148] sm:$0xff] }
 0x46a   : > { %6516 = vmatprep.mubr.bf16.mxu1 %v5141_v29  ;;  %v5144_v3 = vpack.c.bf16 %v5121_v60, %v5120_v61  ;;  %v5133_v61 = vld [vmem:[#allocation2 + $0x210] sm:$0xff] }
 0x470   : > { %6364 = vmatmul.mubr.bf16.gmra.mrb[104].mxu0 %v5141_v29 }
 0x471   : > { %6517 = vmatmul.mubr.bf16.gmra.mrb[132].mxu1 %v17017_v57  ;;  %6371 = vmatprep.mubr.bf16.mxu0 %v17042_v37  ;;  %v5123_v57 = vld [vmem:[#allocation2 + $0x170] sm:$0xff]  ;;  %v5122_v37 = vld [vmem:[#allocation2 + $0x168] sm:$0xff] }
 0x472   : > { %6524 = vmatprep.mubr.bf16.mxu1 %v5142_v58  ;;  %v5145_v24 = vpack.c.bf16 %v5123_v57, %v5122_v37 }
 0x478   : > { %6372 = vmatmul.mubr.bf16.gmra.mrb[108].mxu0 %v5142_v58  ;;  %v5006_v58 = vld [vmem:[#allocation2 + $0x209] sm:$0xff] }
 0x479   : > { %6525 = vmatmul.mubr.bf16.gmra.mrb[136].mxu1 %v17029_v36  ;;  %6379 = vmatprep.mubr.bf16.mxu0 %v17050_v23  ;;  %v5125_v36 = vld [vmem:[#allocation2 + $0x190] sm:$0xff]  ;;  %v5124_v23 = vld [vmem:[#allocation2 + $0x188] sm:$0xff] }
 0x47a   : > { %6532 = vmatprep.mubr.bf16.mxu1 %v5143_v39  ;;  %v5146_v44 = vpack.c.bf16 %v5125_v36, %v5124_v23  ;;  %v5132_v23 = vld [vmem:[#allocation2 + $0x208] sm:$0xff] }
 0x480   : > { %6380 = vmatmul.mubr.bf16.gmra.mrb[112].mxu0 %v5143_v39 }
 0x481   : > { %6533 = vmatmul.mubr.bf16.gmra.mrb[140].mxu1 %v17037_v1  ;;  %6387 = vmatprep.mubr.bf16.mxu0 %v17060_v26  ;;  %v5127_v1 = vld [vmem:[#allocation2 + $0x1b0] sm:$0xff]  ;;  %v5126_v26 = vld [vmem:[#allocation2 + $0x1a8] sm:$0xff] }
 0x482   : > { %6540 = vmatprep.mubr.bf16.mxu1 %v5144_v3  ;;  %v5147_v17 = vpack.c.bf16 %v5127_v1, %v5126_v26 }
 0x488   : > { %6388 = vmatmul.mubr.bf16.gmra.mrb[116].mxu0 %v5144_v3 }
 0x489   : > { %6541 = vmatmul.mubr.bf16.gmra.mrb[144].mxu1 %v17045_v46  ;;  %6395 = vmatprep.mubr.bf16.mxu0 %v17070_v0  ;;  %v17153_v46 = vld [vmem:[%s18701_s2 + $0x2] ss:$0 sm:$0xff] }
 0x48a   : > { %6548 = vmatprep.mubr.bf16.mxu1 %v5145_v24  ;;  %v5996_v30 = vadd.f32 %v17058_v20, %v17153_v46  ;;  %v5999_v10 = vadd.f32 %v17062_v8, %v17153_v46  ;;  %v15000_v20 = vld [vmem:[%s18700_s1 + $0x700] sm:$0xff]  }
 0x48b   : > { %13575 = vmatprep.subr.bf16.mxu1 %v15000_v20 }
 0x48c   : > { %13576 = vmatpush3.bf16.msra.mxu1 %v15001_v12 }
 0x490   : > { %6396 = vmatmul.mubr.bf16.gmra.mrb[120].mxu0 %v5145_v24 }
 0x491   : > { %6549 = vmatmul.mubr.bf16.gmra.mrb[148].mxu1 %v17053_v38  ;;  %6403 = vmatprep.mubr.bf16.mxu0 %v17078_v41 }
 0x492   : > { %6556 = vmatprep.mubr.bf16.mxu1 %v5146_v44 }
 0x498   : > { %6404 = vmatmul.mubr.bf16.gmra.mrb[124].mxu0 %v5146_v44 }
 0x499   : > { %6557 = vmatmul.mubr.bf16.gmra.mrb[152].mxu1 %v17065_v28  ;;  %6411 = vmatprep.mubr.bf16.mxu0 %v17086_v52 }
 0x49a   : > { %6564 = vmatprep.mubr.bf16.mxu1 %v5147_v17 }
 0x49b   : > { %v13125_v0 = vpop.f32.mrb[20].mxu0 }
 0x49c   : > { %v13231_v33 = vpop.f32.mrb[48].mxu1  ;;  %v13126_v38 = vpop.f32.mrb[21].mxu0 }
 0x49d   : > { %v13127_v63 = vadd.f32 %v13126_v38, %v13125_v0  ;;  %v13232_v41 = vpop.f32.mrb[49].mxu1  ;;  %v13128_v14 = vpop.f32.mrb[22].mxu0  ;;  %v15002_v0 = vld [vmem:[%s18700_s1 + $0x708] sm:$0xff]  }
 0x49e   : > { %v13233_v56 = vadd.f32 %v13232_v41, %v13231_v33  ;;  %v13234_v28 = vpop.f32.mrb[50].mxu1  ;;  %v13129_v47 = vpop.f32.mrb[23].mxu0  ;;  %v15003_v33 = vld [vmem:[%s18700_s1 + $0x6c8] sm:$0xff]   ;;  %13577 = vmatprep.subr.bf16.mxu1 %v15002_v0  ;;  %v5177_v0 = vld [vmem:[#allocation2 + $0xd1] sm:$0xff] }
 0x49f   : > { %v13130_v52 = vadd.f32 %v13129_v47, %v13128_v14  ;;  %v13235_v48 = vpop.f32.mrb[51].mxu1  ;;  %v6004_v32 = vadd.f32 %v13127_v63, %v17153_v46  ;;  %13578 = vmatpush3.bf16.msra.mxu1 %v15003_v33 }
 0x4a0   : > { %v17159_v2 = vadd.f32 %v13233_v56, %v5996_v30  ;;  %v13236_v18 = vadd.f32 %v13235_v48, %v13234_v28  ;;  %6412 = vmatmul.mubr.bf16.gmra.mrb[128].mxu0 %v5147_v17  ;;  %v5150_v17 = vpack.c.bf16 %v5133_v61, %v5132_v23  ;;  %v5169_v30 = vld [vmem:[#allocation2 + $0x51] sm:$0xff] }
 0x4a1   : > { %6565 = vmatmul.mubr.bf16.gmra.mrb[156].mxu1 %v17073_v62  ;;  %6419 = vmatprep.mubr.bf16.mxu0 %v17094_v53  ;;  %v5131_v53 = vld [vmem:[#allocation2 + $0x1f0] sm:$0xff]  ;;  %v6007_v16 = vadd.f32 %v13130_v52, %v17153_v46  ;;  %v5200_v12 = vpack.c.bf16 %v5169_v30, %v5168_v34 }
 0x4a2   : > { %v17169_v49 = vadd.f32 %v13236_v18, %v5999_v10  ;;  %6572 = vmatprep.mubr.bf16.mxu1 %v5148_v25  ;;  %v5149_v22 = vpack.c.bf16 %v5131_v53, %v5130_v21  ;;  %v15146_v10 = vld [vmem:[#allocation2 + $0x8] sm:$0xff]  ;;  %v5175_v23 = vld [vmem:[#allocation2 + $0xb1] sm:$0xff] }
 0x4a3   : > { %v13131_v8 = vpop.f32.mrb[24].mxu0  ;;  %v17196_v18 = vpack.c.bf16 %v15146_v10, %v15146_v10 }
 0x4a4   : > { %v13237_v55 = vpop.f32.mrb[52].mxu1  ;;  %v13132_v15 = vpop.f32.mrb[25].mxu0 }
 0x4a5   : > { %v13133_v51 = vadd.f32 %v13132_v15, %v13131_v8  ;;  %v13238_v62 = vpop.f32.mrb[53].mxu1  ;;  %v13134_v5 = vpop.f32.mrb[26].mxu0 }
 0x4a6   : > { %v13239_v59 = vadd.f32 %v13238_v62, %v13237_v55  ;;  %v13240_v45 = vpop.f32.mrb[54].mxu1  ;;  %v13135_v31 = vpop.f32.mrb[27].mxu0  ;;  %v5070_v62 = vld [vmem:[#allocation2 + $0x227] sm:$0xff] }
 0x4a7   : > { %v13136_v43 = vadd.f32 %v13135_v31, %v13134_v5  ;;  %v13241_v40 = vpop.f32.mrb[55].mxu1  ;;  %v6012_v3 = vadd.f32 %v13133_v51, %v17153_v46  ;;  %v5071_v5 = vld [vmem:[#allocation2 + $0x22f] sm:$0xff] }
 0x4a8   : > { %v17173_v35 = vadd.f32 %v13239_v59, %v6004_v32  ;;  %v13242_v50 = vadd.f32 %v13241_v40, %v13240_v45  ;;  %6420 = vmatmul.mubr.bf16.gmra.mrb[132].mxu0 %v5148_v25  ;;  %v5170_v32 = vld [vmem:[#allocation2 + $0x69] sm:$0xff]  ;;  %v5171_v59 = vld [vmem:[#allocation2 + $0x71] sm:$0xff] }
 0x4a9   : > { %6573 = vmatmul.mubr.bf16.gmra.mrb[160].mxu1 %v17081_v9  ;;  %6427 = vmatprep.mubr.bf16.mxu0 %v17102_v19  ;;  %v17180_v19 = vpack.c.bf16 %v5007_v6, %v5006_v58  ;;  %v6015_v44 = vadd.f32 %v13136_v43, %v17153_v46  ;;  %v5172_v43 = vld [vmem:[#allocation2 + $0x89] sm:$0xff]  ;;  %v5173_v40 = vld [vmem:[#allocation2 + $0x91] sm:$0xff]  ;;  %v5201_v58 = vpack.c.bf16 %v5171_v59, %v5170_v32 }
 0x4aa   : > { %v17177_v4 = vadd.f32 %v13242_v50, %v6007_v16  ;;  %6580 = vmatprep.mubr.bf16.mxu1 %v5149_v22 }
 0x4ab   : > { %v13137_v29 = vpop.f32.mrb[28].mxu0 }
 0x4ac   : > { %v13243_v13 = vpop.f32.mrb[56].mxu1  ;;  %v13138_v42 = vpop.f32.mrb[29].mxu0 }
 0x4ad   : > { %v13139_v11 = vadd.f32 %v13138_v42, %v13137_v29  ;;  %v13244_v39 = vpop.f32.mrb[57].mxu1  ;;  %v13140_v60 = vpop.f32.mrb[30].mxu0 }
 0x4ae   : > { %v13245_v57 = vadd.f32 %v13244_v39, %v13243_v13  ;;  %v13246_v37 = vpop.f32.mrb[58].mxu1  ;;  %v13141_v24 = vpop.f32.mrb[31].mxu0  ;;  %v5202_v39 = vpack.c.bf16 %v5173_v40, %v5172_v43 }
 0x4af   : > { %v13142_v9 = vadd.f32 %v13141_v24, %v13140_v60  ;;  %v13247_v36 = vpop.f32.mrb[59].mxu1  ;;  %v6020_v47 = vadd.f32 %v13139_v11, %v17153_v46 }
 0x4b0   : > { %v17183_v1 = vadd.f32 %v13245_v57, %v6012_v3  ;;  %v13248_v26 = vadd.f32 %v13247_v36, %v13246_v37  ;;  %6428 = vmatmul.mubr.bf16.gmra.mrb[136].mxu0 %v5149_v22  ;;  %v5087_v22 = vpack.c.bf16 %v5071_v5, %v5070_v62  ;;  %v15004_v57 = vld [vmem:[%s18700_s1 + $0x710] sm:$0xff]  }
 0x4b1   : > { %6581 = vmatmul.mubr.bf16.gmra.mrb[164].mxu1 %v17089_v54  ;;  %6435 = vmatprep.mubr.bf16.mxu0 %v17180_v19  ;;  %v6023_v8 = vadd.f32 %v13142_v9, %v17153_v46  ;;  %v15005_v37 = vld [vmem:[%s18700_s1 + $0x6d0] sm:$0xff]  }
 0x4b2   : > { %v17193_v38 = vadd.f32 %v13248_v26, %v6015_v44  ;;  %6588 = vmatprep.mubr.bf16.mxu1 %v5150_v17  ;;  %v5174_v36 = vld [vmem:[#allocation2 + $0xa9] sm:$0xff]  ;;  %13579 = vmatprep.subr.bf16.mxu1 %v15004_v57 }
 0x4b3   : > { %v13143_v63 = vpop.f32.mrb[32].mxu0  ;;  %13580 = vmatpush3.bf16.msra.mxu1 %v15005_v37  ;;  %v5180_v5 = vld [vmem:[#allocation2 + $0x109] sm:$0xff] }
 0x4b4   : > { %v13249_v41 = vpop.f32.mrb[60].mxu1  ;;  %v13144_v14 = vpop.f32.mrb[33].mxu0 }
 0x4b5   : > { %v13145_v54 = vadd.f32 %v13144_v14, %v13143_v63  ;;  %v13250_v56 = vpop.f32.mrb[61].mxu1  ;;  %v13146_v28 = vpop.f32.mrb[34].mxu0 }
 0x4b6   : > { %v13251_v52 = vadd.f32 %v13250_v56, %v13249_v41  ;;  %v13252_v48 = vpop.f32.mrb[62].mxu1  ;;  %v13147_v27 = vpop.f32.mrb[35].mxu0  ;;  %v5203_v56 = vpack.c.bf16 %v5175_v23, %v5174_v36  ;;  %v5185_v36 = vld [vmem:[#allocation2 + $0x151] sm:$0xff] }
 0x4b7   : > { %v13148_v25 = vadd.f32 %v13147_v27, %v13146_v28  ;;  %v13253_v20 = vpop.f32.mrb[63].mxu1 }
 0x4b8   : > { %v17199_v55 = vadd.f32 %v13251_v52, %v6020_v47  ;;  %v13254_v15 = vadd.f32 %v13253_v20, %v13252_v48  ;;  %6436 = vmatmul.mubr.bf16.gmra.mrb[140].mxu0 %v5150_v17  ;;  %v5176_v17 = vld [vmem:[#allocation2 + $0xc9] sm:$0xff] }
 0x4b9   : > { %6589 = vmatmul.mubr.bf16.gmra.mrb[168].mxu1 %v17097_v7  ;;  %14631 = vmatprep.mubr.bf16.mxu0 %v5200_v12  ;;  %v6028_v7 = vadd.f32 %v13145_v54, %v17153_v46  ;;  %v6031_v60 = vadd.f32 %v13148_v25, %v17153_v46  ;;  %v5204_v52 = vpack.c.bf16 %v5177_v0, %v5176_v17  ;;  %v5178_v12 = vld [vmem:[#allocation2 + $0xe9] sm:$0xff] }
 0x4ba   : > { %v17202_v51 = vadd.f32 %v13254_v15, %v6023_v8  ;;  %6596 = vmatprep.mubr.bf16.mxu1 %v17196_v18  ;;  %v5179_v8 = vld [vmem:[#allocation2 + $0xf1] sm:$0xff] }
 0x4bb   : > { %v13149_v53 = vpop.f32.mrb[36].mxu0 }
 0x4bc   : > { %v13255_v45 = vpop.f32.mrb[64].mxu1  ;;  %v13150_v31 = vpop.f32.mrb[37].mxu0 }
 0x4bd   : > { %v13151_v21 = vadd.f32 %v13150_v31, %v13149_v53  ;;  %v13256_v16 = vpop.f32.mrb[65].mxu1  ;;  %v13152_v50 = vpop.f32.mrb[38].mxu0  ;;  %v5181_v53 = vld [vmem:[#allocation2 + $0x111] sm:$0xff] }
 0x4be   : > { %v13257_v29 = vadd.f32 %v13256_v16, %v13255_v45  ;;  %v13258_v13 = vpop.f32.mrb[66].mxu1  ;;  %v13153_v42 = vpop.f32.mrb[39].mxu0  ;;  %v5205_v16 = vpack.c.bf16 %v5179_v8, %v5178_v12  ;;  %v5188_v8 = vld [vmem:[#allocation2 + $0x189] sm:$0xff] }
 0x4bf   : > { %v13154_v6 = vadd.f32 %v13153_v42, %v13152_v50  ;;  %v13259_v11 = vpop.f32.mrb[67].mxu1  ;;  %v6036_v14 = vadd.f32 %v13151_v21, %v17153_v46 }
 0x4c0   : > { %v17207_v61 = vadd.f32 %v13257_v29, %v6028_v7  ;;  %v13260_v3 = vadd.f32 %v13259_v11, %v13258_v13  ;;  %14632 = vmatmul.mubr.bf16.vlgmr.msra.gmra.mrb[144].mxu0 %v5201_v58  ;;  %v5206_v7 = vpack.c.bf16 %v5181_v53, %v5180_v5  ;;  %v15006_v58 = vld [vmem:[%s18700_s1 + $0x718] sm:$0xff]  }
 0x4c1   : > { %6597 = vmatmul.mubr.bf16.gmra.mrb[172].mxu1 %v5087_v22  ;;  %14635 = vmatprep.mubr.bf16.mxu0 %v5202_v39  ;;  %v6039_v48 = vadd.f32 %v13154_v6, %v17153_v46  ;;  %v15007_v6 = vld [vmem:[%s18700_s1 + $0x6d8] sm:$0xff]  }
 0x4c2   : > { %v17215_v24 = vadd.f32 %v13260_v3, %v6031_v60  ;;  %v5182_v60 = vld [vmem:[#allocation2 + $0x129] sm:$0xff]  ;;  %v5183_v3 = vld [vmem:[#allocation2 + $0x131] sm:$0xff]  ;;  %13581 = vmatprep.subr.bf16.mxu1 %v15006_v58  ;;  %8167 = vmatprep.mubr.bf16.mxu1 %v17196_v18 }
 0x4c3   : > { %v13155_v9 = vpop.f32.mrb[40].mxu0  ;;  %13582 = vmatpush3.bf16.msra.mxu1 %v15007_v6  ;;  %v15028_v18 = vld [vmem:[%s18700_s1 + $0x7b0] sm:$0xff]  }
 0x4c4   : > { %v13261_v44 = vpop.f32.mrb[68].mxu1  ;;  %v13156_v26 = vpop.f32.mrb[41].mxu0 }
 0x4c5   : > { %v13157_v33 = vadd.f32 %v13156_v26, %v13155_v9  ;;  %v13262_v63 = vpop.f32.mrb[69].mxu1  ;;  %v13158_v41 = vpop.f32.mrb[42].mxu0  ;;  %v5184_v9 = vld [vmem:[#allocation2 + $0x149] sm:$0xff] }
 0x4c6   : > { %v13263_v34 = vadd.f32 %v13262_v63, %v13261_v44  ;;  %v13264_v30 = vpop.f32.mrb[70].mxu1  ;;  %v13159_v54 = vpop.f32.mrb[43].mxu0 }
 0x4c7   : > { %v13160_v28 = vadd.f32 %v13159_v54, %v13158_v41  ;;  %v13265_v47 = vpop.f32.mrb[71].mxu1  ;;  %v6044_v31 = vadd.f32 %v13157_v33, %v17153_v46  ;;  %v5207_v41 = vpack.c.bf16 %v5183_v3, %v5182_v60  ;;  %v5191_v60 = vld [vmem:[#allocation2 + $0x1b1] sm:$0xff] }
 0x4c8   : > { %v17219_v27 = vadd.f32 %v13263_v34, %v6036_v14  ;;  %v13266_v10 = vadd.f32 %v13265_v47, %v13264_v30  ;;  %14636 = vmatmul.mubr.bf16.gmra.mrb[148].mxu0 %v5203_v56  ;;  %v5208_v30 = vpack.c.bf16 %v5185_v36, %v5184_v9  ;;  %v5193_v9 = vld [vmem:[#allocation2 + $0x1d1] sm:$0xff] }
 0x4c9   : > { %14639 = vmatprep.mubr.bf16.mxu0 %v5204_v52  ;;  %v6047_v29 = vadd.f32 %v13160_v28, %v17153_v46 }
 0x4ca   : > { %v17221_v25 = vadd.f32 %v13266_v10, %v6039_v48  ;;  %v5186_v48 = vld [vmem:[#allocation2 + $0x169] sm:$0xff]  ;;  %v5187_v10 = vld [vmem:[#allocation2 + $0x171] sm:$0xff] }
 0x4cb   : > { %v13161_v20 = vpop.f32.mrb[44].mxu0 }
 0x4cc   : > { %v13267_v15 = vpop.f32.mrb[72].mxu1  ;;  %v13162_v62 = vpop.f32.mrb[45].mxu0 }
 0x4cd   : > { %v13163_v32 = vadd.f32 %v13162_v62, %v13161_v20  ;;  %v13268_v59 = vpop.f32.mrb[73].mxu1  ;;  %v13164_v45 = vpop.f32.mrb[46].mxu0 }
 0x4ce   : > { %v13269_v43 = vadd.f32 %v13268_v59, %v13267_v15  ;;  %v13270_v40 = vpop.f32.mrb[74].mxu1  ;;  %v13165_v21 = vpop.f32.mrb[47].mxu0  ;;  %v5189_v15 = vld [vmem:[#allocation2 + $0x191] sm:$0xff] }
 0x4cf   : > { %v13166_v50 = vadd.f32 %v13165_v21, %v13164_v45  ;;  %v13271_v22 = vpop.f32.mrb[75].mxu1  ;;  %v6052_v17 = vadd.f32 %v13163_v32, %v17153_v46 }
 0x4d0   : > { %v17225_v13 = vadd.f32 %v13269_v43, %v6044_v31  ;;  %v13272_v42 = vadd.f32 %v13271_v22, %v13270_v40  ;;  %14640 = vmatmul.mubr.bf16.gmra.mrb[152].mxu0 %v5205_v16  ;;  %v5209_v43 = vpack.c.bf16 %v5187_v10, %v5186_v48  ;;  %v5210_v16 = vpack.c.bf16 %v5189_v15, %v5188_v8  ;;  %v5194_v10 = vld [vmem:[#allocation2 + $0x1e9] sm:$0xff] }
 0x4d1   : > { %14643 = vmatprep.mubr.bf16.mxu0 %v5206_v7  ;;  %v6055_v54 = vadd.f32 %v13166_v50, %v17153_v46 }
 0x4d2   : > { %v17233_v11 = vadd.f32 %v13272_v42, %v6047_v29  ;;  %v15008_v29 = vld [vmem:[%s18700_s1 + $0x720] sm:$0xff]  }
 0x4d3   : > { %v13167_v39 = vpop.f32.mrb[48].mxu0  ;;  %v15009_v42 = vld [vmem:[%s18700_s1 + $0x6e0] sm:$0xff]   ;;  %13583 = vmatprep.subr.bf16.mxu1 %v15008_v29  ;;  %v5199_v29 = vld [vmem:[#allocation2 + $0x231] sm:$0xff] }
 0x4d4   : > { %v13273_v57 = vpop.f32.mrb[76].mxu1  ;;  %v13168_v37 = vpop.f32.mrb[49].mxu0  ;;  %13584 = vmatpush3.bf16.msra.mxu1 %v15009_v42  ;;  %v15010_v42 = vld [vmem:[%s18700_s1 + $0x728] sm:$0xff]  }
 0x4d5   : > { %v13169_v23 = vadd.f32 %v13168_v37, %v13167_v39  ;;  %v13274_v44 = vpop.f32.mrb[77].mxu1  ;;  %v13170_v26 = vpop.f32.mrb[50].mxu0  ;;  %v5190_v39 = vld [vmem:[#allocation2 + $0x1a9] sm:$0xff]  ;;  %13585 = vmatprep.subr.bf16.mxu1 %v15010_v42 }
 0x4d6   : > { %v13275_v0 = vadd.f32 %v13274_v44, %v13273_v57  ;;  %v13276_v33 = vpop.f32.mrb[78].mxu1  ;;  %v13171_v63 = vpop.f32.mrb[51].mxu0  ;;  %v5192_v37 = vld [vmem:[#allocation2 + $0x1c9] sm:$0xff] }
 0x4d7   : > { %v13172_v14 = vadd.f32 %v13171_v63, %v13170_v26  ;;  %v13277_v34 = vpop.f32.mrb[79].mxu1  ;;  %v6060_v32 = vadd.f32 %v13169_v23, %v17153_v46  ;;  %v5211_v63 = vpack.c.bf16 %v5191_v60, %v5190_v39 }
 0x4d8   : > { %v17237_v56 = vadd.f32 %v13275_v0, %v6052_v17  ;;  %v13278_v28 = vadd.f32 %v13277_v34, %v13276_v33  ;;  %14644 = vmatmul.mubr.bf16.gmra.mrb[156].mxu0 %v5207_v41  ;;  %v5212_v34 = vpack.c.bf16 %v5193_v9, %v5192_v37 }
 0x4d9   : > { %14647 = vmatprep.mubr.bf16.mxu0 %v5208_v30  ;;  %v6063_v50 = vadd.f32 %v13172_v14, %v17153_v46 }
 0x4da   : > { %v17239_v47 = vadd.f32 %v13278_v28, %v6055_v54 }
 0x4db   : > { %v13173_v52 = vpop.f32.mrb[52].mxu0 }
 0x4dc   : > { %v13279_v20 = vpop.f32.mrb[80].mxu1  ;;  %v13174_v12 = vpop.f32.mrb[53].mxu0 }
 0x4dd   : > { %v13175_v62 = vadd.f32 %v13174_v12, %v13173_v52  ;;  %v13280_v5 = vpop.f32.mrb[81].mxu1  ;;  %v13176_v53 = vpop.f32.mrb[54].mxu0 }
 0x4de   : > { %v13281_v59 = vadd.f32 %v13280_v5, %v13279_v20  ;;  %v13282_v45 = vpop.f32.mrb[82].mxu1  ;;  %v13177_v31 = vpop.f32.mrb[55].mxu0  ;;  %v5195_v20 = vld [vmem:[#allocation2 + $0x1f1] sm:$0xff] }
 0x4df   : > { %v13178_v40 = vadd.f32 %v13177_v31, %v13176_v53  ;;  %v13283_v21 = vpop.f32.mrb[83].mxu1  ;;  %v6068_v26 = vadd.f32 %v13175_v62, %v17153_v46  ;;  %v5213_v31 = vpack.c.bf16 %v5195_v20, %v5194_v10 }
 0x4e0   : > { %v17243_v22 = vadd.f32 %v13281_v59, %v6060_v32  ;;  %v13284_v7 = vadd.f32 %v13283_v21, %v13282_v45  ;;  %14648 = vmatmul.mubr.bf16.gmra.mrb[160].mxu0 %v5209_v43 }
 0x4e1   : > { %14651 = vmatprep.mubr.bf16.mxu0 %v5210_v16  ;;  %v6071_v30 = vadd.f32 %v13178_v40, %v17153_v46 }
 0x4e2   : > { %v17251_v58 = vadd.f32 %v13284_v7, %v6063_v50  ;;  %v5198_v7 = vld [vmem:[#allocation2 + $0x229] sm:$0xff] }
 0x4e3   : > { %v13179_v6 = vpop.f32.mrb[56].mxu0  ;;  %v5215_v37 = vpack.c.bf16 %v5199_v29, %v5198_v7 }
 0x4e4   : > { %v13285_v3 = vpop.f32.mrb[84].mxu1  ;;  %v13180_v57 = vpop.f32.mrb[57].mxu0 }
 0x4e5   : > { %v13181_v36 = vadd.f32 %v13180_v57, %v13179_v6  ;;  %v13286_v23 = vpop.f32.mrb[85].mxu1  ;;  %v13182_v44 = vpop.f32.mrb[58].mxu0  ;;  %v15011_v6 = vld [vmem:[%s18700_s1 + $0x6e8] sm:$0xff]  }
 0x4e6   : > { %v13287_v17 = vadd.f32 %v13286_v23, %v13285_v3  ;;  %v13288_v0 = vpop.f32.mrb[86].mxu1  ;;  %v13183_v33 = vpop.f32.mrb[59].mxu0  ;;  %13586 = vmatpush3.bf16.msra.mxu1 %v15011_v6 }
 0x4e7   : > { %v13184_v41 = vadd.f32 %v13183_v33, %v13182_v44  ;;  %v13289_v14 = vpop.f32.mrb[87].mxu1  ;;  %v6076_v53 = vadd.f32 %v13181_v36, %v17153_v46 }
 0x4e8   : > { %v17255_v54 = vadd.f32 %v13287_v17, %v6068_v26  ;;  %v13290_v28 = vadd.f32 %v13289_v14, %v13288_v0  ;;  %14652 = vmatmul.mubr.bf16.gmra.mrb[164].mxu0 %v5211_v63 }
 0x4e9   : > { %14655 = vmatprep.mubr.bf16.mxu0 %v5212_v34  ;;  %v6079_v21 = vadd.f32 %v13184_v41, %v17153_v46 }
 0x4ea   : > { %v17257_v52 = vadd.f32 %v13290_v28, %v6071_v30 }
 0x4eb   : > { %v13185_v48 = vpop.f32.mrb[60].mxu0 }
 0x4ec   : > { %v13291_v12 = vpop.f32.mrb[88].mxu1  ;;  %v13186_v8 = vpop.f32.mrb[61].mxu0 }
 0x4ed   : > { %v13187_v15 = vadd.f32 %v13186_v8, %v13185_v48  ;;  %v13292_v62 = vpop.f32.mrb[89].mxu1  ;;  %v13188_v5 = vpop.f32.mrb[62].mxu0 }
 0x4ee   : > { %v13293_v32 = vadd.f32 %v13292_v62, %v13291_v12  ;;  %v13294_v59 = vpop.f32.mrb[90].mxu1  ;;  %v13189_v45 = vpop.f32.mrb[63].mxu0 }
 0x4ef   : > { %v13190_v43 = vadd.f32 %v13189_v45, %v13188_v5  ;;  %v13295_v40 = vpop.f32.mrb[91].mxu1  ;;  %v6084_v23 = vadd.f32 %v13187_v15, %v17153_v46 }
 0x4f0   : > { %v17261_v16 = vadd.f32 %v13293_v32, %v6076_v53  ;;  %v13296_v50 = vadd.f32 %v13295_v40, %v13294_v59  ;;  %14656 = vmatmul.mubr.bf16.gmra.mrb[168].mxu0 %v5213_v31  ;;  %v15013_v40 = vld [vmem:[%s18700_s1 + $0x6f0] sm:$0xff]  }
 0x4f1   : > { %14659 = vmatprep.mubr.bf16.mxu0 %v17180_v19  ;;  %v6087_v63 = vadd.f32 %v13190_v43, %v17153_v46  ;;  %v15012_v43 = vld [vmem:[%s18700_s1 + $0x730] sm:$0xff]  }
 0x4f2   : > { %v17270_v39 = vadd.f32 %v13296_v50, %v6079_v21  ;;  %13587 = vmatprep.subr.bf16.mxu1 %v15012_v43 }
 0x4f3   : > { %v13191_v60 = vpop.f32.mrb[64].mxu0  ;;  %13588 = vmatpush3.bf16.msra.mxu1 %v15013_v40 }
 0x4f4   : > { %v13297_v3 = vpop.f32.mrb[92].mxu1  ;;  %v13192_v57 = vpop.f32.mrb[65].mxu0 }
 0x4f5   : > { %v13193_v9 = vadd.f32 %v13192_v57, %v13191_v60  ;;  %v13298_v36 = vpop.f32.mrb[93].mxu1  ;;  %v13194_v19 = vpop.f32.mrb[66].mxu0 }
 0x4f6   : > { %v13299_v44 = vadd.f32 %v13298_v36, %v13297_v3  ;;  %v13300_v26 = vpop.f32.mrb[94].mxu1  ;;  %v13195_v17 = vpop.f32.mrb[67].mxu0 }
 0x4f7   : > { %v13196_v0 = vadd.f32 %v13195_v17, %v13194_v19  ;;  %v13301_v33 = vpop.f32.mrb[95].mxu1  ;;  %v6092_v8 = vadd.f32 %v13193_v9, %v17153_v46 }
 0x4f8   : > { %v17274_v41 = vadd.f32 %v13299_v44, %v6084_v23  ;;  %v13302_v14 = vadd.f32 %v13301_v33, %v13300_v26  ;;  %14660 = vmatmul.mubr.bf16.gmra.mrb[172].mxu0 %v5215_v37  ;;  %v15014_v23 = vld [vmem:[%s18700_s1 + $0x780] sm:$0xff]   ;;  %v15016_v33 = vld [vmem:[%s18700_s1 + $0x788] sm:$0xff]  }
 0x4f9   : > { %v6095_v59 = vadd.f32 %v13196_v0, %v17153_v46  ;;  %v15015_v0 = vld [vmem:[%s18700_s1 + $0x740] sm:$0xff]   ;;  %13687 = vmatprep.subr.bf16.mxu0 %v15014_v23 }
 0x4fa   : > { %v17276_v34 = vadd.f32 %v13302_v14, %v6087_v63  ;;  %13688 = vmatpush3.bf16.msra.mxu0 %v15015_v0 }
 0x4fb   : > { %v13197_v30 = vpop.f32.mrb[68].mxu0  ;;  %13689 = vmatprep.subr.bf16.mxu0 %v15016_v33 }
 0x4fc   : > { %v13303_v28 = vpop.f32.mrb[96].mxu1  ;;  %v13198_v48 = vpop.f32.mrb[69].mxu0 }
 0x4fd   : > { %v13199_v10 = vadd.f32 %v13198_v48, %v13197_v30  ;;  %v13304_v20 = vpop.f32.mrb[97].mxu1  ;;  %v13200_v12 = vpop.f32.mrb[70].mxu0  ;;  %v15017_v48 = vld [vmem:[%s18700_s1 + $0x748] sm:$0xff]  }
 0x4fe   : > { %v13305_v15 = vadd.f32 %v13304_v20, %v13303_v28  ;;  %v13306_v62 = vpop.f32.mrb[98].mxu1  ;;  %v13201_v5 = vpop.f32.mrb[71].mxu0  ;;  %13690 = vmatpush3.bf16.msra.mxu0 %v15017_v48 }
 0x4ff   : > { %v13202_v53 = vadd.f32 %v13201_v5, %v13200_v12  ;;  %v13307_v32 = vpop.f32.mrb[99].mxu1  ;;  %v6100_v3 = vadd.f32 %v13199_v10, %v17153_v46 }
 0x500   : > { %v17280_v45 = vadd.f32 %v13305_v15, %v6092_v8  ;;  %v13308_v31 = vadd.f32 %v13307_v32, %v13306_v62 }
 0x501   : > { %v6103_v44 = vadd.f32 %v13202_v53, %v17153_v46 }
 0x502   : > { %v17288_v21 = vadd.f32 %v13308_v31, %v6095_v59  ;;  %v15019_v59 = vld [vmem:[%s18700_s1 + $0x790] sm:$0xff]  }
 0x503   : > { %v13203_v50 = vpop.f32.mrb[72].mxu0  ;;  %13691 = vmatprep.subr.bf16.mxu0 %v15019_v59 }
 0x504   : > { %v13309_v7 = vpop.f32.mrb[100].mxu1  ;;  %v13204_v29 = vpop.f32.mrb[73].mxu0 }
 0x505   : > { %v13205_v42 = vadd.f32 %v13204_v29, %v13203_v50  ;;  %v13310_v6 = vpop.f32.mrb[101].mxu1  ;;  %v13206_v60 = vpop.f32.mrb[74].mxu0  ;;  %v15021_v50 = vld [vmem:[%s18700_s1 + $0x750] sm:$0xff]   ;;  %v15020_v29 = vld [vmem:[%s18700_s1 + $0x6f8] sm:$0xff]  }
 0x506   : > { %v13311_v57 = vadd.f32 %v13310_v6, %v13309_v7  ;;  %v13312_v37 = vpop.f32.mrb[102].mxu1  ;;  %v13207_v9 = vpop.f32.mrb[75].mxu0  ;;  %v15018_v7 = vld [vmem:[%s18700_s1 + $0x738] sm:$0xff]   ;;  %13692 = vmatpush3.bf16.msra.mxu0 %v15021_v50 }
 0x507   : > { %v13208_v36 = vadd.f32 %v13207_v9, %v13206_v60  ;;  %v13313_v19 = vpop.f32.mrb[103].mxu1  ;;  %v6108_v8 = vadd.f32 %v13205_v42, %v17153_v46  ;;  %v15022_v42 = vld [vmem:[%s18700_s1 + $0x798] sm:$0xff]   ;;  %13589 = vmatprep.subr.bf16.mxu1 %v15018_v7 }
 0x508   : > { %v17295_v26 = vadd.f32 %v13311_v57, %v6100_v3  ;;  %v13314_v17 = vadd.f32 %v13313_v19, %v13312_v37  ;;  %13693 = vmatprep.subr.bf16.mxu0 %v15022_v42  ;;  %13590 = vmatpush3.bf16.msra.mxu1 %v15020_v29  ;;  %v15023_v37 = vld [vmem:[%s18700_s1 + $0x758] sm:$0xff]  }
 0x509   : > { %v6111_v31 = vadd.f32 %v13208_v36, %v17153_v46 }
 0x50a   : > { %v17303_v63 = vadd.f32 %v13314_v17, %v6103_v44  ;;  %13694 = vmatpush3.bf16.msra.mxu0 %v15023_v37 }
 0x50b   : > { %v13209_v14 = vpop.f32.mrb[76].mxu0 }
 0x50c   : > { %v13315_v30 = vpop.f32.mrb[104].mxu1  ;;  %v13210_v28 = vpop.f32.mrb[77].mxu0 }
 0x50d   : > { %v13211_v10 = vadd.f32 %v13210_v28, %v13209_v14  ;;  %v13316_v20 = vpop.f32.mrb[105].mxu1  ;;  %v13212_v12 = vpop.f32.mrb[78].mxu0  ;;  %v15024_v28 = vld [vmem:[%s18700_s1 + $0x7a0] sm:$0xff]  }
 0x50e   : > { %v13317_v15 = vadd.f32 %v13316_v20, %v13315_v30  ;;  %v13318_v62 = vpop.f32.mrb[106].mxu1  ;;  %v13213_v5 = vpop.f32.mrb[79].mxu0  ;;  %13695 = vmatprep.subr.bf16.mxu0 %v15024_v28 }
 0x50f   : > { %v13214_v53 = vadd.f32 %v13213_v5, %v13212_v12  ;;  %v13319_v32 = vpop.f32.mrb[107].mxu1  ;;  %v6116_v23 = vadd.f32 %v13211_v10, %v17153_v46  ;;  %v15025_v10 = vld [vmem:[%s18700_s1 + $0x760] sm:$0xff]  }
 0x510   : > { %v17313_v43 = vadd.f32 %v13317_v15, %v6108_v8  ;;  %v13320_v40 = vadd.f32 %v13319_v32, %v13318_v62  ;;  %13696 = vmatpush3.bf16.msra.mxu0 %v15025_v10  ;;  %v6831_v62 = vld [vmem:[#allocation2 + $0xf] sm:$0xff] }
 0x511   : > { %v6119_v48 = vadd.f32 %v13214_v53, %v17153_v46  ;;  %v15026_v46 = vld [vmem:[%s18700_s1 + $0x7a8] sm:$0xff]  }
 0x512   : > { %v17327_v6 = vadd.f32 %v13320_v40, %v6111_v31  ;;  %13697 = vmatprep.subr.bf16.mxu0 %v15026_v46 }
 0x513   : > { %v13343_v60 = vpop.f32.mrb[80].mxu0 }
 0x514   : > { %v13321_v3 = vpop.f32.mrb[108].mxu1  ;;  %v13344_v57 = vpop.f32.mrb[81].mxu0 }
 0x515   : > { %v13322_v9 = vpop.f32.mrb[109].mxu1  ;;  %v13345_v36 = vadd.f32 %v13344_v57, %v13343_v60  ;;  %v13346_v19 = vpop.f32.mrb[82].mxu0 }
 0x516   : > { %v13323_v44 = vadd.f32 %v13322_v9, %v13321_v3  ;;  %v13324_v17 = vpop.f32.mrb[110].mxu1  ;;  %v13347_v0 = vpop.f32.mrb[83].mxu0 }
 0x517   : > { %v6318_v33 = vadd.f32 %v13345_v36, %v17159_v2  ;;  %v13325_v14 = vpop.f32.mrb[111].mxu1  ;;  %v13348_v30 = vadd.f32 %v13347_v0, %v13346_v19  ;;  %v6830_v2 = vld [vmem:[#allocation2 + $0x7] sm:$0xff]  ;;  %v15030_v36 = vld [vmem:[%s18700_s1 + $0x770] sm:$0xff]   ;;  %v15032_v0 = vld [vmem:[%s18700_s1 + $0x7b8] sm:$0xff]  }
 0x518   : > { %v17338_v20 = vadd.f32 %v13323_v44, %v6116_v23  ;;  %v13326_v12 = vadd.f32 %v13325_v14, %v13324_v17  ;;  %v6862_v53 = vpack.c.bf16 %v6831_v62, %v6830_v2  ;;  %v15029_v44 = vld [vmem:[%s18700_s1 + $0x800] sm:$0xff]  }
 0x519   : > { %v6321_v8 = vadd.f32 %v13348_v30, %v17169_v49  ;;  %v15027_v49 = vld [vmem:[%s18700_s1 + $0x768] sm:$0xff]   ;;  %v15031_v17 = vld [vmem:[%s18700_s1 + $0x7c0] sm:$0xff]   ;;  %13799 = vmatprep.subr.bf16.mxu1 %v15029_v44 }
 0x51a   : > { %v17344_v15 = vadd.f32 %v13326_v12, %v6119_v48  ;;  %8168 = vmatmul.mubr.bf16.vlgmr.msra.gmra.mrb[176].mxu1 %v6862_v53  ;;  %13698 = vmatpush3.bf16.msra.mxu0 %v15027_v49  ;;  %v15034_v44 = vld [vmem:[%s18700_s1 + $0x808] sm:$0xff]  }
 0x51b   : > { %v13349_v5 = vpop.f32.mrb[84].mxu0  ;;  %13699 = vmatprep.subr.bf16.mxu0 %v15028_v18  ;;  %13800 = vmatpush3.bf16.msra.mxu1 %v15031_v17  ;;  %v15035_v17 = vld [vmem:[%s18700_s1 + $0x7c8] sm:$0xff]  }
 0x51c   : > { %v13455_v32 = vpop.f32.mrb[112].mxu1  ;;  %v13350_v59 = vpop.f32.mrb[85].mxu0  ;;  %13801 = vmatprep.subr.bf16.mxu1 %v15034_v44 }
 0x51d   : > { %v13351_v31 = vadd.f32 %v13350_v59, %v13349_v5  ;;  %v13456_v40 = vpop.f32.mrb[113].mxu1  ;;  %v13352_v50 = vpop.f32.mrb[86].mxu0 }
 0x51e   : > { %v13457_v7 = vadd.f32 %v13456_v40, %v13455_v32  ;;  %v13458_v29 = vpop.f32.mrb[114].mxu1  ;;  %v13353_v42 = vpop.f32.mrb[87].mxu0  ;;  %13700 = vmatpush3.bf16.msra.mxu0 %v15030_v36 }
 0x51f   : > { %v6326_v60 = vadd.f32 %v13351_v31, %v17173_v35  ;;  %v13354_v3 = vadd.f32 %v13353_v42, %v13352_v50  ;;  %v13459_v57 = vpop.f32.mrb[115].mxu1  ;;  %13701 = vmatprep.subr.bf16.mxu0 %v15032_v0  ;;  %13802 = vmatpush3.bf16.msra.mxu1 %v15035_v17 }
 0x520   : > { %v13460_v37 = vadd.f32 %v13459_v57, %v13458_v29  ;;  %v17357_v9 = vadd.f32 %v13457_v7, %v6318_v33 }
 0x521   : > { %v6329_v19 = vadd.f32 %v13354_v3, %v17177_v4  ;;  %v15033_v4 = vld [vmem:[%s18700_s1 + $0x778] sm:$0xff]  }
 0x522   : > { %v17363_v23 = vadd.f32 %v13460_v37, %v6321_v8  ;;  %13702 = vmatpush3.bf16.msra.mxu0 %v15033_v4 }
 0x523   : > { %v13355_v35 = vpop.f32.mrb[88].mxu0 }
 0x524   : > { %v13461_v33 = vpop.f32.mrb[116].mxu1  ;;  %v13356_v14 = vpop.f32.mrb[89].mxu0 }
 0x525   : > { %v13357_v30 = vadd.f32 %v13356_v14, %v13355_v35  ;;  %v13462_v28 = vpop.f32.mrb[117].mxu1  ;;  %v13358_v48 = vpop.f32.mrb[90].mxu0 }
 0x526   : > { %v13463_v12 = vadd.f32 %v13462_v28, %v13461_v33  ;;  %v13464_v10 = vpop.f32.mrb[118].mxu1  ;;  %v13359_v8 = vpop.f32.mrb[91].mxu0 }
 0x527   : > { %v6334_v2 = vadd.f32 %v13357_v30, %v17183_v1  ;;  %v13360_v62 = vadd.f32 %v13359_v8, %v13358_v48  ;;  %v13465_v5 = vpop.f32.mrb[119].mxu1 }
 0x528   : > { %v13466_v46 = vadd.f32 %v13465_v5, %v13464_v10  ;;  %v17378_v53 = vadd.f32 %v13463_v12, %v6326_v60 }
 0x529   : > { %v6337_v32 = vadd.f32 %v13360_v62, %v17193_v38 }
 0x52a   : > { %v17381_v59 = vadd.f32 %v13466_v46, %v6329_v19 }
 0x52b   : > { %v13361_v49 = vpop.f32.mrb[92].mxu0 }
 0x52c   : > { %v13467_v31 = vpop.f32.mrb[120].mxu1  ;;  %v13362_v40 = vpop.f32.mrb[93].mxu0 }
 0x52d   : > { %v13363_v50 = vadd.f32 %v13362_v40, %v13361_v49  ;;  %v13468_v7 = vpop.f32.mrb[121].mxu1  ;;  %v13364_v29 = vpop.f32.mrb[94].mxu0 }
 0x52e   : > { %v13469_v42 = vadd.f32 %v13468_v7, %v13467_v31  ;;  %v13470_v3 = vpop.f32.mrb[122].mxu1  ;;  %v13365_v57 = vpop.f32.mrb[95].mxu0 }
 0x52f   : > { %v6342_v1 = vadd.f32 %v13363_v50, %v17199_v55  ;;  %v13366_v18 = vadd.f32 %v13365_v57, %v13364_v29  ;;  %v13471_v37 = vpop.f32.mrb[123].mxu1 }
 0x530   : > { %v13472_v36 = vadd.f32 %v13471_v37, %v13470_v3  ;;  %v17384_v60 = vadd.f32 %v13469_v42, %v6334_v2 }
 0x531   : > { %v6345_v38 = vadd.f32 %v13366_v18, %v17202_v51 }
 0x532   : > { %v17387_v19 = vadd.f32 %v13472_v36, %v6337_v32 }
 0x533   : > { %v13367_v35 = vpop.f32.mrb[96].mxu0 }
 0x534   : > { %v13473_v0 = vpop.f32.mrb[124].mxu1  ;;  %v13368_v55 = vpop.f32.mrb[97].mxu0 }
 0x535   : > { %v13369_v33 = vadd.f32 %v13368_v55, %v13367_v35  ;;  %v13474_v14 = vpop.f32.mrb[125].mxu1  ;;  %v13370_v4 = vpop.f32.mrb[98].mxu0  ;;  %v15037_v35 = vld [vmem:[%s18700_s1 + $0x7d0] sm:$0xff]  }
 0x536   : > { %v13475_v30 = vadd.f32 %v13474_v14, %v13473_v0  ;;  %v13476_v28 = vpop.f32.mrb[126].mxu1  ;;  %v13371_v51 = vpop.f32.mrb[99].mxu0 }
 0x537   : > { %v6350_v48 = vadd.f32 %v13369_v33, %v17207_v61  ;;  %v13372_v12 = vadd.f32 %v13371_v51, %v13370_v4  ;;  %v13477_v10 = vpop.f32.mrb[127].mxu1 }
 0x538   : > { %v13478_v8 = vadd.f32 %v13477_v10, %v13476_v28  ;;  %v17396_v2 = vadd.f32 %v13475_v30, %v6342_v1 }
 0x539   : > { %v6353_v62 = vadd.f32 %v13372_v12, %v17215_v24 }
 0x53a   : > { %v17399_v5 = vadd.f32 %v13478_v8, %v6345_v38  ;;  %v15036_v38 = vld [vmem:[%s18700_s1 + $0x810] sm:$0xff]  }
 0x53b   : > { %v13373_v46 = vpop.f32.mrb[100].mxu0  ;;  %13803 = vmatprep.subr.bf16.mxu1 %v15036_v38 }
 0x53c   : > { %v13479_v32 = vpop.f32.mrb[128].mxu1  ;;  %v13374_v49 = vpop.f32.mrb[101].mxu0  ;;  %13804 = vmatpush3.bf16.msra.mxu1 %v15037_v35 }
 0x53d   : > { %v13375_v31 = vadd.f32 %v13374_v49, %v13373_v46  ;;  %v13480_v40 = vpop.f32.mrb[129].mxu1  ;;  %v13376_v50 = vpop.f32.mrb[102].mxu0 }
 0x53e   : > { %v13481_v7 = vadd.f32 %v13480_v40, %v13479_v32  ;;  %v13482_v29 = vpop.f32.mrb[130].mxu1  ;;  %v13377_v42 = vpop.f32.mrb[103].mxu0 }
 0x53f   : > { %v6358_v61 = vadd.f32 %v13375_v31, %v17219_v27  ;;  %v13378_v3 = vadd.f32 %v13377_v42, %v13376_v50  ;;  %v13483_v57 = vpop.f32.mrb[131].mxu1 }
 0x540   : > { %v13484_v18 = vadd.f32 %v13483_v57, %v13482_v29  ;;  %v17402_v1 = vadd.f32 %v13481_v7, %v6350_v48 }
 0x541   : > { %v6361_v24 = vadd.f32 %v13378_v3, %v17221_v25 }
 0x542   : > { %v17405_v37 = vadd.f32 %v13484_v18, %v6353_v62 }
 0x543   : > { %v13379_v36 = vpop.f32.mrb[104].mxu0 }
 0x544   : > { %v13485_v44 = vpop.f32.mrb[132].mxu1  ;;  %v13380_v27 = vpop.f32.mrb[105].mxu0 }
 0x545   : > { %v13381_v17 = vadd.f32 %v13380_v27, %v13379_v36  ;;  %v13486_v0 = vpop.f32.mrb[133].mxu1  ;;  %v13382_v55 = vpop.f32.mrb[106].mxu0  ;;  %v15039_v36 = vld [vmem:[%s18700_s1 + $0x7d8] sm:$0xff]  }
 0x546   : > { %v13487_v33 = vadd.f32 %v13486_v0, %v13485_v44  ;;  %v13488_v14 = vpop.f32.mrb[134].mxu1  ;;  %v13383_v25 = vpop.f32.mrb[107].mxu0 }
 0x547   : > { %v6366_v4 = vadd.f32 %v13381_v17, %v17225_v13  ;;  %v13384_v30 = vadd.f32 %v13383_v25, %v13382_v55  ;;  %v13489_v28 = vpop.f32.mrb[135].mxu1 }
 0x548   : > { %v13490_v51 = vadd.f32 %v13489_v28, %v13488_v14  ;;  %v17414_v48 = vadd.f32 %v13487_v33, %v6358_v61 }
 0x549   : > { %v6369_v12 = vadd.f32 %v13384_v30, %v17233_v11 }
 0x54a   : > { %v17417_v10 = vadd.f32 %v13490_v51, %v6361_v24  ;;  %v15038_v24 = vld [vmem:[%s18700_s1 + $0x818] sm:$0xff]  }
 0x54b   : > { %v13385_v8 = vpop.f32.mrb[108].mxu0  ;;  %13805 = vmatprep.subr.bf16.mxu1 %v15038_v24 }
 0x54c   : > { %v13491_v62 = vpop.f32.mrb[136].mxu1  ;;  %v13386_v46 = vpop.f32.mrb[109].mxu0  ;;  %13806 = vmatpush3.bf16.msra.mxu1 %v15039_v36 }
 0x54d   : > { %v13387_v32 = vadd.f32 %v13386_v46, %v13385_v8  ;;  %v13492_v49 = vpop.f32.mrb[137].mxu1  ;;  %v13388_v31 = vpop.f32.mrb[110].mxu0 }
 0x54e   : > { %v13493_v40 = vadd.f32 %v13492_v49, %v13491_v62  ;;  %v13494_v50 = vpop.f32.mrb[138].mxu1  ;;  %v13389_v7 = vpop.f32.mrb[111].mxu0 }
 0x54f   : > { %v6374_v13 = vadd.f32 %v13387_v32, %v17237_v56  ;;  %v13390_v29 = vadd.f32 %v13389_v7, %v13388_v31  ;;  %v13495_v42 = vpop.f32.mrb[139].mxu1 }
 0x550   : > { %v13496_v3 = vadd.f32 %v13495_v42, %v13494_v50  ;;  %v17420_v61 = vadd.f32 %v13493_v40, %v6366_v4 }
 0x551   : > { %v6377_v11 = vadd.f32 %v13390_v29, %v17239_v47 }
 0x552   : > { %v17423_v57 = vadd.f32 %v13496_v3, %v6369_v12 }
 0x553   : > { %v13391_v18 = vpop.f32.mrb[112].mxu0 }
 0x554   : > { %v13497_v38 = vpop.f32.mrb[140].mxu1  ;;  %v13392_v56 = vpop.f32.mrb[113].mxu0 }
 0x555   : > { %v13393_v35 = vadd.f32 %v13392_v56, %v13391_v18  ;;  %v13498_v44 = vpop.f32.mrb[141].mxu1  ;;  %v13394_v27 = vpop.f32.mrb[114].mxu0 }
 0x556   : > { %v13499_v17 = vadd.f32 %v13498_v44, %v13497_v38  ;;  %v13500_v0 = vpop.f32.mrb[142].mxu1  ;;  %v13395_v47 = vpop.f32.mrb[115].mxu0 }
 0x557   : > { %v6382_v55 = vadd.f32 %v13393_v35, %v17243_v22  ;;  %v13396_v33 = vadd.f32 %v13395_v47, %v13394_v27  ;;  %v13501_v14 = vpop.f32.mrb[143].mxu1  ;;  %v15040_v22 = vld [vmem:[%s18700_s1 + $0x820] sm:$0xff]  }
 0x558   : > { %v13502_v25 = vadd.f32 %v13501_v14, %v13500_v0  ;;  %v17432_v4 = vadd.f32 %v13499_v17, %v6374_v13  ;;  %13807 = vmatprep.subr.bf16.mxu1 %v15040_v22 }
 0x559   : > { %v6385_v30 = vadd.f32 %v13396_v33, %v17251_v58  ;;  %v15041_v58 = vld [vmem:[%s18700_s1 + $0x7e0] sm:$0xff]  }
 0x55a   : > { %v17435_v28 = vadd.f32 %v13502_v25, %v6377_v11  ;;  %13808 = vmatpush3.bf16.msra.mxu1 %v15041_v58 }
 0x55b   : > { %v13397_v51 = vpop.f32.mrb[116].mxu0 }
 0x55c   : > { %v13503_v12 = vpop.f32.mrb[144].mxu1  ;;  %v13398_v8 = vpop.f32.mrb[117].mxu0 }
 0x55d   : > { %v13399_v62 = vadd.f32 %v13398_v8, %v13397_v51  ;;  %v13504_v46 = vpop.f32.mrb[145].mxu1  ;;  %v13400_v32 = vpop.f32.mrb[118].mxu0 }
 0x55e   : > { %v13505_v49 = vadd.f32 %v13504_v46, %v13503_v12  ;;  %v13506_v31 = vpop.f32.mrb[146].mxu1  ;;  %v13401_v40 = vpop.f32.mrb[119].mxu0 }
 0x55f   : > { %v6390_v50 = vadd.f32 %v13399_v62, %v17255_v54  ;;  %v13402_v7 = vadd.f32 %v13401_v40, %v13400_v32  ;;  %v13507_v13 = vpop.f32.mrb[147].mxu1 }
 0x560   : > { %v13508_v29 = vadd.f32 %v13507_v13, %v13506_v31  ;;  %v17444_v42 = vadd.f32 %v13505_v49, %v6382_v55 }
 0x561   : > { %v6393_v3 = vadd.f32 %v13402_v7, %v17257_v52 }
 0x562   : > { %v17447_v11 = vadd.f32 %v13508_v29, %v6385_v30 }
 0x563   : > { %v13403_v18 = vpop.f32.mrb[120].mxu0 }
 0x564   : > { %v13509_v24 = vpop.f32.mrb[148].mxu1  ;;  %v13404_v36 = vpop.f32.mrb[121].mxu0 }
 0x565   : > { %v13405_v38 = vadd.f32 %v13404_v36, %v13403_v18  ;;  %v13510_v54 = vpop.f32.mrb[149].mxu1  ;;  %v13406_v56 = vpop.f32.mrb[122].mxu0 }
 0x566   : > { %v13511_v35 = vadd.f32 %v13510_v54, %v13509_v24  ;;  %v13512_v44 = vpop.f32.mrb[150].mxu1  ;;  %v13407_v27 = vpop.f32.mrb[123].mxu0 }
 0x567   : > { %v6398_v17 = vadd.f32 %v13405_v38, %v17261_v16  ;;  %v13408_v0 = vadd.f32 %v13407_v27, %v13406_v56  ;;  %v13513_v47 = vpop.f32.mrb[151].mxu1  ;;  %v15042_v16 = vld [vmem:[%s18700_s1 + $0x828] sm:$0xff]  }
 0x568   : > { %v13514_v55 = vadd.f32 %v13513_v47, %v13512_v44  ;;  %v17450_v33 = vadd.f32 %v13511_v35, %v6390_v50  ;;  %13809 = vmatprep.subr.bf16.mxu1 %v15042_v16 }
 0x569   : > { %v6401_v52 = vadd.f32 %v13408_v0, %v17270_v39  ;;  %v15043_v39 = vld [vmem:[%s18700_s1 + $0x7e8] sm:$0xff]  }
 0x56a   : > { %v17453_v14 = vadd.f32 %v13514_v55, %v6393_v3  ;;  %13810 = vmatpush3.bf16.msra.mxu1 %v15043_v39 }
 0x56b   : > { %v13409_v25 = vpop.f32.mrb[124].mxu0 }
 0x56c   : > { %v13515_v30 = vpop.f32.mrb[152].mxu1  ;;  %v13410_v51 = vpop.f32.mrb[125].mxu0 }
 0x56d   : > { %v13411_v12 = vadd.f32 %v13410_v51, %v13409_v25  ;;  %v13516_v8 = vpop.f32.mrb[153].mxu1  ;;  %v13412_v62 = vpop.f32.mrb[126].mxu0 }
 0x56e   : > { %v13517_v46 = vadd.f32 %v13516_v8, %v13515_v30  ;;  %v13518_v32 = vpop.f32.mrb[154].mxu1  ;;  %v13413_v49 = vpop.f32.mrb[127].mxu0 }
 0x56f   : > { %v6406_v31 = vadd.f32 %v13411_v12, %v17274_v41  ;;  %v13414_v40 = vadd.f32 %v13413_v49, %v13412_v62  ;;  %v13519_v22 = vpop.f32.mrb[155].mxu1 }
 0x570   : > { %v13520_v50 = vadd.f32 %v13519_v22, %v13518_v32  ;;  %v17462_v7 = vadd.f32 %v13517_v46, %v6398_v17 }
 0x571   : > { %v6409_v13 = vadd.f32 %v13414_v40, %v17276_v34 }
 0x572   : > { %v17465_v58 = vadd.f32 %v13520_v50, %v6401_v52 }
 0x573   : > { %v13415_v29 = vpop.f32.mrb[128].mxu0 }
 0x574   : > { %v13521_v3 = vpop.f32.mrb[156].mxu1  ;;  %v13416_v18 = vpop.f32.mrb[129].mxu0 }
 0x575   : > { %v13417_v24 = vadd.f32 %v13416_v18, %v13415_v29  ;;  %v13522_v41 = vpop.f32.mrb[157].mxu1  ;;  %v13418_v36 = vpop.f32.mrb[130].mxu0 }
 0x576   : > { %v13523_v38 = vadd.f32 %v13522_v41, %v13521_v3  ;;  %v13524_v54 = vpop.f32.mrb[158].mxu1  ;;  %v13419_v56 = vpop.f32.mrb[131].mxu0 }
 0x577   : > { %v6414_v35 = vadd.f32 %v13417_v24, %v17280_v45  ;;  %v13420_v44 = vadd.f32 %v13419_v56, %v13418_v36  ;;  %v13525_v27 = vpop.f32.mrb[159].mxu1  ;;  %v15044_v45 = vld [vmem:[%s18700_s1 + $0x830] sm:$0xff]  }
 0x578   : > { %v13526_v17 = vadd.f32 %v13525_v27, %v13524_v54  ;;  %v17468_v0 = vadd.f32 %v13523_v38, %v6406_v31  ;;  %13811 = vmatprep.subr.bf16.mxu1 %v15044_v45  ;;  %v15046_v38 = vld [vmem:[%s18700_s1 + $0x880] sm:$0xff]  }
 0x579   : > { %v6417_v34 = vadd.f32 %v13420_v44, %v17288_v21  ;;  %v15045_v21 = vld [vmem:[%s18700_s1 + $0x7f0] sm:$0xff]   ;;  %13911 = vmatprep.subr.bf16.mxu0 %v15046_v38 }
 0x57a   : > { %v17471_v47 = vadd.f32 %v13526_v17, %v6409_v13  ;;  %13812 = vmatpush3.bf16.msra.mxu1 %v15045_v21 }
 0x57b   : > { %v13421_v55 = vpop.f32.mrb[132].mxu0 }
 0x57c   : > { %v13527_v52 = vpop.f32.mrb[160].mxu1  ;;  %v13422_v25 = vpop.f32.mrb[133].mxu0 }
 0x57d   : > { %v13423_v30 = vadd.f32 %v13422_v25, %v13421_v55  ;;  %v13528_v51 = vpop.f32.mrb[161].mxu1  ;;  %v13424_v12 = vpop.f32.mrb[134].mxu0 }
 0x57e   : > { %v13529_v8 = vadd.f32 %v13528_v51, %v13527_v52  ;;  %v13530_v62 = vpop.f32.mrb[162].mxu1  ;;  %v13425_v46 = vpop.f32.mrb[135].mxu0 }
 0x57f   : > { %v6422_v32 = vadd.f32 %v13423_v30, %v17295_v26  ;;  %v13426_v49 = vadd.f32 %v13425_v46, %v13424_v12  ;;  %v13531_v16 = vpop.f32.mrb[163].mxu1 }
 0x580   : > { %v13532_v31 = vadd.f32 %v13531_v16, %v13530_v62  ;;  %v17480_v40 = vadd.f32 %v13529_v8, %v6414_v35 }
 0x581   : > { %v6425_v22 = vadd.f32 %v13426_v49, %v17303_v63 }
 0x582   : > { %v17483_v39 = vadd.f32 %v13532_v31, %v6417_v34 }
 0x583   : > { %v13427_v50 = vpop.f32.mrb[136].mxu0 }
 0x584   : > { %v13533_v13 = vpop.f32.mrb[164].mxu1  ;;  %v13428_v29 = vpop.f32.mrb[137].mxu0 }
 0x585   : > { %v13429_v3 = vadd.f32 %v13428_v29, %v13427_v50  ;;  %v13534_v26 = vpop.f32.mrb[165].mxu1  ;;  %v13430_v18 = vpop.f32.mrb[138].mxu0 }
 0x586   : > { %v13535_v24 = vadd.f32 %v13534_v26, %v13533_v13  ;;  %v13536_v41 = vpop.f32.mrb[166].mxu1  ;;  %v13431_v36 = vpop.f32.mrb[139].mxu0 }
 0x587   : > { %v6430_v54 = vadd.f32 %v13429_v3, %v17313_v43  ;;  %v13432_v56 = vadd.f32 %v13431_v36, %v13430_v18  ;;  %v13537_v63 = vpop.f32.mrb[167].mxu1  ;;  %v15050_v43 = vld [vmem:[%s18700_s1 + $0x838] sm:$0xff]  }
 0x588   : > { %v13538_v35 = vadd.f32 %v13537_v63, %v13536_v41  ;;  %v17489_v44 = vadd.f32 %v13535_v24, %v6422_v32  ;;  %13813 = vmatprep.subr.bf16.mxu1 %v15050_v43 }
 0x589   : > { %v6433_v27 = vadd.f32 %v13432_v56, %v17327_v6  ;;  %v15052_v6 = vld [vmem:[%s18700_s1 + $0x7f8] sm:$0xff]  }
 0x58a   : > { %v17492_v17 = vadd.f32 %v13538_v35, %v6425_v22  ;;  %13814 = vmatpush3.bf16.msra.mxu1 %v15052_v6 }
 0x58b   : > { %v13433_v34 = vpop.f32.mrb[140].mxu0 }
 0x58c   : > { %v13539_v55 = vpop.f32.mrb[168].mxu1  ;;  %v13434_v52 = vpop.f32.mrb[141].mxu0 }
 0x58d   : > { %v13435_v25 = vadd.f32 %v13434_v52, %v13433_v34  ;;  %v13540_v30 = vpop.f32.mrb[169].mxu1  ;;  %v13436_v51 = vpop.f32.mrb[142].mxu0 }
 0x58e   : > { %v13541_v12 = vadd.f32 %v13540_v30, %v13539_v55  ;;  %v13542_v8 = vpop.f32.mrb[170].mxu1  ;;  %v13437_v62 = vpop.f32.mrb[143].mxu0 }
 0x58f   : > { %v6438_v46 = vadd.f32 %v13435_v25, %v17338_v20  ;;  %v13438_v45 = vadd.f32 %v13437_v62, %v13436_v51  ;;  %v13543_v32 = vpop.f32.mrb[171].mxu1  ;;  %v17520_v62 = vld [vmem:[%s18700_s1 + $0x8c0] sm:$0xff]  }
 0x590   : > { %v13544_v49 = vadd.f32 %v13543_v32, %v13542_v8  ;;  %v17501_v16 = vadd.f32 %v13541_v12, %v6430_v54  ;;  %v6959_v32 = vld [vmem:[#allocation2 + $0x11] sm:$0xff]  ;;  %14663 = vmatprep.subr.bf16.mxu1 %v17520_v62 }
 0x591   : > { %v6441_v21 = vadd.f32 %v13438_v45, %v17344_v15  ;;  %v6958_v45 = vld [vmem:[#allocation2 + $0x9] sm:$0xff] }
 0x592   : > { %v17504_v31 = vadd.f32 %v13544_v49, %v6433_v27  ;;  %v6990_v49 = vpack.c.bf16 %v6959_v32, %v6958_v45 }
 0x593   : > { %v14633_v22 = vpop.f32.mrb[144].mxu0 }
 0x594   : > { %v13545_v50 = vpop.f32.mrb[172].mxu1  ;;  %v6648_v13 = vadd.f32 %v14633_v22, %v17378_v53  ;;  %v6639_v20 = vpop.f32.mrb[145].mxu0 }
 0x595   : > { %v13546_v29 = vpop.f32.mrb[173].mxu1  ;;  %v6640_v3 = vadd.f32 %v6639_v20, %v17357_v9  ;;  %v14634_v26 = vpop.f32.mrb[146].mxu0 }
 0x596   : > { %v6768_v18 = vmax.f32 %v6648_v13, 0.0  ;;  %v13547_v24 = vadd.f32 %v13546_v29, %v13545_v50  ;;  %v13548_v41 = vpop.f32.mrb[174].mxu1  ;;  %v6651_v36 = vadd.f32 %v14634_v26, %v17381_v59  ;;  %v6642_v38 = vpop.f32.mrb[147].mxu0 }
 0x597   : > { %v6766_v54 = vmax.f32 %v6640_v3, 0.0  ;;  %v13549_v15 = vpop.f32.mrb[175].mxu1  ;;  %v6643_v56 = vadd.f32 %v6642_v38, %v17363_v23 }
 0x598   : > { %6800 = vst [vmem:[#allocation2 + $0x48] sm:$0xff] %v6768_v18  ;;  %v6769_v63 = vmax.f32 %v6651_v36, 0.0  ;;  %v13550_v35 = vadd.f32 %v13549_v15, %v13548_v41  ;;  %v17510_v27 = vadd.f32 %v13547_v24, %v6438_v46 }
 0x599   : > { %6798 = vst [vmem:[#allocation2 + $0x28] sm:$0xff] %v6766_v54  ;;  %v6767_v53 = vmax.f32 %v6643_v56, 0.0 }
 0x59a   : > { %6801 = vst [vmem:[#allocation2 + $0x50] sm:$0xff] %v6769_v63  ;;  %v6928_v9 = vpack.c.bf16 %v6769_v63, %v6768_v18  ;;  %v17512_v34 = vadd.f32 %v13550_v35, %v6441_v21  ;;  %v15048_v18 = vld [vmem:[%s18700_s1 + $0x888] sm:$0xff]  }
 0x59b   : > { %6799 = vst [vmem:[#allocation2 + $0x30] sm:$0xff] %v6767_v53  ;;  %v14637_v55 = vpop.f32.mrb[148].mxu0  ;;  %v6927_v52 = vpack.c.bf16 %v6767_v53, %v6766_v54 }
 0x59c   : > { %v6664_v59 = vadd.f32 %v14637_v55, %v17396_v2  ;;  %v6655_v25 = vpop.f32.mrb[149].mxu0 }
 0x59d   : > { %v6656_v30 = vadd.f32 %v6655_v25, %v17384_v60  ;;  %v14638_v23 = vpop.f32.mrb[150].mxu0  ;;  %8175 = vmatprep.mubr.bf16.mxu1 %v6927_v52  ;;  %v15053_v25 = vld [vmem:[%s18700_s1 + $0x850] sm:$0xff]  }
 0x59e   : > { %v6772_v51 = vmax.f32 %v6664_v59, 0.0  ;;  %v6667_v12 = vadd.f32 %v14638_v23, %v17399_v5  ;;  %v6658_v8 = vpop.f32.mrb[151].mxu0 }
 0x59f   : > { %v6770_v43 = vmax.f32 %v6656_v30, 0.0  ;;  %v6659_v46 = vadd.f32 %v6658_v8, %v17387_v19  ;;  %v15047_v19 = vld [vmem:[%s18700_s1 + $0x840] sm:$0xff]   ;;  %v15054_v8 = vld [vmem:[%s18700_s1 + $0x898] sm:$0xff]  }
 0x5a0   : > { %6804 = vst [vmem:[#allocation2 + $0x88] sm:$0xff] %v6772_v51  ;;  %v6773_v2 = vmax.f32 %v6667_v12, 0.0  ;;  %v7022_v6 = vld [vmem:[#allocation2 + $0x27] sm:$0xff] }
 0x5a1   : > { %6802 = vst [vmem:[#allocation2 + $0x68] sm:$0xff] %v6770_v43  ;;  %v6771_v60 = vmax.f32 %v6659_v46, 0.0  ;;  %v7025_v21 = vld [vmem:[#allocation2 + $0x4f] sm:$0xff]  ;;  %v7024_v26 = vld [vmem:[#allocation2 + $0x47] sm:$0xff] }
 0x5a2   : > { %6805 = vst [vmem:[#allocation2 + $0x90] sm:$0xff] %v6773_v2  ;;  %v7023_v5 = vld [vmem:[#allocation2 + $0x2f] sm:$0xff]  ;;  %v17524_v22 = vpack.c.bf16 %v6773_v2, %v6772_v51  ;;  %v17534_v36 = vpack.c.bf16 %v7025_v21, %v7024_v26 }
 0x5a3   : > { %6803 = vst [vmem:[#allocation2 + $0x70] sm:$0xff] %v6771_v60  ;;  %v14641_v50 = vpop.f32.mrb[152].mxu0  ;;  %v7054_v13 = vpack.c.bf16 %v7023_v5, %v7022_v6  ;;  %v6929_v20 = vpack.c.bf16 %v6771_v60, %v6770_v43  ;;  %v6960_v53 = vld [vmem:[#allocation2 + $0x29] sm:$0xff] }
 0x5a4   : > { %v6680_v29 = vadd.f32 %v14641_v50, %v17414_v48  ;;  %v6671_v3 = vpop.f32.mrb[153].mxu0  ;;  %v6962_v21 = vld [vmem:[#allocation2 + $0x49] sm:$0xff]  ;;  %v6963_v50 = vld [vmem:[#allocation2 + $0x51] sm:$0xff] }
 0x5a5   : > { %v6672_v24 = vadd.f32 %v6671_v3, %v17402_v1  ;;  %v14642_v41 = vpop.f32.mrb[154].mxu0  ;;  %8328 = vmatprep.mubr.bf16.mxu0 %v7054_v13  ;;  %8176 = vmatmul.mubr.bf16.gmra.mrb[180].mxu1 %v7054_v13  ;;  %v15049_v1 = vld [vmem:[%s18700_s1 + $0x848] sm:$0xff]  }
 0x5a6   : > { %v6776_v38 = vmax.f32 %v6680_v29, 0.0  ;;  %v6683_v54 = vadd.f32 %v14642_v41, %v17417_v10  ;;  %v6674_v15 = vpop.f32.mrb[155].mxu0  ;;  %8329 = vmatmul.mubr.bf16.vlgmr.msra.gmra.mrb[176].mxu0 %v6990_v49  ;;  %8183 = vmatprep.mubr.bf16.mxu1 %v6928_v9  ;;  %v15051_v10 = vld [vmem:[%s18700_s1 + $0x890] sm:$0xff]   ;;  %v15057_v29 = vld [vmem:[%s18700_s1 + $0x860] sm:$0xff]   ;;  %v15058_v41 = vld [vmem:[%s18700_s1 + $0x8a8] sm:$0xff]  }
 0x5a7   : > { %v6774_v48 = vmax.f32 %v6672_v24, 0.0  ;;  %v6675_v56 = vadd.f32 %v6674_v15, %v17405_v37  ;;  %8336 = vmatprep.mubr.bf16.mxu0 %v17534_v36  ;;  %13912 = vmatpush3.bf16.msra.mxu0 %v15047_v19  ;;  %v6961_v9 = vld [vmem:[#allocation2 + $0x31] sm:$0xff]  ;;  %v7028_v24 = vld [vmem:[#allocation2 + $0x87] sm:$0xff] }
 0x5a8   : > { %6808 = vst [vmem:[#allocation2 + $0xc8] sm:$0xff] %v6776_v38  ;;  %v6777_v63 = vmax.f32 %v6683_v54, 0.0  ;;  %13913 = vmatprep.subr.bf16.mxu0 %v15048_v18  ;;  %v17553_v51 = vpack.c.bf16 %v6961_v9, %v6960_v53  ;;  %v7026_v12 = vld [vmem:[#allocation2 + $0x67] sm:$0xff]  ;;  %v17580_v18 = vpack.c.bf16 %v6963_v50, %v6962_v21 }
 0x5a9   : > { %6806 = vst [vmem:[#allocation2 + $0xa8] sm:$0xff] %v6774_v48  ;;  %v6775_v35 = vmax.f32 %v6675_v56, 0.0 }
 0x5aa   : > { %6809 = vst [vmem:[#allocation2 + $0xd0] sm:$0xff] %v6777_v63  ;;  %v7027_v37 = vld [vmem:[#allocation2 + $0x6f] sm:$0xff]  ;;  %v17545_v55 = vpack.c.bf16 %v6777_v63, %v6776_v38 }
 0x5ab   : > { %6807 = vst [vmem:[#allocation2 + $0xb0] sm:$0xff] %v6775_v35  ;;  %v14645_v52 = vpop.f32.mrb[156].mxu0  ;;  %v17547_v59 = vpack.c.bf16 %v6775_v35, %v6774_v48  ;;  %13914 = vmatpush3.bf16.msra.mxu0 %v15049_v1  ;;  %v17560_v45 = vpack.c.bf16 %v7027_v37, %v7026_v12  ;;  %v6965_v53 = vld [vmem:[#allocation2 + $0x71] sm:$0xff] }
 0x5ac   : > { %v6696_v30 = vadd.f32 %v14645_v52, %v17432_v4  ;;  %v6687_v23 = vpop.f32.mrb[157].mxu0  ;;  %13915 = vmatprep.subr.bf16.mxu0 %v15051_v10 }
 0x5ad   : > { %v6688_v43 = vadd.f32 %v6687_v23, %v17420_v61  ;;  %v14646_v46 = vpop.f32.mrb[158].mxu0  ;;  %8184 = vmatmul.mubr.bf16.gmra.mrb[184].mxu1 %v17534_v36  ;;  %v15055_v61 = vld [vmem:[%s18700_s1 + $0x858] sm:$0xff]  }
 0x5ae   : > { %v6780_v32 = vmax.f32 %v6696_v30, 0.0  ;;  %v6699_v2 = vadd.f32 %v14646_v46, %v17435_v28  ;;  %v6690_v4 = vpop.f32.mrb[159].mxu0  ;;  %8337 = vmatmul.mubr.bf16.gmra.mrb[180].mxu0 %v17553_v51  ;;  %8191 = vmatprep.mubr.bf16.mxu1 %v6929_v20  ;;  %v15056_v28 = vld [vmem:[%s18700_s1 + $0x8a0] sm:$0xff]  }
 0x5af   : > { %v6778_v60 = vmax.f32 %v6688_v43, 0.0  ;;  %v6691_v6 = vadd.f32 %v6690_v4, %v17423_v57  ;;  %8344 = vmatprep.mubr.bf16.mxu0 %v17560_v45  ;;  %13916 = vmatpush3.bf16.msra.mxu0 %v15053_v25  ;;  %v7029_v57 = vld [vmem:[#allocation2 + $0x8f] sm:$0xff]  ;;  %v15063_v43 = vld [vmem:[%s18700_s1 + $0x8b8] sm:$0xff]  }
 0x5b0   : > { %6812 = vst [vmem:[#allocation2 + $0x108] sm:$0xff] %v6780_v32  ;;  %v6781_v5 = vmax.f32 %v6699_v2, 0.0  ;;  %13917 = vmatprep.subr.bf16.mxu0 %v15054_v8  ;;  %v17587_v15 = vpack.c.bf16 %v7029_v57, %v7028_v24  ;;  %v15062_v25 = vld [vmem:[%s18700_s1 + $0x870] sm:$0xff]   ;;  %v7030_v8 = vld [vmem:[#allocation2 + $0xa7] sm:$0xff] }
 0x5b1   : > { %6810 = vst [vmem:[#allocation2 + $0xe8] sm:$0xff] %v6778_v60  ;;  %v6779_v49 = vmax.f32 %v6691_v6, 0.0  ;;  %v7033_v21 = vld [vmem:[#allocation2 + $0xcf] sm:$0xff] }
 0x5b2   : > { %6813 = vst [vmem:[#allocation2 + $0x110] sm:$0xff] %v6781_v5  ;;  %v17572_v13 = vpack.c.bf16 %v6781_v5, %v6780_v32 }
 0x5b3   : > { %6811 = vst [vmem:[#allocation2 + $0xf0] sm:$0xff] %v6779_v49  ;;  %v14649_v20 = vpop.f32.mrb[160].mxu0  ;;  %v17574_v19 = vpack.c.bf16 %v6779_v49, %v6778_v60  ;;  %13918 = vmatpush3.bf16.msra.mxu0 %v15055_v61  ;;  %v6967_v49 = vld [vmem:[#allocation2 + $0x91] sm:$0xff] }
 0x5b4   : > { %v6712_v3 = vadd.f32 %v14649_v20, %v17450_v33  ;;  %v6703_v26 = vpop.f32.mrb[161].mxu0  ;;  %13919 = vmatprep.subr.bf16.mxu0 %v15056_v28  ;;  %v6966_v28 = vld [vmem:[#allocation2 + $0x89] sm:$0xff] }
 0x5b5   : > { %v6704_v38 = vadd.f32 %v6703_v26, %v17444_v42  ;;  %v14650_v54 = vpop.f32.mrb[162].mxu0  ;;  %8192 = vmatmul.mubr.bf16.gmra.mrb[188].mxu1 %v17560_v45  ;;  %v15059_v42 = vld [vmem:[%s18700_s1 + $0x868] sm:$0xff]  }
 0x5b6   : > { %v6784_v48 = vmax.f32 %v6712_v3, 0.0  ;;  %v6715_v56 = vadd.f32 %v14650_v54, %v17453_v14  ;;  %v6706_v33 = vpop.f32.mrb[163].mxu0  ;;  %8345 = vmatmul.mubr.bf16.gmra.mrb[184].mxu0 %v17580_v18  ;;  %8199 = vmatprep.mubr.bf16.mxu1 %v17524_v22  ;;  %v15060_v14 = vld [vmem:[%s18700_s1 + $0x8b0] sm:$0xff]   ;;  %v7032_v3 = vld [vmem:[#allocation2 + $0xc7] sm:$0xff] }
 0x5b7   : > { %v6782_v1 = vmax.f32 %v6704_v38, 0.0  ;;  %v6707_v63 = vadd.f32 %v6706_v33, %v17447_v11  ;;  %8352 = vmatprep.mubr.bf16.mxu0 %v17587_v15  ;;  %13920 = vmatpush3.bf16.msra.mxu0 %v15057_v29  ;;  %v6964_v22 = vld [vmem:[#allocation2 + $0x69] sm:$0xff]  ;;  %v17630_v29 = vpack.c.bf16 %v6967_v49, %v6966_v28 }
 0x5b8   : > { %6816 = vst [vmem:[#allocation2 + $0x148] sm:$0xff] %v6784_v48  ;;  %v6785_v10 = vmax.f32 %v6715_v56, 0.0  ;;  %13921 = vmatprep.subr.bf16.mxu0 %v15058_v41  ;;  %v7031_v11 = vld [vmem:[#allocation2 + $0xaf] sm:$0xff]  ;;  %v17608_v12 = vpack.c.bf16 %v6965_v53, %v6964_v22  ;;  %v17634_v41 = vpack.c.bf16 %v7033_v21, %v7032_v3  ;;  %v7034_v22 = vld [vmem:[#allocation2 + $0xe7] sm:$0xff] }
 0x5b9   : > { %6814 = vst [vmem:[#allocation2 + $0x128] sm:$0xff] %v6782_v1  ;;  %v6783_v35 = vmax.f32 %v6707_v63, 0.0  ;;  %v17615_v2 = vpack.c.bf16 %v7031_v11, %v7030_v8  ;;  %v6969_v63 = vld [vmem:[#allocation2 + $0xb1] sm:$0xff]  ;;  %v6974_v28 = vld [vmem:[#allocation2 + $0x109] sm:$0xff] }
 0x5ba   : > { %6817 = vst [vmem:[#allocation2 + $0x150] sm:$0xff] %v6785_v10  ;;  %v17600_v9 = vpack.c.bf16 %v6785_v10, %v6784_v48 }
 0x5bb   : > { %6815 = vst [vmem:[#allocation2 + $0x130] sm:$0xff] %v6783_v35  ;;  %v14653_v37 = vpop.f32.mrb[164].mxu0  ;;  %v17602_v52 = vpack.c.bf16 %v6783_v35, %v6782_v1  ;;  %13922 = vmatpush3.bf16.msra.mxu0 %v15059_v42  ;;  %v6968_v1 = vld [vmem:[#allocation2 + $0xa9] sm:$0xff] }
 0x5bc   : > { %v6728_v30 = vadd.f32 %v14653_v37, %v17468_v0  ;;  %v6719_v23 = vpop.f32.mrb[165].mxu0  ;;  %13923 = vmatprep.subr.bf16.mxu0 %v15060_v14  ;;  %v7035_v42 = vld [vmem:[#allocation2 + $0xef] sm:$0xff] }
 0x5bd   : > { %v6720_v46 = vadd.f32 %v6719_v23, %v17462_v7  ;;  %v14654_v32 = vpop.f32.mrb[166].mxu0  ;;  %8200 = vmatmul.mubr.bf16.gmra.mrb[192].mxu1 %v17587_v15  ;;  %v15064_v7 = vld [vmem:[%s18700_s1 + $0x878] sm:$0xff]   ;;  %v17650_v37 = vpack.c.bf16 %v7035_v42, %v7034_v22 }
 0x5be   : > { %v6788_v4 = vmax.f32 %v6728_v30, 0.0  ;;  %v6731_v60 = vadd.f32 %v14654_v32, %v17471_v47  ;;  %v6722_v0 = vpop.f32.mrb[167].mxu0  ;;  %8353 = vmatmul.mubr.bf16.gmra.mrb[188].mxu0 %v17608_v12  ;;  %8207 = vmatprep.mubr.bf16.mxu1 %v17547_v59  ;;  %v6971_v32 = vld [vmem:[#allocation2 + $0xd1] sm:$0xff] }
 0x5bf   : > { %v6786_v6 = vmax.f32 %v6720_v46, 0.0  ;;  %v6723_v61 = vadd.f32 %v6722_v0, %v17465_v58  ;;  %8360 = vmatprep.mubr.bf16.mxu0 %v17615_v2  ;;  %13924 = vmatpush3.bf16.msra.mxu0 %v15062_v25  ;;  %v6970_v46 = vld [vmem:[#allocation2 + $0xc9] sm:$0xff] }
 0x5c0   : > { %6820 = vst [vmem:[#allocation2 + $0x188] sm:$0xff] %v6788_v4  ;;  %v6789_v5 = vmax.f32 %v6731_v60, 0.0  ;;  %13925 = vmatprep.subr.bf16.mxu0 %v15063_v43  ;;  %v17659_v60 = vpack.c.bf16 %v6971_v32, %v6970_v46  ;;  %v7036_v0 = vld [vmem:[#allocation2 + $0x107] sm:$0xff] }
 0x5c1   : > { %6818 = vst [vmem:[#allocation2 + $0x168] sm:$0xff] %v6786_v6  ;;  %v6787_v47 = vmax.f32 %v6723_v61, 0.0  ;;  %v7041_v49 = vld [vmem:[#allocation2 + $0x14f] sm:$0xff] }
 0x5c2   : > { %6821 = vst [vmem:[#allocation2 + $0x190] sm:$0xff] %v6789_v5  ;;  %v17625_v59 = vpack.c.bf16 %v6789_v5, %v6788_v4  ;;  %v7037_v4 = vld [vmem:[#allocation2 + $0x10f] sm:$0xff]  ;;  %v7038_v5 = vld [vmem:[#allocation2 + $0x127] sm:$0xff] }
 0x5c3   : > { %6819 = vst [vmem:[#allocation2 + $0x170] sm:$0xff] %v6787_v47  ;;  %v14657_v58 = vpop.f32.mrb[168].mxu0  ;;  %v17627_v50 = vpack.c.bf16 %v6787_v47, %v6786_v6  ;;  %13926 = vmatpush3.bf16.msra.mxu0 %v15064_v7  ;;  %v6973_v6 = vld [vmem:[#allocation2 + $0xf1] sm:$0xff] }
 0x5c4   : > { %v6744_v57 = vadd.f32 %v14657_v58, %v17489_v44  ;;  %v6735_v20 = vpop.f32.mrb[169].mxu0  ;;  %v7039_v61 = vld [vmem:[#allocation2 + $0x12f] sm:$0xff]  ;;  %v7040_v58 = vld [vmem:[#allocation2 + $0x147] sm:$0xff] }
 0x5c5   : > { %v6736_v26 = vadd.f32 %v6735_v20, %v17480_v40  ;;  %v14658_v24 = vpop.f32.mrb[170].mxu0  ;;  %8208 = vmatmul.mubr.bf16.gmra.mrb[196].mxu1 %v17615_v2  ;;  %v17670_v47 = vpack.c.bf16 %v7039_v61, %v7038_v5  ;;  %v6976_v20 = vld [vmem:[#allocation2 + $0x129] sm:$0xff] }
 0x5c6   : > { %v6792_v38 = vmax.f32 %v6744_v57, 0.0  ;;  %v6747_v54 = vadd.f32 %v14658_v24, %v17492_v17  ;;  %v6738_v48 = vpop.f32.mrb[171].mxu0  ;;  %8361 = vmatmul.mubr.bf16.gmra.mrb[192].mxu0 %v17630_v29  ;;  %8215 = vmatprep.mubr.bf16.mxu1 %v17545_v55  ;;  %v17678_v57 = vpack.c.bf16 %v7041_v49, %v7040_v58  ;;  %v7086_v58 = vld [vmem:[#allocation2 + $0x28] sm:$0xff] }
 0x5c7   : > { %v6790_v44 = vmax.f32 %v6736_v26, 0.0  ;;  %v6739_v56 = vadd.f32 %v6738_v48, %v17483_v39  ;;  %8368 = vmatprep.mubr.bf16.mxu0 %v17634_v41  ;;  %v17646_v39 = vpack.c.bf16 %v6969_v63, %v6968_v1  ;;  %v6979_v48 = vld [vmem:[#allocation2 + $0x151] sm:$0xff]  ;;  %v7044_v42 = vld [vmem:[#allocation2 + $0x187] sm:$0xff] }
 0x5c8   : > { %6824 = vst [vmem:[#allocation2 + $0x1c8] sm:$0xff] %v6792_v38  ;;  %v6793_v40 = vmax.f32 %v6747_v54, 0.0  ;;  %v7042_v24 = vld [vmem:[#allocation2 + $0x167] sm:$0xff] }
 0x5c9   : > { %6822 = vst [vmem:[#allocation2 + $0x1a8] sm:$0xff] %v6790_v44  ;;  %v6791_v33 = vmax.f32 %v6739_v56, 0.0  ;;  %v7045_v56 = vld [vmem:[#allocation2 + $0x18f] sm:$0xff] }
 0x5ca   : > { %6825 = vst [vmem:[#allocation2 + $0x1d0] sm:$0xff] %v6793_v40  ;;  %v17641_v10 = vpack.c.bf16 %v6793_v40, %v6792_v38  ;;  %v7043_v3 = vld [vmem:[#allocation2 + $0x16f] sm:$0xff] }
 0x5cb   : > { %6823 = vst [vmem:[#allocation2 + $0x1b0] sm:$0xff] %v6791_v33  ;;  %v14661_v17 = vpop.f32.mrb[172].mxu0  ;;  %v17643_v14 = vpack.c.bf16 %v6791_v33, %v6790_v44  ;;  %v17686_v38 = vpack.c.bf16 %v7043_v3, %v7042_v24  ;;  %v7278_v24 = vld [vmem:[#allocation2 + $0x48] sm:$0xff] }
 0x5cc   : > { %v6760_v55 = vadd.f32 %v14661_v17, %v17510_v27  ;;  %v6751_v35 = vpop.f32.mrb[173].mxu0 }
 0x5cd   : > { %v6752_v53 = vadd.f32 %v6751_v35, %v17501_v16  ;;  %v14662_v11 = vpop.f32.mrb[174].mxu0  ;;  %8216 = vmatmul.mubr.bf16.gmra.mrb[200].mxu1 %v17634_v41  ;;  %v6981_v35 = vld [vmem:[#allocation2 + $0x171] sm:$0xff] }
 0x5ce   : > { %v6796_v25 = vmax.f32 %v6760_v55, 0.0  ;;  %v6763_v30 = vadd.f32 %v14662_v11, %v17512_v34  ;;  %v6754_v23 = vpop.f32.mrb[175].mxu0  ;;  %8369 = vmatmul.mubr.bf16.gmra.mrb[196].mxu0 %v17646_v39  ;;  %8223 = vmatprep.mubr.bf16.mxu1 %v17574_v19  ;;  %v17662_v19 = vpack.c.bf16 %v7037_v4, %v7036_v0  ;;  %v17698_v55 = vpack.c.bf16 %v7045_v56, %v7044_v42  ;;  %v15067_v56 = vld [vmem:[%s18700_s1 + $0x8d8] sm:$0xff]   ;;  %v15069_v42 = vld [vmem:[%s18700_s1 + $0x8e8] sm:$0xff]  }
 0x5cf   : > { %v6794_v27 = vmax.f32 %v6752_v53, 0.0  ;;  %v6755_v8 = vadd.f32 %v6754_v23, %v17504_v31  ;;  %8376 = vmatprep.mubr.bf16.mxu0 %v17650_v37  ;;  %v6972_v31 = vld [vmem:[#allocation2 + $0xe9] sm:$0xff] }
 0x5d0   : > { %6828 = vst [vmem:[#allocation2 + $0x208] sm:$0xff] %v6796_v25  ;;  %v6797_v16 = vmax.f32 %v6763_v30, 0.0  ;;  %v17667_v7 = vpack.c.bf16 %v6973_v6, %v6972_v31  ;;  %v7046_v11 = vld [vmem:[#allocation2 + $0x1a7] sm:$0xff] }
 0x5d1   : > { %6826 = vst [vmem:[#allocation2 + $0x1e8] sm:$0xff] %v6794_v27  ;;  %v6795_v43 = vmax.f32 %v6755_v8, 0.0  ;;  %v6982_v30 = vld [vmem:[#allocation2 + $0x189] sm:$0xff] }
 0x5d2   : > { %6829 = vst [vmem:[#allocation2 + $0x210] sm:$0xff] %v6797_v16  ;;  %v7047_v22 = vld [vmem:[#allocation2 + $0x1af] sm:$0xff]  ;;  %v7048_v8 = vld [vmem:[#allocation2 + $0x1c7] sm:$0xff] }
 0x5d3   : > { %6827 = vst [vmem:[#allocation2 + $0x1f0] sm:$0xff] %v6795_v43  ;;  %v17657_v34 = vpack.c.bf16 %v6795_v43, %v6794_v27  ;;  %v17706_v25 = vpack.c.bf16 %v7047_v22, %v7046_v11  ;;  %v7049_v23 = vld [vmem:[#allocation2 + $0x1cf] sm:$0xff]  ;;  %v15071_v22 = vld [vmem:[%s18700_s1 + $0x8f8] sm:$0xff]  }
 0x5d4   : > { %v17714_v16 = vpack.c.bf16 %v7049_v23, %v7048_v8  ;;  %v6984_v43 = vld [vmem:[#allocation2 + $0x1a9] sm:$0xff] }
 0x5d5   : > { %8224 = vmatmul.mubr.bf16.gmra.mrb[204].mxu1 %v17650_v37  ;;  %v6986_v31 = vld [vmem:[#allocation2 + $0x1c9] sm:$0xff] }
 0x5d6   : > { %8377 = vmatmul.mubr.bf16.gmra.mrb[200].mxu0 %v17659_v60  ;;  %8231 = vmatprep.mubr.bf16.mxu1 %v17572_v13  ;;  %v6975_v13 = vld [vmem:[#allocation2 + $0x111] sm:$0xff]  ;;  %v7288_v23 = vld [vmem:[#allocation2 + $0xe8] sm:$0xff] }
 0x5d7   : > { %8384 = vmatprep.mubr.bf16.mxu0 %v17662_v19  ;;  %v17675_v21 = vpack.c.bf16 %v6975_v13, %v6974_v28  ;;  %v7052_v5 = vld [vmem:[#allocation2 + $0x207] sm:$0xff]  ;;  %v7087_v13 = vld [vmem:[#allocation2 + $0x30] sm:$0xff] }
 0x5d8   : > { %v7050_v4 = vld [vmem:[#allocation2 + $0x1e7] sm:$0xff] }
 0x5d9   : > { %v7053_v6 = vld [vmem:[#allocation2 + $0x20f] sm:$0xff] }
 0x5da   : > { %v7051_v46 = vld [vmem:[#allocation2 + $0x1ef] sm:$0xff]  ;;  %v17730_v28 = vpack.c.bf16 %v7053_v6, %v7052_v5 }
 0x5db   : > { %v17722_v0 = vpack.c.bf16 %v7051_v46, %v7050_v4  ;;  %v6989_v49 = vld [vmem:[#allocation2 + $0x1f1] sm:$0xff] }
 0x5dd   : > { %8232 = vmatmul.mubr.bf16.gmra.mrb[208].mxu1 %v17662_v19 }
 0x5de   : > { %8385 = vmatmul.mubr.bf16.gmra.mrb[204].mxu0 %v17667_v7  ;;  %8239 = vmatprep.mubr.bf16.mxu1 %v17602_v52  ;;  %v6977_v52 = vld [vmem:[#allocation2 + $0x131] sm:$0xff] }
 0x5df   : > { %8392 = vmatprep.mubr.bf16.mxu0 %v17670_v47  ;;  %v17683_v26 = vpack.c.bf16 %v6977_v52, %v6976_v20  ;;  %v7279_v20 = vld [vmem:[#allocation2 + $0x50] sm:$0xff]  ;;  %v7118_v52 = vpack.c.bf16 %v7087_v13, %v7086_v58 }
 0x5e5   : > { %8240 = vmatmul.mubr.bf16.gmra.mrb[212].mxu1 %v17670_v47 }
 0x5e6   : > { %8393 = vmatmul.mubr.bf16.gmra.mrb[208].mxu0 %v17675_v21  ;;  %8247 = vmatprep.mubr.bf16.mxu1 %v17600_v9  ;;  %v6978_v9 = vld [vmem:[#allocation2 + $0x149] sm:$0xff] }
 0x5e7   : > { %8400 = vmatprep.mubr.bf16.mxu0 %v17678_v57  ;;  %v17693_v63 = vpack.c.bf16 %v6979_v48, %v6978_v9  ;;  %v7310_v9 = vpack.c.bf16 %v7279_v20, %v7278_v24  ;;  %v7281_v48 = vld [vmem:[#allocation2 + $0x70] sm:$0xff]  ;;  %v7302_v24 = vld [vmem:[#allocation2 + $0x1c8] sm:$0xff] }
 0x5ed   : > { %8248 = vmatmul.mubr.bf16.gmra.mrb[216].mxu1 %v17678_v57  ;;  %v13591_v54 = vpop.f32.mrb[176].mxu1 }
 0x5ee   : > { %8401 = vmatmul.mubr.bf16.gmra.mrb[212].mxu0 %v17683_v26  ;;  %8255 = vmatprep.mubr.bf16.mxu1 %v17627_v50  ;;  %v13592_v44 = vpop.f32.mrb[177].mxu1  ;;  %v6980_v50 = vld [vmem:[#allocation2 + $0x169] sm:$0xff] }
 0x5ef   : > { %8408 = vmatprep.mubr.bf16.mxu0 %v17686_v38  ;;  %v17691_v40 = vadd.f32 %v13592_v44, %v13591_v54  ;;  %v13594_v33 = vpop.f32.mrb[178].mxu1  ;;  %v17703_v53 = vpack.c.bf16 %v6981_v35, %v6980_v50  ;;  %v15065_v54 = vld [vmem:[%s18700_s1 + $0x8c8] sm:$0xff]  }
 0x5f0   : > { %v13595_v1 = vpop.f32.mrb[179].mxu1  ;;  %v7280_v44 = vld [vmem:[#allocation2 + $0x68] sm:$0xff] }
 0x5f1   : > { %v17695_v17 = vadd.f32 %v13595_v1, %v13594_v33  ;;  %v7311_v33 = vpack.c.bf16 %v7281_v48, %v7280_v44  ;;  %v7282_v1 = vld [vmem:[#allocation2 + $0x88] sm:$0xff]  ;;  %v15073_v44 = vld [vmem:[%s18700_s1 + $0x900] sm:$0xff]  }
 0x5f2   : > { %v7284_v35 = vld [vmem:[#allocation2 + $0xa8] sm:$0xff] }
 0x5f5   : > { %8256 = vmatmul.mubr.bf16.gmra.mrb[220].mxu1 %v17686_v38 }
 0x5f6   : > { %8409 = vmatmul.mubr.bf16.gmra.mrb[216].mxu0 %v17693_v63  ;;  %8263 = vmatprep.mubr.bf16.mxu1 %v17625_v59  ;;  %v6983_v59 = vld [vmem:[#allocation2 + $0x191] sm:$0xff] }
 0x5f7   : > { %8416 = vmatprep.mubr.bf16.mxu0 %v17698_v55  ;;  %v17711_v27 = vpack.c.bf16 %v6983_v59, %v6982_v30  ;;  %v7289_v59 = vld [vmem:[#allocation2 + $0xf0] sm:$0xff] }
 0x5f8   : > { %v7315_v8 = vpack.c.bf16 %v7289_v59, %v7288_v23 }
 0x5fd   : > { %8264 = vmatmul.mubr.bf16.gmra.mrb[224].mxu1 %v17698_v55 }
 0x5fe   : > { %8417 = vmatmul.mubr.bf16.gmra.mrb[220].mxu0 %v17703_v53  ;;  %8271 = vmatprep.mubr.bf16.mxu1 %v17643_v14  ;;  %v6985_v14 = vld [vmem:[#allocation2 + $0x1b1] sm:$0xff] }
 0x5ff   : > { %8424 = vmatprep.mubr.bf16.mxu0 %v17706_v25  ;;  %v17719_v32 = vpack.c.bf16 %v6985_v14, %v6984_v43 }
 0x605   : > { %8272 = vmatmul.mubr.bf16.gmra.mrb[228].mxu1 %v17706_v25 }
 0x606   : > { %8425 = vmatmul.mubr.bf16.gmra.mrb[224].mxu0 %v17711_v27  ;;  %8279 = vmatprep.mubr.bf16.mxu1 %v17641_v10  ;;  %v6987_v10 = vld [vmem:[#allocation2 + $0x1d1] sm:$0xff] }
 0x607   : > { %8432 = vmatprep.mubr.bf16.mxu0 %v17714_v16  ;;  %v17727_v61 = vpack.c.bf16 %v6987_v10, %v6986_v31 }
 0x60d   : > { %8280 = vmatmul.mubr.bf16.gmra.mrb[232].mxu1 %v17714_v16 }
 0x60e   : > { %8433 = vmatmul.mubr.bf16.gmra.mrb[228].mxu0 %v17719_v32  ;;  %8287 = vmatprep.mubr.bf16.mxu1 %v17657_v34  ;;  %v6988_v34 = vld [vmem:[#allocation2 + $0x1e9] sm:$0xff] }
 0x60f   : > { %8440 = vmatprep.mubr.bf16.mxu0 %v17722_v0  ;;  %v17735_v3 = vpack.c.bf16 %v6989_v49, %v6988_v34  ;;  %v7303_v34 = vld [vmem:[#allocation2 + $0x1d0] sm:$0xff] }
 0x615   : > { %8288 = vmatmul.mubr.bf16.gmra.mrb[236].mxu1 %v17722_v0 }
 0x616   : > { %8441 = vmatmul.mubr.bf16.gmra.mrb[232].mxu0 %v17727_v61  ;;  %8489 = vmatprep.mubr.bf16.mxu1 %v17553_v51  ;;  %v15066_v51 = vld [vmem:[%s18700_s1 + $0x8d0] sm:$0xff]  }
 0x617   : > { %8448 = vmatprep.mubr.bf16.mxu0 %v17730_v28 }
 0x61d   : > { %8490 = vmatmul.mubr.bf16.vlgmr.msra.gmra.mrb[240].mxu1 %v7118_v52 }
 0x61e   : > { %8449 = vmatmul.mubr.bf16.gmra.mrb[236].mxu0 %v17735_v3  ;;  %8497 = vmatprep.mubr.bf16.mxu1 %v17580_v18  ;;  %v7283_v18 = vld [vmem:[#allocation2 + $0x90] sm:$0xff] }
 0x61f   : > { %8650 = vmatprep.mubr.bf16.mxu0 %v7310_v9  ;;  %14664 = vmatpush3.bf16.msra.mxu1 %v17520_v62  ;;  %v15068_v62 = vld [vmem:[%s18700_s1 + $0x8e0] sm:$0xff]   ;;  %v7312_v50 = vpack.c.bf16 %v7283_v18, %v7282_v1 }
 0x620   : > { %14665 = vmatprep.subr.bf16.mxu1 %v15065_v54 }
 0x623   : > { %14666 = vmatpush3.bf16.msra.mxu1 %v15065_v54 }
 0x624   : > { %14667 = vmatprep.subr.bf16.mxu1 %v15066_v51 }
 0x625   : > { %8498 = vmatmul.mubr.bf16.gmra.mrb[244].mxu1 %v7310_v9 }
 0x626   : > { %8651 = vmatmul.mubr.bf16.vlgmr.msra.gmra.mrb[240].mxu0 %v17534_v36  ;;  %8505 = vmatprep.mubr.bf16.mxu1 %v17608_v12  ;;  %v15070_v36 = vld [vmem:[%s18700_s1 + $0x8f0] sm:$0xff]  }
 0x627   : > { %8658 = vmatprep.mubr.bf16.mxu0 %v7311_v33  ;;  %14668 = vmatpush3.bf16.msra.mxu1 %v15066_v51  ;;  %v7285_v12 = vld [vmem:[#allocation2 + $0xb0] sm:$0xff]  ;;  %v7322_v51 = vpack.c.bf16 %v7303_v34, %v7302_v24 }
 0x628   : > { %14669 = vmatprep.subr.bf16.mxu1 %v15067_v56  ;;  %v7313_v11 = vpack.c.bf16 %v7285_v12, %v7284_v35  ;;  %v7342_v34 = vld [vmem:[#allocation2 + $0x49] sm:$0xff] }
 0x62b   : > { %14670 = vmatpush3.bf16.msra.mxu1 %v15067_v56 }
 0x62c   : > { %14671 = vmatprep.subr.bf16.mxu1 %v15068_v62 }
 0x62d   : > { %8506 = vmatmul.mubr.bf16.gmra.mrb[248].mxu1 %v7311_v33 }
 0x62e   : > { %8659 = vmatmul.mubr.bf16.gmra.mrb[244].mxu0 %v17560_v45  ;;  %8513 = vmatprep.mubr.bf16.mxu1 %v17630_v29  ;;  %v7287_v45 = vld [vmem:[#allocation2 + $0xd0] sm:$0xff]  ;;  %v7286_v29 = vld [vmem:[#allocation2 + $0xc8] sm:$0xff] }
 0x62f   : > { %8666 = vmatprep.mubr.bf16.mxu0 %v7312_v50  ;;  %14672 = vmatpush3.bf16.msra.mxu1 %v15068_v62  ;;  %v7314_v30 = vpack.c.bf16 %v7287_v45, %v7286_v29 }
 0x630   : > { %14673 = vmatprep.subr.bf16.mxu1 %v15069_v42 }
 0x633   : > { %14674 = vmatpush3.bf16.msra.mxu1 %v15069_v42 }
 0x634   : > { %14675 = vmatprep.subr.bf16.mxu1 %v15070_v36 }
 0x635   : > { %8514 = vmatmul.mubr.bf16.gmra.mrb[252].mxu1 %v7312_v50 }
 0x636   : > { %8667 = vmatmul.mubr.bf16.gmra.mrb[248].mxu0 %v17587_v15  ;;  %8521 = vmatprep.mubr.bf16.mxu1 %v17646_v39  ;;  %v7291_v15 = vld [vmem:[#allocation2 + $0x110] sm:$0xff]  ;;  %v7290_v39 = vld [vmem:[#allocation2 + $0x108] sm:$0xff] }
 0x637   : > { %8674 = vmatprep.mubr.bf16.mxu0 %v7313_v11  ;;  %14676 = vmatpush3.bf16.msra.mxu1 %v15070_v36  ;;  %v7316_v43 = vpack.c.bf16 %v7291_v15, %v7290_v39 }
 0x638   : > { %14677 = vmatprep.subr.bf16.mxu1 %v15071_v22 }
 0x63b   : > { %14678 = vmatpush3.bf16.msra.mxu1 %v15071_v22 }
 0x63d   : > { %8522 = vmatmul.mubr.bf16.gmra.mrb[0].mxu1 %v7313_v11  ;;  %v7304_v11 = vld [vmem:[#allocation2 + $0x1e8] sm:$0xff] }
 0x63e   : > { %8675 = vmatmul.mubr.bf16.gmra.mrb[252].mxu0 %v17615_v2  ;;  %8529 = vmatprep.mubr.bf16.mxu1 %v17659_v60  ;;  %v7293_v2 = vld [vmem:[#allocation2 + $0x130] sm:$0xff]  ;;  %v7292_v60 = vld [vmem:[#allocation2 + $0x128] sm:$0xff] }
 0x63f   : > { %8682 = vmatprep.mubr.bf16.mxu0 %v7314_v30  ;;  %v7317_v14 = vpack.c.bf16 %v7293_v2, %v7292_v60  ;;  %v7181_v2 = vld [vmem:[#allocation2 + $0x211] sm:$0xff] }
 0x645   : > { %8530 = vmatmul.mubr.bf16.gmra.mrb[4].mxu1 %v7314_v30 }
 0x646   : > { %8683 = vmatmul.mubr.bf16.gmra.mrb[0].mxu0 %v17634_v41  ;;  %8537 = vmatprep.mubr.bf16.mxu1 %v17667_v7  ;;  %v7295_v41 = vld [vmem:[#allocation2 + $0x150] sm:$0xff]  ;;  %v7294_v7 = vld [vmem:[#allocation2 + $0x148] sm:$0xff] }
 0x647   : > { %8690 = vmatprep.mubr.bf16.mxu0 %v7315_v8  ;;  %v7318_v46 = vpack.c.bf16 %v7295_v41, %v7294_v7  ;;  %v7307_v7 = vld [vmem:[#allocation2 + $0x210] sm:$0xff] }
 0x64d   : > { %8538 = vmatmul.mubr.bf16.gmra.mrb[8].mxu1 %v7315_v8 }
 0x64e   : > { %8691 = vmatmul.mubr.bf16.gmra.mrb[4].mxu0 %v17650_v37  ;;  %8545 = vmatprep.mubr.bf16.mxu1 %v17675_v21  ;;  %v7297_v37 = vld [vmem:[#allocation2 + $0x170] sm:$0xff]  ;;  %v7296_v21 = vld [vmem:[#allocation2 + $0x168] sm:$0xff] }
 0x64f   : > { %8698 = vmatprep.mubr.bf16.mxu0 %v7316_v43  ;;  %v7319_v4 = vpack.c.bf16 %v7297_v37, %v7296_v21 }
 0x655   : > { %8546 = vmatmul.mubr.bf16.gmra.mrb[12].mxu1 %v7316_v43  ;;  %v7180_v43 = vld [vmem:[#allocation2 + $0x209] sm:$0xff] }
 0x656   : > { %8699 = vmatmul.mubr.bf16.gmra.mrb[8].mxu0 %v17662_v19  ;;  %8553 = vmatprep.mubr.bf16.mxu1 %v17683_v26  ;;  %v7299_v19 = vld [vmem:[#allocation2 + $0x190] sm:$0xff]  ;;  %v7298_v26 = vld [vmem:[#allocation2 + $0x188] sm:$0xff] }
 0x657   : > { %8706 = vmatprep.mubr.bf16.mxu0 %v7317_v14  ;;  %v7320_v31 = vpack.c.bf16 %v7299_v19, %v7298_v26  ;;  %v7306_v26 = vld [vmem:[#allocation2 + $0x208] sm:$0xff] }
 0x65d   : > { %8554 = vmatmul.mubr.bf16.gmra.mrb[16].mxu1 %v7317_v14 }
 0x65e   : > { %8707 = vmatmul.mubr.bf16.gmra.mrb[12].mxu0 %v17670_v47  ;;  %8561 = vmatprep.mubr.bf16.mxu1 %v17693_v63  ;;  %v7301_v47 = vld [vmem:[#allocation2 + $0x1b0] sm:$0xff]  ;;  %v7300_v63 = vld [vmem:[#allocation2 + $0x1a8] sm:$0xff] }
 0x65f   : > { %8714 = vmatprep.mubr.bf16.mxu0 %v7318_v46  ;;  %v7321_v10 = vpack.c.bf16 %v7301_v47, %v7300_v63  ;;  %v7324_v63 = vpack.c.bf16 %v7307_v7, %v7306_v26  ;;  %v7349_v26 = vld [vmem:[#allocation2 + $0xb1] sm:$0xff] }
 0x665   : > { %8562 = vmatmul.mubr.bf16.gmra.mrb[20].mxu1 %v7318_v46 }
 0x666   : > { %8715 = vmatmul.mubr.bf16.gmra.mrb[16].mxu0 %v17678_v57  ;;  %8569 = vmatprep.mubr.bf16.mxu1 %v17703_v53  ;;  %v17786_v57 = vld [vmem:[%s18701_s2 + $0x3] ss:$0 sm:$0xff] }
 0x667   : > { %8722 = vmatprep.mubr.bf16.mxu0 %v7319_v4  ;;  %v8170_v49 = vadd.f32 %v17691_v40, %v17786_v57  ;;  %v8173_v54 = vadd.f32 %v17695_v17, %v17786_v57  ;;  %v15072_v40 = vld [vmem:[%s18700_s1 + $0x940] sm:$0xff]  }
 0x668   : > { %14047 = vmatprep.subr.bf16.mxu0 %v15072_v40 }
 0x669   : > { %14048 = vmatpush3.bf16.msra.mxu0 %v15073_v44 }
 0x66d   : > { %8570 = vmatmul.mubr.bf16.gmra.mrb[24].mxu1 %v7319_v4 }
 0x66e   : > { %8723 = vmatmul.mubr.bf16.gmra.mrb[20].mxu0 %v17686_v38  ;;  %8577 = vmatprep.mubr.bf16.mxu1 %v17711_v27 }
 0x66f   : > { %8730 = vmatprep.mubr.bf16.mxu0 %v7320_v31 }
 0x675   : > { %8578 = vmatmul.mubr.bf16.gmra.mrb[28].mxu1 %v7320_v31 }
 0x676   : > { %8731 = vmatmul.mubr.bf16.gmra.mrb[24].mxu0 %v17698_v55  ;;  %8585 = vmatprep.mubr.bf16.mxu1 %v17719_v32 }
 0x677   : > { %8738 = vmatprep.mubr.bf16.mxu0 %v7321_v10 }
 0x678   : > { %v13597_v53 = vpop.f32.mrb[180].mxu1 }
 0x679   : > { %v13703_v6 = vpop.f32.mrb[176].mxu0  ;;  %v13598_v38 = vpop.f32.mrb[181].mxu1 }
 0x67a   : > { %v13599_v5 = vadd.f32 %v13598_v38, %v13597_v53  ;;  %v13704_v27 = vpop.f32.mrb[177].mxu0  ;;  %v13600_v13 = vpop.f32.mrb[182].mxu1  ;;  %v15074_v53 = vld [vmem:[%s18700_s1 + $0x948] sm:$0xff]  }
 0x67b   : > { %v13705_v58 = vadd.f32 %v13704_v27, %v13703_v6  ;;  %v13706_v55 = vpop.f32.mrb[178].mxu0  ;;  %v13601_v20 = vpop.f32.mrb[183].mxu1  ;;  %v15075_v6 = vld [vmem:[%s18700_s1 + $0x908] sm:$0xff]   ;;  %14049 = vmatprep.subr.bf16.mxu0 %v15074_v53  ;;  %v7351_v53 = vld [vmem:[#allocation2 + $0xd1] sm:$0xff] }
 0x67c   : > { %v13602_v32 = vadd.f32 %v13601_v20, %v13600_v13  ;;  %v13707_v52 = vpop.f32.mrb[179].mxu0  ;;  %v8178_v42 = vadd.f32 %v13599_v5, %v17786_v57  ;;  %14050 = vmatpush3.bf16.msra.mxu0 %v15075_v6 }
 0x67d   : > { %v13708_v9 = vadd.f32 %v13707_v52, %v13706_v55  ;;  %8586 = vmatmul.mubr.bf16.gmra.mrb[32].mxu1 %v7321_v10  ;;  %v17792_v48 = vadd.f32 %v13705_v58, %v8170_v49  ;;  %v7343_v49 = vld [vmem:[#allocation2 + $0x51] sm:$0xff] }
 0x67e   : > { %8739 = vmatmul.mubr.bf16.gmra.mrb[28].mxu0 %v17706_v25  ;;  %8593 = vmatprep.mubr.bf16.mxu1 %v17727_v61  ;;  %v7305_v61 = vld [vmem:[#allocation2 + $0x1f0] sm:$0xff]  ;;  %v8181_v45 = vadd.f32 %v13602_v32, %v17786_v57  ;;  %v7374_v44 = vpack.c.bf16 %v7343_v49, %v7342_v34 }
 0x67f   : > { %8746 = vmatprep.mubr.bf16.mxu0 %v7322_v51  ;;  %v17802_v56 = vadd.f32 %v13708_v9, %v8173_v54  ;;  %v7323_v30 = vpack.c.bf16 %v7305_v61, %v7304_v11  ;;  %v15147_v54 = vld [vmem:[#allocation2 + $0x8] sm:$0xff] }
 0x680   : > { %v13603_v17 = vpop.f32.mrb[184].mxu1  ;;  %v17829_v9 = vpack.c.bf16 %v15147_v54, %v15147_v54 }
 0x681   : > { %v13709_v33 = vpop.f32.mrb[180].mxu0  ;;  %v13604_v62 = vpop.f32.mrb[185].mxu1 }
 0x682   : > { %v13605_v18 = vadd.f32 %v13604_v62, %v13603_v17  ;;  %v13710_v25 = vpop.f32.mrb[181].mxu0  ;;  %v13606_v1 = vpop.f32.mrb[186].mxu1 }
 0x683   : > { %v13711_v50 = vadd.f32 %v13710_v25, %v13709_v33  ;;  %v13712_v36 = vpop.f32.mrb[182].mxu0  ;;  %v13607_v12 = vpop.f32.mrb[187].mxu1  ;;  %v7245_v25 = vld [vmem:[#allocation2 + $0x22f] sm:$0xff] }
 0x684   : > { %v13608_v35 = vadd.f32 %v13607_v12, %v13606_v1  ;;  %v13713_v22 = vpop.f32.mrb[183].mxu0  ;;  %v8186_v46 = vadd.f32 %v13605_v18, %v17786_v57  ;;  %v7244_v18 = vld [vmem:[#allocation2 + $0x227] sm:$0xff] }
 0x685   : > { %v13714_v29 = vadd.f32 %v13713_v22, %v13712_v36  ;;  %8594 = vmatmul.mubr.bf16.gmra.mrb[36].mxu1 %v7322_v51  ;;  %v17806_v59 = vadd.f32 %v13711_v50, %v8178_v42  ;;  %v7344_v42 = vld [vmem:[#allocation2 + $0x69] sm:$0xff]  ;;  %v7345_v50 = vld [vmem:[#allocation2 + $0x71] sm:$0xff] }
 0x686   : > { %8747 = vmatmul.mubr.bf16.gmra.mrb[32].mxu0 %v17714_v16  ;;  %8601 = vmatprep.mubr.bf16.mxu1 %v17735_v3  ;;  %v17813_v3 = vpack.c.bf16 %v7181_v2, %v7180_v43  ;;  %v8189_v31 = vadd.f32 %v13608_v35, %v17786_v57  ;;  %v7346_v35 = vld [vmem:[#allocation2 + $0x89] sm:$0xff]  ;;  %v7347_v22 = vld [vmem:[#allocation2 + $0x91] sm:$0xff]  ;;  %v7375_v43 = vpack.c.bf16 %v7345_v50, %v7344_v42 }
 0x687   : > { %8754 = vmatprep.mubr.bf16.mxu0 %v7323_v30  ;;  %v17810_v23 = vadd.f32 %v13714_v29, %v8181_v45 }
 0x688   : > { %v13609_v8 = vpop.f32.mrb[188].mxu1 }
 0x689   : > { %v13715_v15 = vpop.f32.mrb[184].mxu0  ;;  %v13610_v39 = vpop.f32.mrb[189].mxu1 }
 0x68a   : > { %v13611_v60 = vadd.f32 %v13610_v39, %v13609_v8  ;;  %v13716_v14 = vpop.f32.mrb[185].mxu0  ;;  %v13612_v41 = vpop.f32.mrb[190].mxu1 }
 0x68b   : > { %v13717_v37 = vadd.f32 %v13716_v14, %v13715_v15  ;;  %v13718_v21 = vpop.f32.mrb[186].mxu0  ;;  %v13613_v4 = vpop.f32.mrb[191].mxu1  ;;  %v7376_v14 = vpack.c.bf16 %v7347_v22, %v7346_v35 }
 0x68c   : > { %v13614_v16 = vadd.f32 %v13613_v4, %v13612_v41  ;;  %v13719_v19 = vpop.f32.mrb[187].mxu0  ;;  %v8194_v20 = vadd.f32 %v13611_v60, %v17786_v57 }
 0x68d   : > { %v13720_v47 = vadd.f32 %v13719_v19, %v13718_v21  ;;  %8602 = vmatmul.mubr.bf16.gmra.mrb[40].mxu1 %v7323_v30  ;;  %v17816_v10 = vadd.f32 %v13717_v37, %v8186_v46  ;;  %v7261_v30 = vpack.c.bf16 %v7245_v25, %v7244_v18  ;;  %v15076_v37 = vld [vmem:[%s18700_s1 + $0x950] sm:$0xff]  }
 0x68e   : > { %8755 = vmatmul.mubr.bf16.gmra.mrb[36].mxu0 %v17722_v0  ;;  %8609 = vmatprep.mubr.bf16.mxu1 %v17813_v3  ;;  %v8197_v17 = vadd.f32 %v13614_v16, %v17786_v57  ;;  %v15077_v21 = vld [vmem:[%s18700_s1 + $0x910] sm:$0xff]  }
 0x68f   : > { %8762 = vmatprep.mubr.bf16.mxu0 %v7324_v63  ;;  %v17826_v38 = vadd.f32 %v13720_v47, %v8189_v31  ;;  %v7348_v19 = vld [vmem:[#allocation2 + $0xa9] sm:$0xff]  ;;  %14051 = vmatprep.subr.bf16.mxu0 %v15076_v37 }
 0x690   : > { %v13615_v5 = vpop.f32.mrb[192].mxu1  ;;  %14052 = vmatpush3.bf16.msra.mxu0 %v15077_v21  ;;  %v7354_v25 = vld [vmem:[#allocation2 + $0x109] sm:$0xff] }
 0x691   : > { %v13721_v27 = vpop.f32.mrb[188].mxu0  ;;  %v13616_v13 = vpop.f32.mrb[193].mxu1 }
 0x692   : > { %v13617_v0 = vadd.f32 %v13616_v13, %v13615_v5  ;;  %v13722_v58 = vpop.f32.mrb[189].mxu0  ;;  %v13618_v55 = vpop.f32.mrb[194].mxu1 }
 0x693   : > { %v13723_v32 = vadd.f32 %v13722_v58, %v13721_v27  ;;  %v13724_v52 = vpop.f32.mrb[190].mxu0  ;;  %v13619_v24 = vpop.f32.mrb[195].mxu1  ;;  %v7377_v58 = vpack.c.bf16 %v7349_v26, %v7348_v19  ;;  %v7359_v19 = vld [vmem:[#allocation2 + $0x151] sm:$0xff] }
 0x694   : > { %v13620_v51 = vadd.f32 %v13619_v24, %v13618_v55  ;;  %v13725_v40 = vpop.f32.mrb[191].mxu0 }
 0x695   : > { %v13726_v33 = vadd.f32 %v13725_v40, %v13724_v52  ;;  %8610 = vmatmul.mubr.bf16.gmra.mrb[44].mxu1 %v7324_v63  ;;  %v17832_v62 = vadd.f32 %v13723_v32, %v8194_v20  ;;  %v7350_v63 = vld [vmem:[#allocation2 + $0xc9] sm:$0xff] }
 0x696   : > { %8763 = vmatmul.mubr.bf16.gmra.mrb[40].mxu0 %v17730_v28  ;;  %14679 = vmatprep.mubr.bf16.mxu1 %v7374_v44  ;;  %v8202_v28 = vadd.f32 %v13617_v0, %v17786_v57  ;;  %v8205_v41 = vadd.f32 %v13620_v51, %v17786_v57  ;;  %v7378_v32 = vpack.c.bf16 %v7351_v53, %v7350_v63  ;;  %v7352_v44 = vld [vmem:[#allocation2 + $0xe9] sm:$0xff] }
 0x697   : > { %8770 = vmatprep.mubr.bf16.mxu0 %v17829_v9  ;;  %v17836_v1 = vadd.f32 %v13726_v33, %v8197_v17  ;;  %v7353_v17 = vld [vmem:[#allocation2 + $0xf1] sm:$0xff] }
 0x698   : > { %v13621_v61 = vpop.f32.mrb[196].mxu1 }
 0x699   : > { %v13727_v36 = vpop.f32.mrb[192].mxu0  ;;  %v13622_v12 = vpop.f32.mrb[197].mxu1 }
 0x69a   : > { %v13623_v11 = vadd.f32 %v13622_v12, %v13621_v61  ;;  %v13728_v45 = vpop.f32.mrb[193].mxu0  ;;  %v13624_v29 = vpop.f32.mrb[198].mxu1  ;;  %v7355_v61 = vld [vmem:[#allocation2 + $0x111] sm:$0xff] }
 0x69b   : > { %v13729_v8 = vadd.f32 %v13728_v45, %v13727_v36  ;;  %v13730_v15 = vpop.f32.mrb[194].mxu0  ;;  %v13625_v39 = vpop.f32.mrb[199].mxu1  ;;  %v7379_v45 = vpack.c.bf16 %v7353_v17, %v7352_v44  ;;  %v7362_v17 = vld [vmem:[#allocation2 + $0x189] sm:$0xff] }
 0x69c   : > { %v13626_v2 = vadd.f32 %v13625_v39, %v13624_v29  ;;  %v13731_v60 = vpop.f32.mrb[195].mxu0  ;;  %v8210_v13 = vadd.f32 %v13623_v11, %v17786_v57 }
 0x69d   : > { %v13732_v7 = vadd.f32 %v13731_v60, %v13730_v15  ;;  %14680 = vmatmul.mubr.bf16.vlgmr.msra.gmra.mrb[48].mxu1 %v7375_v43  ;;  %v17840_v46 = vadd.f32 %v13729_v8, %v8202_v28  ;;  %v7380_v28 = vpack.c.bf16 %v7355_v61, %v7354_v25  ;;  %v15078_v43 = vld [vmem:[%s18700_s1 + $0x958] sm:$0xff]  }
 0x69e   : > { %8771 = vmatmul.mubr.bf16.gmra.mrb[44].mxu0 %v7261_v30  ;;  %14683 = vmatprep.mubr.bf16.mxu1 %v7376_v14  ;;  %v8213_v52 = vadd.f32 %v13626_v2, %v17786_v57  ;;  %v15079_v2 = vld [vmem:[%s18700_s1 + $0x918] sm:$0xff]  }
 0x69f   : > { %v17848_v4 = vadd.f32 %v13732_v7, %v8205_v41  ;;  %v7356_v41 = vld [vmem:[#allocation2 + $0x129] sm:$0xff]  ;;  %v7357_v7 = vld [vmem:[#allocation2 + $0x131] sm:$0xff]  ;;  %14053 = vmatprep.subr.bf16.mxu0 %v15078_v43  ;;  %10341 = vmatprep.mubr.bf16.mxu0 %v17829_v9 }
 0x6a0   : > { %v13627_v16 = vpop.f32.mrb[200].mxu1  ;;  %14054 = vmatpush3.bf16.msra.mxu0 %v15079_v2  ;;  %v15100_v9 = vld [vmem:[%s18700_s1 + $0x9f0] sm:$0xff]  }
 0x6a1   : > { %v13733_v31 = vpop.f32.mrb[196].mxu0  ;;  %v13628_v47 = vpop.f32.mrb[201].mxu1 }
 0x6a2   : > { %v13629_v6 = vadd.f32 %v13628_v47, %v13627_v16  ;;  %v13734_v5 = vpop.f32.mrb[197].mxu0  ;;  %v13630_v27 = vpop.f32.mrb[202].mxu1  ;;  %v7358_v16 = vld [vmem:[#allocation2 + $0x149] sm:$0xff] }
 0x6a3   : > { %v13735_v34 = vadd.f32 %v13734_v5, %v13733_v31  ;;  %v13736_v49 = vpop.f32.mrb[198].mxu0  ;;  %v13631_v0 = vpop.f32.mrb[203].mxu1 }
 0x6a4   : > { %v13632_v55 = vadd.f32 %v13631_v0, %v13630_v27  ;;  %v13737_v20 = vpop.f32.mrb[199].mxu0  ;;  %v8218_v12 = vadd.f32 %v13629_v6, %v17786_v57  ;;  %v7381_v27 = vpack.c.bf16 %v7357_v7, %v7356_v41  ;;  %v7365_v41 = vld [vmem:[#allocation2 + $0x1b1] sm:$0xff] }
 0x6a5   : > { %v13738_v24 = vadd.f32 %v13737_v20, %v13736_v49  ;;  %14684 = vmatmul.mubr.bf16.gmra.mrb[52].mxu1 %v7377_v58  ;;  %v17852_v54 = vadd.f32 %v13735_v34, %v8210_v13  ;;  %v7382_v49 = vpack.c.bf16 %v7359_v19, %v7358_v16  ;;  %v7367_v16 = vld [vmem:[#allocation2 + $0x1d1] sm:$0xff] }
 0x6a6   : > { %14687 = vmatprep.mubr.bf16.mxu1 %v7378_v32  ;;  %v8221_v8 = vadd.f32 %v13632_v55, %v17786_v57 }
 0x6a7   : > { %v17854_v51 = vadd.f32 %v13738_v24, %v8213_v52  ;;  %v7360_v52 = vld [vmem:[#allocation2 + $0x169] sm:$0xff]  ;;  %v7361_v24 = vld [vmem:[#allocation2 + $0x171] sm:$0xff] }
 0x6a8   : > { %v13633_v40 = vpop.f32.mrb[204].mxu1 }
 0x6a9   : > { %v13739_v33 = vpop.f32.mrb[200].mxu0  ;;  %v13634_v18 = vpop.f32.mrb[205].mxu1 }
 0x6aa   : > { %v13635_v42 = vadd.f32 %v13634_v18, %v13633_v40  ;;  %v13740_v50 = vpop.f32.mrb[201].mxu0  ;;  %v13636_v36 = vpop.f32.mrb[206].mxu1 }
 0x6ab   : > { %v13741_v35 = vadd.f32 %v13740_v50, %v13739_v33  ;;  %v13742_v22 = vpop.f32.mrb[202].mxu0  ;;  %v13637_v11 = vpop.f32.mrb[207].mxu1  ;;  %v7363_v33 = vld [vmem:[#allocation2 + $0x191] sm:$0xff] }
 0x6ac   : > { %v13638_v29 = vadd.f32 %v13637_v11, %v13636_v36  ;;  %v13743_v30 = vpop.f32.mrb[203].mxu0  ;;  %v8226_v63 = vadd.f32 %v13635_v42, %v17786_v57 }
 0x6ad   : > { %v13744_v15 = vadd.f32 %v13743_v30, %v13742_v22  ;;  %14688 = vmatmul.mubr.bf16.gmra.mrb[56].mxu1 %v7379_v45  ;;  %v17858_v39 = vadd.f32 %v13741_v35, %v8218_v12  ;;  %v7383_v35 = vpack.c.bf16 %v7361_v24, %v7360_v52  ;;  %v7384_v45 = vpack.c.bf16 %v7363_v33, %v7362_v17  ;;  %v7368_v24 = vld [vmem:[#allocation2 + $0x1e9] sm:$0xff] }
 0x6ae   : > { %14691 = vmatprep.mubr.bf16.mxu1 %v7380_v28  ;;  %v8229_v0 = vadd.f32 %v13638_v29, %v17786_v57 }
 0x6af   : > { %v17866_v60 = vadd.f32 %v13744_v15, %v8221_v8  ;;  %v15080_v8 = vld [vmem:[%s18700_s1 + $0x960] sm:$0xff]  }
 0x6b0   : > { %v13639_v14 = vpop.f32.mrb[208].mxu1  ;;  %v15081_v15 = vld [vmem:[%s18700_s1 + $0x920] sm:$0xff]   ;;  %14055 = vmatprep.subr.bf16.mxu0 %v15080_v8  ;;  %v7373_v8 = vld [vmem:[#allocation2 + $0x231] sm:$0xff] }
 0x6b1   : > { %v13745_v37 = vpop.f32.mrb[204].mxu0  ;;  %v13640_v21 = vpop.f32.mrb[209].mxu1  ;;  %14056 = vmatpush3.bf16.msra.mxu0 %v15081_v15  ;;  %v15082_v15 = vld [vmem:[%s18700_s1 + $0x968] sm:$0xff]  }
 0x6b2   : > { %v13641_v26 = vadd.f32 %v13640_v21, %v13639_v14  ;;  %v13746_v31 = vpop.f32.mrb[205].mxu0  ;;  %v13642_v47 = vpop.f32.mrb[210].mxu1  ;;  %v7364_v14 = vld [vmem:[#allocation2 + $0x1a9] sm:$0xff]  ;;  %14057 = vmatprep.subr.bf16.mxu0 %v15082_v15 }
 0x6b3   : > { %v13747_v53 = vadd.f32 %v13746_v31, %v13745_v37  ;;  %v13748_v6 = vpop.f32.mrb[206].mxu0  ;;  %v13643_v5 = vpop.f32.mrb[211].mxu1  ;;  %v7366_v21 = vld [vmem:[#allocation2 + $0x1c9] sm:$0xff] }
 0x6b4   : > { %v13644_v13 = vadd.f32 %v13643_v5, %v13642_v47  ;;  %v13749_v34 = vpop.f32.mrb[207].mxu0  ;;  %v8234_v42 = vadd.f32 %v13641_v26, %v17786_v57  ;;  %v7385_v5 = vpack.c.bf16 %v7365_v41, %v7364_v14 }
 0x6b5   : > { %v13750_v58 = vadd.f32 %v13749_v34, %v13748_v6  ;;  %14692 = vmatmul.mubr.bf16.gmra.mrb[60].mxu1 %v7381_v27  ;;  %v17870_v55 = vadd.f32 %v13747_v53, %v8226_v63  ;;  %v7386_v34 = vpack.c.bf16 %v7367_v16, %v7366_v21 }
 0x6b6   : > { %14695 = vmatprep.mubr.bf16.mxu1 %v7382_v49  ;;  %v8237_v29 = vadd.f32 %v13644_v13, %v17786_v57 }
 0x6b7   : > { %v17872_v20 = vadd.f32 %v13750_v58, %v8229_v0 }
 0x6b8   : > { %v13645_v32 = vpop.f32.mrb[212].mxu1 }
 0x6b9   : > { %v13751_v40 = vpop.f32.mrb[208].mxu0  ;;  %v13646_v44 = vpop.f32.mrb[213].mxu1 }
 0x6ba   : > { %v13647_v18 = vadd.f32 %v13646_v44, %v13645_v32  ;;  %v13752_v25 = vpop.f32.mrb[209].mxu0  ;;  %v13648_v61 = vpop.f32.mrb[214].mxu1 }
 0x6bb   : > { %v13753_v50 = vadd.f32 %v13752_v25, %v13751_v40  ;;  %v13754_v36 = vpop.f32.mrb[210].mxu0  ;;  %v13649_v12 = vpop.f32.mrb[215].mxu1  ;;  %v7369_v40 = vld [vmem:[#allocation2 + $0x1f1] sm:$0xff] }
 0x6bc   : > { %v13650_v22 = vadd.f32 %v13649_v12, %v13648_v61  ;;  %v13755_v11 = vpop.f32.mrb[211].mxu0  ;;  %v8242_v47 = vadd.f32 %v13647_v18, %v17786_v57  ;;  %v7387_v12 = vpack.c.bf16 %v7369_v40, %v7368_v24 }
 0x6bd   : > { %v17876_v30 = vadd.f32 %v13753_v50, %v8234_v42  ;;  %v13756_v28 = vadd.f32 %v13755_v11, %v13754_v36  ;;  %14696 = vmatmul.mubr.bf16.gmra.mrb[64].mxu1 %v7383_v35 }
 0x6be   : > { %14699 = vmatprep.mubr.bf16.mxu1 %v7384_v45  ;;  %v8245_v49 = vadd.f32 %v13650_v22, %v17786_v57 }
 0x6bf   : > { %v17884_v43 = vadd.f32 %v13756_v28, %v8237_v29  ;;  %v7372_v28 = vld [vmem:[#allocation2 + $0x229] sm:$0xff] }
 0x6c0   : > { %v13651_v2 = vpop.f32.mrb[216].mxu1  ;;  %v7389_v21 = vpack.c.bf16 %v7373_v8, %v7372_v28 }
 0x6c1   : > { %v13757_v7 = vpop.f32.mrb[212].mxu0  ;;  %v13652_v37 = vpop.f32.mrb[217].mxu1 }
 0x6c2   : > { %v13653_v19 = vadd.f32 %v13652_v37, %v13651_v2  ;;  %v13758_v26 = vpop.f32.mrb[213].mxu0  ;;  %v13654_v31 = vpop.f32.mrb[218].mxu1  ;;  %v15083_v2 = vld [vmem:[%s18700_s1 + $0x928] sm:$0xff]  }
 0x6c3   : > { %v13759_v63 = vadd.f32 %v13758_v26, %v13757_v7  ;;  %v13760_v53 = vpop.f32.mrb[214].mxu0  ;;  %v13655_v6 = vpop.f32.mrb[219].mxu1  ;;  %14058 = vmatpush3.bf16.msra.mxu0 %v15083_v2 }
 0x6c4   : > { %v13656_v27 = vadd.f32 %v13655_v6, %v13654_v31  ;;  %v13761_v13 = vpop.f32.mrb[215].mxu0  ;;  %v8250_v61 = vadd.f32 %v13653_v19, %v17786_v57 }
 0x6c5   : > { %v17888_v0 = vadd.f32 %v13759_v63, %v8242_v47  ;;  %v13762_v58 = vadd.f32 %v13761_v13, %v13760_v53  ;;  %14700 = vmatmul.mubr.bf16.gmra.mrb[68].mxu1 %v7385_v5 }
 0x6c6   : > { %14703 = vmatprep.mubr.bf16.mxu1 %v7386_v34  ;;  %v8253_v11 = vadd.f32 %v13656_v27, %v17786_v57 }
 0x6c7   : > { %v17890_v32 = vadd.f32 %v13762_v58, %v8245_v49 }
 0x6c8   : > { %v13657_v52 = vpop.f32.mrb[220].mxu1 }
 0x6c9   : > { %v13763_v44 = vpop.f32.mrb[216].mxu0  ;;  %v13658_v17 = vpop.f32.mrb[221].mxu1 }
 0x6ca   : > { %v13659_v33 = vadd.f32 %v13658_v17, %v13657_v52  ;;  %v13764_v18 = vpop.f32.mrb[217].mxu0  ;;  %v13660_v25 = vpop.f32.mrb[222].mxu1 }
 0x6cb   : > { %v13765_v42 = vadd.f32 %v13764_v18, %v13763_v44  ;;  %v13766_v50 = vpop.f32.mrb[218].mxu0  ;;  %v13661_v36 = vpop.f32.mrb[223].mxu1 }
 0x6cc   : > { %v13662_v35 = vadd.f32 %v13661_v36, %v13660_v25  ;;  %v13767_v22 = vpop.f32.mrb[219].mxu0  ;;  %v8258_v26 = vadd.f32 %v13659_v33, %v17786_v57 }
 0x6cd   : > { %v17894_v45 = vadd.f32 %v13765_v42, %v8250_v61  ;;  %v13768_v29 = vadd.f32 %v13767_v22, %v13766_v50  ;;  %14704 = vmatmul.mubr.bf16.gmra.mrb[72].mxu1 %v7387_v12  ;;  %v15085_v22 = vld [vmem:[%s18700_s1 + $0x930] sm:$0xff]  }
 0x6ce   : > { %14707 = vmatprep.mubr.bf16.mxu1 %v17813_v3  ;;  %v8261_v5 = vadd.f32 %v13662_v35, %v17786_v57  ;;  %v15084_v35 = vld [vmem:[%s18700_s1 + $0x970] sm:$0xff]  }
 0x6cf   : > { %v17903_v14 = vadd.f32 %v13768_v29, %v8253_v11  ;;  %14059 = vmatprep.subr.bf16.mxu0 %v15084_v35 }
 0x6d0   : > { %v13663_v41 = vpop.f32.mrb[224].mxu1  ;;  %14060 = vmatpush3.bf16.msra.mxu0 %v15085_v22 }
 0x6d1   : > { %v13769_v7 = vpop.f32.mrb[220].mxu0  ;;  %v13664_v37 = vpop.f32.mrb[225].mxu1 }
 0x6d2   : > { %v13665_v16 = vadd.f32 %v13664_v37, %v13663_v41  ;;  %v13770_v19 = vpop.f32.mrb[221].mxu0  ;;  %v13666_v3 = vpop.f32.mrb[226].mxu1 }
 0x6d3   : > { %v13771_v31 = vadd.f32 %v13770_v19, %v13769_v7  ;;  %v13772_v47 = vpop.f32.mrb[222].mxu0  ;;  %v13667_v63 = vpop.f32.mrb[227].mxu1 }
 0x6d4   : > { %v13668_v53 = vadd.f32 %v13667_v63, %v13666_v3  ;;  %v13773_v6 = vpop.f32.mrb[223].mxu0  ;;  %v8266_v17 = vadd.f32 %v13665_v16, %v17786_v57 }
 0x6d5   : > { %v17907_v27 = vadd.f32 %v13771_v31, %v8258_v26  ;;  %v13774_v13 = vadd.f32 %v13773_v6, %v13772_v47  ;;  %14708 = vmatmul.mubr.bf16.gmra.mrb[76].mxu1 %v7389_v21  ;;  %v15086_v26 = vld [vmem:[%s18700_s1 + $0x9c0] sm:$0xff]   ;;  %v15088_v6 = vld [vmem:[%s18700_s1 + $0x9c8] sm:$0xff]  }
 0x6d6   : > { %v8269_v50 = vadd.f32 %v13668_v53, %v17786_v57  ;;  %v15087_v53 = vld [vmem:[%s18700_s1 + $0x980] sm:$0xff]   ;;  %14159 = vmatprep.subr.bf16.mxu1 %v15086_v26 }
 0x6d7   : > { %v17909_v34 = vadd.f32 %v13774_v13, %v8261_v5  ;;  %14160 = vmatpush3.bf16.msra.mxu1 %v15087_v53 }
 0x6d8   : > { %v13669_v49 = vpop.f32.mrb[228].mxu1  ;;  %14161 = vmatprep.subr.bf16.mxu1 %v15088_v6 }
 0x6d9   : > { %v13775_v58 = vpop.f32.mrb[224].mxu0  ;;  %v13670_v52 = vpop.f32.mrb[229].mxu1 }
 0x6da   : > { %v13671_v24 = vadd.f32 %v13670_v52, %v13669_v49  ;;  %v13776_v40 = vpop.f32.mrb[225].mxu0  ;;  %v13672_v44 = vpop.f32.mrb[230].mxu1  ;;  %v15089_v52 = vld [vmem:[%s18700_s1 + $0x988] sm:$0xff]  }
 0x6db   : > { %v13777_v33 = vadd.f32 %v13776_v40, %v13775_v58  ;;  %v13778_v18 = vpop.f32.mrb[226].mxu0  ;;  %v13673_v25 = vpop.f32.mrb[231].mxu1  ;;  %14162 = vmatpush3.bf16.msra.mxu1 %v15089_v52 }
 0x6dc   : > { %v13674_v61 = vadd.f32 %v13673_v25, %v13672_v44  ;;  %v13779_v42 = vpop.f32.mrb[227].mxu0  ;;  %v8274_v7 = vadd.f32 %v13671_v24, %v17786_v57 }
 0x6dd   : > { %v17913_v36 = vadd.f32 %v13777_v33, %v8266_v17  ;;  %v13780_v12 = vadd.f32 %v13779_v42, %v13778_v18 }
 0x6de   : > { %v8277_v31 = vadd.f32 %v13674_v61, %v17786_v57 }
 0x6df   : > { %v17921_v11 = vadd.f32 %v13780_v12, %v8269_v50  ;;  %v15091_v50 = vld [vmem:[%s18700_s1 + $0x9d0] sm:$0xff]  }
 0x6e0   : > { %v13675_v29 = vpop.f32.mrb[232].mxu1  ;;  %14163 = vmatprep.subr.bf16.mxu1 %v15091_v50 }
 0x6e1   : > { %v13781_v28 = vpop.f32.mrb[228].mxu0  ;;  %v13676_v8 = vpop.f32.mrb[233].mxu1 }
 0x6e2   : > { %v13677_v15 = vadd.f32 %v13676_v8, %v13675_v29  ;;  %v13782_v2 = vpop.f32.mrb[229].mxu0  ;;  %v13678_v41 = vpop.f32.mrb[234].mxu1  ;;  %v15093_v29 = vld [vmem:[%s18700_s1 + $0x990] sm:$0xff]   ;;  %v15092_v8 = vld [vmem:[%s18700_s1 + $0x938] sm:$0xff]  }
 0x6e3   : > { %v13783_v37 = vadd.f32 %v13782_v2, %v13781_v28  ;;  %v13784_v21 = vpop.f32.mrb[230].mxu0  ;;  %v13679_v16 = vpop.f32.mrb[235].mxu1  ;;  %v15090_v28 = vld [vmem:[%s18700_s1 + $0x978] sm:$0xff]   ;;  %14164 = vmatpush3.bf16.msra.mxu1 %v15093_v29 }
 0x6e4   : > { %v13680_v19 = vadd.f32 %v13679_v16, %v13678_v41  ;;  %v13785_v3 = vpop.f32.mrb[231].mxu0  ;;  %v8282_v17 = vadd.f32 %v13677_v15, %v17786_v57  ;;  %v15094_v15 = vld [vmem:[%s18700_s1 + $0x9d8] sm:$0xff]   ;;  %14061 = vmatprep.subr.bf16.mxu0 %v15090_v28 }
 0x6e5   : > { %v17928_v47 = vadd.f32 %v13783_v37, %v8274_v7  ;;  %v13786_v63 = vadd.f32 %v13785_v3, %v13784_v21  ;;  %14165 = vmatprep.subr.bf16.mxu1 %v15094_v15  ;;  %14062 = vmatpush3.bf16.msra.mxu0 %v15092_v8  ;;  %v15095_v21 = vld [vmem:[%s18700_s1 + $0x998] sm:$0xff]  }
 0x6e6   : > { %v8285_v12 = vadd.f32 %v13680_v19, %v17786_v57 }
 0x6e7   : > { %v17936_v5 = vadd.f32 %v13786_v63, %v8277_v31  ;;  %14166 = vmatpush3.bf16.msra.mxu1 %v15095_v21 }
 0x6e8   : > { %v13681_v13 = vpop.f32.mrb[236].mxu1 }
 0x6e9   : > { %v13787_v49 = vpop.f32.mrb[232].mxu0  ;;  %v13682_v58 = vpop.f32.mrb[237].mxu1 }
 0x6ea   : > { %v13683_v24 = vadd.f32 %v13682_v58, %v13681_v13  ;;  %v13788_v40 = vpop.f32.mrb[233].mxu0  ;;  %v13684_v44 = vpop.f32.mrb[238].mxu1  ;;  %v15096_v58 = vld [vmem:[%s18700_s1 + $0x9e0] sm:$0xff]  }
 0x6eb   : > { %v13789_v33 = vadd.f32 %v13788_v40, %v13787_v49  ;;  %v13790_v18 = vpop.f32.mrb[234].mxu0  ;;  %v13685_v25 = vpop.f32.mrb[239].mxu1  ;;  %14167 = vmatprep.subr.bf16.mxu1 %v15096_v58 }
 0x6ec   : > { %v13686_v61 = vadd.f32 %v13685_v25, %v13684_v44  ;;  %v13791_v42 = vpop.f32.mrb[235].mxu0  ;;  %v8290_v26 = vadd.f32 %v13683_v24, %v17786_v57  ;;  %v15097_v24 = vld [vmem:[%s18700_s1 + $0x9a0] sm:$0xff]  }
 0x6ed   : > { %v17946_v35 = vadd.f32 %v13789_v33, %v8282_v17  ;;  %v13792_v22 = vadd.f32 %v13791_v42, %v13790_v18  ;;  %14168 = vmatpush3.bf16.msra.mxu1 %v15097_v24  ;;  %v9005_v18 = vld [vmem:[#allocation2 + $0xf] sm:$0xff] }
 0x6ee   : > { %v8293_v52 = vadd.f32 %v13686_v61, %v17786_v57  ;;  %v15098_v57 = vld [vmem:[%s18700_s1 + $0x9e8] sm:$0xff]  }
 0x6ef   : > { %v17960_v2 = vadd.f32 %v13792_v22, %v8285_v12  ;;  %14169 = vmatprep.subr.bf16.mxu1 %v15098_v57 }
 0x6f0   : > { %v13815_v41 = vpop.f32.mrb[240].mxu1 }
 0x6f1   : > { %v13793_v7 = vpop.f32.mrb[236].mxu0  ;;  %v13816_v37 = vpop.f32.mrb[241].mxu1 }
 0x6f2   : > { %v13794_v16 = vpop.f32.mrb[237].mxu0  ;;  %v13817_v19 = vadd.f32 %v13816_v37, %v13815_v41  ;;  %v13818_v3 = vpop.f32.mrb[242].mxu1 }
 0x6f3   : > { %v13795_v31 = vadd.f32 %v13794_v16, %v13793_v7  ;;  %v13796_v63 = vpop.f32.mrb[238].mxu0  ;;  %v13819_v53 = vpop.f32.mrb[243].mxu1 }
 0x6f4   : > { %v8492_v6 = vadd.f32 %v13817_v19, %v17792_v48  ;;  %v13797_v13 = vpop.f32.mrb[239].mxu0  ;;  %v13820_v49 = vadd.f32 %v13819_v53, %v13818_v3  ;;  %v9004_v48 = vld [vmem:[#allocation2 + $0x7] sm:$0xff]  ;;  %v15102_v19 = vld [vmem:[%s18700_s1 + $0x9b0] sm:$0xff]   ;;  %v15104_v53 = vld [vmem:[%s18700_s1 + $0x9f8] sm:$0xff]  }
 0x6f5   : > { %v17971_v40 = vadd.f32 %v13795_v31, %v8290_v26  ;;  %v13798_v44 = vadd.f32 %v13797_v13, %v13796_v63  ;;  %v9036_v61 = vpack.c.bf16 %v9005_v18, %v9004_v48  ;;  %v15101_v31 = vld [vmem:[%s18700_s1 + $0xa40] sm:$0xff]  }
 0x6f6   : > { %v8495_v17 = vadd.f32 %v13820_v49, %v17802_v56  ;;  %v15099_v56 = vld [vmem:[%s18700_s1 + $0x9a8] sm:$0xff]   ;;  %v15103_v63 = vld [vmem:[%s18700_s1 + $0xa00] sm:$0xff]   ;;  %14271 = vmatprep.subr.bf16.mxu0 %v15101_v31 }
 0x6f7   : > { %v17977_v33 = vadd.f32 %v13798_v44, %v8293_v52  ;;  %10342 = vmatmul.mubr.bf16.vlgmr.msra.gmra.mrb[48].mxu0 %v9036_v61  ;;  %14170 = vmatpush3.bf16.msra.mxu1 %v15099_v56  ;;  %v15106_v31 = vld [vmem:[%s18700_s1 + $0xa48] sm:$0xff]  }
 0x6f8   : > { %v13821_v25 = vpop.f32.mrb[244].mxu1  ;;  %14171 = vmatprep.subr.bf16.mxu1 %v15100_v9  ;;  %14272 = vmatpush3.bf16.msra.mxu0 %v15103_v63  ;;  %v15107_v63 = vld [vmem:[%s18700_s1 + $0xa08] sm:$0xff]  }
 0x6f9   : > { %v13927_v42 = vpop.f32.mrb[240].mxu0  ;;  %v13822_v50 = vpop.f32.mrb[245].mxu1  ;;  %14273 = vmatprep.subr.bf16.mxu0 %v15106_v31 }
 0x6fa   : > { %v13823_v12 = vadd.f32 %v13822_v50, %v13821_v25  ;;  %v13928_v22 = vpop.f32.mrb[241].mxu0  ;;  %v13824_v29 = vpop.f32.mrb[246].mxu1 }
 0x6fb   : > { %v13929_v28 = vadd.f32 %v13928_v22, %v13927_v42  ;;  %v13930_v8 = vpop.f32.mrb[242].mxu0  ;;  %v13825_v15 = vpop.f32.mrb[247].mxu1  ;;  %14172 = vmatpush3.bf16.msra.mxu1 %v15102_v19 }
 0x6fc   : > { %v8500_v41 = vadd.f32 %v13823_v12, %v17806_v59  ;;  %v13826_v7 = vadd.f32 %v13825_v15, %v13824_v29  ;;  %v13931_v37 = vpop.f32.mrb[243].mxu0  ;;  %14173 = vmatprep.subr.bf16.mxu1 %v15104_v53  ;;  %14274 = vmatpush3.bf16.msra.mxu0 %v15107_v63 }
 0x6fd   : > { %v13932_v21 = vadd.f32 %v13931_v37, %v13930_v8  ;;  %v17990_v16 = vadd.f32 %v13929_v28, %v8492_v6 }
 0x6fe   : > { %v8503_v3 = vadd.f32 %v13826_v7, %v17810_v23  ;;  %v15105_v23 = vld [vmem:[%s18700_s1 + $0x9b8] sm:$0xff]  }
 0x6ff   : > { %v17996_v26 = vadd.f32 %v13932_v21, %v8495_v17  ;;  %14174 = vmatpush3.bf16.msra.mxu1 %v15105_v23 }
 0x700   : > { %v13827_v59 = vpop.f32.mrb[248].mxu1 }
 0x701   : > { %v13933_v6 = vpop.f32.mrb[244].mxu0  ;;  %v13828_v13 = vpop.f32.mrb[249].mxu1 }
 0x702   : > { %v13829_v49 = vadd.f32 %v13828_v13, %v13827_v59  ;;  %v13934_v58 = vpop.f32.mrb[245].mxu0  ;;  %v13830_v52 = vpop.f32.mrb[250].mxu1 }
 0x703   : > { %v13935_v44 = vadd.f32 %v13934_v58, %v13933_v6  ;;  %v13936_v24 = vpop.f32.mrb[246].mxu0  ;;  %v13831_v17 = vpop.f32.mrb[251].mxu1 }
 0x704   : > { %v8508_v48 = vadd.f32 %v13829_v49, %v17816_v10  ;;  %v13832_v18 = vadd.f32 %v13831_v17, %v13830_v52  ;;  %v13937_v25 = vpop.f32.mrb[247].mxu0 }
 0x705   : > { %v13938_v57 = vadd.f32 %v13937_v25, %v13936_v24  ;;  %v18011_v61 = vadd.f32 %v13935_v44, %v8500_v41 }
 0x706   : > { %v8511_v42 = vadd.f32 %v13832_v18, %v17826_v38 }
 0x707   : > { %v18014_v50 = vadd.f32 %v13938_v57, %v8503_v3 }
 0x708   : > { %v13833_v56 = vpop.f32.mrb[252].mxu1 }
 0x709   : > { %v13939_v12 = vpop.f32.mrb[248].mxu0  ;;  %v13834_v22 = vpop.f32.mrb[253].mxu1 }
 0x70a   : > { %v13835_v29 = vadd.f32 %v13834_v22, %v13833_v56  ;;  %v13940_v28 = vpop.f32.mrb[249].mxu0  ;;  %v13836_v8 = vpop.f32.mrb[254].mxu1 }
 0x70b   : > { %v13941_v15 = vadd.f32 %v13940_v28, %v13939_v12  ;;  %v13942_v7 = vpop.f32.mrb[250].mxu0  ;;  %v13837_v37 = vpop.f32.mrb[255].mxu1 }
 0x70c   : > { %v8516_v10 = vadd.f32 %v13835_v29, %v17832_v62  ;;  %v13838_v9 = vadd.f32 %v13837_v37, %v13836_v8  ;;  %v13943_v21 = vpop.f32.mrb[251].mxu0 }
 0x70d   : > { %v13944_v19 = vadd.f32 %v13943_v21, %v13942_v7  ;;  %v18017_v41 = vadd.f32 %v13941_v15, %v8508_v48 }
 0x70e   : > { %v8519_v38 = vadd.f32 %v13838_v9, %v17836_v1 }
 0x70f   : > { %v18020_v3 = vadd.f32 %v13944_v19, %v8511_v42 }
 0x710   : > { %v13839_v59 = vpop.f32.mrb[0].mxu1 }
 0x711   : > { %v13945_v53 = vpop.f32.mrb[252].mxu0  ;;  %v13840_v62 = vpop.f32.mrb[1].mxu1 }
 0x712   : > { %v13841_v6 = vadd.f32 %v13840_v62, %v13839_v59  ;;  %v13946_v13 = vpop.f32.mrb[253].mxu0  ;;  %v13842_v23 = vpop.f32.mrb[2].mxu1  ;;  %v15109_v59 = vld [vmem:[%s18700_s1 + $0xa10] sm:$0xff]  }
 0x713   : > { %v13947_v49 = vadd.f32 %v13946_v13, %v13945_v53  ;;  %v13948_v58 = vpop.f32.mrb[254].mxu0  ;;  %v13843_v1 = vpop.f32.mrb[3].mxu1 }
 0x714   : > { %v8524_v52 = vadd.f32 %v13841_v6, %v17840_v46  ;;  %v13844_v44 = vadd.f32 %v13843_v1, %v13842_v23  ;;  %v13949_v24 = vpop.f32.mrb[255].mxu0 }
 0x715   : > { %v13950_v17 = vadd.f32 %v13949_v24, %v13948_v58  ;;  %v18029_v48 = vadd.f32 %v13947_v49, %v8516_v10 }
 0x716   : > { %v8527_v18 = vadd.f32 %v13844_v44, %v17848_v4 }
 0x717   : > { %v18032_v25 = vadd.f32 %v13950_v17, %v8519_v38  ;;  %v15108_v38 = vld [vmem:[%s18700_s1 + $0xa50] sm:$0xff]  }
 0x718   : > { %v13845_v57 = vpop.f32.mrb[4].mxu1  ;;  %14275 = vmatprep.subr.bf16.mxu0 %v15108_v38 }
 0x719   : > { %v13951_v42 = vpop.f32.mrb[0].mxu0  ;;  %v13846_v56 = vpop.f32.mrb[5].mxu1  ;;  %14276 = vmatpush3.bf16.msra.mxu0 %v15109_v59 }
 0x71a   : > { %v13847_v12 = vadd.f32 %v13846_v56, %v13845_v57  ;;  %v13952_v22 = vpop.f32.mrb[1].mxu0  ;;  %v13848_v29 = vpop.f32.mrb[6].mxu1 }
 0x71b   : > { %v13953_v28 = vadd.f32 %v13952_v22, %v13951_v42  ;;  %v13954_v8 = vpop.f32.mrb[2].mxu0  ;;  %v13849_v15 = vpop.f32.mrb[7].mxu1 }
 0x71c   : > { %v8532_v46 = vadd.f32 %v13847_v12, %v17852_v54  ;;  %v13850_v7 = vadd.f32 %v13849_v15, %v13848_v29  ;;  %v13955_v37 = vpop.f32.mrb[3].mxu0 }
 0x71d   : > { %v13956_v9 = vadd.f32 %v13955_v37, %v13954_v8  ;;  %v18035_v10 = vadd.f32 %v13953_v28, %v8524_v52 }
 0x71e   : > { %v8535_v4 = vadd.f32 %v13850_v7, %v17854_v51 }
 0x71f   : > { %v18038_v21 = vadd.f32 %v13956_v9, %v8527_v18 }
 0x720   : > { %v13851_v19 = vpop.f32.mrb[8].mxu1 }
 0x721   : > { %v13957_v31 = vpop.f32.mrb[4].mxu0  ;;  %v13852_v54 = vpop.f32.mrb[9].mxu1 }
 0x722   : > { %v13853_v63 = vadd.f32 %v13852_v54, %v13851_v19  ;;  %v13958_v53 = vpop.f32.mrb[5].mxu0  ;;  %v13854_v62 = vpop.f32.mrb[10].mxu1  ;;  %v15111_v19 = vld [vmem:[%s18700_s1 + $0xa18] sm:$0xff]  }
 0x723   : > { %v13959_v6 = vadd.f32 %v13958_v53, %v13957_v31  ;;  %v13960_v13 = vpop.f32.mrb[6].mxu0  ;;  %v13855_v51 = vpop.f32.mrb[11].mxu1 }
 0x724   : > { %v8540_v23 = vadd.f32 %v13853_v63, %v17858_v39  ;;  %v13856_v49 = vadd.f32 %v13855_v51, %v13854_v62  ;;  %v13961_v58 = vpop.f32.mrb[7].mxu0  ;;  %v15112_v51 = vld [vmem:[%s18700_s1 + $0xac0] sm:$0xff]  }
 0x725   : > { %v13962_v1 = vadd.f32 %v13961_v58, %v13960_v13  ;;  %v18047_v52 = vadd.f32 %v13959_v6, %v8532_v46  ;;  %14383 = vmatprep.subr.bf16.mxu1 %v15112_v51 }
 0x726   : > { %v8543_v44 = vadd.f32 %v13856_v49, %v17866_v60 }
 0x727   : > { %v18050_v24 = vadd.f32 %v13962_v1, %v8535_v4  ;;  %v15110_v4 = vld [vmem:[%s18700_s1 + $0xa58] sm:$0xff]  }
 0x728   : > { %v13857_v17 = vpop.f32.mrb[12].mxu1  ;;  %14277 = vmatprep.subr.bf16.mxu0 %v15110_v4 }
 0x729   : > { %v13963_v18 = vpop.f32.mrb[8].mxu0  ;;  %v13858_v57 = vpop.f32.mrb[13].mxu1  ;;  %14278 = vmatpush3.bf16.msra.mxu0 %v15111_v19 }
 0x72a   : > { %v13859_v42 = vadd.f32 %v13858_v57, %v13857_v17  ;;  %v13964_v56 = vpop.f32.mrb[9].mxu0  ;;  %v13860_v12 = vpop.f32.mrb[14].mxu1 }
 0x72b   : > { %v13965_v22 = vadd.f32 %v13964_v56, %v13963_v18  ;;  %v13966_v29 = vpop.f32.mrb[10].mxu0  ;;  %v13861_v28 = vpop.f32.mrb[15].mxu1 }
 0x72c   : > { %v8548_v39 = vadd.f32 %v13859_v42, %v17870_v55  ;;  %v13862_v8 = vadd.f32 %v13861_v28, %v13860_v12  ;;  %v13967_v15 = vpop.f32.mrb[11].mxu0 }
 0x72d   : > { %v13968_v7 = vadd.f32 %v13967_v15, %v13966_v29  ;;  %v18053_v46 = vadd.f32 %v13965_v22, %v8540_v23  ;;  %v15114_v29 = vld [vmem:[%s18700_s1 + $0xa60] sm:$0xff]  }
 0x72e   : > { %v8551_v60 = vadd.f32 %v13862_v8, %v17872_v20  ;;  %v15115_v8 = vld [vmem:[%s18700_s1 + $0xa20] sm:$0xff]   ;;  %14279 = vmatprep.subr.bf16.mxu0 %v15114_v29 }
 0x72f   : > { %v18056_v37 = vadd.f32 %v13968_v7, %v8543_v44  ;;  %14280 = vmatpush3.bf16.msra.mxu0 %v15115_v8 }
 0x730   : > { %v13863_v9 = vpop.f32.mrb[16].mxu1 }
 0x731   : > { %v13969_v38 = vpop.f32.mrb[12].mxu0  ;;  %v13864_v55 = vpop.f32.mrb[17].mxu1 }
 0x732   : > { %v13865_v59 = vadd.f32 %v13864_v55, %v13863_v9  ;;  %v13970_v31 = vpop.f32.mrb[13].mxu0  ;;  %v13866_v54 = vpop.f32.mrb[18].mxu1 }
 0x733   : > { %v13971_v63 = vadd.f32 %v13970_v31, %v13969_v38  ;;  %v13972_v53 = vpop.f32.mrb[14].mxu0  ;;  %v13867_v20 = vpop.f32.mrb[19].mxu1 }
 0x734   : > { %v8556_v62 = vadd.f32 %v13865_v59, %v17876_v30  ;;  %v13868_v6 = vadd.f32 %v13867_v20, %v13866_v54  ;;  %v13973_v13 = vpop.f32.mrb[15].mxu0 }
 0x735   : > { %v13974_v23 = vadd.f32 %v13973_v13, %v13972_v53  ;;  %v18068_v49 = vadd.f32 %v13971_v63, %v8548_v39 }
 0x736   : > { %v8559_v58 = vadd.f32 %v13868_v6, %v17884_v43 }
 0x737   : > { %v18071_v1 = vadd.f32 %v13974_v23, %v8551_v60 }
 0x738   : > { %v13869_v44 = vpop.f32.mrb[20].mxu1 }
 0x739   : > { %v13975_v17 = vpop.f32.mrb[16].mxu0  ;;  %v13870_v18 = vpop.f32.mrb[21].mxu1 }
 0x73a   : > { %v13871_v57 = vadd.f32 %v13870_v18, %v13869_v44  ;;  %v13976_v42 = vpop.f32.mrb[17].mxu0  ;;  %v13872_v30 = vpop.f32.mrb[22].mxu1 }
 0x73b   : > { %v13977_v56 = vadd.f32 %v13976_v42, %v13975_v17  ;;  %v13978_v12 = vpop.f32.mrb[18].mxu0  ;;  %v13873_v22 = vpop.f32.mrb[23].mxu1 }
 0x73c   : > { %v8564_v28 = vadd.f32 %v13871_v57, %v17888_v0  ;;  %v13874_v39 = vadd.f32 %v13873_v22, %v13872_v30  ;;  %v13979_v43 = vpop.f32.mrb[19].mxu0 }
 0x73d   : > { %v13980_v15 = vadd.f32 %v13979_v43, %v13978_v12  ;;  %v18080_v7 = vadd.f32 %v13977_v56, %v8556_v62 }
 0x73e   : > { %v8567_v60 = vadd.f32 %v13874_v39, %v17890_v32 }
 0x73f   : > { %v18083_v9 = vadd.f32 %v13980_v15, %v8559_v58 }
 0x740   : > { %v13875_v4 = vpop.f32.mrb[24].mxu1 }
 0x741   : > { %v13981_v19 = vpop.f32.mrb[20].mxu0  ;;  %v13876_v38 = vpop.f32.mrb[25].mxu1 }
 0x742   : > { %v13877_v55 = vadd.f32 %v13876_v38, %v13875_v4  ;;  %v13982_v0 = vpop.f32.mrb[21].mxu0  ;;  %v13878_v59 = vpop.f32.mrb[26].mxu1 }
 0x743   : > { %v13983_v31 = vadd.f32 %v13982_v0, %v13981_v19  ;;  %v13984_v54 = vpop.f32.mrb[22].mxu0  ;;  %v13879_v63 = vpop.f32.mrb[27].mxu1 }
 0x744   : > { %v8572_v53 = vadd.f32 %v13877_v55, %v17894_v45  ;;  %v13880_v20 = vadd.f32 %v13879_v63, %v13878_v59  ;;  %v13985_v62 = vpop.f32.mrb[23].mxu0  ;;  %v15118_v45 = vld [vmem:[%s18700_s1 + $0xa68] sm:$0xff]  }
 0x745   : > { %v13986_v6 = vadd.f32 %v13985_v62, %v13984_v54  ;;  %v18086_v13 = vadd.f32 %v13983_v31, %v8564_v28  ;;  %14281 = vmatprep.subr.bf16.mxu0 %v15118_v45 }
 0x746   : > { %v8575_v32 = vadd.f32 %v13880_v20, %v17903_v14  ;;  %v15119_v14 = vld [vmem:[%s18700_s1 + $0xa28] sm:$0xff]  }
 0x747   : > { %v18089_v51 = vadd.f32 %v13986_v6, %v8567_v60  ;;  %14282 = vmatpush3.bf16.msra.mxu0 %v15119_v14 }
 0x748   : > { %v13881_v23 = vpop.f32.mrb[28].mxu1 }
 0x749   : > { %v13987_v58 = vpop.f32.mrb[24].mxu0  ;;  %v13882_v44 = vpop.f32.mrb[29].mxu1 }
 0x74a   : > { %v13883_v17 = vadd.f32 %v13882_v44, %v13881_v23  ;;  %v13988_v18 = vpop.f32.mrb[25].mxu0  ;;  %v13884_v57 = vpop.f32.mrb[30].mxu1 }
 0x74b   : > { %v13989_v42 = vadd.f32 %v13988_v18, %v13987_v58  ;;  %v13990_v30 = vpop.f32.mrb[26].mxu0  ;;  %v13885_v56 = vpop.f32.mrb[31].mxu1 }
 0x74c   : > { %v8580_v12 = vadd.f32 %v13883_v17, %v17907_v27  ;;  %v13886_v22 = vadd.f32 %v13885_v56, %v13884_v57  ;;  %v13991_v29 = vpop.f32.mrb[27].mxu0 }
 0x74d   : > { %v13992_v28 = vadd.f32 %v13991_v29, %v13990_v30  ;;  %v18098_v39 = vadd.f32 %v13989_v42, %v8572_v53 }
 0x74e   : > { %v8583_v43 = vadd.f32 %v13886_v22, %v17909_v34 }
 0x74f   : > { %v18101_v8 = vadd.f32 %v13992_v28, %v8575_v32 }
 0x750   : > { %v13887_v15 = vpop.f32.mrb[32].mxu1 }
 0x751   : > { %v13993_v60 = vpop.f32.mrb[28].mxu0  ;;  %v13888_v4 = vpop.f32.mrb[33].mxu1 }
 0x752   : > { %v13889_v19 = vadd.f32 %v13888_v4, %v13887_v15  ;;  %v13994_v27 = vpop.f32.mrb[29].mxu0  ;;  %v13890_v38 = vpop.f32.mrb[34].mxu1 }
 0x753   : > { %v13995_v55 = vadd.f32 %v13994_v27, %v13993_v60  ;;  %v13996_v0 = vpop.f32.mrb[30].mxu0  ;;  %v13891_v59 = vpop.f32.mrb[35].mxu1 }
 0x754   : > { %v8588_v31 = vadd.f32 %v13889_v19, %v17913_v36  ;;  %v13892_v54 = vadd.f32 %v13891_v59, %v13890_v38  ;;  %v13997_v63 = vpop.f32.mrb[31].mxu0  ;;  %v15122_v36 = vld [vmem:[%s18700_s1 + $0xa70] sm:$0xff]  }
 0x755   : > { %v13998_v53 = vadd.f32 %v13997_v63, %v13996_v0  ;;  %v18104_v20 = vadd.f32 %v13995_v55, %v8580_v12  ;;  %14283 = vmatprep.subr.bf16.mxu0 %v15122_v36 }
 0x756   : > { %v8591_v34 = vadd.f32 %v13892_v54, %v17921_v11  ;;  %v15123_v11 = vld [vmem:[%s18700_s1 + $0xa30] sm:$0xff]  }
 0x757   : > { %v18107_v62 = vadd.f32 %v13998_v53, %v8583_v43  ;;  %14284 = vmatpush3.bf16.msra.mxu0 %v15123_v11 }
 0x758   : > { %v13893_v6 = vpop.f32.mrb[36].mxu1 }
 0x759   : > { %v13999_v32 = vpop.f32.mrb[32].mxu0  ;;  %v13894_v23 = vpop.f32.mrb[37].mxu1 }
 0x75a   : > { %v13895_v58 = vadd.f32 %v13894_v23, %v13893_v6  ;;  %v14000_v44 = vpop.f32.mrb[33].mxu0  ;;  %v13896_v17 = vpop.f32.mrb[38].mxu1 }
 0x75b   : > { %v14001_v18 = vadd.f32 %v14000_v44, %v13999_v32  ;;  %v14002_v57 = vpop.f32.mrb[34].mxu0  ;;  %v13897_v42 = vpop.f32.mrb[39].mxu1 }
 0x75c   : > { %v8596_v30 = vadd.f32 %v13895_v58, %v17928_v47  ;;  %v13898_v56 = vadd.f32 %v13897_v42, %v13896_v17  ;;  %v14003_v45 = vpop.f32.mrb[35].mxu0 }
 0x75d   : > { %v14004_v12 = vadd.f32 %v14003_v45, %v14002_v57  ;;  %v18116_v22 = vadd.f32 %v14001_v18, %v8588_v31 }
 0x75e   : > { %v8599_v29 = vadd.f32 %v13898_v56, %v17936_v5 }
 0x75f   : > { %v18119_v14 = vadd.f32 %v14004_v12, %v8591_v34 }
 0x760   : > { %v13899_v28 = vpop.f32.mrb[40].mxu1 }
 0x761   : > { %v14005_v43 = vpop.f32.mrb[36].mxu0  ;;  %v13900_v15 = vpop.f32.mrb[41].mxu1 }
 0x762   : > { %v13901_v60 = vadd.f32 %v13900_v15, %v13899_v28  ;;  %v14006_v47 = vpop.f32.mrb[37].mxu0  ;;  %v13902_v4 = vpop.f32.mrb[42].mxu1 }
 0x763   : > { %v14007_v19 = vadd.f32 %v14006_v47, %v14005_v43  ;;  %v14008_v27 = vpop.f32.mrb[38].mxu0  ;;  %v13903_v38 = vpop.f32.mrb[43].mxu1 }
 0x764   : > { %v8604_v55 = vadd.f32 %v13901_v60, %v17946_v35  ;;  %v13904_v0 = vadd.f32 %v13903_v38, %v13902_v4  ;;  %v14009_v59 = vpop.f32.mrb[39].mxu0  ;;  %v15126_v35 = vld [vmem:[%s18700_s1 + $0xa78] sm:$0xff]  }
 0x765   : > { %v14010_v31 = vadd.f32 %v14009_v59, %v14008_v27  ;;  %v18122_v54 = vadd.f32 %v14007_v19, %v8596_v30  ;;  %14285 = vmatprep.subr.bf16.mxu0 %v15126_v35 }
 0x766   : > { %v8607_v5 = vadd.f32 %v13904_v0, %v17960_v2  ;;  %v15127_v2 = vld [vmem:[%s18700_s1 + $0xa38] sm:$0xff]  }
 0x767   : > { %v18125_v63 = vadd.f32 %v14010_v31, %v8599_v29  ;;  %14286 = vmatpush3.bf16.msra.mxu0 %v15127_v2 }
 0x768   : > { %v13905_v53 = vpop.f32.mrb[44].mxu1 }
 0x769   : > { %v14011_v34 = vpop.f32.mrb[40].mxu0  ;;  %v13906_v6 = vpop.f32.mrb[45].mxu1 }
 0x76a   : > { %v13907_v32 = vadd.f32 %v13906_v6, %v13905_v53  ;;  %v14012_v23 = vpop.f32.mrb[41].mxu0  ;;  %v13908_v58 = vpop.f32.mrb[46].mxu1 }
 0x76b   : > { %v14013_v44 = vadd.f32 %v14012_v23, %v14011_v34  ;;  %v14014_v17 = vpop.f32.mrb[42].mxu0  ;;  %v13909_v18 = vpop.f32.mrb[47].mxu1 }
 0x76c   : > { %v8612_v57 = vadd.f32 %v13907_v32, %v17971_v40  ;;  %v13910_v42 = vadd.f32 %v13909_v18, %v13908_v58  ;;  %v14015_v36 = vpop.f32.mrb[43].mxu0  ;;  %v18153_v18 = vld [vmem:[%s18700_s1 + $0xb00] sm:$0xff]  }
 0x76d   : > { %v14016_v30 = vadd.f32 %v14015_v36, %v14014_v17  ;;  %v18134_v56 = vadd.f32 %v14013_v44, %v8604_v55  ;;  %v9133_v36 = vld [vmem:[#allocation2 + $0x11] sm:$0xff]  ;;  %14711 = vmatprep.subr.bf16.mxu0 %v18153_v18 }
 0x76e   : > { %v8615_v45 = vadd.f32 %v13910_v42, %v17977_v33  ;;  %v9132_v42 = vld [vmem:[#allocation2 + $0x9] sm:$0xff] }
 0x76f   : > { %v18137_v11 = vadd.f32 %v14016_v30, %v8607_v5  ;;  %v9164_v30 = vpack.c.bf16 %v9133_v36, %v9132_v42 }
 0x770   : > { %v14681_v12 = vpop.f32.mrb[48].mxu1 }
 0x771   : > { %v14017_v29 = vpop.f32.mrb[44].mxu0  ;;  %v8822_v28 = vadd.f32 %v14681_v12, %v18011_v61  ;;  %v8813_v40 = vpop.f32.mrb[49].mxu1 }
 0x772   : > { %v14018_v43 = vpop.f32.mrb[45].mxu0  ;;  %v8814_v15 = vadd.f32 %v8813_v40, %v17990_v16  ;;  %v14682_v60 = vpop.f32.mrb[50].mxu1 }
 0x773   : > { %v8942_v47 = vmax.f32 %v8822_v28, 0.0  ;;  %v14019_v4 = vadd.f32 %v14018_v43, %v14017_v29  ;;  %v14020_v19 = vpop.f32.mrb[46].mxu0  ;;  %v8825_v27 = vadd.f32 %v14682_v60, %v18014_v50  ;;  %v8816_v38 = vpop.f32.mrb[51].mxu1 }
 0x774   : > { %v8940_v55 = vmax.f32 %v8814_v15, 0.0  ;;  %v14021_v33 = vpop.f32.mrb[47].mxu0  ;;  %v8817_v0 = vadd.f32 %v8816_v38, %v17996_v26 }
 0x775   : > { %8974 = vst [vmem:[#allocation2 + $0x48] sm:$0xff] %v8942_v47  ;;  %v8943_v59 = vmax.f32 %v8825_v27, 0.0  ;;  %v14022_v31 = vadd.f32 %v14021_v33, %v14020_v19  ;;  %v18143_v5 = vadd.f32 %v14019_v4, %v8612_v57 }
 0x776   : > { %8972 = vst [vmem:[#allocation2 + $0x28] sm:$0xff] %v8940_v55  ;;  %v8941_v61 = vmax.f32 %v8817_v0, 0.0 }
 0x777   : > { %8975 = vst [vmem:[#allocation2 + $0x50] sm:$0xff] %v8943_v59  ;;  %v9102_v16 = vpack.c.bf16 %v8943_v59, %v8942_v47  ;;  %v18145_v53 = vadd.f32 %v14022_v31, %v8615_v45  ;;  %v15116_v47 = vld [vmem:[%s18700_s1 + $0xac8] sm:$0xff]  }
 0x778   : > { %8973 = vst [vmem:[#allocation2 + $0x30] sm:$0xff] %v8941_v61  ;;  %v14685_v34 = vpop.f32.mrb[52].mxu1  ;;  %v9101_v6 = vpack.c.bf16 %v8941_v61, %v8940_v55 }
 0x779   : > { %v8838_v50 = vadd.f32 %v14685_v34, %v18029_v48  ;;  %v8829_v32 = vpop.f32.mrb[53].mxu1 }
 0x77a   : > { %v8830_v23 = vadd.f32 %v8829_v32, %v18017_v41  ;;  %v14686_v26 = vpop.f32.mrb[54].mxu1  ;;  %10349 = vmatprep.mubr.bf16.mxu0 %v9101_v6  ;;  %v15121_v32 = vld [vmem:[%s18700_s1 + $0xa90] sm:$0xff]  }
 0x77b   : > { %v8946_v58 = vmax.f32 %v8838_v50, 0.0  ;;  %v8841_v44 = vadd.f32 %v14686_v26, %v18032_v25  ;;  %v8832_v17 = vpop.f32.mrb[55].mxu1 }
 0x77c   : > { %v8944_v35 = vmax.f32 %v8830_v23, 0.0  ;;  %v8833_v57 = vadd.f32 %v8832_v17, %v18020_v3  ;;  %v15113_v3 = vld [vmem:[%s18700_s1 + $0xa80] sm:$0xff]   ;;  %v15124_v17 = vld [vmem:[%s18700_s1 + $0xad8] sm:$0xff]  }
 0x77d   : > { %8978 = vst [vmem:[#allocation2 + $0x88] sm:$0xff] %v8946_v58  ;;  %v8947_v48 = vmax.f32 %v8841_v44, 0.0  ;;  %v9196_v2 = vld [vmem:[#allocation2 + $0x27] sm:$0xff] }
 0x77e   : > { %8976 = vst [vmem:[#allocation2 + $0x68] sm:$0xff] %v8944_v35  ;;  %v8945_v41 = vmax.f32 %v8833_v57, 0.0  ;;  %v9199_v45 = vld [vmem:[#allocation2 + $0x4f] sm:$0xff]  ;;  %v9198_v60 = vld [vmem:[#allocation2 + $0x47] sm:$0xff] }
 0x77f   : > { %8979 = vst [vmem:[#allocation2 + $0x90] sm:$0xff] %v8947_v48  ;;  %v9197_v25 = vld [vmem:[#allocation2 + $0x2f] sm:$0xff]  ;;  %v18157_v12 = vpack.c.bf16 %v8947_v48, %v8946_v58  ;;  %v18167_v27 = vpack.c.bf16 %v9199_v45, %v9198_v60 }
 0x780   : > { %8977 = vst [vmem:[#allocation2 + $0x70] sm:$0xff] %v8945_v41  ;;  %v14689_v29 = vpop.f32.mrb[56].mxu1  ;;  %v9228_v28 = vpack.c.bf16 %v9197_v25, %v9196_v2  ;;  %v9103_v40 = vpack.c.bf16 %v8945_v41, %v8944_v35  ;;  %v9134_v61 = vld [vmem:[#allocation2 + $0x29] sm:$0xff] }
 0x781   : > { %v8854_v43 = vadd.f32 %v14689_v29, %v18047_v52  ;;  %v8845_v15 = vpop.f32.mrb[57].mxu1  ;;  %v9136_v45 = vld [vmem:[#allocation2 + $0x49] sm:$0xff]  ;;  %v9137_v29 = vld [vmem:[#allocation2 + $0x51] sm:$0xff] }
 0x782   : > { %v8846_v4 = vadd.f32 %v8845_v15, %v18035_v10  ;;  %v14690_v19 = vpop.f32.mrb[58].mxu1  ;;  %10502 = vmatprep.mubr.bf16.mxu1 %v9228_v28  ;;  %10350 = vmatmul.mubr.bf16.gmra.mrb[52].mxu0 %v9228_v28  ;;  %v15117_v10 = vld [vmem:[%s18700_s1 + $0xa88] sm:$0xff]  }
 0x783   : > { %v8950_v38 = vmax.f32 %v8854_v43, 0.0  ;;  %v8857_v55 = vadd.f32 %v14690_v19, %v18050_v24  ;;  %v8848_v33 = vpop.f32.mrb[59].mxu1  ;;  %10503 = vmatmul.mubr.bf16.vlgmr.msra.gmra.mrb[80].mxu1 %v9164_v30  ;;  %10357 = vmatprep.mubr.bf16.mxu0 %v9102_v16  ;;  %v15120_v24 = vld [vmem:[%s18700_s1 + $0xad0] sm:$0xff]   ;;  %v15129_v43 = vld [vmem:[%s18700_s1 + $0xaa0] sm:$0xff]   ;;  %v15130_v19 = vld [vmem:[%s18700_s1 + $0xae8] sm:$0xff]  }
 0x784   : > { %v8948_v52 = vmax.f32 %v8846_v4, 0.0  ;;  %v8849_v0 = vadd.f32 %v8848_v33, %v18038_v21  ;;  %10510 = vmatprep.mubr.bf16.mxu1 %v18167_v27  ;;  %14384 = vmatpush3.bf16.msra.mxu1 %v15113_v3  ;;  %v9135_v16 = vld [vmem:[#allocation2 + $0x31] sm:$0xff]  ;;  %v9202_v4 = vld [vmem:[#allocation2 + $0x87] sm:$0xff] }
 0x785   : > { %8982 = vst [vmem:[#allocation2 + $0xc8] sm:$0xff] %v8950_v38  ;;  %v8951_v59 = vmax.f32 %v8857_v55, 0.0  ;;  %14385 = vmatprep.subr.bf16.mxu1 %v15116_v47  ;;  %v18186_v58 = vpack.c.bf16 %v9135_v16, %v9134_v61  ;;  %v9200_v44 = vld [vmem:[#allocation2 + $0x67] sm:$0xff]  ;;  %v18213_v47 = vpack.c.bf16 %v9137_v29, %v9136_v45 }
 0x786   : > { %8980 = vst [vmem:[#allocation2 + $0xa8] sm:$0xff] %v8948_v52  ;;  %v8949_v31 = vmax.f32 %v8849_v0, 0.0 }
 0x787   : > { %8983 = vst [vmem:[#allocation2 + $0xd0] sm:$0xff] %v8951_v59  ;;  %v9201_v21 = vld [vmem:[#allocation2 + $0x6f] sm:$0xff]  ;;  %v18178_v34 = vpack.c.bf16 %v8951_v59, %v8950_v38 }
 0x788   : > { %8981 = vst [vmem:[#allocation2 + $0xb0] sm:$0xff] %v8949_v31  ;;  %v14693_v6 = vpop.f32.mrb[60].mxu1  ;;  %v18180_v50 = vpack.c.bf16 %v8949_v31, %v8948_v52  ;;  %14386 = vmatpush3.bf16.msra.mxu1 %v15117_v10  ;;  %v18193_v42 = vpack.c.bf16 %v9201_v21, %v9200_v44  ;;  %v9139_v61 = vld [vmem:[#allocation2 + $0x71] sm:$0xff] }
 0x789   : > { %v8870_v23 = vadd.f32 %v14693_v6, %v18068_v49  ;;  %v8861_v26 = vpop.f32.mrb[61].mxu1  ;;  %14387 = vmatprep.subr.bf16.mxu1 %v15120_v24 }
 0x78a   : > { %v8862_v35 = vadd.f32 %v8861_v26, %v18053_v46  ;;  %v14694_v57 = vpop.f32.mrb[62].mxu1  ;;  %10358 = vmatmul.mubr.bf16.gmra.mrb[56].mxu0 %v18167_v27  ;;  %v15125_v46 = vld [vmem:[%s18700_s1 + $0xa98] sm:$0xff]  }
 0x78b   : > { %v8954_v36 = vmax.f32 %v8870_v23, 0.0  ;;  %v8873_v48 = vadd.f32 %v14694_v57, %v18071_v1  ;;  %v8864_v49 = vpop.f32.mrb[63].mxu1  ;;  %10511 = vmatmul.mubr.bf16.gmra.mrb[84].mxu1 %v18186_v58  ;;  %10365 = vmatprep.mubr.bf16.mxu0 %v9103_v40  ;;  %v15128_v1 = vld [vmem:[%s18700_s1 + $0xae0] sm:$0xff]  }
 0x78c   : > { %v8952_v41 = vmax.f32 %v8862_v35, 0.0  ;;  %v8865_v2 = vadd.f32 %v8864_v49, %v18056_v37  ;;  %10518 = vmatprep.mubr.bf16.mxu1 %v18193_v42  ;;  %14388 = vmatpush3.bf16.msra.mxu1 %v15121_v32  ;;  %v9203_v37 = vld [vmem:[#allocation2 + $0x8f] sm:$0xff]  ;;  %v15135_v35 = vld [vmem:[%s18700_s1 + $0xaf8] sm:$0xff]  }
 0x78d   : > { %8986 = vst [vmem:[#allocation2 + $0x108] sm:$0xff] %v8954_v36  ;;  %v8955_v25 = vmax.f32 %v8873_v48, 0.0  ;;  %14389 = vmatprep.subr.bf16.mxu1 %v15124_v17  ;;  %v18220_v33 = vpack.c.bf16 %v9203_v37, %v9202_v4  ;;  %v15134_v32 = vld [vmem:[%s18700_s1 + $0xab0] sm:$0xff]   ;;  %v9204_v17 = vld [vmem:[#allocation2 + $0xa7] sm:$0xff] }
 0x78e   : > { %8984 = vst [vmem:[#allocation2 + $0xe8] sm:$0xff] %v8952_v41  ;;  %v8953_v30 = vmax.f32 %v8865_v2, 0.0  ;;  %v9207_v45 = vld [vmem:[#allocation2 + $0xcf] sm:$0xff] }
 0x78f   : > { %8987 = vst [vmem:[#allocation2 + $0x110] sm:$0xff] %v8955_v25  ;;  %v18205_v28 = vpack.c.bf16 %v8955_v25, %v8954_v36 }
 0x790   : > { %8985 = vst [vmem:[#allocation2 + $0xf0] sm:$0xff] %v8953_v30  ;;  %v14697_v40 = vpop.f32.mrb[64].mxu1  ;;  %v18207_v3 = vpack.c.bf16 %v8953_v30, %v8952_v41  ;;  %14390 = vmatpush3.bf16.msra.mxu1 %v15125_v46  ;;  %v9141_v30 = vld [vmem:[#allocation2 + $0x91] sm:$0xff] }
 0x791   : > { %v8886_v15 = vadd.f32 %v14697_v40, %v18086_v13  ;;  %v8877_v60 = vpop.f32.mrb[65].mxu1  ;;  %14391 = vmatprep.subr.bf16.mxu1 %v15128_v1  ;;  %v9140_v1 = vld [vmem:[#allocation2 + $0x89] sm:$0xff] }
 0x792   : > { %v8878_v38 = vadd.f32 %v8877_v60, %v18080_v7  ;;  %v14698_v55 = vpop.f32.mrb[66].mxu1  ;;  %10366 = vmatmul.mubr.bf16.gmra.mrb[60].mxu0 %v18193_v42  ;;  %v15131_v7 = vld [vmem:[%s18700_s1 + $0xaa8] sm:$0xff]  }
 0x793   : > { %v8958_v52 = vmax.f32 %v8886_v15, 0.0  ;;  %v8889_v0 = vadd.f32 %v14698_v55, %v18089_v51  ;;  %v8880_v13 = vpop.f32.mrb[67].mxu1  ;;  %10519 = vmatmul.mubr.bf16.gmra.mrb[88].mxu1 %v18213_v47  ;;  %10373 = vmatprep.mubr.bf16.mxu0 %v18157_v12  ;;  %v15132_v51 = vld [vmem:[%s18700_s1 + $0xaf0] sm:$0xff]   ;;  %v9206_v15 = vld [vmem:[#allocation2 + $0xc7] sm:$0xff] }
 0x794   : > { %v8956_v10 = vmax.f32 %v8878_v38, 0.0  ;;  %v8881_v59 = vadd.f32 %v8880_v13, %v18083_v9  ;;  %10526 = vmatprep.mubr.bf16.mxu1 %v18220_v33  ;;  %14392 = vmatpush3.bf16.msra.mxu1 %v15129_v43  ;;  %v9138_v12 = vld [vmem:[#allocation2 + $0x69] sm:$0xff]  ;;  %v18263_v43 = vpack.c.bf16 %v9141_v30, %v9140_v1 }
 0x795   : > { %8990 = vst [vmem:[#allocation2 + $0x148] sm:$0xff] %v8958_v52  ;;  %v8959_v24 = vmax.f32 %v8889_v0, 0.0  ;;  %14393 = vmatprep.subr.bf16.mxu1 %v15130_v19  ;;  %v9205_v9 = vld [vmem:[#allocation2 + $0xaf] sm:$0xff]  ;;  %v18241_v44 = vpack.c.bf16 %v9139_v61, %v9138_v12  ;;  %v18267_v19 = vpack.c.bf16 %v9207_v45, %v9206_v15  ;;  %v9208_v12 = vld [vmem:[#allocation2 + $0xe7] sm:$0xff] }
 0x796   : > { %8988 = vst [vmem:[#allocation2 + $0x128] sm:$0xff] %v8956_v10  ;;  %v8957_v31 = vmax.f32 %v8881_v59, 0.0  ;;  %v18248_v48 = vpack.c.bf16 %v9205_v9, %v9204_v17  ;;  %v9143_v59 = vld [vmem:[#allocation2 + $0xb1] sm:$0xff]  ;;  %v9148_v1 = vld [vmem:[#allocation2 + $0x109] sm:$0xff] }
 0x797   : > { %8991 = vst [vmem:[#allocation2 + $0x150] sm:$0xff] %v8959_v24  ;;  %v18233_v16 = vpack.c.bf16 %v8959_v24, %v8958_v52 }
 0x798   : > { %8989 = vst [vmem:[#allocation2 + $0x130] sm:$0xff] %v8957_v31  ;;  %v14701_v21 = vpop.f32.mrb[68].mxu1  ;;  %v18235_v6 = vpack.c.bf16 %v8957_v31, %v8956_v10  ;;  %14394 = vmatpush3.bf16.msra.mxu1 %v15131_v7  ;;  %v9142_v10 = vld [vmem:[#allocation2 + $0xa9] sm:$0xff] }
 0x799   : > { %v8902_v23 = vadd.f32 %v14701_v21, %v18104_v20  ;;  %v8893_v26 = vpop.f32.mrb[69].mxu1  ;;  %14395 = vmatprep.subr.bf16.mxu1 %v15132_v51  ;;  %v9209_v7 = vld [vmem:[#allocation2 + $0xef] sm:$0xff] }
 0x79a   : > { %v8894_v57 = vadd.f32 %v8893_v26, %v18098_v39  ;;  %v14702_v36 = vpop.f32.mrb[70].mxu1  ;;  %10374 = vmatmul.mubr.bf16.gmra.mrb[64].mxu0 %v18220_v33  ;;  %v15136_v39 = vld [vmem:[%s18700_s1 + $0xab8] sm:$0xff]   ;;  %v18283_v21 = vpack.c.bf16 %v9209_v7, %v9208_v12 }
 0x79b   : > { %v8962_v49 = vmax.f32 %v8902_v23, 0.0  ;;  %v8905_v41 = vadd.f32 %v14702_v36, %v18107_v62  ;;  %v8896_v20 = vpop.f32.mrb[71].mxu1  ;;  %10527 = vmatmul.mubr.bf16.gmra.mrb[92].mxu1 %v18241_v44  ;;  %10381 = vmatprep.mubr.bf16.mxu0 %v18180_v50  ;;  %v9145_v36 = vld [vmem:[#allocation2 + $0xd1] sm:$0xff] }
 0x79c   : > { %v8960_v2 = vmax.f32 %v8894_v57, 0.0  ;;  %v8897_v46 = vadd.f32 %v8896_v20, %v18101_v8  ;;  %10534 = vmatprep.mubr.bf16.mxu1 %v18248_v48  ;;  %14396 = vmatpush3.bf16.msra.mxu1 %v15134_v32  ;;  %v9144_v57 = vld [vmem:[#allocation2 + $0xc9] sm:$0xff] }
 0x79d   : > { %8994 = vst [vmem:[#allocation2 + $0x188] sm:$0xff] %v8962_v49  ;;  %v8963_v25 = vmax.f32 %v8905_v41, 0.0  ;;  %14397 = vmatprep.subr.bf16.mxu1 %v15135_v35  ;;  %v18292_v41 = vpack.c.bf16 %v9145_v36, %v9144_v57  ;;  %v9210_v20 = vld [vmem:[#allocation2 + $0x107] sm:$0xff] }
 0x79e   : > { %8992 = vst [vmem:[#allocation2 + $0x168] sm:$0xff] %v8960_v2  ;;  %v8961_v62 = vmax.f32 %v8897_v46, 0.0  ;;  %v9215_v30 = vld [vmem:[#allocation2 + $0x14f] sm:$0xff] }
 0x79f   : > { %8995 = vst [vmem:[#allocation2 + $0x190] sm:$0xff] %v8963_v25  ;;  %v18258_v50 = vpack.c.bf16 %v8963_v25, %v8962_v49  ;;  %v9211_v49 = vld [vmem:[#allocation2 + $0x10f] sm:$0xff]  ;;  %v9212_v25 = vld [vmem:[#allocation2 + $0x127] sm:$0xff] }
 0x7a0   : > { %8993 = vst [vmem:[#allocation2 + $0x170] sm:$0xff] %v8961_v62  ;;  %v14705_v8 = vpop.f32.mrb[72].mxu1  ;;  %v18260_v29 = vpack.c.bf16 %v8961_v62, %v8960_v2  ;;  %14398 = vmatpush3.bf16.msra.mxu1 %v15136_v39  ;;  %v9147_v2 = vld [vmem:[#allocation2 + $0xf1] sm:$0xff] }
 0x7a1   : > { %v8918_v37 = vadd.f32 %v14705_v8, %v18122_v54  ;;  %v8909_v40 = vpop.f32.mrb[73].mxu1  ;;  %v9213_v46 = vld [vmem:[#allocation2 + $0x12f] sm:$0xff]  ;;  %v9214_v8 = vld [vmem:[#allocation2 + $0x147] sm:$0xff] }
 0x7a2   : > { %v8910_v60 = vadd.f32 %v8909_v40, %v18116_v22  ;;  %v14706_v4 = vpop.f32.mrb[74].mxu1  ;;  %10382 = vmatmul.mubr.bf16.gmra.mrb[68].mxu0 %v18248_v48  ;;  %v18303_v62 = vpack.c.bf16 %v9213_v46, %v9212_v25  ;;  %v9150_v40 = vld [vmem:[#allocation2 + $0x129] sm:$0xff] }
 0x7a3   : > { %v8966_v38 = vmax.f32 %v8918_v37, 0.0  ;;  %v8921_v55 = vadd.f32 %v14706_v4, %v18125_v63  ;;  %v8912_v52 = vpop.f32.mrb[75].mxu1  ;;  %10535 = vmatmul.mubr.bf16.gmra.mrb[96].mxu1 %v18263_v43  ;;  %10389 = vmatprep.mubr.bf16.mxu0 %v18178_v34  ;;  %v18311_v37 = vpack.c.bf16 %v9215_v30, %v9214_v8  ;;  %v9260_v8 = vld [vmem:[#allocation2 + $0x28] sm:$0xff] }
 0x7a4   : > { %v8964_v54 = vmax.f32 %v8910_v60, 0.0  ;;  %v8913_v0 = vadd.f32 %v8912_v52, %v18119_v14  ;;  %10542 = vmatprep.mubr.bf16.mxu1 %v18267_v19  ;;  %v18279_v14 = vpack.c.bf16 %v9143_v59, %v9142_v10  ;;  %v9153_v52 = vld [vmem:[#allocation2 + $0x151] sm:$0xff]  ;;  %v9218_v7 = vld [vmem:[#allocation2 + $0x187] sm:$0xff] }
 0x7a5   : > { %8998 = vst [vmem:[#allocation2 + $0x1c8] sm:$0xff] %v8966_v38  ;;  %v8967_v22 = vmax.f32 %v8921_v55, 0.0  ;;  %v9216_v4 = vld [vmem:[#allocation2 + $0x167] sm:$0xff] }
 0x7a6   : > { %8996 = vst [vmem:[#allocation2 + $0x1a8] sm:$0xff] %v8964_v54  ;;  %v8965_v13 = vmax.f32 %v8913_v0, 0.0  ;;  %v9219_v0 = vld [vmem:[#allocation2 + $0x18f] sm:$0xff] }
 0x7a7   : > { %8999 = vst [vmem:[#allocation2 + $0x1d0] sm:$0xff] %v8967_v22  ;;  %v18274_v24 = vpack.c.bf16 %v8967_v22, %v8966_v38  ;;  %v9217_v15 = vld [vmem:[#allocation2 + $0x16f] sm:$0xff] }
 0x7a8   : > { %8997 = vst [vmem:[#allocation2 + $0x1b0] sm:$0xff] %v8965_v13  ;;  %v14709_v63 = vpop.f32.mrb[76].mxu1  ;;  %v18276_v51 = vpack.c.bf16 %v8965_v13, %v8964_v54  ;;  %v18319_v38 = vpack.c.bf16 %v9217_v15, %v9216_v4  ;;  %v9452_v4 = vld [vmem:[#allocation2 + $0x48] sm:$0xff] }
 0x7a9   : > { %v8934_v34 = vadd.f32 %v14709_v63, %v18143_v5  ;;  %v8925_v31 = vpop.f32.mrb[77].mxu1 }
 0x7aa   : > { %v8926_v61 = vadd.f32 %v8925_v31, %v18134_v56  ;;  %v14710_v9 = vpop.f32.mrb[78].mxu1  ;;  %10390 = vmatmul.mubr.bf16.gmra.mrb[72].mxu0 %v18267_v19  ;;  %v9155_v31 = vld [vmem:[#allocation2 + $0x171] sm:$0xff] }
 0x7ab   : > { %v8970_v32 = vmax.f32 %v8934_v34, 0.0  ;;  %v8937_v23 = vadd.f32 %v14710_v9, %v18145_v53  ;;  %v8928_v26 = vpop.f32.mrb[79].mxu1  ;;  %10543 = vmatmul.mubr.bf16.gmra.mrb[100].mxu1 %v18279_v14  ;;  %10397 = vmatprep.mubr.bf16.mxu0 %v18207_v3  ;;  %v18295_v3 = vpack.c.bf16 %v9211_v49, %v9210_v20  ;;  %v18331_v34 = vpack.c.bf16 %v9219_v0, %v9218_v7  ;;  %v15139_v0 = vld [vmem:[%s18700_s1 + $0xb18] sm:$0xff]   ;;  %v15141_v7 = vld [vmem:[%s18700_s1 + $0xb28] sm:$0xff]  }
 0x7ac   : > { %v8968_v5 = vmax.f32 %v8926_v61, 0.0  ;;  %v8929_v17 = vadd.f32 %v8928_v26, %v18137_v11  ;;  %10550 = vmatprep.mubr.bf16.mxu1 %v18283_v21  ;;  %v9146_v11 = vld [vmem:[#allocation2 + $0xe9] sm:$0xff] }
 0x7ad   : > { %9002 = vst [vmem:[#allocation2 + $0x208] sm:$0xff] %v8970_v32  ;;  %v8971_v56 = vmax.f32 %v8937_v23, 0.0  ;;  %v18300_v39 = vpack.c.bf16 %v9147_v2, %v9146_v11  ;;  %v9220_v9 = vld [vmem:[#allocation2 + $0x1a7] sm:$0xff] }
 0x7ae   : > { %9000 = vst [vmem:[#allocation2 + $0x1e8] sm:$0xff] %v8968_v5  ;;  %v8969_v35 = vmax.f32 %v8929_v17, 0.0  ;;  %v9156_v23 = vld [vmem:[#allocation2 + $0x189] sm:$0xff] }
 0x7af   : > { %9003 = vst [vmem:[#allocation2 + $0x210] sm:$0xff] %v8971_v56  ;;  %v9221_v12 = vld [vmem:[#allocation2 + $0x1af] sm:$0xff]  ;;  %v9222_v17 = vld [vmem:[#allocation2 + $0x1c7] sm:$0xff] }
 0x7b0   : > { %9001 = vst [vmem:[#allocation2 + $0x1f0] sm:$0xff] %v8969_v35  ;;  %v18290_v53 = vpack.c.bf16 %v8969_v35, %v8968_v5  ;;  %v18339_v32 = vpack.c.bf16 %v9221_v12, %v9220_v9  ;;  %v9223_v26 = vld [vmem:[#allocation2 + $0x1cf] sm:$0xff]  ;;  %v15143_v12 = vld [vmem:[%s18700_s1 + $0xb38] sm:$0xff]  }
 0x7b1   : > { %v18347_v56 = vpack.c.bf16 %v9223_v26, %v9222_v17  ;;  %v9158_v35 = vld [vmem:[#allocation2 + $0x1a9] sm:$0xff] }
 0x7b2   : > { %10398 = vmatmul.mubr.bf16.gmra.mrb[76].mxu0 %v18283_v21  ;;  %v9160_v11 = vld [vmem:[#allocation2 + $0x1c9] sm:$0xff] }
 0x7b3   : > { %10551 = vmatmul.mubr.bf16.gmra.mrb[104].mxu1 %v18292_v41  ;;  %10405 = vmatprep.mubr.bf16.mxu0 %v18205_v28  ;;  %v9149_v28 = vld [vmem:[#allocation2 + $0x111] sm:$0xff]  ;;  %v9462_v26 = vld [vmem:[#allocation2 + $0xe8] sm:$0xff] }
 0x7b4   : > { %10558 = vmatprep.mubr.bf16.mxu1 %v18295_v3  ;;  %v18308_v45 = vpack.c.bf16 %v9149_v28, %v9148_v1  ;;  %v9226_v25 = vld [vmem:[#allocation2 + $0x207] sm:$0xff]  ;;  %v9261_v28 = vld [vmem:[#allocation2 + $0x30] sm:$0xff] }
 0x7b5   : > { %v9224_v49 = vld [vmem:[#allocation2 + $0x1e7] sm:$0xff] }
 0x7b6   : > { %v9227_v2 = vld [vmem:[#allocation2 + $0x20f] sm:$0xff] }
 0x7b7   : > { %v9225_v57 = vld [vmem:[#allocation2 + $0x1ef] sm:$0xff]  ;;  %v18363_v1 = vpack.c.bf16 %v9227_v2, %v9226_v25 }
 0x7b8   : > { %v18355_v20 = vpack.c.bf16 %v9225_v57, %v9224_v49  ;;  %v9163_v30 = vld [vmem:[#allocation2 + $0x1f1] sm:$0xff] }
 0x7ba   : > { %10406 = vmatmul.mubr.bf16.gmra.mrb[80].mxu0 %v18295_v3 }
 0x7bb   : > { %10559 = vmatmul.mubr.bf16.gmra.mrb[108].mxu1 %v18300_v39  ;;  %10413 = vmatprep.mubr.bf16.mxu0 %v18235_v6  ;;  %v9151_v6 = vld [vmem:[#allocation2 + $0x131] sm:$0xff] }
 0x7bc   : > { %10566 = vmatprep.mubr.bf16.mxu1 %v18303_v62  ;;  %v18316_v60 = vpack.c.bf16 %v9151_v6, %v9150_v40  ;;  %v9453_v40 = vld [vmem:[#allocation2 + $0x50] sm:$0xff]  ;;  %v9292_v6 = vpack.c.bf16 %v9261_v28, %v9260_v8 }
 0x7c2   : > { %10414 = vmatmul.mubr.bf16.gmra.mrb[84].mxu0 %v18303_v62 }
 0x7c3   : > { %10567 = vmatmul.mubr.bf16.gmra.mrb[112].mxu1 %v18308_v45  ;;  %10421 = vmatprep.mubr.bf16.mxu0 %v18233_v16  ;;  %v9152_v16 = vld [vmem:[#allocation2 + $0x149] sm:$0xff] }
 0x7c4   : > { %10574 = vmatprep.mubr.bf16.mxu1 %v18311_v37  ;;  %v18326_v59 = vpack.c.bf16 %v9153_v52, %v9152_v16  ;;  %v9484_v16 = vpack.c.bf16 %v9453_v40, %v9452_v4  ;;  %v9455_v52 = vld [vmem:[#allocation2 + $0x70] sm:$0xff]  ;;  %v9476_v4 = vld [vmem:[#allocation2 + $0x1c8] sm:$0xff] }
 0x7ca   : > { %10422 = vmatmul.mubr.bf16.gmra.mrb[88].mxu0 %v18311_v37  ;;  %v14063_v55 = vpop.f32.mrb[48].mxu0 }
 0x7cb   : > { %10575 = vmatmul.mubr.bf16.gmra.mrb[116].mxu1 %v18316_v60  ;;  %10429 = vmatprep.mubr.bf16.mxu0 %v18260_v29  ;;  %v14064_v54 = vpop.f32.mrb[49].mxu0  ;;  %v9154_v29 = vld [vmem:[#allocation2 + $0x169] sm:$0xff] }
 0x7cc   : > { %10582 = vmatprep.mubr.bf16.mxu1 %v18319_v38  ;;  %v18324_v22 = vadd.f32 %v14064_v54, %v14063_v55  ;;  %v14066_v13 = vpop.f32.mrb[50].mxu0  ;;  %v18336_v61 = vpack.c.bf16 %v9155_v31, %v9154_v29  ;;  %v15137_v55 = vld [vmem:[%s18700_s1 + $0xb08] sm:$0xff]  }
 0x7cd   : > { %v14067_v10 = vpop.f32.mrb[51].mxu0  ;;  %v9454_v54 = vld [vmem:[#allocation2 + $0x68] sm:$0xff] }
 0x7ce   : > { %v18328_v63 = vadd.f32 %v14067_v10, %v14066_v13  ;;  %v9485_v13 = vpack.c.bf16 %v9455_v52, %v9454_v54  ;;  %v9456_v10 = vld [vmem:[#allocation2 + $0x88] sm:$0xff] }
 0x7cf   : > { %v9458_v31 = vld [vmem:[#allocation2 + $0xa8] sm:$0xff] }
 0x7d2   : > { %10430 = vmatmul.mubr.bf16.gmra.mrb[92].mxu0 %v18319_v38 }
 0x7d3   : > { %10583 = vmatmul.mubr.bf16.gmra.mrb[120].mxu1 %v18326_v59  ;;  %10437 = vmatprep.mubr.bf16.mxu0 %v18258_v50  ;;  %v9157_v50 = vld [vmem:[#allocation2 + $0x191] sm:$0xff] }
 0x7d4   : > { %10590 = vmatprep.mubr.bf16.mxu1 %v18331_v34  ;;  %v18344_v5 = vpack.c.bf16 %v9157_v50, %v9156_v23  ;;  %v9463_v50 = vld [vmem:[#allocation2 + $0xf0] sm:$0xff] }
 0x7d5   : > { %v9489_v17 = vpack.c.bf16 %v9463_v50, %v9462_v26 }
 0x7da   : > { %10438 = vmatmul.mubr.bf16.gmra.mrb[96].mxu0 %v18331_v34 }
 0x7db   : > { %10591 = vmatmul.mubr.bf16.gmra.mrb[124].mxu1 %v18336_v61  ;;  %10445 = vmatprep.mubr.bf16.mxu0 %v18276_v51  ;;  %v9159_v51 = vld [vmem:[#allocation2 + $0x1b1] sm:$0xff] }
 0x7dc   : > { %10598 = vmatprep.mubr.bf16.mxu1 %v18339_v32  ;;  %v18352_v36 = vpack.c.bf16 %v9159_v51, %v9158_v35 }
 0x7e2   : > { %10446 = vmatmul.mubr.bf16.gmra.mrb[100].mxu0 %v18339_v32 }
 0x7e3   : > { %10599 = vmatmul.mubr.bf16.gmra.mrb[128].mxu1 %v18344_v5  ;;  %10453 = vmatprep.mubr.bf16.mxu0 %v18274_v24  ;;  %v9161_v24 = vld [vmem:[#allocation2 + $0x1d1] sm:$0xff] }
 0x7e4   : > { %10606 = vmatprep.mubr.bf16.mxu1 %v18347_v56  ;;  %v18360_v46 = vpack.c.bf16 %v9161_v24, %v9160_v11 }
 0x7ea   : > { %10454 = vmatmul.mubr.bf16.gmra.mrb[104].mxu0 %v18347_v56 }
 0x7eb   : > { %10607 = vmatmul.mubr.bf16.gmra.mrb[132].mxu1 %v18352_v36  ;;  %10461 = vmatprep.mubr.bf16.mxu0 %v18290_v53  ;;  %v9162_v53 = vld [vmem:[#allocation2 + $0x1e9] sm:$0xff] }
 0x7ec   : > { %10614 = vmatprep.mubr.bf16.mxu1 %v18355_v20  ;;  %v18368_v15 = vpack.c.bf16 %v9163_v30, %v9162_v53  ;;  %v9477_v53 = vld [vmem:[#allocation2 + $0x1d0] sm:$0xff] }
 0x7ed   : > { %v9496_v52 = vpack.c.bf16 %v9477_v53, %v9476_v4 }
 0x7f2   : > { %10462 = vmatmul.mubr.bf16.gmra.mrb[108].mxu0 %v18355_v20 }
 0x7f3   : > { %10615 = vmatmul.mubr.bf16.gmra.mrb[136].mxu1 %v18360_v46  ;;  %10663 = vmatprep.mubr.bf16.mxu0 %v18186_v58  ;;  %v15138_v58 = vld [vmem:[%s18700_s1 + $0xb10] sm:$0xff]  }
 0x7f4   : > { %10622 = vmatprep.mubr.bf16.mxu1 %v18363_v1 }
 0x7fa   : > { %10664 = vmatmul.mubr.bf16.vlgmr.msra.gmra.mrb[112].mxu0 %v9292_v6 }
 0x7fb   : > { %10623 = vmatmul.mubr.bf16.gmra.mrb[140].mxu1 %v18368_v15  ;;  %10671 = vmatprep.mubr.bf16.mxu0 %v18213_v47  ;;  %v9457_v47 = vld [vmem:[#allocation2 + $0x90] sm:$0xff] }
 0x7fc   : > { %10824 = vmatprep.mubr.bf16.mxu1 %v9484_v16  ;;  %14712 = vmatpush3.bf16.msra.mxu0 %v18153_v18  ;;  %v15140_v18 = vld [vmem:[%s18700_s1 + $0xb20] sm:$0xff]   ;;  %v9486_v29 = vpack.c.bf16 %v9457_v47, %v9456_v10 }
 0x7fd   : > { %14713 = vmatprep.subr.bf16.mxu0 %v15137_v55 }
 0x800   : > { %14714 = vmatpush3.bf16.msra.mxu0 %v15137_v55 }
 0x801   : > { %14715 = vmatprep.subr.bf16.mxu0 %v15138_v58 }
 0x802   : > { %10672 = vmatmul.mubr.bf16.gmra.mrb[116].mxu0 %v9484_v16 }
 0x803   : > { %10825 = vmatmul.mubr.bf16.vlgmr.msra.gmra.mrb[144].mxu1 %v18167_v27  ;;  %10679 = vmatprep.mubr.bf16.mxu0 %v18241_v44  ;;  %v15142_v27 = vld [vmem:[%s18700_s1 + $0xb30] sm:$0xff]  }
 0x804   : > { %10832 = vmatprep.mubr.bf16.mxu1 %v9485_v13  ;;  %14716 = vmatpush3.bf16.msra.mxu0 %v15138_v58  ;;  %v9459_v44 = vld [vmem:[#allocation2 + $0xb0] sm:$0xff] }
 0x805   : > { %14717 = vmatprep.subr.bf16.mxu0 %v15139_v0  ;;  %v9487_v9 = vpack.c.bf16 %v9459_v44, %v9458_v31 }
 0x808   : > { %14718 = vmatpush3.bf16.msra.mxu0 %v15139_v0 }
 0x809   : > { %14719 = vmatprep.subr.bf16.mxu0 %v15140_v18 }
 0x80a   : > { %10680 = vmatmul.mubr.bf16.gmra.mrb[120].mxu0 %v9485_v13 }
 0x80b   : > { %10833 = vmatmul.mubr.bf16.gmra.mrb[148].mxu1 %v18193_v42  ;;  %10687 = vmatprep.mubr.bf16.mxu0 %v18263_v43  ;;  %v9461_v42 = vld [vmem:[#allocation2 + $0xd0] sm:$0xff]  ;;  %v9460_v43 = vld [vmem:[#allocation2 + $0xc8] sm:$0xff] }
 0x80c   : > { %10840 = vmatprep.mubr.bf16.mxu1 %v9486_v29  ;;  %14720 = vmatpush3.bf16.msra.mxu0 %v15140_v18  ;;  %v9488_v23 = vpack.c.bf16 %v9461_v42, %v9460_v43 }
 0x80d   : > { %14721 = vmatprep.subr.bf16.mxu0 %v15141_v7 }
 0x810   : > { %14722 = vmatpush3.bf16.msra.mxu0 %v15141_v7  ;;  %v9479_v7 = vld [vmem:[#allocation2 + $0x1f0] sm:$0xff] }
 0x811   : > { %14723 = vmatprep.subr.bf16.mxu0 %v15142_v27 }
 0x812   : > { %10688 = vmatmul.mubr.bf16.gmra.mrb[124].mxu0 %v9486_v29 }
 0x813   : > { %10841 = vmatmul.mubr.bf16.gmra.mrb[152].mxu1 %v18220_v33  ;;  %10695 = vmatprep.mubr.bf16.mxu0 %v18279_v14  ;;  %v9465_v33 = vld [vmem:[#allocation2 + $0x110] sm:$0xff]  ;;  %v9464_v14 = vld [vmem:[#allocation2 + $0x108] sm:$0xff] }
 0x814   : > { %10848 = vmatprep.mubr.bf16.mxu1 %v9487_v9  ;;  %14724 = vmatpush3.bf16.msra.mxu0 %v15142_v27  ;;  %v9490_v35 = vpack.c.bf16 %v9465_v33, %v9464_v14  ;;  %v9354_v33 = vld [vmem:[#allocation2 + $0x209] sm:$0xff]  ;;  %v9355_v14 = vld [vmem:[#allocation2 + $0x211] sm:$0xff] }
 0x815   : > { %14725 = vmatprep.subr.bf16.mxu0 %v15143_v12 }
 0x818   : > { %14726 = vmatpush3.bf16.msra.mxu0 %v15143_v12 }
 0x81a   : > { %10696 = vmatmul.mubr.bf16.gmra.mrb[128].mxu0 %v9487_v9 }
 0x81b   : > { %10849 = vmatmul.mubr.bf16.gmra.mrb[156].mxu1 %v18248_v48  ;;  %10703 = vmatprep.mubr.bf16.mxu0 %v18292_v41  ;;  %v9467_v48 = vld [vmem:[#allocation2 + $0x130] sm:$0xff]  ;;  %v9466_v41 = vld [vmem:[#allocation2 + $0x128] sm:$0xff] }
 0x81c   : > { %10856 = vmatprep.mubr.bf16.mxu1 %v9488_v23  ;;  %v9491_v51 = vpack.c.bf16 %v9467_v48, %v9466_v41 }
 0x822   : > { %10704 = vmatmul.mubr.bf16.gmra.mrb[132].mxu0 %v9488_v23 }
 0x823   : > { %10857 = vmatmul.mubr.bf16.gmra.mrb[160].mxu1 %v18267_v19  ;;  %10711 = vmatprep.mubr.bf16.mxu0 %v18300_v39  ;;  %v9469_v19 = vld [vmem:[#allocation2 + $0x150] sm:$0xff]  ;;  %v9468_v39 = vld [vmem:[#allocation2 + $0x148] sm:$0xff] }
 0x824   : > { %10864 = vmatprep.mubr.bf16.mxu1 %v9489_v17  ;;  %v9492_v57 = vpack.c.bf16 %v9469_v19, %v9468_v39 }
 0x82a   : > { %10712 = vmatmul.mubr.bf16.gmra.mrb[136].mxu0 %v9489_v17 }
 0x82b   : > { %10865 = vmatmul.mubr.bf16.gmra.mrb[164].mxu1 %v18283_v21  ;;  %10719 = vmatprep.mubr.bf16.mxu0 %v18308_v45  ;;  %v9471_v21 = vld [vmem:[#allocation2 + $0x170] sm:$0xff]  ;;  %v9470_v45 = vld [vmem:[#allocation2 + $0x168] sm:$0xff] }
 0x82c   : > { %10872 = vmatprep.mubr.bf16.mxu1 %v9490_v35  ;;  %v9493_v49 = vpack.c.bf16 %v9471_v21, %v9470_v45 }
 0x832   : > { %10720 = vmatmul.mubr.bf16.gmra.mrb[140].mxu0 %v9490_v35 }
 0x833   : > { %10873 = vmatmul.mubr.bf16.gmra.mrb[168].mxu1 %v18295_v3  ;;  %10727 = vmatprep.mubr.bf16.mxu0 %v18316_v60  ;;  %v9473_v3 = vld [vmem:[#allocation2 + $0x190] sm:$0xff]  ;;  %v9472_v60 = vld [vmem:[#allocation2 + $0x188] sm:$0xff] }
 0x834   : > { %10880 = vmatprep.mubr.bf16.mxu1 %v9491_v51  ;;  %v9494_v11 = vpack.c.bf16 %v9473_v3, %v9472_v60 }
 0x83a   : > { %10728 = vmatmul.mubr.bf16.gmra.mrb[144].mxu0 %v9491_v51  ;;  %v9481_v51 = vld [vmem:[#allocation2 + $0x210] sm:$0xff] }
 0x83b   : > { %10881 = vmatmul.mubr.bf16.gmra.mrb[172].mxu1 %v18303_v62  ;;  %10735 = vmatprep.mubr.bf16.mxu0 %v18326_v59  ;;  %v9475_v62 = vld [vmem:[#allocation2 + $0x1b0] sm:$0xff]  ;;  %v9474_v59 = vld [vmem:[#allocation2 + $0x1a8] sm:$0xff] }
 0x83c   : > { %10888 = vmatprep.mubr.bf16.mxu1 %v9492_v57  ;;  %v9495_v24 = vpack.c.bf16 %v9475_v62, %v9474_v59 }
 0x842   : > { %10736 = vmatmul.mubr.bf16.gmra.mrb[148].mxu0 %v9492_v57 }
 0x843   : > { %10889 = vmatmul.mubr.bf16.gmra.mrb[176].mxu1 %v18311_v37  ;;  %10743 = vmatprep.mubr.bf16.mxu0 %v18336_v61  ;;  %v18419_v37 = vld [vmem:[%s18701_s2 + $0x4] ss:$0 sm:$0xff] }
 0x844   : > { %10896 = vmatprep.mubr.bf16.mxu1 %v9493_v49  ;;  %v10344_v30 = vadd.f32 %v18324_v22, %v18419_v37  ;;  %v10347_v55 = vadd.f32 %v18328_v63, %v18419_v37 }
 0x84a   : > { %10744 = vmatmul.mubr.bf16.gmra.mrb[152].mxu0 %v9493_v49  ;;  %v9480_v49 = vld [vmem:[#allocation2 + $0x208] sm:$0xff] }
 0x84b   : > { %10897 = vmatmul.mubr.bf16.gmra.mrb[180].mxu1 %v18319_v38  ;;  %10751 = vmatprep.mubr.bf16.mxu0 %v18344_v5  ;;  %v9498_v62 = vpack.c.bf16 %v9481_v51, %v9480_v49  ;;  %v9525_v49 = vld [vmem:[#allocation2 + $0xd1] sm:$0xff] }
 0x84c   : > { %10904 = vmatprep.mubr.bf16.mxu1 %v9494_v11 }
 0x852   : > { %10752 = vmatmul.mubr.bf16.gmra.mrb[156].mxu0 %v9494_v11 }
 0x853   : > { %10905 = vmatmul.mubr.bf16.gmra.mrb[184].mxu1 %v18331_v34  ;;  %10759 = vmatprep.mubr.bf16.mxu0 %v18352_v36 }
 0x854   : > { %10912 = vmatprep.mubr.bf16.mxu1 %v9495_v24 }
 0x855   : > { %v14069_v61 = vpop.f32.mrb[52].mxu0 }
 0x856   : > { %v14175_v2 = vpop.f32.mrb[80].mxu1  ;;  %v14070_v38 = vpop.f32.mrb[53].mxu0 }
 0x857   : > { %v14071_v25 = vadd.f32 %v14070_v38, %v14069_v61  ;;  %v14176_v5 = vpop.f32.mrb[81].mxu1  ;;  %v14072_v28 = vpop.f32.mrb[54].mxu0  ;;  %v9516_v38 = vld [vmem:[#allocation2 + $0x49] sm:$0xff] }
 0x858   : > { %v14177_v8 = vadd.f32 %v14176_v5, %v14175_v2  ;;  %v14178_v34 = vpop.f32.mrb[82].mxu1  ;;  %v14073_v40 = vpop.f32.mrb[55].mxu0 }
 0x859   : > { %v14074_v36 = vadd.f32 %v14073_v40, %v14072_v28  ;;  %v14179_v6 = vpop.f32.mrb[83].mxu1  ;;  %v10352_v63 = vadd.f32 %v14071_v25, %v18419_v37  ;;  %v9517_v25 = vld [vmem:[#allocation2 + $0x51] sm:$0xff] }
 0x85a   : > { %v18425_v16 = vadd.f32 %v14177_v8, %v10344_v30  ;;  %v14180_v58 = vadd.f32 %v14179_v6, %v14178_v34  ;;  %10760 = vmatmul.mubr.bf16.gmra.mrb[160].mxu0 %v9495_v24 }
 0x85b   : > { %10913 = vmatmul.mubr.bf16.gmra.mrb[188].mxu1 %v18339_v32  ;;  %10767 = vmatprep.mubr.bf16.mxu0 %v18360_v46  ;;  %v9478_v32 = vld [vmem:[#allocation2 + $0x1e8] sm:$0xff]  ;;  %v10355_v46 = vadd.f32 %v14074_v36, %v18419_v37 }
 0x85c   : > { %v18429_v54 = vadd.f32 %v14180_v58, %v10347_v55  ;;  %10920 = vmatprep.mubr.bf16.mxu1 %v9496_v52  ;;  %v9497_v43 = vpack.c.bf16 %v9479_v7, %v9478_v32  ;;  %v15148_v36 = vld [vmem:[#allocation2 + $0x8] sm:$0xff]  ;;  %v9548_v55 = vpack.c.bf16 %v9517_v25, %v9516_v38  ;;  %v9519_v7 = vld [vmem:[#allocation2 + $0x71] sm:$0xff] }
 0x85d   : > { %v14075_v22 = vpop.f32.mrb[56].mxu0 }
 0x85e   : > { %v14181_v0 = vpop.f32.mrb[84].mxu1  ;;  %v14076_v13 = vpop.f32.mrb[57].mxu0 }
 0x85f   : > { %v14077_v18 = vadd.f32 %v14076_v13, %v14075_v22  ;;  %v14182_v47 = vpop.f32.mrb[85].mxu1  ;;  %v14078_v10 = vpop.f32.mrb[58].mxu0  ;;  %v9418_v13 = vld [vmem:[#allocation2 + $0x227] sm:$0xff] }
 0x860   : > { %v14183_v29 = vadd.f32 %v14182_v47, %v14181_v0  ;;  %v14184_v27 = vpop.f32.mrb[86].mxu1  ;;  %v14079_v44 = vpop.f32.mrb[59].mxu0 }
 0x861   : > { %v14080_v31 = vadd.f32 %v14079_v44, %v14078_v10  ;;  %v14185_v12 = vpop.f32.mrb[87].mxu1  ;;  %v10360_v19 = vadd.f32 %v14077_v18, %v18419_v37  ;;  %v9419_v18 = vld [vmem:[#allocation2 + $0x22f] sm:$0xff] }
 0x862   : > { %v18433_v9 = vadd.f32 %v14183_v29, %v10352_v63  ;;  %v14186_v42 = vadd.f32 %v14185_v12, %v14184_v27  ;;  %10768 = vmatmul.mubr.bf16.gmra.mrb[164].mxu0 %v9496_v52  ;;  %v9518_v10 = vld [vmem:[#allocation2 + $0x69] sm:$0xff]  ;;  %v9521_v44 = vld [vmem:[#allocation2 + $0x91] sm:$0xff] }
 0x863   : > { %10921 = vmatmul.mubr.bf16.gmra.mrb[192].mxu1 %v18347_v56  ;;  %10775 = vmatprep.mubr.bf16.mxu0 %v18368_v15  ;;  %v18440_v15 = vpack.c.bf16 %v9355_v14, %v9354_v33  ;;  %v10363_v3 = vadd.f32 %v14080_v31, %v18419_v37  ;;  %v9520_v27 = vld [vmem:[#allocation2 + $0x89] sm:$0xff] }
 0x864   : > { %v18437_v23 = vadd.f32 %v14186_v42, %v10355_v46  ;;  %10928 = vmatprep.mubr.bf16.mxu1 %v9497_v43  ;;  %v9435_v46 = vpack.c.bf16 %v9419_v18, %v9418_v13  ;;  %v9550_v14 = vpack.c.bf16 %v9521_v44, %v9520_v27 }
 0x865   : > { %v14081_v50 = vpop.f32.mrb[60].mxu0 }
 0x866   : > { %v14187_v26 = vpop.f32.mrb[88].mxu1  ;;  %v14082_v17 = vpop.f32.mrb[61].mxu0 }
 0x867   : > { %v14083_v35 = vadd.f32 %v14082_v17, %v14081_v50  ;;  %v14188_v48 = vpop.f32.mrb[89].mxu1  ;;  %v14084_v41 = vpop.f32.mrb[62].mxu0 }
 0x868   : > { %v14189_v39 = vadd.f32 %v14188_v48, %v14187_v26  ;;  %v14190_v57 = vpop.f32.mrb[90].mxu1  ;;  %v14085_v21 = vpop.f32.mrb[63].mxu0  ;;  %v9549_v26 = vpack.c.bf16 %v9519_v7, %v9518_v10 }
 0x869   : > { %v14086_v56 = vadd.f32 %v14085_v21, %v14084_v41  ;;  %v14191_v45 = vpop.f32.mrb[91].mxu1  ;;  %v10368_v30 = vadd.f32 %v14083_v35, %v18419_v37 }
 0x86a   : > { %v18443_v60 = vadd.f32 %v14189_v39, %v10360_v19  ;;  %v14192_v11 = vadd.f32 %v14191_v45, %v14190_v57  ;;  %10776 = vmatmul.mubr.bf16.gmra.mrb[168].mxu0 %v9497_v43  ;;  %v9522_v39 = vld [vmem:[#allocation2 + $0xa9] sm:$0xff]  ;;  %v9523_v57 = vld [vmem:[#allocation2 + $0xb1] sm:$0xff] }
 0x86b   : > { %10929 = vmatmul.mubr.bf16.gmra.mrb[196].mxu1 %v18355_v20  ;;  %10783 = vmatprep.mubr.bf16.mxu0 %v18440_v15  ;;  %v9499_v20 = vpack.c.bf16 %v15148_v36, %v15148_v36  ;;  %v10371_v58 = vadd.f32 %v14086_v56, %v18419_v37  ;;  %v9524_v45 = vld [vmem:[#allocation2 + $0xc9] sm:$0xff]  ;;  %v9551_v25 = vpack.c.bf16 %v9523_v57, %v9522_v39 }
 0x86c   : > { %v18447_v59 = vadd.f32 %v14192_v11, %v10363_v3  ;;  %10936 = vmatprep.mubr.bf16.mxu1 %v9498_v62 }
 0x86d   : > { %v14087_v24 = vpop.f32.mrb[64].mxu0 }
 0x86e   : > { %v14193_v61 = vpop.f32.mrb[92].mxu1  ;;  %v14088_v2 = vpop.f32.mrb[65].mxu0 }
 0x86f   : > { %v14089_v5 = vadd.f32 %v14088_v2, %v14087_v24  ;;  %v14194_v28 = vpop.f32.mrb[93].mxu1  ;;  %v14090_v53 = vpop.f32.mrb[66].mxu0 }
 0x870   : > { %v14195_v8 = vadd.f32 %v14194_v28, %v14193_v61  ;;  %v14196_v34 = vpop.f32.mrb[94].mxu1  ;;  %v14091_v40 = vpop.f32.mrb[67].mxu0 }
 0x871   : > { %v14092_v6 = vadd.f32 %v14091_v40, %v14090_v53  ;;  %v14197_v4 = vpop.f32.mrb[95].mxu1  ;;  %v10376_v42 = vadd.f32 %v14089_v5, %v18419_v37  ;;  %v9552_v53 = vpack.c.bf16 %v9525_v49, %v9524_v45 }
 0x872   : > { %v18451_v52 = vadd.f32 %v14195_v8, %v10368_v30  ;;  %v14198_v22 = vadd.f32 %v14197_v4, %v14196_v34  ;;  %10784 = vmatmul.mubr.bf16.gmra.mrb[172].mxu0 %v9498_v62 }
 0x873   : > { %10937 = vmatmul.mubr.bf16.gmra.mrb[200].mxu1 %v18363_v1  ;;  %14727 = vmatprep.mubr.bf16.mxu0 %v9548_v55  ;;  %v10379_v35 = vadd.f32 %v14092_v6, %v18419_v37  ;;  %v9527_v6 = vld [vmem:[#allocation2 + $0xf1] sm:$0xff] }
 0x874   : > { %v18454_v0 = vadd.f32 %v14198_v22, %v10371_v58  ;;  %10944 = vmatprep.mubr.bf16.mxu1 %v9499_v20  ;;  %v9526_v20 = vld [vmem:[#allocation2 + $0xe9] sm:$0xff]  ;;  %v9529_v22 = vld [vmem:[#allocation2 + $0x111] sm:$0xff] }
 0x875   : > { %v14093_v47 = vpop.f32.mrb[68].mxu0  ;;  %v9528_v58 = vld [vmem:[#allocation2 + $0x109] sm:$0xff]  ;;  %v9553_v27 = vpack.c.bf16 %v9527_v6, %v9526_v20 }
 0x876   : > { %v14199_v63 = vpop.f32.mrb[96].mxu1  ;;  %v14094_v29 = vpop.f32.mrb[69].mxu0 }
 0x877   : > { %v14095_v31 = vadd.f32 %v14094_v29, %v14093_v47  ;;  %v14200_v12 = vpop.f32.mrb[97].mxu1  ;;  %v14096_v32 = vpop.f32.mrb[70].mxu0 }
 0x878   : > { %v14201_v1 = vadd.f32 %v14200_v12, %v14199_v63  ;;  %v14202_v43 = vpop.f32.mrb[98].mxu1  ;;  %v14097_v50 = vpop.f32.mrb[71].mxu0  ;;  %v9554_v12 = vpack.c.bf16 %v9529_v22, %v9528_v58 }
 0x879   : > { %v14098_v17 = vadd.f32 %v14097_v50, %v14096_v32  ;;  %v14203_v33 = vpop.f32.mrb[99].mxu1  ;;  %v10384_v24 = vadd.f32 %v14095_v31, %v18419_v37  ;;  %v9530_v50 = vld [vmem:[#allocation2 + $0x129] sm:$0xff] }
 0x87a   : > { %v18458_v48 = vadd.f32 %v14201_v1, %v10376_v42  ;;  %v14204_v41 = vadd.f32 %v14203_v33, %v14202_v43  ;;  %14728 = vmatmul.mubr.bf16.vlgmr.msra.gmra.mrb[176].mxu0 %v9549_v26  ;;  %v9531_v26 = vld [vmem:[#allocation2 + $0x131] sm:$0xff] }
 0x87b   : > { %10945 = vmatmul.mubr.bf16.gmra.mrb[204].mxu1 %v9435_v46  ;;  %14731 = vmatprep.mubr.bf16.mxu0 %v9550_v14  ;;  %v10387_v30 = vadd.f32 %v14098_v17, %v18419_v37  ;;  %v9532_v14 = vld [vmem:[#allocation2 + $0x149] sm:$0xff]  ;;  %v9555_v49 = vpack.c.bf16 %v9531_v26, %v9530_v50  ;;  %v9541_v26 = vld [vmem:[#allocation2 + $0x1d1] sm:$0xff] }
 0x87c   : > { %v18460_v51 = vadd.f32 %v14204_v41, %v10379_v35  ;;  %v9533_v35 = vld [vmem:[#allocation2 + $0x151] sm:$0xff]  ;;  %v9540_v50 = vld [vmem:[#allocation2 + $0x1c9] sm:$0xff] }
 0x87d   : > { %v14099_v19 = vpop.f32.mrb[72].mxu0 }
 0x87e   : > { %v14205_v21 = vpop.f32.mrb[100].mxu1  ;;  %v14100_v56 = vpop.f32.mrb[73].mxu0 }
 0x87f   : > { %v14101_v3 = vadd.f32 %v14100_v56, %v14099_v19  ;;  %v14206_v11 = vpop.f32.mrb[101].mxu1  ;;  %v14102_v62 = vpop.f32.mrb[74].mxu0 }
 0x880   : > { %v14207_v61 = vadd.f32 %v14206_v11, %v14205_v21  ;;  %v14208_v2 = vpop.f32.mrb[102].mxu1  ;;  %v14103_v38 = vpop.f32.mrb[75].mxu0 }
 0x881   : > { %v14104_v5 = vadd.f32 %v14103_v38, %v14102_v62  ;;  %v14209_v28 = vpop.f32.mrb[103].mxu1  ;;  %v10392_v10 = vadd.f32 %v14101_v3, %v18419_v37  ;;  %v9556_v62 = vpack.c.bf16 %v9533_v35, %v9532_v14 }
 0x882   : > { %v18464_v8 = vadd.f32 %v14207_v61, %v10384_v24  ;;  %v14210_v34 = vadd.f32 %v14209_v28, %v14208_v2  ;;  %14732 = vmatmul.mubr.bf16.gmra.mrb[180].mxu0 %v9551_v25  ;;  %v9535_v28 = vld [vmem:[#allocation2 + $0x171] sm:$0xff] }
 0x883   : > { %14735 = vmatprep.mubr.bf16.mxu0 %v9552_v53  ;;  %v10395_v32 = vadd.f32 %v14104_v5, %v18419_v37  ;;  %v9534_v5 = vld [vmem:[#allocation2 + $0x169] sm:$0xff] }
 0x884   : > { %v18466_v40 = vadd.f32 %v14210_v34, %v10387_v30  ;;  %v9536_v34 = vld [vmem:[#allocation2 + $0x189] sm:$0xff] }
 0x885   : > { %v14105_v36 = vpop.f32.mrb[76].mxu0 }
 0x886   : > { %v14211_v4 = vpop.f32.mrb[104].mxu1  ;;  %v14106_v55 = vpop.f32.mrb[77].mxu0 }
 0x887   : > { %v14107_v13 = vadd.f32 %v14106_v55, %v14105_v36  ;;  %v14212_v18 = vpop.f32.mrb[105].mxu1  ;;  %v14108_v47 = vpop.f32.mrb[78].mxu0  ;;  %v9537_v36 = vld [vmem:[#allocation2 + $0x191] sm:$0xff] }
 0x888   : > { %v14213_v7 = vadd.f32 %v14212_v18, %v14211_v4  ;;  %v14214_v63 = vpop.f32.mrb[106].mxu1  ;;  %v14109_v29 = vpop.f32.mrb[79].mxu0  ;;  %v9557_v18 = vpack.c.bf16 %v9535_v28, %v9534_v5 }
 0x889   : > { %v14110_v44 = vadd.f32 %v14109_v29, %v14108_v47  ;;  %v14215_v31 = vpop.f32.mrb[107].mxu1  ;;  %v10400_v57 = vadd.f32 %v14107_v13, %v18419_v37 }
 0x88a   : > { %v18470_v46 = vadd.f32 %v14213_v7, %v10392_v10  ;;  %v14216_v42 = vadd.f32 %v14215_v31, %v14214_v63  ;;  %14736 = vmatmul.mubr.bf16.gmra.mrb[184].mxu0 %v9553_v27  ;;  %v9558_v7 = vpack.c.bf16 %v9537_v36, %v9536_v34 }
 0x88b   : > { %14739 = vmatprep.mubr.bf16.mxu0 %v9554_v12  ;;  %v10403_v24 = vadd.f32 %v14110_v44, %v18419_v37  ;;  %v9538_v12 = vld [vmem:[#allocation2 + $0x1a9] sm:$0xff] }
 0x88c   : > { %v18472_v1 = vadd.f32 %v14216_v42, %v10395_v32  ;;  %v9539_v32 = vld [vmem:[#allocation2 + $0x1b1] sm:$0xff] }
 0x88d   : > { %v14111_v43 = vpop.f32.mrb[80].mxu0 }
 0x88e   : > { %v14217_v17 = vpop.f32.mrb[108].mxu1  ;;  %v14112_v33 = vpop.f32.mrb[81].mxu0 }
 0x88f   : > { %v14113_v41 = vadd.f32 %v14112_v33, %v14111_v43  ;;  %v14218_v19 = vpop.f32.mrb[109].mxu1  ;;  %v14114_v39 = vpop.f32.mrb[82].mxu0 }
 0x890   : > { %v14219_v21 = vadd.f32 %v14218_v19, %v14217_v17  ;;  %v14220_v56 = vpop.f32.mrb[110].mxu1  ;;  %v14115_v45 = vpop.f32.mrb[83].mxu0 }
 0x891   : > { %v14116_v3 = vadd.f32 %v14115_v45, %v14114_v39  ;;  %v14221_v11 = vpop.f32.mrb[111].mxu1  ;;  %v10408_v55 = vadd.f32 %v14113_v41, %v18419_v37  ;;  %v9560_v45 = vpack.c.bf16 %v9541_v26, %v9540_v50 }
 0x892   : > { %v18476_v61 = vadd.f32 %v14219_v21, %v10400_v57  ;;  %v14222_v2 = vadd.f32 %v14221_v11, %v14220_v56  ;;  %14740 = vmatmul.mubr.bf16.gmra.mrb[188].mxu0 %v9555_v49  ;;  %v9559_v57 = vpack.c.bf16 %v9539_v32, %v9538_v12 }
 0x893   : > { %14743 = vmatprep.mubr.bf16.mxu0 %v9556_v62  ;;  %v10411_v63 = vadd.f32 %v14116_v3, %v18419_v37 }
 0x894   : > { %v18478_v38 = vadd.f32 %v14222_v2, %v10403_v24  ;;  %v9542_v2 = vld [vmem:[#allocation2 + $0x1e9] sm:$0xff] }
 0x895   : > { %v14117_v25 = vpop.f32.mrb[84].mxu0 }
 0x896   : > { %v14223_v53 = vpop.f32.mrb[112].mxu1  ;;  %v14118_v30 = vpop.f32.mrb[85].mxu0 }
 0x897   : > { %v14119_v20 = vadd.f32 %v14118_v30, %v14117_v25  ;;  %v14224_v6 = vpop.f32.mrb[113].mxu1  ;;  %v14120_v4 = vpop.f32.mrb[86].mxu0  ;;  %v9543_v25 = vld [vmem:[#allocation2 + $0x1f1] sm:$0xff] }
 0x898   : > { %v14225_v58 = vadd.f32 %v14224_v6, %v14223_v53  ;;  %v14226_v22 = vpop.f32.mrb[114].mxu1  ;;  %v14121_v13 = vpop.f32.mrb[87].mxu0 }
 0x899   : > { %v14122_v47 = vadd.f32 %v14121_v13, %v14120_v4  ;;  %v14227_v10 = vpop.f32.mrb[115].mxu1  ;;  %v10416_v35 = vadd.f32 %v14119_v20, %v18419_v37 }
 0x89a   : > { %v18482_v29 = vadd.f32 %v14225_v58, %v10408_v55  ;;  %v14228_v27 = vadd.f32 %v14227_v10, %v14226_v22  ;;  %14744 = vmatmul.mubr.bf16.gmra.mrb[192].mxu0 %v9557_v18  ;;  %v9561_v55 = vpack.c.bf16 %v9543_v25, %v9542_v2  ;;  %v9546_v10 = vld [vmem:[#allocation2 + $0x229] sm:$0xff] }
 0x89b   : > { %14747 = vmatprep.mubr.bf16.mxu0 %v9558_v7  ;;  %v10419_v49 = vadd.f32 %v14122_v47, %v18419_v37  ;;  %v9547_v7 = vld [vmem:[#allocation2 + $0x231] sm:$0xff] }
 0x89c   : > { %v18484_v44 = vadd.f32 %v14228_v27, %v10411_v63  ;;  %v9563_v32 = vpack.c.bf16 %v9547_v7, %v9546_v10 }
 0x89d   : > { %v14123_v31 = vpop.f32.mrb[88].mxu0 }
 0x89e   : > { %v14229_v42 = vpop.f32.mrb[116].mxu1  ;;  %v14124_v43 = vpop.f32.mrb[89].mxu0 }
 0x89f   : > { %v14125_v17 = vadd.f32 %v14124_v43, %v14123_v31  ;;  %v14230_v33 = vpop.f32.mrb[117].mxu1  ;;  %v14126_v14 = vpop.f32.mrb[90].mxu0 }
 0x8a0   : > { %v14231_v41 = vadd.f32 %v14230_v33, %v14229_v42  ;;  %v14232_v19 = vpop.f32.mrb[118].mxu1  ;;  %v14127_v39 = vpop.f32.mrb[91].mxu0 }
 0x8a1   : > { %v14128_v21 = vadd.f32 %v14127_v39, %v14126_v14  ;;  %v14233_v56 = vpop.f32.mrb[119].mxu1  ;;  %v10424_v36 = vadd.f32 %v14125_v17, %v18419_v37 }
 0x8a2   : > { %v18488_v3 = vadd.f32 %v14231_v41, %v10416_v35  ;;  %v14234_v11 = vadd.f32 %v14233_v56, %v14232_v19  ;;  %14748 = vmatmul.mubr.bf16.gmra.mrb[196].mxu0 %v9559_v57 }
 0x8a3   : > { %14751 = vmatprep.mubr.bf16.mxu0 %v9560_v45  ;;  %v10427_v13 = vadd.f32 %v14128_v21, %v18419_v37 }
 0x8a4   : > { %v18490_v62 = vadd.f32 %v14234_v11, %v10419_v49 }
 0x8a5   : > { %v14129_v24 = vpop.f32.mrb[92].mxu0 }
 0x8a6   : > { %v14235_v5 = vpop.f32.mrb[120].mxu1  ;;  %v14130_v28 = vpop.f32.mrb[93].mxu0 }
 0x8a7   : > { %v14131_v53 = vadd.f32 %v14130_v28, %v14129_v24  ;;  %v14236_v30 = vpop.f32.mrb[121].mxu1  ;;  %v14132_v34 = vpop.f32.mrb[94].mxu0 }
 0x8a8   : > { %v14237_v20 = vadd.f32 %v14236_v30, %v14235_v5  ;;  %v14238_v6 = vpop.f32.mrb[122].mxu1  ;;  %v14133_v4 = vpop.f32.mrb[95].mxu0 }
 0x8a9   : > { %v14134_v58 = vadd.f32 %v14133_v4, %v14132_v34  ;;  %v14239_v22 = vpop.f32.mrb[123].mxu1  ;;  %v10432_v26 = vadd.f32 %v14131_v53, %v18419_v37 }
 0x8aa   : > { %v18494_v18 = vadd.f32 %v14237_v20, %v10424_v36  ;;  %v14240_v47 = vadd.f32 %v14239_v22, %v14238_v6  ;;  %14752 = vmatmul.mubr.bf16.gmra.mrb[200].mxu0 %v9561_v55 }
 0x8ab   : > { %14755 = vmatprep.mubr.bf16.mxu0 %v18440_v15  ;;  %v10435_v15 = vadd.f32 %v14134_v58, %v18419_v37 }
 0x8ac   : > { %v18497_v63 = vadd.f32 %v14240_v47, %v10427_v13 }
 0x8ad   : > { %v14135_v27 = vpop.f32.mrb[96].mxu0 }
 0x8ae   : > { %v14241_v31 = vpop.f32.mrb[124].mxu1  ;;  %v14136_v12 = vpop.f32.mrb[97].mxu0 }
 0x8af   : > { %v14137_v42 = vadd.f32 %v14136_v12, %v14135_v27  ;;  %v14242_v43 = vpop.f32.mrb[125].mxu1  ;;  %v14138_v50 = vpop.f32.mrb[98].mxu0 }
 0x8b0   : > { %v14243_v17 = vadd.f32 %v14242_v43, %v14241_v31  ;;  %v14244_v33 = vpop.f32.mrb[126].mxu1  ;;  %v14139_v14 = vpop.f32.mrb[99].mxu0 }
 0x8b1   : > { %v14140_v35 = vadd.f32 %v14139_v14, %v14138_v50  ;;  %v14245_v41 = vpop.f32.mrb[127].mxu1  ;;  %v10440_v2 = vadd.f32 %v14137_v42, %v18419_v37 }
 0x8b2   : > { %v18501_v19 = vadd.f32 %v14243_v17, %v10432_v26  ;;  %v14246_v39 = vadd.f32 %v14245_v41, %v14244_v33  ;;  %14756 = vmatmul.mubr.bf16.gmra.mrb[204].mxu0 %v9563_v32 }
 0x8b3   : > { %v10443_v34 = vadd.f32 %v14140_v35, %v18419_v37 }
 0x8b4   : > { %v18503_v57 = vadd.f32 %v14246_v39, %v10435_v15 }
 0x8b5   : > { %v14141_v21 = vpop.f32.mrb[100].mxu0 }
 0x8b6   : > { %v14247_v56 = vpop.f32.mrb[128].mxu1  ;;  %v14142_v45 = vpop.f32.mrb[101].mxu0 }
 0x8b7   : > { %v14143_v49 = vadd.f32 %v14142_v45, %v14141_v21  ;;  %v14248_v11 = vpop.f32.mrb[129].mxu1  ;;  %v14144_v24 = vpop.f32.mrb[102].mxu0 }
 0x8b8   : > { %v14249_v25 = vadd.f32 %v14248_v11, %v14247_v56  ;;  %v14250_v5 = vpop.f32.mrb[130].mxu1  ;;  %v14145_v28 = vpop.f32.mrb[103].mxu0 }
 0x8b9   : > { %v14146_v53 = vadd.f32 %v14145_v28, %v14144_v24  ;;  %v14251_v30 = vpop.f32.mrb[131].mxu1  ;;  %v10448_v10 = vadd.f32 %v14143_v49, %v18419_v37 }
 0x8ba   : > { %v18507_v36 = vadd.f32 %v14249_v25, %v10440_v2  ;;  %v14252_v20 = vadd.f32 %v14251_v30, %v14250_v5 }
 0x8bb   : > { %v10451_v42 = vadd.f32 %v14146_v53, %v18419_v37 }
 0x8bc   : > { %v18509_v6 = vadd.f32 %v14252_v20, %v10443_v34 }
 0x8bd   : > { %v14147_v4 = vpop.f32.mrb[104].mxu0 }
 0x8be   : > { %v14253_v55 = vpop.f32.mrb[132].mxu1  ;;  %v14148_v58 = vpop.f32.mrb[105].mxu0 }
 0x8bf   : > { %v14149_v22 = vadd.f32 %v14148_v58, %v14147_v4  ;;  %v14254_v13 = vpop.f32.mrb[133].mxu1  ;;  %v14150_v47 = vpop.f32.mrb[106].mxu0 }
 0x8c0   : > { %v14255_v7 = vadd.f32 %v14254_v13, %v14253_v55  ;;  %v14256_v27 = vpop.f32.mrb[134].mxu1  ;;  %v14151_v31 = vpop.f32.mrb[107].mxu0 }
 0x8c1   : > { %v14152_v12 = vadd.f32 %v14151_v31, %v14150_v47  ;;  %v14257_v32 = vpop.f32.mrb[135].mxu1  ;;  %v10456_v39 = vadd.f32 %v14149_v22, %v18419_v37 }
 0x8c2   : > { %v18513_v43 = vadd.f32 %v14255_v7, %v10448_v10  ;;  %v14258_v50 = vadd.f32 %v14257_v32, %v14256_v27 }
 0x8c3   : > { %v10459_v24 = vadd.f32 %v14152_v12, %v18419_v37 }
 0x8c4   : > { %v18515_v26 = vadd.f32 %v14258_v50, %v10451_v42 }
 0x8c5   : > { %v14153_v17 = vpop.f32.mrb[108].mxu0 }
 0x8c6   : > { %v14259_v33 = vpop.f32.mrb[136].mxu1  ;;  %v14154_v14 = vpop.f32.mrb[109].mxu0 }
 0x8c7   : > { %v14155_v35 = vadd.f32 %v14154_v14, %v14153_v17  ;;  %v14260_v41 = vpop.f32.mrb[137].mxu1  ;;  %v14156_v15 = vpop.f32.mrb[110].mxu0 }
 0x8c8   : > { %v14261_v21 = vadd.f32 %v14260_v41, %v14259_v33  ;;  %v14262_v56 = vpop.f32.mrb[138].mxu1  ;;  %v14157_v45 = vpop.f32.mrb[111].mxu0 }
 0x8c9   : > { %v14158_v49 = vadd.f32 %v14157_v45, %v14156_v15  ;;  %v14263_v11 = vpop.f32.mrb[139].mxu1  ;;  %v10464_v55 = vadd.f32 %v14155_v35, %v18419_v37 }
 0x8ca   : > { %v18519_v2 = vadd.f32 %v14261_v21, %v10456_v39  ;;  %v14264_v25 = vadd.f32 %v14263_v11, %v14262_v56 }
 0x8cb   : > { %v10467_v27 = vadd.f32 %v14158_v49, %v18419_v37 }
 0x8cc   : > { %v18521_v5 = vadd.f32 %v14264_v25, %v10459_v24 }
 0x8cd   : > { %v14287_v28 = vpop.f32.mrb[112].mxu0 }
 0x8ce   : > { %v14265_v53 = vpop.f32.mrb[140].mxu1  ;;  %v14288_v30 = vpop.f32.mrb[113].mxu0 }
 0x8cf   : > { %v14266_v34 = vpop.f32.mrb[141].mxu1  ;;  %v14289_v20 = vadd.f32 %v14288_v30, %v14287_v28  ;;  %v14290_v4 = vpop.f32.mrb[114].mxu0 }
 0x8d0   : > { %v14267_v58 = vadd.f32 %v14266_v34, %v14265_v53  ;;  %v14268_v22 = vpop.f32.mrb[142].mxu1  ;;  %v14291_v13 = vpop.f32.mrb[115].mxu0 }
 0x8d1   : > { %v10666_v47 = vadd.f32 %v14289_v20, %v18425_v16  ;;  %v14269_v10 = vpop.f32.mrb[143].mxu1  ;;  %v14292_v7 = vadd.f32 %v14291_v13, %v14290_v4 }
 0x8d2   : > { %v18526_v31 = vadd.f32 %v14267_v58, %v10464_v55  ;;  %v14270_v12 = vadd.f32 %v14269_v10, %v14268_v22 }
 0x8d3   : > { %v10669_v32 = vadd.f32 %v14292_v7, %v18429_v54 }
 0x8d4   : > { %v18529_v42 = vadd.f32 %v14270_v12, %v10467_v27 }
 0x8d5   : > { %v14293_v50 = vpop.f32.mrb[116].mxu0 }
 0x8d6   : > { %v14399_v17 = vpop.f32.mrb[144].mxu1  ;;  %v14294_v33 = vpop.f32.mrb[117].mxu0 }
 0x8d7   : > { %v14295_v14 = vadd.f32 %v14294_v33, %v14293_v50  ;;  %v14400_v35 = vpop.f32.mrb[145].mxu1  ;;  %v14296_v41 = vpop.f32.mrb[118].mxu0 }
 0x8d8   : > { %v14401_v15 = vadd.f32 %v14400_v35, %v14399_v17  ;;  %v14402_v39 = vpop.f32.mrb[146].mxu1  ;;  %v14297_v16 = vpop.f32.mrb[119].mxu0 }
 0x8d9   : > { %v10674_v21 = vadd.f32 %v14295_v14, %v18433_v9  ;;  %v14298_v56 = vadd.f32 %v14297_v16, %v14296_v41  ;;  %v14403_v37 = vpop.f32.mrb[147].mxu1 }
 0x8da   : > { %v14404_v45 = vadd.f32 %v14403_v37, %v14402_v39  ;;  %v18532_v49 = vadd.f32 %v14401_v15, %v10666_v47 }
 0x8db   : > { %v10677_v54 = vadd.f32 %v14298_v56, %v18437_v23 }
 0x8dc   : > { %v18535_v11 = vadd.f32 %v14404_v45, %v10669_v32 }
 0x8dd   : > { %v14299_v24 = vpop.f32.mrb[120].mxu0 }
 0x8de   : > { %v14405_v25 = vpop.f32.mrb[148].mxu1  ;;  %v14300_v28 = vpop.f32.mrb[121].mxu0 }
 0x8df   : > { %v14301_v53 = vadd.f32 %v14300_v28, %v14299_v24  ;;  %v14406_v30 = vpop.f32.mrb[149].mxu1  ;;  %v14302_v34 = vpop.f32.mrb[122].mxu0 }
 0x8e0   : > { %v14407_v20 = vadd.f32 %v14406_v30, %v14405_v25  ;;  %v14408_v4 = vpop.f32.mrb[150].mxu1  ;;  %v14303_v55 = vpop.f32.mrb[123].mxu0 }
 0x8e1   : > { %v10682_v9 = vadd.f32 %v14301_v53, %v18443_v60  ;;  %v14304_v58 = vadd.f32 %v14303_v55, %v14302_v34  ;;  %v14409_v22 = vpop.f32.mrb[151].mxu1 }
 0x8e2   : > { %v14410_v13 = vadd.f32 %v14409_v22, %v14408_v4  ;;  %v18538_v47 = vadd.f32 %v14407_v20, %v10674_v21 }
 0x8e3   : > { %v10685_v23 = vadd.f32 %v14304_v58, %v18447_v59 }
 0x8e4   : > { %v18541_v10 = vadd.f32 %v14410_v13, %v10677_v54 }
 0x8e5   : > { %v14305_v7 = vpop.f32.mrb[124].mxu0 }
 0x8e6   : > { %v14411_v27 = vpop.f32.mrb[152].mxu1  ;;  %v14306_v12 = vpop.f32.mrb[125].mxu0 }
 0x8e7   : > { %v14307_v32 = vadd.f32 %v14306_v12, %v14305_v7  ;;  %v14412_v50 = vpop.f32.mrb[153].mxu1  ;;  %v14308_v17 = vpop.f32.mrb[126].mxu0 }
 0x8e8   : > { %v14413_v33 = vadd.f32 %v14412_v50, %v14411_v27  ;;  %v14414_v14 = vpop.f32.mrb[154].mxu1  ;;  %v14309_v35 = vpop.f32.mrb[127].mxu0 }
 0x8e9   : > { %v10690_v60 = vadd.f32 %v14307_v32, %v18451_v52  ;;  %v14310_v41 = vadd.f32 %v14309_v35, %v14308_v17  ;;  %v14415_v15 = vpop.f32.mrb[155].mxu1 }
 0x8ea   : > { %v14416_v39 = vadd.f32 %v14415_v15, %v14414_v14  ;;  %v18544_v16 = vadd.f32 %v14413_v33, %v10682_v9 }
 0x8eb   : > { %v10693_v59 = vadd.f32 %v14310_v41, %v18454_v0 }
 0x8ec   : > { %v18547_v21 = vadd.f32 %v14416_v39, %v10685_v23 }
 0x8ed   : > { %v14311_v56 = vpop.f32.mrb[128].mxu0 }
 0x8ee   : > { %v14417_v37 = vpop.f32.mrb[156].mxu1  ;;  %v14312_v45 = vpop.f32.mrb[129].mxu0 }
 0x8ef   : > { %v14313_v54 = vadd.f32 %v14312_v45, %v14311_v56  ;;  %v14418_v24 = vpop.f32.mrb[157].mxu1  ;;  %v14314_v25 = vpop.f32.mrb[130].mxu0 }
 0x8f0   : > { %v14419_v28 = vadd.f32 %v14418_v24, %v14417_v37  ;;  %v14420_v53 = vpop.f32.mrb[158].mxu1  ;;  %v14315_v30 = vpop.f32.mrb[131].mxu0 }
 0x8f1   : > { %v10698_v52 = vadd.f32 %v14313_v54, %v18458_v48  ;;  %v14316_v34 = vadd.f32 %v14315_v30, %v14314_v25  ;;  %v14421_v20 = vpop.f32.mrb[159].mxu1 }
 0x8f2   : > { %v14422_v4 = vadd.f32 %v14421_v20, %v14420_v53  ;;  %v18550_v55 = vadd.f32 %v14419_v28, %v10690_v60 }
 0x8f3   : > { %v10701_v0 = vadd.f32 %v14316_v34, %v18460_v51 }
 0x8f4   : > { %v18553_v9 = vadd.f32 %v14422_v4, %v10693_v59 }
 0x8f5   : > { %v14317_v58 = vpop.f32.mrb[132].mxu0 }
 0x8f6   : > { %v14423_v22 = vpop.f32.mrb[160].mxu1  ;;  %v14318_v13 = vpop.f32.mrb[133].mxu0 }
 0x8f7   : > { %v14319_v23 = vadd.f32 %v14318_v13, %v14317_v58  ;;  %v14424_v7 = vpop.f32.mrb[161].mxu1  ;;  %v14320_v27 = vpop.f32.mrb[134].mxu0 }
 0x8f8   : > { %v14425_v12 = vadd.f32 %v14424_v7, %v14423_v22  ;;  %v14426_v32 = vpop.f32.mrb[162].mxu1  ;;  %v14321_v50 = vpop.f32.mrb[135].mxu0 }
 0x8f9   : > { %v10706_v48 = vadd.f32 %v14319_v23, %v18464_v8  ;;  %v14322_v17 = vadd.f32 %v14321_v50, %v14320_v27  ;;  %v14427_v33 = vpop.f32.mrb[163].mxu1 }
 0x8fa   : > { %v14428_v14 = vadd.f32 %v14427_v33, %v14426_v32  ;;  %v18556_v35 = vadd.f32 %v14425_v12, %v10698_v52 }
 0x8fb   : > { %v10709_v51 = vadd.f32 %v14322_v17, %v18466_v40 }
 0x8fc   : > { %v18559_v60 = vadd.f32 %v14428_v14, %v10701_v0 }
 0x8fd   : > { %v14323_v41 = vpop.f32.mrb[136].mxu0 }
 0x8fe   : > { %v14429_v15 = vpop.f32.mrb[164].mxu1  ;;  %v14324_v39 = vpop.f32.mrb[137].mxu0 }
 0x8ff   : > { %v14325_v59 = vadd.f32 %v14324_v39, %v14323_v41  ;;  %v14430_v56 = vpop.f32.mrb[165].mxu1  ;;  %v14326_v37 = vpop.f32.mrb[138].mxu0 }
 0x900   : > { %v14431_v45 = vadd.f32 %v14430_v56, %v14429_v15  ;;  %v14432_v54 = vpop.f32.mrb[166].mxu1  ;;  %v14327_v24 = vpop.f32.mrb[139].mxu0 }
 0x901   : > { %v10714_v8 = vadd.f32 %v14325_v59, %v18470_v46  ;;  %v14328_v25 = vadd.f32 %v14327_v24, %v14326_v37  ;;  %v14433_v28 = vpop.f32.mrb[167].mxu1 }
 0x902   : > { %v14434_v53 = vadd.f32 %v14433_v28, %v14432_v54  ;;  %v18562_v30 = vadd.f32 %v14431_v45, %v10706_v48 }
 0x903   : > { %v10717_v40 = vadd.f32 %v14328_v25, %v18472_v1 }
 0x904   : > { %v18565_v52 = vadd.f32 %v14434_v53, %v10709_v51 }
 0x905   : > { %v14329_v34 = vpop.f32.mrb[140].mxu0 }
 0x906   : > { %v14435_v20 = vpop.f32.mrb[168].mxu1  ;;  %v14330_v4 = vpop.f32.mrb[141].mxu0 }
 0x907   : > { %v14331_v0 = vadd.f32 %v14330_v4, %v14329_v34  ;;  %v14436_v58 = vpop.f32.mrb[169].mxu1  ;;  %v14332_v22 = vpop.f32.mrb[142].mxu0 }
 0x908   : > { %v14437_v13 = vadd.f32 %v14436_v58, %v14435_v20  ;;  %v14438_v23 = vpop.f32.mrb[170].mxu1  ;;  %v14333_v7 = vpop.f32.mrb[143].mxu0 }
 0x909   : > { %v10722_v46 = vadd.f32 %v14331_v0, %v18476_v61  ;;  %v14334_v27 = vadd.f32 %v14333_v7, %v14332_v22  ;;  %v14439_v12 = vpop.f32.mrb[171].mxu1 }
 0x90a   : > { %v14440_v32 = vadd.f32 %v14439_v12, %v14438_v23  ;;  %v18568_v50 = vadd.f32 %v14437_v13, %v10714_v8 }
 0x90b   : > { %v10725_v1 = vadd.f32 %v14334_v27, %v18478_v38 }
 0x90c   : > { %v18571_v48 = vadd.f32 %v14440_v32, %v10717_v40 }
 0x90d   : > { %v14335_v17 = vpop.f32.mrb[144].mxu0 }
 0x90e   : > { %v14441_v33 = vpop.f32.mrb[172].mxu1  ;;  %v14336_v14 = vpop.f32.mrb[145].mxu0 }
 0x90f   : > { %v14337_v51 = vadd.f32 %v14336_v14, %v14335_v17  ;;  %v14442_v41 = vpop.f32.mrb[173].mxu1  ;;  %v14338_v15 = vpop.f32.mrb[146].mxu0 }
 0x910   : > { %v14443_v39 = vadd.f32 %v14442_v41, %v14441_v33  ;;  %v14444_v59 = vpop.f32.mrb[174].mxu1  ;;  %v14339_v56 = vpop.f32.mrb[147].mxu0 }
 0x911   : > { %v10730_v61 = vadd.f32 %v14337_v51, %v18482_v29  ;;  %v14340_v37 = vadd.f32 %v14339_v56, %v14338_v15  ;;  %v14445_v45 = vpop.f32.mrb[175].mxu1 }
 0x912   : > { %v14446_v54 = vadd.f32 %v14445_v45, %v14444_v59  ;;  %v18574_v24 = vadd.f32 %v14443_v39, %v10722_v46 }
 0x913   : > { %v10733_v38 = vadd.f32 %v14340_v37, %v18484_v44 }
 0x914   : > { %v18577_v8 = vadd.f32 %v14446_v54, %v10725_v1 }
 0x915   : > { %v14341_v25 = vpop.f32.mrb[148].mxu0 }
 0x916   : > { %v14447_v28 = vpop.f32.mrb[176].mxu1  ;;  %v14342_v53 = vpop.f32.mrb[149].mxu0 }
 0x917   : > { %v14343_v40 = vadd.f32 %v14342_v53, %v14341_v25  ;;  %v14448_v34 = vpop.f32.mrb[177].mxu1  ;;  %v14344_v20 = vpop.f32.mrb[150].mxu0 }
 0x918   : > { %v14449_v4 = vadd.f32 %v14448_v34, %v14447_v28  ;;  %v14450_v0 = vpop.f32.mrb[178].mxu1  ;;  %v14345_v58 = vpop.f32.mrb[151].mxu0 }
 0x919   : > { %v10738_v29 = vadd.f32 %v14343_v40, %v18488_v3  ;;  %v14346_v22 = vadd.f32 %v14345_v58, %v14344_v20  ;;  %v14451_v13 = vpop.f32.mrb[179].mxu1 }
 0x91a   : > { %v14452_v23 = vadd.f32 %v14451_v13, %v14450_v0  ;;  %v18580_v7 = vadd.f32 %v14449_v4, %v10730_v61 }
 0x91b   : > { %v10741_v44 = vadd.f32 %v14346_v22, %v18490_v62 }
 0x91c   : > { %v18583_v46 = vadd.f32 %v14452_v23, %v10733_v38 }
 0x91d   : > { %v14347_v27 = vpop.f32.mrb[152].mxu0 }
 0x91e   : > { %v14453_v12 = vpop.f32.mrb[180].mxu1  ;;  %v14348_v32 = vpop.f32.mrb[153].mxu0 }
 0x91f   : > { %v14349_v1 = vadd.f32 %v14348_v32, %v14347_v27  ;;  %v14454_v17 = vpop.f32.mrb[181].mxu1  ;;  %v14350_v33 = vpop.f32.mrb[154].mxu0 }
 0x920   : > { %v14455_v14 = vadd.f32 %v14454_v17, %v14453_v12  ;;  %v14456_v51 = vpop.f32.mrb[182].mxu1  ;;  %v14351_v41 = vpop.f32.mrb[155].mxu0 }
 0x921   : > { %v10746_v3 = vadd.f32 %v14349_v1, %v18494_v18  ;;  %v14352_v15 = vadd.f32 %v14351_v41, %v14350_v33  ;;  %v14457_v39 = vpop.f32.mrb[183].mxu1 }
 0x922   : > { %v14458_v59 = vadd.f32 %v14457_v39, %v14456_v51  ;;  %v18586_v56 = vadd.f32 %v14455_v14, %v10738_v29 }
 0x923   : > { %v10749_v62 = vadd.f32 %v14352_v15, %v18497_v63 }
 0x924   : > { %v18589_v61 = vadd.f32 %v14458_v59, %v10741_v44 }
 0x925   : > { %v14353_v37 = vpop.f32.mrb[156].mxu0 }
 0x926   : > { %v14459_v45 = vpop.f32.mrb[184].mxu1  ;;  %v14354_v54 = vpop.f32.mrb[157].mxu0 }
 0x927   : > { %v14355_v38 = vadd.f32 %v14354_v54, %v14353_v37  ;;  %v14460_v25 = vpop.f32.mrb[185].mxu1  ;;  %v14356_v28 = vpop.f32.mrb[158].mxu0 }
 0x928   : > { %v14461_v53 = vadd.f32 %v14460_v25, %v14459_v45  ;;  %v14462_v40 = vpop.f32.mrb[186].mxu1  ;;  %v14357_v34 = vpop.f32.mrb[159].mxu0 }
 0x929   : > { %v10754_v18 = vadd.f32 %v14355_v38, %v18501_v19  ;;  %v14358_v20 = vadd.f32 %v14357_v34, %v14356_v28  ;;  %v14463_v4 = vpop.f32.mrb[187].mxu1 }
 0x92a   : > { %v14464_v0 = vadd.f32 %v14463_v4, %v14462_v40  ;;  %v18592_v58 = vadd.f32 %v14461_v53, %v10746_v3 }
 0x92b   : > { %v10757_v63 = vadd.f32 %v14358_v20, %v18503_v57 }
 0x92c   : > { %v18595_v29 = vadd.f32 %v14464_v0, %v10749_v62 }
 0x92d   : > { %v14359_v22 = vpop.f32.mrb[160].mxu0 }
 0x92e   : > { %v14465_v13 = vpop.f32.mrb[188].mxu1  ;;  %v14360_v23 = vpop.f32.mrb[161].mxu0 }
 0x92f   : > { %v14361_v44 = vadd.f32 %v14360_v23, %v14359_v22  ;;  %v14466_v27 = vpop.f32.mrb[189].mxu1  ;;  %v14362_v12 = vpop.f32.mrb[162].mxu0 }
 0x930   : > { %v14467_v32 = vadd.f32 %v14466_v27, %v14465_v13  ;;  %v14468_v1 = vpop.f32.mrb[190].mxu1  ;;  %v14363_v17 = vpop.f32.mrb[163].mxu0 }
 0x931   : > { %v10762_v19 = vadd.f32 %v14361_v44, %v18507_v36  ;;  %v14364_v33 = vadd.f32 %v14363_v17, %v14362_v12  ;;  %v14469_v14 = vpop.f32.mrb[191].mxu1 }
 0x932   : > { %v14470_v51 = vadd.f32 %v14469_v14, %v14468_v1  ;;  %v18598_v41 = vadd.f32 %v14467_v32, %v10754_v18 }
 0x933   : > { %v10765_v57 = vadd.f32 %v14364_v33, %v18509_v6 }
 0x934   : > { %v18601_v3 = vadd.f32 %v14470_v51, %v10757_v63 }
 0x935   : > { %v14365_v15 = vpop.f32.mrb[164].mxu0 }
 0x936   : > { %v14471_v39 = vpop.f32.mrb[192].mxu1  ;;  %v14366_v59 = vpop.f32.mrb[165].mxu0 }
 0x937   : > { %v14367_v62 = vadd.f32 %v14366_v59, %v14365_v15  ;;  %v14472_v37 = vpop.f32.mrb[193].mxu1  ;;  %v14368_v45 = vpop.f32.mrb[166].mxu0 }
 0x938   : > { %v14473_v54 = vadd.f32 %v14472_v37, %v14471_v39  ;;  %v14474_v38 = vpop.f32.mrb[194].mxu1  ;;  %v14369_v25 = vpop.f32.mrb[167].mxu0 }
 0x939   : > { %v10770_v36 = vadd.f32 %v14367_v62, %v18513_v43  ;;  %v14370_v28 = vadd.f32 %v14369_v25, %v14368_v45  ;;  %v14475_v53 = vpop.f32.mrb[195].mxu1 }
 0x93a   : > { %v14476_v40 = vadd.f32 %v14475_v53, %v14474_v38  ;;  %v18604_v34 = vadd.f32 %v14473_v54, %v10762_v19 }
 0x93b   : > { %v10773_v6 = vadd.f32 %v14370_v28, %v18515_v26 }
 0x93c   : > { %v18607_v18 = vadd.f32 %v14476_v40, %v10765_v57 }
 0x93d   : > { %v14371_v20 = vpop.f32.mrb[168].mxu0 }
 0x93e   : > { %v14477_v4 = vpop.f32.mrb[196].mxu1  ;;  %v14372_v0 = vpop.f32.mrb[169].mxu0 }
 0x93f   : > { %v14373_v63 = vadd.f32 %v14372_v0, %v14371_v20  ;;  %v14478_v22 = vpop.f32.mrb[197].mxu1  ;;  %v14374_v13 = vpop.f32.mrb[170].mxu0 }
 0x940   : > { %v14479_v23 = vadd.f32 %v14478_v22, %v14477_v4  ;;  %v14480_v44 = vpop.f32.mrb[198].mxu1  ;;  %v14375_v27 = vpop.f32.mrb[171].mxu0 }
 0x941   : > { %v10778_v43 = vadd.f32 %v14373_v63, %v18519_v2  ;;  %v14376_v12 = vadd.f32 %v14375_v27, %v14374_v13  ;;  %v14481_v32 = vpop.f32.mrb[199].mxu1 }
 0x942   : > { %v14482_v1 = vadd.f32 %v14481_v32, %v14480_v44  ;;  %v18610_v17 = vadd.f32 %v14479_v23, %v10770_v36 }
 0x943   : > { %v10781_v26 = vadd.f32 %v14376_v12, %v18521_v5 }
 0x944   : > { %v18613_v19 = vadd.f32 %v14482_v1, %v10773_v6 }
 0x945   : > { %v14377_v33 = vpop.f32.mrb[172].mxu0 }
 0x946   : > { %v14483_v14 = vpop.f32.mrb[200].mxu1  ;;  %v14378_v51 = vpop.f32.mrb[173].mxu0 }
 0x947   : > { %v14379_v57 = vadd.f32 %v14378_v51, %v14377_v33  ;;  %v14484_v15 = vpop.f32.mrb[201].mxu1  ;;  %v14380_v39 = vpop.f32.mrb[174].mxu0 }
 0x948   : > { %v14485_v59 = vadd.f32 %v14484_v15, %v14483_v14  ;;  %v14486_v62 = vpop.f32.mrb[202].mxu1  ;;  %v14381_v37 = vpop.f32.mrb[175].mxu0 }
 0x949   : > { %v10786_v2 = vadd.f32 %v14379_v57, %v18526_v31  ;;  %v14382_v45 = vadd.f32 %v14381_v37, %v14380_v39  ;;  %v14487_v54 = vpop.f32.mrb[203].mxu1 }
 0x94a   : > { %v14488_v38 = vadd.f32 %v14487_v54, %v14486_v62  ;;  %v18616_v25 = vadd.f32 %v14485_v59, %v10778_v43 }
 0x94b   : > { %v10789_v5 = vadd.f32 %v14382_v45, %v18529_v42 }
 0x94c   : > { %v18619_v36 = vadd.f32 %v14488_v38, %v10781_v26 }
 0x94d   : > { %v14729_v28 = vpop.f32.mrb[176].mxu0 }
 0x94e   : > { %v14489_v31 = vpop.f32.mrb[204].mxu1  ;;  %v10996_v53 = vadd.f32 %v14729_v28, %v18538_v47  ;;  %v10987_v40 = vpop.f32.mrb[177].mxu0 }
 0x94f   : > { %v14490_v6 = vpop.f32.mrb[205].mxu1  ;;  %v10988_v42 = vadd.f32 %v10987_v40, %v18532_v49  ;;  %v14730_v20 = vpop.f32.mrb[178].mxu0 }
 0x950   : > { %11116 = vst [vmem:[%s18626_s6 + $0x10] sm:$0xff] %v10996_v53  ;;  %v14491_v4 = vadd.f32 %v14490_v6, %v14489_v31  ;;  %v14492_v0 = vpop.f32.mrb[206].mxu1  ;;  %v10999_v63 = vadd.f32 %v14730_v20, %v18541_v10  ;;  %v10990_v22 = vpop.f32.mrb[179].mxu0 }
 0x951   : > { %11114 = vst [vmem:[%s18626_s6] sm:$0xff] %v10988_v42  ;;  %v14493_v13 = vpop.f32.mrb[207].mxu1  ;;  %v10991_v23 = vadd.f32 %v10990_v22, %v18535_v11 }
 0x952   : > { %11117 = vst [vmem:[%s18626_s6 + $0x18] sm:$0xff] %v10999_v63  ;;  %v14494_v47 = vadd.f32 %v14493_v13, %v14492_v0  ;;  %v18635_v44 = vadd.f32 %v14491_v4, %v10786_v2 }
 0x953   : > { %11115 = vst [vmem:[%s18626_s6 + $0x8] sm:$0xff] %v10991_v23 }
 0x954   : > { %v18638_v49 = vadd.f32 %v14494_v47, %v10789_v5 }
 0x955   : > { %v14733_v27 = vpop.f32.mrb[180].mxu0 }
 0x956   : > { %v11012_v43 = vadd.f32 %v14733_v27, %v18550_v55  ;;  %v11003_v10 = vpop.f32.mrb[181].mxu0 }
 0x957   : > { %v11004_v12 = vadd.f32 %v11003_v10, %v18544_v16  ;;  %v14734_v32 = vpop.f32.mrb[182].mxu0 }
 0x958   : > { %11120 = vst [vmem:[%s18626_s6 + $0x30] sm:$0xff] %v11012_v43  ;;  %v11015_v11 = vadd.f32 %v14734_v32, %v18553_v9  ;;  %v11006_v1 = vpop.f32.mrb[183].mxu0 }
 0x959   : > { %11118 = vst [vmem:[%s18626_s6 + $0x20] sm:$0xff] %v11004_v12  ;;  %v11007_v26 = vadd.f32 %v11006_v1, %v18547_v21 }
 0x95a   : > { %11121 = vst [vmem:[%s18626_s6 + $0x38] sm:$0xff] %v11015_v11 }
 0x95b   : > { %11119 = vst [vmem:[%s18626_s6 + $0x28] sm:$0xff] %v11007_v26 }
 0x95d   : > { %v14737_v33 = vpop.f32.mrb[184].mxu0 }
 0x95e   : > { %v11028_v55 = vadd.f32 %v14737_v33, %v18562_v30  ;;  %v11019_v14 = vpop.f32.mrb[185].mxu0 }
 0x95f   : > { %v11020_v16 = vadd.f32 %v11019_v14, %v18556_v35  ;;  %v14738_v51 = vpop.f32.mrb[186].mxu0 }
 0x960   : > { %11124 = vst [vmem:[%s18626_s6 + $0x50] sm:$0xff] %v11028_v55  ;;  %v11031_v9 = vadd.f32 %v14738_v51, %v18565_v52  ;;  %v11022_v57 = vpop.f32.mrb[187].mxu0 }
 0x961   : > { %11122 = vst [vmem:[%s18626_s6 + $0x40] sm:$0xff] %v11020_v16  ;;  %v11023_v21 = vadd.f32 %v11022_v57, %v18559_v60 }
 0x962   : > { %11125 = vst [vmem:[%s18626_s6 + $0x58] sm:$0xff] %v11031_v9 }
 0x963   : > { %11123 = vst [vmem:[%s18626_s6 + $0x48] sm:$0xff] %v11023_v21 }
 0x965   : > { %v14741_v15 = vpop.f32.mrb[188].mxu0 }
 0x966   : > { %v11044_v30 = vadd.f32 %v14741_v15, %v18574_v24  ;;  %v11035_v39 = vpop.f32.mrb[189].mxu0 }
 0x967   : > { %v11036_v35 = vadd.f32 %v11035_v39, %v18568_v50  ;;  %v14742_v59 = vpop.f32.mrb[190].mxu0 }
 0x968   : > { %11128 = vst [vmem:[%s18626_s6 + $0x70] sm:$0xff] %v11044_v30  ;;  %v11047_v52 = vadd.f32 %v14742_v59, %v18577_v8  ;;  %v11038_v62 = vpop.f32.mrb[191].mxu0 }
 0x969   : > { %11126 = vst [vmem:[%s18626_s6 + $0x60] sm:$0xff] %v11036_v35  ;;  %v11039_v60 = vadd.f32 %v11038_v62, %v18571_v48 }
 0x96a   : > { %11129 = vst [vmem:[%s18626_s6 + $0x78] sm:$0xff] %v11047_v52 }
 0x96b   : > { %11127 = vst [vmem:[%s18626_s6 + $0x68] sm:$0xff] %v11039_v60 }
 0x96d   : > { %v14745_v37 = vpop.f32.mrb[192].mxu0 }
 0x96e   : > { %v11060_v24 = vadd.f32 %v14745_v37, %v18586_v56  ;;  %v11051_v2 = vpop.f32.mrb[193].mxu0 }
 0x96f   : > { %v11052_v50 = vadd.f32 %v11051_v2, %v18580_v7  ;;  %v14746_v45 = vpop.f32.mrb[194].mxu0 }
 0x970   : > { %11132 = vst [vmem:[%s18626_s6 + $0x90] sm:$0xff] %v11060_v24  ;;  %v11063_v8 = vadd.f32 %v14746_v45, %v18589_v61  ;;  %v11054_v54 = vpop.f32.mrb[195].mxu0 }
 0x971   : > { %11130 = vst [vmem:[%s18626_s6 + $0x80] sm:$0xff] %v11052_v50  ;;  %v11055_v48 = vadd.f32 %v11054_v54, %v18583_v46 }
 0x972   : > { %11133 = vst [vmem:[%s18626_s6 + $0x98] sm:$0xff] %v11063_v8 }
 0x973   : > { %11131 = vst [vmem:[%s18626_s6 + $0x88] sm:$0xff] %v11055_v48 }
 0x975   : > { %v14749_v38 = vpop.f32.mrb[196].mxu0 }
 0x976   : > { %v11076_v56 = vadd.f32 %v14749_v38, %v18598_v41  ;;  %v11067_v5 = vpop.f32.mrb[197].mxu0 }
 0x977   : > { %v11068_v7 = vadd.f32 %v11067_v5, %v18592_v58  ;;  %v14750_v28 = vpop.f32.mrb[198].mxu0 }
 0x978   : > { %11136 = vst [vmem:[%s18626_s6 + $0xb0] sm:$0xff] %v11076_v56  ;;  %v11079_v61 = vadd.f32 %v14750_v28, %v18601_v3  ;;  %v11070_v31 = vpop.f32.mrb[199].mxu0 }
 0x979   : > { %11134 = vst [vmem:[%s18626_s6 + $0xa0] sm:$0xff] %v11068_v7  ;;  %v11071_v46 = vadd.f32 %v11070_v31, %v18595_v29 }
 0x97a   : > { %11137 = vst [vmem:[%s18626_s6 + $0xb8] sm:$0xff] %v11079_v61 }
 0x97b   : > { %11135 = vst [vmem:[%s18626_s6 + $0xa8] sm:$0xff] %v11071_v46 }
 0x97d   : > { %v14753_v53 = vpop.f32.mrb[200].mxu0 }
 0x97e   : > { %v11092_v41 = vadd.f32 %v14753_v53, %v18610_v17  ;;  %v11083_v40 = vpop.f32.mrb[201].mxu0 }
 0x97f   : > { %v11084_v58 = vadd.f32 %v11083_v40, %v18604_v34  ;;  %v14754_v6 = vpop.f32.mrb[202].mxu0 }
 0x980   : > { %11140 = vst [vmem:[%s18626_s6 + $0xd0] sm:$0xff] %v11092_v41  ;;  %v11095_v3 = vadd.f32 %v14754_v6, %v18613_v19  ;;  %v11086_v42 = vpop.f32.mrb[203].mxu0 }
 0x981   : > { %11138 = vst [vmem:[%s18626_s6 + $0xc0] sm:$0xff] %v11084_v58  ;;  %v11087_v29 = vadd.f32 %v11086_v42, %v18607_v18 }
 0x982   : > { %11141 = vst [vmem:[%s18626_s6 + $0xd8] sm:$0xff] %v11095_v3 }
 0x983   : > { %11139 = vst [vmem:[%s18626_s6 + $0xc8] sm:$0xff] %v11087_v29 }
 0x985   : > { %v14757_v20 = vpop.f32.mrb[204].mxu0 }
 0x986   : > { %v11108_v17 = vadd.f32 %v14757_v20, %v18635_v44  ;;  %v11099_v4 = vpop.f32.mrb[205].mxu0 }
 0x987   : > { %v11100_v0 = vadd.f32 %v11099_v4, %v18616_v25  ;;  %v14758_v34 = vpop.f32.mrb[206].mxu0 }
 0x988   : > { %11144 = vst [vmem:[%s18626_s6 + $0xf0] sm:$0xff] %v11108_v17  ;;  %v11111_v63 = vadd.f32 %v14758_v34, %v18638_v49  ;;  %v11102_v22 = vpop.f32.mrb[207].mxu0 }
 0x989   : > { %11142 = vst [vmem:[%s18626_s6 + $0xe0] sm:$0xff] %v11100_v0  ;;  %v11103_v19 = vadd.f32 %v11102_v22, %v18619_v36 }
 0x98a   : > { %11145 = vst [vmem:[%s18626_s6 + $0xf8] sm:$0xff] %v11111_v63 }
 0x98b   : > { %11143 = vst [vmem:[%s18626_s6 + $0xe8] sm:$0xff] %v11103_v19 }
 0x98c PF: > { %s13_s12 = sadd.s32 1, %s15155_s12  }
 0x98d   : > { %p10_p4 = scmp.ge.s32.totalorder %s13_s12, 4  }
 0x98f   :  { %12 = sbr.rel (!%p10_p4) target bundleno = 1 (0x1), region = 72 }

</bundles_post_ra>
